<compile_context>
chip_gen: v5e
topology: v5e:2x2
jax: 0.10.0
libtpu: 0.0.40
codegen_flags: <defaults>
</compile_context>

<pallas_src>
import functools

import jax
import jax.numpy as jnp
from jax.experimental import pallas as pl
from jax.experimental.pallas import tpu as pltpu


def _silu(x):
    return x * jax.nn.sigmoid(x)


def _round_up(x, m):
    return ((x + m - 1) // m) * m


# ----------------------------------------------------------------------------
# Kernel
# ----------------------------------------------------------------------------
def residual_kernel(x_ref, xt_ref, xb_ref, w1_ref, b1_ref, w2_ref, b2_ref,
                    out_ref, y1_ref, *, TH, W, C, Cp, add):
    """One (batch, row-strip) tile.

    x_ref  : (1, TH, W, Cp)   input strip (channels lane-padded to Cp)
    xt_ref : (1, 1,  W, Cp)   row above the strip (clamped at the image top)
    xb_ref : (1, 1,  W, Cp)   row below the strip (clamped at the image bottom)
    w1_ref : (Cp, Cp)         1x1 weight (I, O), BN1 scale folded in
    b1_ref : (1, Cp)          BN1 bias (f32)
    w2_ref : (3*Cp, 3*Cp)     3x3 weight; rows=(ky, I), cols=(kx, O), BN2 folded
    b2_ref : (1, Cp)          BN2 bias (f32)
    out_ref: (1, TH, W, C)    output strip at the real channel count
    y1_ref : ((TH+2)*W, Cp)   VMEM scratch: SiLU(BN1(Conv1x1)) incl. halo rows
    """
    r = pl.program_id(1)
    nr = pl.num_programs(1)
    cdt = x_ref.dtype
    n_mid = TH * W

    w1 = w1_ref[...]
    b1 = b1_ref[...]

    # ---- Conv1x1 + BN1 bias + SiLU, written piecewise into the y1 scratch ----
    x_mid = x_ref[0].reshape(n_mid, Cp)
    y1_mid = _silu(jnp.dot(x_mid, w1, preferred_element_type=jnp.float32) + b1)
    y1_ref[W:W + n_mid, :] = y1_mid.astype(cdt)

    # Halo rows: the 3x3 zero-pads in y1-space at the image borders, so kill
    # the halo there (interior strips use the real neighbouring row's y1).
    y1_top = _silu(
        jnp.dot(xt_ref[0, 0], w1, preferred_element_type=jnp.float32) + b1)
    y1_ref[0:W, :] = jnp.where(r == 0, 0.0, y1_top).astype(cdt)

    y1_bot = _silu(
        jnp.dot(xb_ref[0, 0], w1, preferred_element_type=jnp.float32) + b1)
    y1_ref[W + n_mid:2 * W + n_mid, :] = jnp.where(
        r == nr - 1, 0.0, y1_bot).astype(cdt)

    # ---- Conv3x3 with dx factored out ----------------------------------------
    # acc[:, j*Cp:(j+1)*Cp] = P_{dx=j-1}(row, col) = sum_dy y1(row+dy, col) @ W2[dy, dx]
    # Three accumulating MXU dots on W-aligned dy windows of the scratch.
    acc = jnp.dot(y1_ref[0:n_mid, :], w2_ref[0:Cp, :],
                  preferred_element_type=jnp.float32)
    acc += jnp.dot(y1_ref[W:W + n_mid, :], w2_ref[Cp:2 * Cp, :],
                   preferred_element_type=jnp.float32)
    acc += jnp.dot(y1_ref[2 * W:2 * W + n_mid, :], w2_ref[2 * Cp:3 * Cp, :],
                   preferred_element_type=jnp.float32)

    # dx = -1 / +1: shift the f32 partials by one pixel along the flattened
    # spatial axis (XLU roll) and zero the image's left / right edge columns.
    col = jax.lax.broadcasted_iota(jnp.int32, (n_mid, 1), 0) % W
    left = pltpu.roll(acc[:, 0:Cp], shift=1, axis=0)                # P_{-1}(row, col-1)
    right = pltpu.roll(acc[:, 2 * Cp:3 * Cp], shift=n_mid - 1, axis=0)  # P_{+1}(row, col+1)
    y2 = (acc[:, Cp:2 * Cp]
          + jnp.where(col == 0, 0.0, left)
          + jnp.where(col == W - 1, 0.0, right))
    y2 = _silu(y2 + b2_ref[...])

    # ---- Residual add + store (only the real C channels go back to HBM) ------
    if add:
        y2 = y2 + x_mid.astype(jnp.float32)
    out_ref[0] = y2.reshape(TH, W, Cp)[:, :, :C].astype(out_ref.dtype)


# ----------------------------------------------------------------------------
# Parameter preparation: fold BN into (weight, bias), pad channels to 128.
# ----------------------------------------------------------------------------
def prepare_kernel_params(w1_t, w2_t, bn1, bn2, C, Cp, dtype, eps=1e-3):
    g1, be1, m1, v1 = bn1
    s1 = g1 / jnp.sqrt(v1 + eps)
    b1 = be1 - m1 * s1
    g2, be2, m2, v2 = bn2
    s2 = g2 / jnp.sqrt(v2 + eps)
    b2 = be2 - m2 * s2

    # Conv1: torch (O, I, 1, 1) -> (I, O); fold s1 into output columns.
    w1 = jnp.transpose(w1_t[:, :, 0, 0], (1, 0)) * s1[None, :]
    w1_p = jnp.zeros((Cp, Cp), jnp.float32).at[:C, :C].set(w1)

    # Conv2: torch (O, I, ky, kx) -> rows (ky, I), cols (kx, O); fold s2.
    w2 = jnp.transpose(w2_t, (2, 3, 1, 0)) * s2[None, None, None, :]  # (ky,kx,I,O)
    w2_p = jnp.zeros((3, 3, Cp, Cp), jnp.float32).at[:, :, :C, :C].set(w2)
    w2_p = jnp.transpose(w2_p, (0, 2, 1, 3)).reshape(3 * Cp, 3 * Cp)

    b1_p = jnp.zeros((1, Cp), jnp.float32).at[0, :C].set(b1)
    b2_p = jnp.zeros((1, Cp), jnp.float32).at[0, :C].set(b2)
    # Weights in the activation dtype (bf16 inputs -> bf16 MXU operands);
    # biases stay f32 for the epilogue.
    return w1_p.astype(dtype), b1_p, w2_p.astype(dtype), b2_p


# ----------------------------------------------------------------------------
# Row-strip sizing: biggest TH (divisor of H) under a ~20 MiB per-step budget,
# keeping >= 2 grid steps for megacore / v7x's two TensorCores when possible.
# ----------------------------------------------------------------------------
def _pick_row_tile(N, H, W, Cp, itemsize, budget_bytes=20 * 1024 * 1024):
    def step_bytes(th):
        m = th * W
        xio = 4 * m * Cp * itemsize           # x in + out blocks, double-buffered
        halo = 8 * W * Cp * itemsize
        y1 = (th + 2) * W * Cp * itemsize     # scratch
        acc = 3 * m * Cp * 4                  # f32 dy-partials (all three dx)
        tmp = 3 * m * Cp * 4                  # rolls / epilogue temporaries
        wts = 2 * 10 * Cp * Cp * itemsize
        return xio + halo + y1 + acc + tmp + wts

    divs = [d for d in range(1, H + 1) if H % d == 0]
    fits = [d for d in divs if step_bytes(d) <= budget_bytes]
    th = max(fits) if fits else 1
    if N * (H // th) < 2:
        alts = [d for d in fits if N * (H // d) >= 2]
        if alts:
            th = max(alts)
    return th


# ----------------------------------------------------------------------------
# Wrapper
# ----------------------------------------------------------------------------
def residual_forward_nhwc(x, w1_t, w2_t, bn1, bn2, *, add=True,
                          row_tile=None, eps=1e-3):
    """x: (N, H, W, C) NHWC. Weights in torch OIHW layout; BN params (g,b,m,v)."""
    N, H, W, C = x.shape
    Cp = _round_up(C, 128)
    itemsize = jnp.dtype(x.dtype).itemsize

    if row_tile is None:
        row_tile = _pick_row_tile(N, H, W, Cp, itemsize)
    TH = row_tile
    assert H % TH == 0, "row_tile must divide H"

    w1_p, b1_p, w2_p, b2_p = prepare_kernel_params(
        w1_t, w2_t, bn1, bn2, C, Cp, x.dtype, eps=eps)

    # Lane-dense channel padding of the input (no-op when C is already a
    # 128-multiple).  The output is written directly at C channels, so there is
    # no post-kernel slice pass.  For small-C production layers the input pad
    # should be fused into the upstream producer.
    xp = x if C == Cp else jnp.pad(x, ((0, 0), (0, 0), (0, 0), (0, Cp - C)))

    kernel = functools.partial(residual_kernel, TH=TH, W=W, C=C, Cp=Cp, add=add)

    def x_map(n, r):
        return (n, r, 0, 0)

    def x_top_map(n, r):      # row above the strip, clamped at the image top
        return (n, jnp.maximum(r * TH - 1, 0), 0, 0)

    def x_bot_map(n, r):      # row below the strip, clamped at the image bottom
        return (n, jnp.minimum(r * TH + TH, H - 1), 0, 0)

    def const2(n, r):
        return (0, 0)

    def build(single_buffer_weights):
        buffered = getattr(pl, "Buffered", None) if single_buffer_weights else None

        def wspec(shape):
            if buffered is not None:
                # Invariant operands: no double-buffering -> VMEM back for TH.
                return pl.BlockSpec(shape, const2, pipeline_mode=buffered(1))
            return pl.BlockSpec(shape, const2)

        grid_spec = pltpu.PrefetchScalarGridSpec(
            num_scalar_prefetch=0,
            grid=(N, H // TH),
            in_specs=[
                pl.BlockSpec((1, TH, W, Cp), x_map),       # x strip
                pl.BlockSpec((1, 1, W, Cp), x_top_map),    # halo row above
                pl.BlockSpec((1, 1, W, Cp), x_bot_map),    # halo row below
                wspec((Cp, Cp)),                           # w1 (BN1 folded)
                wspec((1, Cp)),                            # b1
                wspec((3 * Cp, 3 * Cp)),                   # w2 (BN2 folded)
                wspec((1, Cp)),                            # b2
            ],
            out_specs=pl.BlockSpec((1, TH, W, C), x_map),
            scratch_shapes=[pltpu.VMEM(((TH + 2) * W, Cp), x.dtype)],
        )
        return pl.pallas_call(
            kernel,
            out_shape=jax.ShapeDtypeStruct((N, H, W, C), x.dtype),
            grid_spec=grid_spec,
            compiler_params=pltpu.CompilerParams(
                dimension_semantics=("parallel", "parallel"),
                vmem_limit_bytes=32 * 1024 * 1024),
        )

    args = (xp, xp, xp, w1_p, b1_p, w2_p, b2_p)
    try:
        return build(True)(*args)
    except Exception:
        # Fallback for jax versions without BlockSpec pipeline_mode support.
        return build(False)(*args)


# ----------------------------------------------------------------------------
# Deterministic parameters + pure-JAX reference (NHWC end-to-end)
# ----------------------------------------------------------------------------
def make_params(key, ch):
    ks = jax.random.split(key, 10)
    w1_t = jax.random.normal(ks[0], (ch, ch, 1, 1), jnp.float32) * 0.1
    g1 = 1.0 + 0.1 * jax.random.normal(ks[1], (ch,), jnp.float32)
    be1 = 0.1 * jax.random.normal(ks[2], (ch,), jnp.float32)
    m1 = 0.1 * jax.random.normal(ks[3], (ch,), jnp.float32)
    v1 = jnp.abs(jax.random.normal(ks[4], (ch,), jnp.float32)) + 0.5

    w2_t = jax.random.normal(ks[5], (ch, ch, 3, 3), jnp.float32) * 0.1
    g2 = 1.0 + 0.1 * jax.random.normal(ks[6], (ch,), jnp.float32)
    be2 = 0.1 * jax.random.normal(ks[7], (ch,), jnp.float32)
    m2 = 0.1 * jax.random.normal(ks[8], (ch,), jnp.float32)
    v2 = jnp.abs(jax.random.normal(ks[9], (ch,), jnp.float32)) + 0.5

    return w1_t, w2_t, (g1, be1, m1, v1), (g2, be2, m2, v2)


def reference_nhwc(x, w1_t, w2_t, bn1, bn2, eps=1e-3):
    """Matches PyTorch Conv2d(bias=False) + BatchNorm2d(eval, eps=1e-3) + SiLU."""

    def conv(x, w_oihw, p):
        w_hwio = jnp.transpose(w_oihw, (2, 3, 1, 0))
        return jax.lax.conv_general_dilated(
            x, w_hwio, window_strides=(1, 1), padding=[(p, p), (p, p)],
            dimension_numbers=("NHWC", "HWIO", "NHWC"))

    def bn(x, p):
        g, b, m, v = p
        return (x - m) / jnp.sqrt(v + eps) * g + b

    y = _silu(bn(conv(x, w1_t, 0), bn1))
    y = _silu(bn(conv(y, w2_t, 1), bn2))
    return y + x


if __name__ == "__main__":
    N, C, H, W = 2, 4, 16, 16
    key = jax.random.PRNGKey(0)
    kx, kp = jax.random.split(key)

    # NHWC end-to-end: no NCHW<->NHWC transposes around the pallas_call.
    x = jax.random.normal(kx, (N, H, W, C), jnp.float32)
    params = make_params(kp, C)

    out = residual_forward_nhwc(x, *params)
    out = jax.block_until_ready(out)

    ref = reference_nhwc(x, *params)
    assert out.shape == (N, H, W, C)
    max_err = jnp.max(jnp.abs(out - ref))
    assert jnp.allclose(out, ref, atol=1e-3, rtol=1e-3), f"max err {max_err}"

    print("KERNEL_OK")
</pallas_src>

<mosaic_0001>
module attributes {stable_mosaic.version = 11 : i64} {
  func.func @residual_kernel(%arg0: i32, %arg1: i32, %arg2: memref<1x16x16x128xf32, #tpu.memory_space<vmem>>, %arg3: memref<1x1x16x128xf32, #tpu.memory_space<vmem>>, %arg4: memref<1x1x16x128xf32, #tpu.memory_space<vmem>>, %arg5: memref<128x128xf32, #tpu.memory_space<vmem>>, %arg6: memref<1x128xf32, #tpu.memory_space<vmem>>, %arg7: memref<384x384xf32, #tpu.memory_space<vmem>>, %arg8: memref<1x128xf32, #tpu.memory_space<vmem>>, %arg9: memref<1x16x16x4xf32, #tpu.memory_space<vmem>>, %arg10: memref<288x128xf32, #tpu.memory_space<vmem>>) attributes {dimension_semantics = [#tpu.dimension_semantics<parallel>, #tpu.dimension_semantics<parallel>], iteration_bounds = array<i64: 2, 1>, scalar_prefetch = 0 : i64, scratch_operands = 1 : i64, tpu.core_type = #tpu.core_type<tc>, window_params = [{transform_indices = @transform_0, window_bounds = array<i64: 1, 16, 16, 128>}, {transform_indices = @transform_1, window_bounds = array<i64: 1, 1, 16, 128>}, {transform_indices = @transform_2, window_bounds = array<i64: 1, 1, 16, 128>}, {pipeline_mode = #tpu.pipeline_mode<synchronous>, transform_indices = @transform_3, window_bounds = array<i64: 128, 128>}, {pipeline_mode = #tpu.pipeline_mode<synchronous>, transform_indices = @transform_4, window_bounds = array<i64: 1, 128>}, {pipeline_mode = #tpu.pipeline_mode<synchronous>, transform_indices = @transform_5, window_bounds = array<i64: 384, 384>}, {pipeline_mode = #tpu.pipeline_mode<synchronous>, transform_indices = @transform_6, window_bounds = array<i64: 1, 128>}, {transform_indices = @transform_7, window_bounds = array<i64: 1, 16, 16, 4>}]} {
    %c0 = arith.constant 0 : index
    %c0_0 = arith.constant 0 : index
    %0 = vector.load %arg5[%c0, %c0_0] : memref<128x128xf32, #tpu.memory_space<vmem>>, vector<128x128xf32>
    %c0_1 = arith.constant 0 : index
    %c0_2 = arith.constant 0 : index
    %1 = vector.load %arg6[%c0_1, %c0_2] : memref<1x128xf32, #tpu.memory_space<vmem>>, vector<1x128xf32>
    %c0_3 = arith.constant 0 : index
    %c0_4 = arith.constant 0 : index
    %c0_5 = arith.constant 0 : index
    %c0_6 = arith.constant 0 : index
    %2 = vector.load %arg2[%c0_3, %c0_4, %c0_5, %c0_6] : memref<1x16x16x128xf32, #tpu.memory_space<vmem>>, vector<1x16x16x128xf32>
    %3 = vector.shape_cast %2 : vector<1x16x16x128xf32> to vector<16x16x128xf32>
    %4 = vector.shape_cast %3 : vector<16x16x128xf32> to vector<256x128xf32>
    %cst = arith.constant dense<0.000000e+00> : vector<256x128xf32>
    %5 = tpu.matmul %4, %0, %cst {dimension_numbers = #tpu.dot_dimension_numbers<[1], [0], [0], [1], [0, 0, 1, 1], [], []>} : vector<256x128xf32>, vector<128x128xf32>, vector<256x128xf32> -> vector<256x128xf32>
    %6 = vector.broadcast %1 : vector<1x128xf32> to vector<256x128xf32>
    %7 = arith.addf %5, %6 : vector<256x128xf32>
    %8 = arith.negf %7 : vector<256x128xf32>
    %9 = math.exp %8 : vector<256x128xf32>
    %cst_7 = arith.constant 1.000000e+00 : f32
    %10 = vector.broadcast %cst_7 : f32 to vector<256x128xf32>
    %11 = arith.addf %10, %9 : vector<256x128xf32>
    %12 = arith.divf %10, %11 : vector<256x128xf32>
    %13 = arith.mulf %7, %12 : vector<256x128xf32>
    %c16 = arith.constant 16 : index
    %c0_8 = arith.constant 0 : index
    %14 = vector.load %arg10[%c16, %c0_8] : memref<288x128xf32, #tpu.memory_space<vmem>>, vector<256x128xf32>
    tpu.vector_store %arg10[%c16, %c0_8], %13 {strides = array<i32>} : memref<288x128xf32, #tpu.memory_space<vmem>>, vector<256x128xf32>,
    %c0_9 = arith.constant 0 : index
    %c0_10 = arith.constant 0 : index
    %c0_11 = arith.constant 0 : index
    %c0_12 = arith.constant 0 : index
    %15 = vector.load %arg3[%c0_9, %c0_10, %c0_11, %c0_12] : memref<1x1x16x128xf32, #tpu.memory_space<vmem>>, vector<1x1x16x128xf32>
    %16 = vector.shape_cast %15 : vector<1x1x16x128xf32> to vector<16x128xf32>
    %cst_13 = arith.constant dense<0.000000e+00> : vector<16x128xf32>
    %17 = tpu.matmul %16, %0, %cst_13 {dimension_numbers = #tpu.dot_dimension_numbers<[1], [0], [0], [1], [0, 0, 1, 1], [], []>} : vector<16x128xf32>, vector<128x128xf32>, vector<16x128xf32> -> vector<16x128xf32>
    %18 = vector.broadcast %1 : vector<1x128xf32> to vector<16x128xf32>
    %19 = arith.addf %17, %18 : vector<16x128xf32>
    %20 = arith.negf %19 : vector<16x128xf32>
    %21 = math.exp %20 : vector<16x128xf32>
    %cst_14 = arith.constant 1.000000e+00 : f32
    %22 = vector.broadcast %cst_14 : f32 to vector<16x128xf32>
    %23 = arith.addf %22, %21 : vector<16x128xf32>
    %24 = arith.divf %22, %23 : vector<16x128xf32>
    %25 = arith.mulf %19, %24 : vector<16x128xf32>
    %c0_i32 = arith.constant 0 : i32
    %26 = arith.cmpi eq, %arg1, %c0_i32 : i32
    %cst_15 = arith.constant 0.000000e+00 : f32
    %27 = vector.broadcast %cst_15 : f32 to vector<16x128xf32>
    %28 = arith.select %26, %27, %25 : vector<16x128xf32>
    %c0_16 = arith.constant 0 : index
    %c0_17 = arith.constant 0 : index
    %29 = vector.load %arg10[%c0_16, %c0_17] : memref<288x128xf32, #tpu.memory_space<vmem>>, vector<16x128xf32>
    tpu.vector_store %arg10[%c0_16, %c0_17], %28 {strides = array<i32>} : memref<288x128xf32, #tpu.memory_space<vmem>>, vector<16x128xf32>,
    %c0_18 = arith.constant 0 : index
    %c0_19 = arith.constant 0 : index
    %c0_20 = arith.constant 0 : index
    %c0_21 = arith.constant 0 : index
    %30 = vector.load %arg4[%c0_18, %c0_19, %c0_20, %c0_21] : memref<1x1x16x128xf32, #tpu.memory_space<vmem>>, vector<1x1x16x128xf32>
    %31 = vector.shape_cast %30 : vector<1x1x16x128xf32> to vector<16x128xf32>
    %cst_22 = arith.constant dense<0.000000e+00> : vector<16x128xf32>
    %32 = tpu.matmul %31, %0, %cst_22 {dimension_numbers = #tpu.dot_dimension_numbers<[1], [0], [0], [1], [0, 0, 1, 1], [], []>} : vector<16x128xf32>, vector<128x128xf32>, vector<16x128xf32> -> vector<16x128xf32>
    %33 = vector.broadcast %1 : vector<1x128xf32> to vector<16x128xf32>
    %34 = arith.addf %32, %33 : vector<16x128xf32>
    %35 = arith.negf %34 : vector<16x128xf32>
    %36 = math.exp %35 : vector<16x128xf32>
    %cst_23 = arith.constant 1.000000e+00 : f32
    %37 = vector.broadcast %cst_23 : f32 to vector<16x128xf32>
    %38 = arith.addf %37, %36 : vector<16x128xf32>
    %39 = arith.divf %37, %38 : vector<16x128xf32>
    %40 = arith.mulf %34, %39 : vector<16x128xf32>
    %c0_i32_24 = arith.constant 0 : i32
    %41 = arith.cmpi eq, %arg1, %c0_i32_24 : i32
    %cst_25 = arith.constant 0.000000e+00 : f32
    %42 = vector.broadcast %cst_25 : f32 to vector<16x128xf32>
    %43 = arith.select %41, %42, %40 : vector<16x128xf32>
    %c272 = arith.constant 272 : index
    %c0_26 = arith.constant 0 : index
    %44 = vector.load %arg10[%c272, %c0_26] : memref<288x128xf32, #tpu.memory_space<vmem>>, vector<16x128xf32>
    tpu.vector_store %arg10[%c272, %c0_26], %43 {strides = array<i32>} : memref<288x128xf32, #tpu.memory_space<vmem>>, vector<16x128xf32>,
    %c0_27 = arith.constant 0 : index
    %c0_28 = arith.constant 0 : index
    %45 = vector.load %arg10[%c0_27, %c0_28] : memref<288x128xf32, #tpu.memory_space<vmem>>, vector<256x128xf32>
    %c0_29 = arith.constant 0 : index
    %c0_30 = arith.constant 0 : index
    %46 = vector.load %arg7[%c0_29, %c0_30] : memref<384x384xf32, #tpu.memory_space<vmem>>, vector<128x384xf32>
    %cst_31 = arith.constant dense<0.000000e+00> : vector<256x384xf32>
    %47 = tpu.matmul %45, %46, %cst_31 {dimension_numbers = #tpu.dot_dimension_numbers<[1], [0], [0], [1], [0, 0, 1, 1], [], []>} : vector<256x128xf32>, vector<128x384xf32>, vector<256x384xf32> -> vector<256x384xf32>
    %c16_32 = arith.constant 16 : index
    %c0_33 = arith.constant 0 : index
    %48 = vector.load %arg10[%c16_32, %c0_33] : memref<288x128xf32, #tpu.memory_space<vmem>>, vector<256x128xf32>
    %c128 = arith.constant 128 : index
    %c0_34 = arith.constant 0 : index
    %49 = vector.load %arg7[%c128, %c0_34] : memref<384x384xf32, #tpu.memory_space<vmem>>, vector<128x384xf32>
    %cst_35 = arith.constant dense<0.000000e+00> : vector<256x384xf32>
    %50 = tpu.matmul %48, %49, %cst_35 {dimension_numbers = #tpu.dot_dimension_numbers<[1], [0], [0], [1], [0, 0, 1, 1], [], []>} : vector<256x128xf32>, vector<128x384xf32>, vector<256x384xf32> -> vector<256x384xf32>
    %51 = arith.addf %47, %50 : vector<256x384xf32>
    %c32 = arith.constant 32 : index
    %c0_36 = arith.constant 0 : index
    %52 = vector.load %arg10[%c32, %c0_36] : memref<288x128xf32, #tpu.memory_space<vmem>>, vector<256x128xf32>
    %c256 = arith.constant 256 : index
    %c0_37 = arith.constant 0 : index
    %53 = vector.load %arg7[%c256, %c0_37] : memref<384x384xf32, #tpu.memory_space<vmem>>, vector<128x384xf32>
    %cst_38 = arith.constant dense<0.000000e+00> : vector<256x384xf32>
    %54 = tpu.matmul %52, %53, %cst_38 {dimension_numbers = #tpu.dot_dimension_numbers<[1], [0], [0], [1], [0, 0, 1, 1], [], []>} : vector<256x128xf32>, vector<128x384xf32>, vector<256x384xf32> -> vector<256x384xf32>
    %55 = arith.addf %51, %54 : vector<256x384xf32>
    %56 = tpu.iota {dimensions = array<i32: 0>} : vector<256x1xi32>
    %c16_i32 = arith.constant 16 : i32
    %c0_i32_39 = arith.constant 0 : i32
    %57 = arith.cmpi eq, %c16_i32, %c0_i32_39 : i32
    %c1_i32 = arith.constant 1 : i32
    %58 = arith.select %57, %c1_i32, %c16_i32 : i32
    %59 = vector.broadcast %58 : i32 to vector<256x1xi32>
    %60 = arith.remsi %56, %59 : vector<256x1xi32>
    %c0_i32_40 = arith.constant 0 : i32
    %61 = vector.broadcast %c0_i32_40 : i32 to vector<256x1xi32>
    %62 = arith.cmpi ne, %60, %61 : vector<256x1xi32>
    %c0_i32_41 = arith.constant 0 : i32
    %63 = vector.broadcast %c0_i32_41 : i32 to vector<256x1xi32>
    %64 = arith.cmpi slt, %60, %63 : vector<256x1xi32>
    %c0_i32_42 = arith.constant 0 : i32
    %65 = arith.cmpi slt, %58, %c0_i32_42 : i32
    %66 = vector.broadcast %65 : i1 to vector<256x1xi1>
    %67 = vector.broadcast %66 : vector<256x1xi1> to vector<256x1xi1>
    %68 = arith.xori %64, %67 : vector<256x1xi1>
    %69 = arith.andi %68, %62 : vector<256x1xi1>
    %70 = vector.broadcast %58 : i32 to vector<256x1xi32>
    %71 = arith.addi %60, %70 : vector<256x1xi32>
    %72 = arith.select %69, %71, %60 : vector<256x1xi1>, vector<256x1xi32>
    %73 = vector.extract_strided_slice %55 {offsets = [0, 0], sizes = [256, 128], strides = [1, 1]} : vector<256x384xf32> to vector<256x128xf32>
    %c1_i32_43 = arith.constant 1 : i32
    %74 = tpu.dynamic_rotate %73 by %c1_i32_43 dim 0 : vector<256x128xf32>, i32 -> vector<256x128xf32>
    %75 = vector.extract_strided_slice %55 {offsets = [0, 256], sizes = [256, 128], strides = [1, 1]} : vector<256x384xf32> to vector<256x128xf32>
    %c255_i32 = arith.constant 255 : i32
    %76 = tpu.dynamic_rotate %75 by %c255_i32 dim 0 : vector<256x128xf32>, i32 -> vector<256x128xf32>
    %77 = vector.extract_strided_slice %55 {offsets = [0, 128], sizes = [256, 128], strides = [1, 1]} : vector<256x384xf32> to vector<256x128xf32>
    %c0_i32_44 = arith.constant 0 : i32
    %78 = vector.broadcast %c0_i32_44 : i32 to vector<256x1xi32>
    %79 = arith.cmpi eq, %72, %78 : vector<256x1xi32>
    %cst_45 = arith.constant 0.000000e+00 : f32
    %80 = vector.shape_cast %79 : vector<256x1xi1> to vector<256x1xi1>
    %81 = vector.broadcast %80 : vector<256x1xi1> to vector<256x128xi1>
    %82 = vector.broadcast %cst_45 : f32 to vector<256x128xf32>
    %83 = arith.select %81, %82, %74 : vector<256x128xi1>, vector<256x128xf32>
    %84 = arith.addf %77, %83 : vector<256x128xf32>
    %c15_i32 = arith.constant 15 : i32
    %85 = vector.broadcast %c15_i32 : i32 to vector<256x1xi32>
    %86 = arith.cmpi eq, %72, %85 : vector<256x1xi32>
    %cst_46 = arith.constant 0.000000e+00 : f32
    %87 = vector.shape_cast %86 : vector<256x1xi1> to vector<256x1xi1>
    %88 = vector.broadcast %87 : vector<256x1xi1> to vector<256x128xi1>
    %89 = vector.broadcast %cst_46 : f32 to vector<256x128xf32>
    %90 = arith.select %88, %89, %76 : vector<256x128xi1>, vector<256x128xf32>
    %91 = arith.addf %84, %90 : vector<256x128xf32>
    %c0_47 = arith.constant 0 : index
    %c0_48 = arith.constant 0 : index
    %92 = vector.load %arg8[%c0_47, %c0_48] : memref<1x128xf32, #tpu.memory_space<vmem>>, vector<1x128xf32>
    %93 = vector.broadcast %92 : vector<1x128xf32> to vector<256x128xf32>
    %94 = arith.addf %91, %93 : vector<256x128xf32>
    %95 = arith.negf %94 : vector<256x128xf32>
    %96 = math.exp %95 : vector<256x128xf32>
    %cst_49 = arith.constant 1.000000e+00 : f32
    %97 = vector.broadcast %cst_49 : f32 to vector<256x128xf32>
    %98 = arith.addf %97, %96 : vector<256x128xf32>
    %99 = arith.divf %97, %98 : vector<256x128xf32>
    %100 = arith.mulf %94, %99 : vector<256x128xf32>
    %101 = arith.addf %100, %4 : vector<256x128xf32>
    %102 = vector.shape_cast %101 : vector<256x128xf32> to vector<16x16x128xf32>
    %103 = vector.extract_strided_slice %102 {offsets = [0, 0, 0], sizes = [16, 16, 4], strides = [1, 1, 1]} : vector<16x16x128xf32> to vector<16x16x4xf32>
    %c0_50 = arith.constant 0 : index
    %c0_51 = arith.constant 0 : index
    %c0_52 = arith.constant 0 : index
    %c0_53 = arith.constant 0 : index
    %104 = vector.load %arg9[%c0_50, %c0_51, %c0_52, %c0_53] : memref<1x16x16x4xf32, #tpu.memory_space<vmem>>, vector<1x16x16x4xf32>
    %105 = vector.shape_cast %104 : vector<1x16x16x4xf32> to vector<16x16x4xf32>
    %106 = vector.shape_cast %103 : vector<16x16x4xf32> to vector<1x16x16x4xf32>
    tpu.vector_store %arg9[%c0_50, %c0_51, %c0_52, %c0_53], %106 {strides = array<i32>} : memref<1x16x16x4xf32, #tpu.memory_space<vmem>>, vector<1x16x16x4xf32>,
    return
  }
  func.func @transform_0(%arg0: i32, %arg1: i32) -> (i32, i32, i32, i32) {
    %c0_i32 = arith.constant 0 : i32
    %c0_i32_0 = arith.constant 0 : i32
    %c0_i32_1 = arith.constant 0 : i32
    return %arg0, %arg1, %c0_i32, %c0_i32_0 : i32, i32, i32, i32
  }
  func.func @transform_1(%arg0: i32, %arg1: i32) -> (i32, i32, i32, i32) {
    %c16_i32 = arith.constant 16 : i32
    %0 = arith.muli %arg1, %c16_i32 : i32
    %c1_i32 = arith.constant 1 : i32
    %1 = arith.subi %0, %c1_i32 : i32
    %c0_i32 = arith.constant 0 : i32
    %2 = arith.maxsi %1, %c0_i32 : i32
    %c0_i32_0 = arith.constant 0 : i32
    %c0_i32_1 = arith.constant 0 : i32
    %c0_i32_2 = arith.constant 0 : i32
    return %arg0, %2, %c0_i32_0, %c0_i32_1 : i32, i32, i32, i32
  }
  func.func @transform_2(%arg0: i32, %arg1: i32) -> (i32, i32, i32, i32) {
    %c16_i32 = arith.constant 16 : i32
    %0 = arith.muli %arg1, %c16_i32 : i32
    %c16_i32_0 = arith.constant 16 : i32
    %1 = arith.addi %0, %c16_i32_0 : i32
    %c15_i32 = arith.constant 15 : i32
    %2 = arith.minsi %1, %c15_i32 : i32
    %c0_i32 = arith.constant 0 : i32
    %c0_i32_1 = arith.constant 0 : i32
    %c0_i32_2 = arith.constant 0 : i32
    return %arg0, %2, %c0_i32, %c0_i32_1 : i32, i32, i32, i32
  }
  func.func @transform_3(%arg0: i32, %arg1: i32) -> (i32, i32) {
    %c0_i32 = arith.constant 0 : i32
    %c0_i32_0 = arith.constant 0 : i32
    %c0_i32_1 = arith.constant 0 : i32
    return %c0_i32, %c0_i32_0 : i32, i32
  }
  func.func @transform_4(%arg0: i32, %arg1: i32) -> (i32, i32) {
    %c0_i32 = arith.constant 0 : i32
    %c0_i32_0 = arith.constant 0 : i32
    %c0_i32_1 = arith.constant 0 : i32
    return %c0_i32, %c0_i32_0 : i32, i32
  }
  func.func @transform_5(%arg0: i32, %arg1: i32) -> (i32, i32) {
    %c0_i32 = arith.constant 0 : i32
    %c0_i32_0 = arith.constant 0 : i32
    %c0_i32_1 = arith.constant 0 : i32
    return %c0_i32, %c0_i32_0 : i32, i32
  }
  func.func @transform_6(%arg0: i32, %arg1: i32) -> (i32, i32) {
    %c0_i32 = arith.constant 0 : i32
    %c0_i32_0 = arith.constant 0 : i32
    %c0_i32_1 = arith.constant 0 : i32
    return %c0_i32, %c0_i32_0 : i32, i32
  }
  func.func @transform_7(%arg0: i32, %arg1: i32) -> (i32, i32, i32, i32) {
    %c0_i32 = arith.constant 0 : i32
    %c0_i32_0 = arith.constant 0 : i32
    %c0_i32_1 = arith.constant 0 : i32
    return %arg0, %arg1, %c0_i32, %c0_i32_0 : i32, i32, i32, i32
  }
}

module attributes {stable_mosaic.version = 11 : i64} {
  func.func @residual_kernel(%arg0: i32, %arg1: i32, %arg2: memref<1x16x16x128xf32, #tpu.memory_space<vmem>>, %arg3: memref<1x1x16x128xf32, #tpu.memory_space<vmem>>, %arg4: memref<1x1x16x128xf32, #tpu.memory_space<vmem>>, %arg5: memref<128x128xf32, #tpu.memory_space<vmem>>, %arg6: memref<1x128xf32, #tpu.memory_space<vmem>>, %arg7: memref<384x384xf32, #tpu.memory_space<vmem>>, %arg8: memref<1x128xf32, #tpu.memory_space<vmem>>, %arg9: memref<1x16x16x4xf32, #tpu.memory_space<vmem>>, %arg10: memref<288x128xf32, #tpu.memory_space<vmem>>) attributes {dimension_semantics = [#tpu.dimension_semantics<parallel>, #tpu.dimension_semantics<parallel>], iteration_bounds = array<i64: 2, 1>, scalar_prefetch = 0 : i64, scratch_operands = 1 : i64, tpu.core_type = #tpu.core_type<tc>, window_params = [{transform_indices = @transform_0, window_bounds = array<i64: 1, 16, 16, 128>}, {transform_indices = @transform_1, window_bounds = array<i64: 1, 1, 16, 128>}, {transform_indices = @transform_2, window_bounds = array<i64: 1, 1, 16, 128>}, {pipeline_mode = #tpu.pipeline_mode<synchronous>, transform_indices = @transform_3, window_bounds = array<i64: 128, 128>}, {pipeline_mode = #tpu.pipeline_mode<synchronous>, transform_indices = @transform_4, window_bounds = array<i64: 1, 128>}, {pipeline_mode = #tpu.pipeline_mode<synchronous>, transform_indices = @transform_5, window_bounds = array<i64: 384, 384>}, {pipeline_mode = #tpu.pipeline_mode<synchronous>, transform_indices = @transform_6, window_bounds = array<i64: 1, 128>}, {transform_indices = @transform_7, window_bounds = array<i64: 1, 16, 16, 4>}]} {
    %c0 = arith.constant 0 : index
    %c0_0 = arith.constant 0 : index
    %0 = vector.load %arg5[%c0, %c0_0] : memref<128x128xf32, #tpu.memory_space<vmem>>, vector<128x128xf32>
    %c0_1 = arith.constant 0 : index
    %c0_2 = arith.constant 0 : index
    %1 = vector.load %arg6[%c0_1, %c0_2] : memref<1x128xf32, #tpu.memory_space<vmem>>, vector<1x128xf32>
    %c0_3 = arith.constant 0 : index
    %c0_4 = arith.constant 0 : index
    %c0_5 = arith.constant 0 : index
    %c0_6 = arith.constant 0 : index
    %2 = vector.load %arg2[%c0_3, %c0_4, %c0_5, %c0_6] : memref<1x16x16x128xf32, #tpu.memory_space<vmem>>, vector<1x16x16x128xf32>
    %3 = vector.shape_cast %2 : vector<1x16x16x128xf32> to vector<16x16x128xf32>
    %4 = vector.shape_cast %3 : vector<16x16x128xf32> to vector<256x128xf32>
    %cst = arith.constant dense<0.000000e+00> : vector<256x128xf32>
    %5 = tpu.matmul %4, %0, %cst {dimension_numbers = #tpu.dot_dimension_numbers<[1], [0], [0], [1], [0, 0, 1, 1], [], []>} : vector<256x128xf32>, vector<128x128xf32>, vector<256x128xf32> -> vector<256x128xf32>
    %6 = vector.broadcast %1 : vector<1x128xf32> to vector<256x128xf32>
    %7 = arith.addf %5, %6 : vector<256x128xf32>
    %8 = arith.negf %7 : vector<256x128xf32>
    %9 = math.exp %8 : vector<256x128xf32>
    %cst_7 = arith.constant 1.000000e+00 : f32
    %10 = vector.broadcast %cst_7 : f32 to vector<256x128xf32>
    %11 = arith.addf %10, %9 : vector<256x128xf32>
    %12 = arith.divf %10, %11 : vector<256x128xf32>
    %13 = arith.mulf %7, %12 : vector<256x128xf32>
    %c16 = arith.constant 16 : index
    %c0_8 = arith.constant 0 : index
    %14 = vector.load %arg10[%c16, %c0_8] : memref<288x128xf32, #tpu.memory_space<vmem>>, vector<256x128xf32>
    tpu.vector_store %arg10[%c16, %c0_8], %13 {strides = array<i32>} : memref<288x128xf32, #tpu.memory_space<vmem>>, vector<256x128xf32>,
    %c0_9 = arith.constant 0 : index
    %c0_10 = arith.constant 0 : index
    %c0_11 = arith.constant 0 : index
    %c0_12 = arith.constant 0 : index
    %15 = vector.load %arg3[%c0_9, %c0_10, %c0_11, %c0_12] : memref<1x1x16x128xf32, #tpu.memory_space<vmem>>, vector<1x1x16x128xf32>
    %16 = vector.shape_cast %15 : vector<1x1x16x128xf32> to vector<16x128xf32>
    %cst_13 = arith.constant dense<0.000000e+00> : vector<16x128xf32>
    %17 = tpu.matmul %16, %0, %cst_13 {dimension_numbers = #tpu.dot_dimension_numbers<[1], [0], [0], [1], [0, 0, 1, 1], [], []>} : vector<16x128xf32>, vector<128x128xf32>, vector<16x128xf32> -> vector<16x128xf32>
    %18 = vector.broadcast %1 : vector<1x128xf32> to vector<16x128xf32>
    %19 = arith.addf %17, %18 : vector<16x128xf32>
    %20 = arith.negf %19 : vector<16x128xf32>
    %21 = math.exp %20 : vector<16x128xf32>
    %cst_14 = arith.constant 1.000000e+00 : f32
    %22 = vector.broadcast %cst_14 : f32 to vector<16x128xf32>
    %23 = arith.addf %22, %21 : vector<16x128xf32>
    %24 = arith.divf %22, %23 : vector<16x128xf32>
    %25 = arith.mulf %19, %24 : vector<16x128xf32>
    %c0_i32 = arith.constant 0 : i32
    %26 = arith.cmpi eq, %arg1, %c0_i32 : i32
    %cst_15 = arith.constant 0.000000e+00 : f32
    %27 = vector.broadcast %cst_15 : f32 to vector<16x128xf32>
    %28 = arith.select %26, %27, %25 : vector<16x128xf32>
    %c0_16 = arith.constant 0 : index
    %c0_17 = arith.constant 0 : index
    %29 = vector.load %arg10[%c0_16, %c0_17] : memref<288x128xf32, #tpu.memory_space<vmem>>, vector<16x128xf32>
    tpu.vector_store %arg10[%c0_16, %c0_17], %28 {strides = array<i32>} : memref<288x128xf32, #tpu.memory_space<vmem>>, vector<16x128xf32>,
    %c0_18 = arith.constant 0 : index
    %c0_19 = arith.constant 0 : index
    %c0_20 = arith.constant 0 : index
    %c0_21 = arith.constant 0 : index
    %30 = vector.load %arg4[%c0_18, %c0_19, %c0_20, %c0_21] : memref<1x1x16x128xf32, #tpu.memory_space<vmem>>, vector<1x1x16x128xf32>
    %31 = vector.shape_cast %30 : vector<1x1x16x128xf32> to vector<16x128xf32>
    %cst_22 = arith.constant dense<0.000000e+00> : vector<16x128xf32>
    %32 = tpu.matmul %31, %0, %cst_22 {dimension_numbers = #tpu.dot_dimension_numbers<[1], [0], [0], [1], [0, 0, 1, 1], [], []>} : vector<16x128xf32>, vector<128x128xf32>, vector<16x128xf32> -> vector<16x128xf32>
    %33 = vector.broadcast %1 : vector<1x128xf32> to vector<16x128xf32>
    %34 = arith.addf %32, %33 : vector<16x128xf32>
    %35 = arith.negf %34 : vector<16x128xf32>
    %36 = math.exp %35 : vector<16x128xf32>
    %cst_23 = arith.constant 1.000000e+00 : f32
    %37 = vector.broadcast %cst_23 : f32 to vector<16x128xf32>
    %38 = arith.addf %37, %36 : vector<16x128xf32>
    %39 = arith.divf %37, %38 : vector<16x128xf32>
    %40 = arith.mulf %34, %39 : vector<16x128xf32>
    %c0_i32_24 = arith.constant 0 : i32
    %41 = arith.cmpi eq, %arg1, %c0_i32_24 : i32
    %cst_25 = arith.constant 0.000000e+00 : f32
    %42 = vector.broadcast %cst_25 : f32 to vector<16x128xf32>
    %43 = arith.select %41, %42, %40 : vector<16x128xf32>
    %c272 = arith.constant 272 : index
    %c0_26 = arith.constant 0 : index
    %44 = vector.load %arg10[%c272, %c0_26] : memref<288x128xf32, #tpu.memory_space<vmem>>, vector<16x128xf32>
    tpu.vector_store %arg10[%c272, %c0_26], %43 {strides = array<i32>} : memref<288x128xf32, #tpu.memory_space<vmem>>, vector<16x128xf32>,
    %c0_27 = arith.constant 0 : index
    %c0_28 = arith.constant 0 : index
    %45 = vector.load %arg10[%c0_27, %c0_28] : memref<288x128xf32, #tpu.memory_space<vmem>>, vector<256x128xf32>
    %c0_29 = arith.constant 0 : index
    %c0_30 = arith.constant 0 : index
    %46 = vector.load %arg7[%c0_29, %c0_30] : memref<384x384xf32, #tpu.memory_space<vmem>>, vector<128x384xf32>
    %cst_31 = arith.constant dense<0.000000e+00> : vector<256x384xf32>
    %47 = tpu.matmul %45, %46, %cst_31 {dimension_numbers = #tpu.dot_dimension_numbers<[1], [0], [0], [1], [0, 0, 1, 1], [], []>} : vector<256x128xf32>, vector<128x384xf32>, vector<256x384xf32> -> vector<256x384xf32>
    %c16_32 = arith.constant 16 : index
    %c0_33 = arith.constant 0 : index
    %48 = vector.load %arg10[%c16_32, %c0_33] : memref<288x128xf32, #tpu.memory_space<vmem>>, vector<256x128xf32>
    %c128 = arith.constant 128 : index
    %c0_34 = arith.constant 0 : index
    %49 = vector.load %arg7[%c128, %c0_34] : memref<384x384xf32, #tpu.memory_space<vmem>>, vector<128x384xf32>
    %cst_35 = arith.constant dense<0.000000e+00> : vector<256x384xf32>
    %50 = tpu.matmul %48, %49, %cst_35 {dimension_numbers = #tpu.dot_dimension_numbers<[1], [0], [0], [1], [0, 0, 1, 1], [], []>} : vector<256x128xf32>, vector<128x384xf32>, vector<256x384xf32> -> vector<256x384xf32>
    %51 = arith.addf %47, %50 : vector<256x384xf32>
    %c32 = arith.constant 32 : index
    %c0_36 = arith.constant 0 : index
    %52 = vector.load %arg10[%c32, %c0_36] : memref<288x128xf32, #tpu.memory_space<vmem>>, vector<256x128xf32>
    %c256 = arith.constant 256 : index
    %c0_37 = arith.constant 0 : index
    %53 = vector.load %arg7[%c256, %c0_37] : memref<384x384xf32, #tpu.memory_space<vmem>>, vector<128x384xf32>
    %cst_38 = arith.constant dense<0.000000e+00> : vector<256x384xf32>
    %54 = tpu.matmul %52, %53, %cst_38 {dimension_numbers = #tpu.dot_dimension_numbers<[1], [0], [0], [1], [0, 0, 1, 1], [], []>} : vector<256x128xf32>, vector<128x384xf32>, vector<256x384xf32> -> vector<256x384xf32>
    %55 = arith.addf %51, %54 : vector<256x384xf32>
    %56 = tpu.iota {dimensions = array<i32: 0>} : vector<256x1xi32>
    %c16_i32 = arith.constant 16 : i32
    %c0_i32_39 = arith.constant 0 : i32
    %57 = arith.cmpi eq, %c16_i32, %c0_i32_39 : i32
    %c1_i32 = arith.constant 1 : i32
    %58 = arith.select %57, %c1_i32, %c16_i32 : i32
    %59 = vector.broadcast %58 : i32 to vector<256x1xi32>
    %60 = arith.remsi %56, %59 : vector<256x1xi32>
    %c0_i32_40 = arith.constant 0 : i32
    %61 = vector.broadcast %c0_i32_40 : i32 to vector<256x1xi32>
    %62 = arith.cmpi ne, %60, %61 : vector<256x1xi32>
    %c0_i32_41 = arith.constant 0 : i32
    %63 = vector.broadcast %c0_i32_41 : i32 to vector<256x1xi32>
    %64 = arith.cmpi slt, %60, %63 : vector<256x1xi32>
    %c0_i32_42 = arith.constant 0 : i32
    %65 = arith.cmpi slt, %58, %c0_i32_42 : i32
    %66 = vector.broadcast %65 : i1 to vector<256x1xi1>
    %67 = vector.broadcast %66 : vector<256x1xi1> to vector<256x1xi1>
    %68 = arith.xori %64, %67 : vector<256x1xi1>
    %69 = arith.andi %68, %62 : vector<256x1xi1>
    %70 = vector.broadcast %58 : i32 to vector<256x1xi32>
    %71 = arith.addi %60, %70 : vector<256x1xi32>
    %72 = arith.select %69, %71, %60 : vector<256x1xi1>, vector<256x1xi32>
    %73 = vector.extract_strided_slice %55 {offsets = [0, 0], sizes = [256, 128], strides = [1, 1]} : vector<256x384xf32> to vector<256x128xf32>
    %c1_i32_43 = arith.constant 1 : i32
    %74 = tpu.dynamic_rotate %73 by %c1_i32_43 dim 0 : vector<256x128xf32>, i32 -> vector<256x128xf32>
    %75 = vector.extract_strided_slice %55 {offsets = [0, 256], sizes = [256, 128], strides = [1, 1]} : vector<256x384xf32> to vector<256x128xf32>
    %c255_i32 = arith.constant 255 : i32
    %76 = tpu.dynamic_rotate %75 by %c255_i32 dim 0 : vector<256x128xf32>, i32 -> vector<256x128xf32>
    %77 = vector.extract_strided_slice %55 {offsets = [0, 128], sizes = [256, 128], strides = [1, 1]} : vector<256x384xf32> to vector<256x128xf32>
    %c0_i32_44 = arith.constant 0 : i32
    %78 = vector.broadcast %c0_i32_44 : i32 to vector<256x1xi32>
    %79 = arith.cmpi eq, %72, %78 : vector<256x1xi32>
    %cst_45 = arith.constant 0.000000e+00 : f32
    %80 = vector.shape_cast %79 : vector<256x1xi1> to vector<256x1xi1>
    %81 = vector.broadcast %80 : vector<256x1xi1> to vector<256x128xi1>
    %82 = vector.broadcast %cst_45 : f32 to vector<256x128xf32>
    %83 = arith.select %81, %82, %74 : vector<256x128xi1>, vector<256x128xf32>
    %84 = arith.addf %77, %83 : vector<256x128xf32>
    %c15_i32 = arith.constant 15 : i32
    %85 = vector.broadcast %c15_i32 : i32 to vector<256x1xi32>
    %86 = arith.cmpi eq, %72, %85 : vector<256x1xi32>
    %cst_46 = arith.constant 0.000000e+00 : f32
    %87 = vector.shape_cast %86 : vector<256x1xi1> to vector<256x1xi1>
    %88 = vector.broadcast %87 : vector<256x1xi1> to vector<256x128xi1>
    %89 = vector.broadcast %cst_46 : f32 to vector<256x128xf32>
    %90 = arith.select %88, %89, %76 : vector<256x128xi1>, vector<256x128xf32>
    %91 = arith.addf %84, %90 : vector<256x128xf32>
    %c0_47 = arith.constant 0 : index
    %c0_48 = arith.constant 0 : index
    %92 = vector.load %arg8[%c0_47, %c0_48] : memref<1x128xf32, #tpu.memory_space<vmem>>, vector<1x128xf32>
    %93 = vector.broadcast %92 : vector<1x128xf32> to vector<256x128xf32>
    %94 = arith.addf %91, %93 : vector<256x128xf32>
    %95 = arith.negf %94 : vector<256x128xf32>
    %96 = math.exp %95 : vector<256x128xf32>
    %cst_49 = arith.constant 1.000000e+00 : f32
    %97 = vector.broadcast %cst_49 : f32 to vector<256x128xf32>
    %98 = arith.addf %97, %96 : vector<256x128xf32>
    %99 = arith.divf %97, %98 : vector<256x128xf32>
    %100 = arith.mulf %94, %99 : vector<256x128xf32>
    %101 = arith.addf %100, %4 : vector<256x128xf32>
    %102 = vector.shape_cast %101 : vector<256x128xf32> to vector<16x16x128xf32>
    %103 = vector.extract_strided_slice %102 {offsets = [0, 0, 0], sizes = [16, 16, 4], strides = [1, 1, 1]} : vector<16x16x128xf32> to vector<16x16x4xf32>
    %c0_50 = arith.constant 0 : index
    %c0_51 = arith.constant 0 : index
    %c0_52 = arith.constant 0 : index
    %c0_53 = arith.constant 0 : index
    %104 = vector.load %arg9[%c0_50, %c0_51, %c0_52, %c0_53] : memref<1x16x16x4xf32, #tpu.memory_space<vmem>>, vector<1x16x16x4xf32>
    %105 = vector.shape_cast %104 : vector<1x16x16x4xf32> to vector<16x16x4xf32>
    %106 = vector.shape_cast %103 : vector<16x16x4xf32> to vector<1x16x16x4xf32>
    tpu.vector_store %arg9[%c0_50, %c0_51, %c0_52, %c0_53], %106 {strides = array<i32>} : memref<1x16x16x4xf32, #tpu.memory_space<vmem>>, vector<1x16x16x4xf32>,
    return
  }
  func.func @transform_0(%arg0: i32, %arg1: i32) -> (i32, i32, i32, i32) {
    %c0_i32 = arith.constant 0 : i32
    %c0_i32_0 = arith.constant 0 : i32
    %c0_i32_1 = arith.constant 0 : i32
    return %arg0, %arg1, %c0_i32, %c0_i32_0 : i32, i32, i32, i32
  }
  func.func @transform_1(%arg0: i32, %arg1: i32) -> (i32, i32, i32, i32) {
    %c16_i32 = arith.constant 16 : i32
    %0 = arith.muli %arg1, %c16_i32 : i32
    %c1_i32 = arith.constant 1 : i32
    %1 = arith.subi %0, %c1_i32 : i32
    %c0_i32 = arith.constant 0 : i32
    %2 = arith.maxsi %1, %c0_i32 : i32
    %c0_i32_0 = arith.constant 0 : i32
    %c0_i32_1 = arith.constant 0 : i32
    %c0_i32_2 = arith.constant 0 : i32
    return %arg0, %2, %c0_i32_0, %c0_i32_1 : i32, i32, i32, i32
  }
  func.func @transform_2(%arg0: i32, %arg1: i32) -> (i32, i32, i32, i32) {
    %c16_i32 = arith.constant 16 : i32
    %0 = arith.muli %arg1, %c16_i32 : i32
    %c16_i32_0 = arith.constant 16 : i32
    %1 = arith.addi %0, %c16_i32_0 : i32
    %c15_i32 = arith.constant 15 : i32
    %2 = arith.minsi %1, %c15_i32 : i32
    %c0_i32 = arith.constant 0 : i32
    %c0_i32_1 = arith.constant 0 : i32
    %c0_i32_2 = arith.constant 0 : i32
    return %arg0, %2, %c0_i32, %c0_i32_1 : i32, i32, i32, i32
  }
  func.func @transform_3(%arg0: i32, %arg1: i32) -> (i32, i32) {
    %c0_i32 = arith.constant 0 : i32
    %c0_i32_0 = arith.constant 0 : i32
    %c0_i32_1 = arith.constant 0 : i32
    return %c0_i32, %c0_i32_0 : i32, i32
  }
  func.func @transform_4(%arg0: i32, %arg1: i32) -> (i32, i32) {
    %c0_i32 = arith.constant 0 : i32
    %c0_i32_0 = arith.constant 0 : i32
    %c0_i32_1 = arith.constant 0 : i32
    return %c0_i32, %c0_i32_0 : i32, i32
  }
  func.func @transform_5(%arg0: i32, %arg1: i32) -> (i32, i32) {
    %c0_i32 = arith.constant 0 : i32
    %c0_i32_0 = arith.constant 0 : i32
    %c0_i32_1 = arith.constant 0 : i32
    return %c0_i32, %c0_i32_0 : i32, i32
  }
  func.func @transform_6(%arg0: i32, %arg1: i32) -> (i32, i32) {
    %c0_i32 = arith.constant 0 : i32
    %c0_i32_0 = arith.constant 0 : i32
    %c0_i32_1 = arith.constant 0 : i32
    return %c0_i32, %c0_i32_0 : i32, i32
  }
  func.func @transform_7(%arg0: i32, %arg1: i32) -> (i32, i32, i32, i32) {
    %c0_i32 = arith.constant 0 : i32
    %c0_i32_0 = arith.constant 0 : i32
    %c0_i32_1 = arith.constant 0 : i32
    return %arg0, %arg1, %c0_i32, %c0_i32_0 : i32, i32, i32, i32
  }
}

</mosaic_0001>

<bundles_post_ra>
// kernel: tpu_custom_call.1
= control target key start
LH: loop header
LB: loop body
LE: loop exit
PB: predicated region body
PF: predicated region fallthrough
CT: control target
= control target key end

     0   :  { %s8082_s0 = inlined_call_operand.hbm [shape: f32[2,16,16,128], index: 0, kind: input, shape index: {}]   ;;  %s8083_s1 = inlined_call_operand.hbm [shape: f32[2,16,16,128], index: 1, kind: input, shape index: {}]   ;;  %s8084_s2 = inlined_call_operand.hbm [shape: f32[2,16,16,128], index: 2, kind: input, shape index: {}]   ;;  %s8085_s3 = inlined_call_operand.hbm [shape: f32[128,128], index: 3, kind: input, shape index: {}]   ;;  %s8086_s4 = inlined_call_operand.vmem [shape: f32[1,128], index: 4, kind: input, shape index: {}]   ;;  %s8087_s5 = inlined_call_operand.hbm [shape: f32[384,384], index: 5, kind: input, shape index: {}]   ;;  %s8088_s6 = inlined_call_operand.vmem [shape: f32[1,128], index: 6, kind: input, shape index: {}]   ;;  %s8089_s7 = inlined_call_operand.vmem [shape: f32[2,16,16,4], index: 7, kind: output, shape index: {}]  }
   0x1   :  { %8112 = sst [smem:[#allocation132_spill]] %s8083_s1 }
   0x2   :  { %8113 = sst [smem:[#allocation133_spill]] %s8085_s3 }
   0x3   :  { %8114 = sst [smem:[#allocation134_spill]] %s8087_s5 }
   0x4   :  { %8115 = sst [smem:[#allocation135_spill]] %s8089_s7 }
   0x5   :  { %12 = vsyncpa [#allocation4], 0 }
   0x6   :  { %14 = vsyncpa [#allocation4 + $0x1], 0 }
   0x7   :  { %15 = vsyncpa [#allocation6], 0 }
   0x8   :  { %17 = vsyncpa [#allocation6 + $0x1], 0 }
   0x9   :  { %18 = vsyncpa [#allocation9], 0  ;;  %s5336_s24 = smov 0   ;;  %s5338_s25 = smov 0  }
   0xa   :  { %s5340_s26 = smov 0   ;;  %s5342_s27 = smov 0  }
   0xb   :  { %s5344_s28 = smov 0   ;;  %s5346_s29 = smov 0  }
   0xc LB: > { %8116 = sst [smem:[#allocation14_spill]] %s5275_s26  ;;  %s8090_s30 = sadd.s32 4294967295, %s5287_s29   ;;  %s5287_s29 = sphi %s5346_s29, %s24_s29   ;;  %s5283_s28 = sphi %s5344_s28, %s8488_s28   ;;  %s5279_s27 = sphi %s5342_s27, %s8487_s27   ;;  %s5275_s26 = sphi %s5340_s26, %s8486_s26   ;;  %s5271_s25 = sphi %s5338_s25, %s8490_s25   ;;  %s5267_s24 = sphi %s5336_s24, %s8489_s24  }
   0xd   : > { %8117 = sst [smem:[#allocation15_spill]] %s5279_s27  ;;  %p58_p0 = scmp.ne.s32.totalorder %s5271_s25, %s5267_s24 }
   0xe   : > { %8118 = sst [smem:[#allocation16_spill]] %s5283_s28  ;;  %p5368_p1 = scmp.eq.s32.totalorder %s8090_s30, 0 }
   0xf   : > { %p4567_p2 = scmp.ge.s32.totalorder %s5287_s29, 1  ;;  %p253_p3 = scmp.lt.s32.totalorder %s5287_s29, 3 }
  0x10   : > { %p5376_p4 = por %p5368_p1, %p58_p0  ;;  %s8121_s3 = sld [smem:[#allocation133_spill]] }
  0x11   : > { %p5383_p5 = pnand %p4567_p2, %p253_p3  ;;  %s5289_s14 = smov [#allocation8]  }
  0x12   : > { %s266_s15 = sshll.u32 %s5289_s14, 4  ;;  %s8091_s17 = smov 128   ;;  %s267_s15 = int_to_ptr.vmem [resolvable:$true] %s266_s15 }
  0x13   : > { %p4710_p6 = pneg %p5383_p5  ;;  %s8093_s18 = smov 8  }
  0x14   : > { %s36_s19 = sadd.s32 1, %s5283_s28  ;;  %s45_s20 = sadd.s32 1, %s5275_s26 }
  0x15   : > { %p5391_p7 = pnand %p4710_p6, %p5368_p1  ;;  %p38_p8 = scmp.ge.s32.totalorder %s36_s19, 2 }
  0x16   : > { %s264_s12 = sshll.u32 %s8121_s3, 4  ;;  %p52_p9 = scmp.ne.s32.totalorder %s5275_s26, %s5271_s25  ;;  %s265_s12 = int_to_ptr.hbm [resolvable:$true] %s264_s12 }
  0x17   : > { %4713 = dma.hbm_to_vmem [thread:$0]  (!%p5391_p7), %s265_s12, 2048, %s267_s15, [#allocation9], %s8091_s17, %s8091_s17, %s8093_s18  }
  0x18   : > { %p53_p10 = scmp.eq.s32.totalorder %s5287_s29, 0  ;;  %s8492_s19 = smov (%p38_p8, %s36_s19), 0 }
  0x19   : > { %8124 = sst [smem:[#allocation17_spill]] %s8492_s19  ;;  %p4729_p12 = scmp.lt.s32.totalorder %s5287_s29, 2 }
  0x1a   : > { %p54_p11 = por %p53_p10, %p52_p9  ;;  %s40_s21 = ssub.s32 %s5283_s28, %s8492_s19 }
  0x1b   : > { %s5411_s22 = sand.u32 1, %s5275_s26   ;;  %p43_p13 = scmp.eq.s32.totalorder %s40_s21, 0 }
  0x1c   : > { %s5414_s23 = sshll.u32 %s5283_s28, 8  ;;  %p5416_p0 = pnand %p4729_p12, %p54_p11 }
  0x1d   : > { %s325_s10 = sand.u32 1, %s5287_s29   ;;  %s4574_s12 = sshll.u32 %s5411_s22, 4 }
  0x1e   : > { %s5422_s11 = scalar_select %p43_p13, %s5275_s26, %s45_s20  }
  0x1f   : > { %s8127_s1 = sld [smem:[#allocation132_spill]]  ;;  %s329_s21 = scalar_lea.vmem [#allocation5], %s4574_s12 }
  0x20   : > { %8126 = sst [smem:[#allocation18_spill]] %s5422_s11  ;;  %s343_s18 = sshll.u32 %s329_s21, 4  ;;  %s344_s18 = int_to_ptr.vmem [resolvable:$true] %s343_s18 }
  0x21   : > { %s5429_s3 = scalar_lea.sflag [#allocation6], %s325_s10  ;;  %s8128_s19 = smov 8  }
  0x22   : > { %s8129_s28 = smov 128   ;;  %s8130_s5 = sld [smem:[#allocation134_spill]] }
  0x23   : > { %s5292_s21 = smov [#allocation10]   ;;  %s5293_s10 = smov 384  }
  0x24   : > { %s5294_s26 = smov 24   ;;  %s312_s11 = scalar_lea.hbm %s8082_s0, %s5414_s23 }
  0x25   : > { %s340_s30 = scalar_lea.hbm %s8127_s1, %s5414_s23  ;;  %s283_s1 = sshll.u32 %s5292_s21, 4  ;;  %s284_s1 = int_to_ptr.vmem [resolvable:$true] %s283_s1 }
  0x26   : > { %s341_s17 = sshll.u32 %s340_s30, 4  ;;  %s357_s30 = scalar_lea.vmem [#allocation7], %s4574_s12  ;;  %s342_s17 = int_to_ptr.hbm [resolvable:$true] %s341_s17 }
  0x27   : > { %4723 = dma.hbm_to_vmem [thread:$0]  (!%p5416_p0), %s342_s17, 256, %s344_s18, %s5429_s3, %s8129_s28, %s8129_s28, %s8128_s19  }
  0x28   : > { %s281_s14 = sshll.u32 %s8130_s5, 4  ;;  %s371_s15 = sshll.u32 %s357_s30, 4  ;;  %s282_s14 = int_to_ptr.hbm [resolvable:$true] %s281_s14  ;;  %s372_s15 = int_to_ptr.vmem [resolvable:$true] %s371_s15 }
  0x29   : > { %4716 = dma.hbm_to_vmem [thread:$0]  (!%p5391_p7), %s282_s14, 18432, %s284_s1, [#allocation9], %s5293_s10, %s5293_s10, %s5294_s26  }
  0x2a   : > { %s4571_s17 = sshll.u32 %s5411_s22, 8  ;;  %s313_s12 = sshll.u32 %s312_s11, 4  ;;  %s314_s12 = int_to_ptr.hbm [resolvable:$true] %s313_s12 }
  0x2b   : > { %s304_s20 = scalar_lea.vmem [#allocation3], %s4571_s17  ;;  %s4661_s5 = sadd.s32 240, %s5414_s23 }
  0x2c   : > { %s315_s30 = sshll.u32 %s304_s20, 4  ;;  %s301_s27 = scalar_lea.sflag [#allocation4], %s5411_s22  ;;  %s316_s30 = int_to_ptr.vmem [resolvable:$true] %s315_s30 }
  0x2d   : > { %4720 = dma.hbm_to_vmem [thread:$0]  (!%p5416_p0), %s314_s12, 4096, %s316_s30, %s301_s27, %s8129_s28, %s8129_s28, %s8128_s19  }
  0x2e   : > { %s368_s26 = scalar_lea.hbm %s8084_s2, %s4661_s5  ;;  %383 = sbr.rel (%p5383_p5) target bundleno = 1202 (0x4b2), region = 48 }
  0x2f   : > { %s369_s14 = sshll.u32 %s368_s26, 4  ;;  %s370_s14 = int_to_ptr.hbm [resolvable:$true] %s369_s14 }
  0x30   : > { %4726 = dma.hbm_to_vmem [thread:$0]  (!%p5416_p0), %s370_s14, 256, %s372_s15, %s5429_s3, %s8129_s28, %s8129_s28, %s8128_s19  }
  0x33   : > { %s385_s7 = sand.u32 1, %s5271_s25  }
  0x34   : > { %s4581_s22 = sshll.u32 %s385_s7, 8  ;;  %s386_s27 = scalar_lea.sflag [#allocation4], %s385_s7 }
  0x35   : > { %s5466_s23 = scalar_lea.vmem [#allocation3], %s4581_s22 }
  0x36   : > { %5254 = dma.done.wait (%p5376_p4), %s386_s27, 4096  }
  0x37   : > { %5256 = vsyncadd (%p5376_p4), %s386_s27, 4294963200  ;;  %s8131_s5 = sadd.s32 4294967295, %s5287_s29   ;;  %s4582_s3 = sshll.u32 %s385_s7, 4 }
  0x38   : > { %s395_s24 = sand.u32 1, %s8131_s5   ;;  %s5474_s13 = scalar_lea.vmem [#allocation5], %s4582_s3 }
  0x39   : > { %s396_s28 = scalar_lea.sflag [#allocation6], %s395_s24 }
  0x3a   : > { %5258 = dma.done.wait (%p5376_p4), %s396_s28, 512  }
  0x3b   : > { %5260 = vsyncadd (%p5376_p4), %s396_s28, 4294966784  ;;  %s5480_s19 = scalar_lea.vmem [#allocation7], %s4582_s3 }
  0x3c   : > { %5262 = dma.done.wait (%p5368_p1), [#allocation9], 20480  }
  0x3d   : > { %5264 = vsyncadd (%p5368_p1), [#allocation9], 4294946816  ;;  %v5486_v0 = vld [vmem:[#allocation8 + $0x78] sm:$0xff]  ;;  %v5488_v1 = vld [vmem:[#allocation8 + $0x70] sm:$0xff]  ;;  %s8381_s18 = sld [smem:[#allocation15_spill]] }
  0x3e   : > { %538 = vmatpush.msra.mxu0 %v5486_v0  ;;  %4664 = vmatpush.msra.mxu1 %v5486_v0  ;;  %v5492_v2 = vld [vmem:[#allocation8 + $0x68] sm:$0xff]  ;;  %v5497_v3 = vld [vmem:[#allocation8 + $0x60] sm:$0xff]  ;;  %v5502_v4 = vld [vmem:[#allocation8 + $0x58] sm:$0xff]  ;;  %s8393_s30 = sld [smem:[#allocation135_spill]] }
  0x3f   : > { %1398 = vmatpush.msra.mxu2 %v5486_v0  ;;  %v496_v5 = vld [vmem:[#allocation8 + $0x50] sm:$0xff]  ;;  %v495_v6 = vld [vmem:[#allocation8 + $0x48] sm:$0xff]  ;;  %v494_v7 = vld [vmem:[#allocation8 + $0x40] sm:$0xff] }
  0x40   : > { %539 = vmatpush.msra.mxu0 %v5488_v1  ;;  %4665 = vmatpush.msra.mxu1 %v5488_v1  ;;  %v493_v8 = vld [vmem:[#allocation8 + $0x38] sm:$0xff]  ;;  %v492_v9 = vld [vmem:[#allocation8 + $0x30] sm:$0xff]  ;;  %v491_v10 = vld [vmem:[#allocation8 + $0x28] sm:$0xff] }
  0x41   : > { %1399 = vmatpush.msra.mxu2 %v5488_v1  ;;  %v490_v11 = vld [vmem:[#allocation8 + $0x20] sm:$0xff]  ;;  %v489_v12 = vld [vmem:[#allocation8 + $0x18] sm:$0xff]  ;;  %v488_v13 = vld [vmem:[#allocation8 + $0x10] sm:$0xff] }
  0x42   : > { %540 = vmatpush.msra.mxu0 %v5492_v2  ;;  %4666 = vmatpush.msra.mxu1 %v5492_v2  ;;  %v487_v14 = vld [vmem:[#allocation8 + $0x8] sm:$0xff]  ;;  %v486_v15 = vld [vmem:[#allocation8] sm:$0xff]  ;;  %v521_v17 = vld [vmem:[%s5466_s23 + $0x90] sm:$0xff] }
  0x43   : > { %1400 = vmatpush.msra.mxu2 %v5492_v2  ;;  %v503_v16 = vld [vmem:[%s5466_s23] sm:$0xff]  ;;  %v504_v18 = vld [vmem:[%s5466_s23 + $0x8] sm:$0xff]  ;;  %v522_v19 = vld [vmem:[%s5466_s23 + $0x98] sm:$0xff]  ;;  %p476_p1 = scmp.lt.s32.totalorder %s8381_s18, 1 }
  0x44   : > { %541 = vmatpush.msra.mxu0 %v5497_v3  ;;  %4667 = vmatpush.msra.mxu1 %v5497_v3  ;;  %v505_v20 = vld [vmem:[%s5466_s23 + $0x10] sm:$0xff]  ;;  %v523_v21 = vld [vmem:[%s5466_s23 + $0xa0] sm:$0xff]  ;;  %v506_v22 = vld [vmem:[%s5466_s23 + $0x18] sm:$0xff] }
  0x45   : > { %1401 = vmatpush.msra.mxu2 %v5497_v3  ;;  %v524_v23 = vld [vmem:[%s5466_s23 + $0xa8] sm:$0xff]  ;;  %v507_v24 = vld [vmem:[%s5466_s23 + $0x20] sm:$0xff]  ;;  %v525_v25 = vld [vmem:[%s5466_s23 + $0xb0] sm:$0xff]  ;;  %s8494_s18 = smov (!%p476_p1, %s8381_s18), 1 }
  0x46   : > { %542 = vmatpush.msra.mxu0 %v5502_v4  ;;  %4668 = vmatpush.msra.mxu1 %v5502_v4  ;;  %v508_v26 = vld [vmem:[%s5466_s23 + $0x28] sm:$0xff]  ;;  %v526_v27 = vld [vmem:[%s5466_s23 + $0xb8] sm:$0xff]  ;;  %v509_v28 = vld [vmem:[%s5466_s23 + $0x30] sm:$0xff]  ;;  %s4662_s11 = sshll.u32 %s8494_s18, 8 }
  0x47   : > { %1402 = vmatpush.msra.mxu2 %v5502_v4  ;;  %v527_v29 = vld [vmem:[%s5466_s23 + $0xc0] sm:$0xff]  ;;  %v510_v30 = vld [vmem:[%s5466_s23 + $0x38] sm:$0xff]  ;;  %v528_v31 = vld [vmem:[%s5466_s23 + $0xc8] sm:$0xff]  ;;  %s7192_s16 = scalar_lea.vmem %s8393_s30, %s4662_s11 }
  0x48   : > { %543 = vmatpush.msra.mxu0 %v496_v5  ;;  %4669 = vmatpush.msra.mxu1 %v496_v5  ;;  %v511_v32 = vld [vmem:[%s5466_s23 + $0x40] sm:$0xff]  ;;  %v529_v33 = vld [vmem:[%s5466_s23 + $0xd0] sm:$0xff]  ;;  %v512_v34 = vld [vmem:[%s5466_s23 + $0x48] sm:$0xff] }
  0x49   : > { %1403 = vmatpush.msra.mxu2 %v496_v5  ;;  %v530_v35 = vld [vmem:[%s5466_s23 + $0xd8] sm:$0xff]  ;;  %v513_v36 = vld [vmem:[%s5466_s23 + $0x50] sm:$0xff]  ;;  %v531_v37 = vld [vmem:[%s5466_s23 + $0xe0] sm:$0xff] }
  0x4a   : > { %544 = vmatpush.msra.mxu0 %v495_v6  ;;  %4670 = vmatpush.msra.mxu1 %v495_v6  ;;  %v1542_v38 = vld [vmem:[#allocation10 + $0x168] sm:$0xff]  ;;  %v1539_v39 = vld [vmem:[#allocation10 + $0x150] sm:$0xff]  ;;  %v1536_v40 = vld [vmem:[#allocation10 + $0x138] sm:$0xff] }
  0x4b   : > { %1404 = vmatpush.msra.mxu2 %v495_v6  ;;  %v1533_v41 = vld [vmem:[#allocation10 + $0x120] sm:$0xff]  ;;  %v514_v42 = vld [vmem:[%s5466_s23 + $0x58] sm:$0xff]  ;;  %v532_v43 = vld [vmem:[%s5466_s23 + $0xe8] sm:$0xff] }
  0x4c   : > { %545 = vmatpush.msra.mxu0 %v494_v7  ;;  %4671 = vmatpush.msra.mxu1 %v494_v7  ;;  %v1530_v44 = vld [vmem:[#allocation10 + $0x108] sm:$0xff]  ;;  %v1527_v45 = vld [vmem:[#allocation10 + $0xf0] sm:$0xff]  ;;  %v1524_v46 = vld [vmem:[#allocation10 + $0xd8] sm:$0xff] }
  0x4d   : > { %1405 = vmatpush.msra.mxu2 %v494_v7  ;;  %v515_v47 = vld [vmem:[%s5466_s23 + $0x60] sm:$0xff]  ;;  %v533_v48 = vld [vmem:[%s5466_s23 + $0xf0] sm:$0xff]  ;;  %v1592_v49 = vld [vmem:[#allocation10 + $0x2e8] sm:$0xff] }
  0x4e   : > { %546 = vmatpush.msra.mxu0 %v493_v8  ;;  %4672 = vmatpush.msra.mxu1 %v493_v8  ;;  %v1593_v50 = vld [vmem:[#allocation10 + $0x2f0] sm:$0xff]  ;;  %v1521_v51 = vld [vmem:[#allocation10 + $0xc0] sm:$0xff]  ;;  %v1590_v53 = vld [vmem:[#allocation10 + $0x2d8] sm:$0xff] }
  0x4f   : > { %1406 = vmatpush.msra.mxu2 %v493_v8  ;;  %v1589_v52 = vld [vmem:[#allocation10 + $0x2d0] sm:$0xff]  ;;  %v1518_v54 = vld [vmem:[#allocation10 + $0xa8] sm:$0xff]  ;;  %v1586_v55 = vld [vmem:[#allocation10 + $0x2b8] sm:$0xff]  ;;  %4680 = vmatpush.msra.mxu3 %v1592_v49 }
  0x50   : > { %547 = vmatpush.msra.mxu0 %v492_v9  ;;  %4673 = vmatpush.msra.mxu1 %v492_v9  ;;  %v1587_v56 = vld [vmem:[#allocation10 + $0x2c0] sm:$0xff]  ;;  %v1515_v57 = vld [vmem:[#allocation10 + $0x90] sm:$0xff]  ;;  %v1584_v59 = vld [vmem:[#allocation10 + $0x2a8] sm:$0xff] }
  0x51   : > { %1407 = vmatpush.msra.mxu2 %v492_v9  ;;  %v1583_v58 = vld [vmem:[#allocation10 + $0x2a0] sm:$0xff]  ;;  %v1512_v60 = vld [vmem:[#allocation10 + $0x78] sm:$0xff]  ;;  %4681 = vmatpush.msra.mxu3 %v1589_v52  ;;  %v516_v61 = vld [vmem:[%s5466_s23 + $0x68] sm:$0xff] }
  0x52   : > { %548 = vmatpush.msra.mxu0 %v491_v10  ;;  %4674 = vmatpush.msra.mxu1 %v491_v10  ;;  %v534_v62 = vld [vmem:[%s5466_s23 + $0xf8] sm:$0xff]  ;;  %v1580_v63 = vld [vmem:[#allocation10 + $0x288] sm:$0xff] }
  0x53   : > { %1408 = vmatpush.msra.mxu2 %v491_v10  ;;  %4682 = vmatpush.msra.mxu3 %v1586_v55 }
  0x54   : > { %549 = vmatpush.msra.mxu0 %v490_v11  ;;  %4675 = vmatpush.msra.mxu1 %v490_v11 }
  0x55   : > { %1409 = vmatpush.msra.mxu2 %v490_v11  ;;  %4683 = vmatpush.msra.mxu3 %v1583_v58 }
  0x56   : > { %550 = vmatpush.msra.mxu0 %v489_v12  ;;  %4676 = vmatpush.msra.mxu1 %v489_v12 }
  0x57   : > { %1410 = vmatpush.msra.mxu2 %v489_v12  ;;  %4684 = vmatpush.msra.mxu3 %v1580_v63 }
  0x58   : > { %551 = vmatpush.msra.mxu0 %v488_v13  ;;  %4677 = vmatpush.msra.mxu1 %v488_v13 }
  0x59   : > { %1411 = vmatpush.msra.mxu2 %v488_v13 }
  0x5a   : > { %552 = vmatpush.msra.mxu0 %v487_v14  ;;  %4678 = vmatpush.msra.mxu1 %v487_v14 }
  0x5b   : > { %1412 = vmatpush.msra.mxu2 %v487_v14 }
  0x5c   : > { %553 = vmatpush.msra.mxu0 %v486_v15  ;;  %4679 = vmatpush.msra.mxu1 %v486_v15 }
  0x5d   : > { %554 = vmatmul.f32.vlgmr.msra.gmra.mxu0 %v503_v16  ;;  %608 = vmatmul.f32.vlgmr.msra.gmra.mxu1 %v521_v17  ;;  %v1497_v16 = vld [vmem:[#allocation10] sm:$0xff]  ;;  %v1565_v17 = vld [vmem:[#allocation10 + $0x210] sm:$0xff] }
  0x5e   : > { %1325 = vmatpush.msrb.mxu1 %v5486_v0  ;;  %1413 = vmatpush.msra.mxu2 %v486_v15  ;;  %v1581_v0 = vld [vmem:[#allocation10 + $0x290] sm:$0xff] }
  0x5f   : > { %1934 = vmatpush.msrb.mxu0 %v1542_v38  ;;  %v1547_v38 = vld [vmem:[#allocation10 + $0x180] sm:$0xff] }
  0x60   : > { %1326 = vmatpush.msrb.mxu1 %v5488_v1  ;;  %1595 = vmatpush.msrb.mxu2 %v1592_v49  ;;  %v1509_v1 = vld [vmem:[#allocation10 + $0x60] sm:$0xff] }
  0x61   : > { %1935 = vmatpush.msrb.mxu0 %v1539_v39  ;;  %v1548_v39 = vld [vmem:[#allocation10 + $0x188] sm:$0xff] }
  0x62   : > { %1327 = vmatpush.msrb.mxu1 %v5492_v2  ;;  %1596 = vmatpush.msrb.mxu2 %v1589_v52  ;;  %v1577_v2 = vld [vmem:[#allocation10 + $0x270] sm:$0xff] }
  0x63   : > { %1936 = vmatpush.msrb.mxu0 %v1536_v40  ;;  %4685 = vmatpush.msra.mxu3 %v1577_v2 }
  0x64   : > { %1328 = vmatpush.msrb.mxu1 %v5497_v3  ;;  %1597 = vmatpush.msrb.mxu2 %v1586_v55  ;;  %v1578_v3 = vld [vmem:[#allocation10 + $0x278] sm:$0xff] }
  0x65   : > { %557 = vmatmul.f32.gmra.mxu0 %v504_v18  ;;  %611 = vmatmul.f32.gmra.mxu1 %v522_v19  ;;  %v1566_v18 = vld [vmem:[#allocation10 + $0x218] sm:$0xff] }
  0x66   : > { %1329 = vmatpush.msrb.mxu1 %v5502_v4  ;;  %1937 = vmatpush.msrb.mxu0 %v1533_v41  ;;  %v1506_v4 = vld [vmem:[#allocation10 + $0x48] sm:$0xff]  ;;  %v1562_v19 = vld [vmem:[#allocation10 + $0x1f8] sm:$0xff] }
  0x67   : > { %1598 = vmatpush.msrb.mxu2 %v1583_v58  ;;  %v520_v41 = vld [vmem:[%s5466_s23 + $0x88] sm:$0xff] }
  0x68   : > { %1330 = vmatpush.msrb.mxu1 %v496_v5  ;;  %1938 = vmatpush.msrb.mxu0 %v1530_v44  ;;  %v1574_v5 = vld [vmem:[#allocation10 + $0x258] sm:$0xff] }
  0x69   : > { %1599 = vmatpush.msrb.mxu2 %v1580_v63  ;;  %4686 = vmatpush.msra.mxu3 %v1574_v5 }
  0x6a   : > { %1331 = vmatpush.msrb.mxu1 %v495_v6  ;;  %1939 = vmatpush.msrb.mxu0 %v1527_v45  ;;  %v1575_v6 = vld [vmem:[#allocation10 + $0x260] sm:$0xff] }
  0x6b   : > { %1600 = vmatpush.msrb.mxu2 %v1577_v2 }
  0x6c   : > { %1332 = vmatpush.msrb.mxu1 %v494_v7  ;;  %1940 = vmatpush.msrb.mxu0 %v1524_v46  ;;  %v1503_v7 = vld [vmem:[#allocation10 + $0x30] sm:$0xff] }
  0x6d   : > { %560 = vmatmul.f32.gmra.mxu0 %v505_v20  ;;  %614 = vmatmul.f32.gmra.mxu1 %v523_v21  ;;  %v1563_v20 = vld [vmem:[#allocation10 + $0x200] sm:$0xff]  ;;  %v518_v21 = vld [vmem:[%s5466_s23 + $0x78] sm:$0xff] }
  0x6e   : > { %1333 = vmatpush.msrb.mxu1 %v493_v8  ;;  %1941 = vmatpush.msrb.mxu0 %v1521_v51  ;;  %v517_v8 = vld [vmem:[%s5466_s23 + $0x70] sm:$0xff]  ;;  %v8099_v51 = vmov 0.0  }
  0x6f   : > { %1601 = vmatpush.msrb.mxu2 %v1574_v5 }
  0x70   : > { %1334 = vmatpush.msrb.mxu1 %v492_v9  ;;  %1942 = vmatpush.msrb.mxu0 %v1518_v54  ;;  %v1571_v9 = vld [vmem:[#allocation10 + $0x240] sm:$0xff] }
  0x71   : > { %1602 = vmatpush.msrb.mxu2 %v1571_v9  ;;  %4687 = vmatpush.msra.mxu3 %v1571_v9 }
  0x72   : > { %1335 = vmatpush.msrb.mxu1 %v491_v10  ;;  %1943 = vmatpush.msrb.mxu0 %v1515_v57  ;;  %v1572_v10 = vld [vmem:[#allocation10 + $0x248] sm:$0xff] }
  0x74   : > { %1336 = vmatpush.msrb.mxu1 %v490_v11  ;;  %1944 = vmatpush.msrb.mxu0 %v1512_v60  ;;  %v1500_v11 = vld [vmem:[#allocation10 + $0x18] sm:$0xff] }
  0x75   : > { %563 = vmatmul.f32.gmra.mxu0 %v506_v22  ;;  %617 = vmatmul.f32.gmra.mxu1 %v524_v23  ;;  %v1559_v22 = vld [vmem:[#allocation10 + $0x1e0] sm:$0xff]  ;;  %v1560_v23 = vld [vmem:[#allocation10 + $0x1e8] sm:$0xff] }
  0x76   : > { %1337 = vmatpush.msrb.mxu1 %v489_v12  ;;  %1945 = vmatpush.msrb.mxu0 %v1509_v1  ;;  %v1323_v12 = vld [vmem:[%s5474_s13] sm:$0xff] }
  0x78   : > { %1338 = vmatpush.msrb.mxu1 %v488_v13  ;;  %1946 = vmatpush.msrb.mxu0 %v1506_v4  ;;  %v1396_v13 = vld [vmem:[%s5480_s19] sm:$0xff] }
  0x79   : > { %1414 = vmatmul.f32.vlgmr.msra.gmra.mxu2 %v1396_v13 }
  0x7a   : > { %1339 = vmatpush.msrb.mxu1 %v487_v14  ;;  %1947 = vmatpush.msrb.mxu0 %v1503_v7  ;;  %v1568_v14 = vld [vmem:[#allocation10 + $0x228] sm:$0xff] }
  0x7b   : > { %1603 = vmatpush.msrb.mxu2 %v1568_v14  ;;  %4688 = vmatpush.msra.mxu3 %v1568_v14 }
  0x7c   : > { %1340 = vmatpush.msrb.mxu1 %v486_v15  ;;  %1948 = vmatpush.msrb.mxu0 %v1500_v11  ;;  %v1569_v15 = vld [vmem:[#allocation10 + $0x230] sm:$0xff] }
  0x7d   : > { %566 = vmatmul.f32.gmra.mxu0 %v507_v24  ;;  %620 = vmatmul.f32.gmra.mxu1 %v525_v25  ;;  %v1324_v24 = vld [vmem:[%s5474_s13 + $0x8] sm:$0xff] }
  0x7e   : > { %1708 = vmatpush.msra.mxu1 %v1593_v50  ;;  %1949 = vmatpush.msrb.mxu0 %v1497_v16  ;;  %v1397_v25 = vld [vmem:[%s5480_s19 + $0x8] sm:$0xff] }
  0x7f   : > { %1604 = vmatpush.msrb.mxu2 %v1565_v17  ;;  %4689 = vmatpush.msra.mxu3 %v1565_v17 }
  0x80   : > { %1709 = vmatpush.msra.mxu1 %v1590_v53 }
  0x81   : > { %1605 = vmatpush.msrb.mxu2 %v1562_v19  ;;  %4690 = vmatpush.msra.mxu3 %v1562_v19 }
  0x82   : > { %1710 = vmatpush.msra.mxu1 %v1587_v56  ;;  %1417 = vmatmul.f32.gmra.mxu2 %v1397_v25 }
  0x83   : > { %1606 = vmatpush.msrb.mxu2 %v1559_v22  ;;  %4691 = vmatpush.msra.mxu3 %v1559_v22 }
  0x84   : > { %1711 = vmatpush.msra.mxu1 %v1584_v59 }
  0x85   : > { %569 = vmatmul.f32.gmra.mxu0 %v508_v26  ;;  %623 = vmatmul.f32.gmra.mxu1 %v526_v27  ;;  %v1556_v26 = vld [vmem:[#allocation10 + $0x1c8] sm:$0xff]  ;;  %v1557_v27 = vld [vmem:[#allocation10 + $0x1d0] sm:$0xff] }
  0x86   : > { %1712 = vmatpush.msra.mxu1 %v1581_v0  ;;  %1607 = vmatpush.msrb.mxu2 %v1556_v26 }
  0x87   : > { %4692 = vmatpush.msra.mxu3 %v1556_v26 }
  0x88   : > { %1713 = vmatpush.msra.mxu1 %v1578_v3 }
  0x8a   : > { %1714 = vmatpush.msra.mxu1 %v1575_v6 }
  0x8c   : > { %1715 = vmatpush.msra.mxu1 %v1572_v10 }
  0x8d   : > { %572 = vmatmul.f32.gmra.mxu0 %v509_v28  ;;  %626 = vmatmul.f32.gmra.mxu1 %v527_v29  ;;  %v1553_v28 = vld [vmem:[#allocation10 + $0x1b0] sm:$0xff]  ;;  %v1554_v29 = vld [vmem:[#allocation10 + $0x1b8] sm:$0xff] }
  0x8e   : > { %1716 = vmatpush.msra.mxu1 %v1569_v15  ;;  %1608 = vmatpush.msrb.mxu2 %v1553_v28 }
  0x8f   : > { %4693 = vmatpush.msra.mxu3 %v1553_v28 }
  0x90   : > { %1717 = vmatpush.msra.mxu1 %v1566_v18 }
  0x92   : > { %1718 = vmatpush.msra.mxu1 %v1563_v20 }
  0x94   : > { %1719 = vmatpush.msra.mxu1 %v1560_v23 }
  0x95   : > { %575 = vmatmul.f32.gmra.mxu0 %v510_v30  ;;  %629 = vmatmul.f32.gmra.mxu1 %v528_v31  ;;  %v5553_v30 = vld [vmem:[%s8086_s4] ss:$0 sm:$0xff]  ;;  %v1550_v31 = vld [vmem:[#allocation10 + $0x198] sm:$0xff] }
  0x96   : > { %1720 = vmatpush.msra.mxu1 %v1557_v27  ;;  %1609 = vmatpush.msrb.mxu2 %v1550_v31 }
  0x97   : > { %4694 = vmatpush.msra.mxu3 %v1550_v31 }
  0x98   : > { %1721 = vmatpush.msra.mxu1 %v1554_v29  ;;  %1610 = vmatpush.msrb.mxu2 %v1547_v38 }
  0x99   : > { %4695 = vmatpush.msra.mxu3 %v1547_v38 }
  0x9d   : > { %578 = vmatmul.f32.gmra.mxu0 %v511_v32  ;;  %632 = vmatmul.f32.gmra.mxu1 %v529_v33  ;;  %v1551_v32 = vld [vmem:[#allocation10 + $0x1a0] sm:$0xff] }
  0x9e   : > { %1722 = vmatpush.msra.mxu1 %v1551_v32 }
  0xa0   : > { %1723 = vmatpush.msra.mxu1 %v1548_v39 }
  0xa5   : > { %581 = vmatmul.f32.gmra.mxu0 %v512_v34  ;;  %635 = vmatmul.f32.gmra.mxu1 %v530_v35  ;;  %v519_v34 = vld [vmem:[%s5466_s23 + $0x80] sm:$0xff] }
  0xad   : > { %584 = vmatmul.f32.gmra.mxu0 %v513_v36  ;;  %638 = vmatmul.f32.gmra.mxu1 %v531_v37 }
  0xb5   : > { %587 = vmatmul.f32.gmra.mxu0 %v514_v42  ;;  %641 = vmatmul.f32.gmra.mxu1 %v532_v43 }
  0xbd   : > { %590 = vmatmul.f32.gmra.mxu0 %v515_v47  ;;  %644 = vmatmul.f32.gmra.mxu1 %v533_v48 }
  0xc5   : > { %593 = vmatmul.f32.gmra.mxu0 %v516_v61  ;;  %647 = vmatmul.f32.gmra.mxu1 %v534_v62 }
  0xcd   : > { %596 = vmatmul.f32.gmra.mxu0 %v517_v8  ;;  %1341 = vmatmul.f32.vlgmr.msrb.gmra.mxu1 %v1323_v12 }
  0xd5   : > { %599 = vmatmul.f32.gmra.mxu0 %v518_v21  ;;  %1344 = vmatmul.f32.gmra.mxu1 %v1324_v24 }
  0xda   : > { %v555_v33 = vpop.f32.mrf.mxu0  ;;  %v5556_v35 = vpop.f32.mrf.mxu1 }
  0xdb   : > { %v556_v36 = vadd.f32 %v5553_v30, %v555_v33 }
  0xdd   : > { %v4588_v37 = vmul.f32 -1.442695, %v556_v36  ;;  %602 = vmatmul.f32.gmra.mxu0 %v519_v34 }
  0xdf   : > { %4789 = vpow2.f32 %v4588_v37 }
  0xe2   : > { %v558_v40 = vpop.f32.mrf.mxu0  ;;  %v5563_v43 = vpop.f32.mrf.mxu1 }
  0xe3   : > { %v5561_v42 = vadd.f32 %v5553_v30, %v558_v40 }
  0xe5   : > { %v4790_v44 = vpop.eup %4789  ;;  %v4589_v45 = vmul.f32 -1.442695, %v5561_v42  ;;  %605 = vmatmul.f32.gmra.mxu0 %v520_v41 }
  0xe6   : > { %v747_v46 = vadd.f32 1.0, %v4790_v44 }
  0xe7   : > { %4791 = vpow2.f32 %v4589_v45 }
  0xe8   : > { %4793 = vrcp.f32 %v747_v46  ;;  %v790_v57 = vand.u32 2147483648, %v747_v46  ;;  %v788_v60 = vand.u32 2147483647, %v747_v46  ;;  %vm784_vm1 = vweird.f32 %v747_v46 }
  0xea   : > { %v561_v47 = vpop.f32.mrf.mxu0  ;;  %v5571_v54 = vpop.f32.mrf.mxu1  ;;  %v791_v2 = vor.u32 1.1754944e-38, %v790_v57  ;;  %vm789_vm3 = vcmp.eq.f32.partialorder %v788_v60, 8.507059e+37 }
  0xeb   : > { %v5567_v48 = vadd.f32 %v5553_v30, %v561_v47 }
  0xed   : > { %v4792_v49 = vpop.eup %4791  ;;  %v4590_v50 = vmul.f32 -1.442695, %v5567_v48  ;;  %1950 = vmatmul.f32.vlgmr.msrb.gmra.mxu0 %v8099_v51 }
  0xee   : > { %v4794_v52 = vpop.eup %4793  ;;  %v748_v53 = vadd.f32 1.0, %v4792_v49 }
  0xef   : > { %v780_v55 = vmul.f32 %v4794_v52, %v747_v46  ;;  %4795 = vpow2.f32 %v4590_v50  ;;  %vm785_vm0 = vweird.f32 %v4794_v52 }
  0xf0   : > { %4797 = vrcp.f32 %v748_v53  ;;  %vm786_vm2 = vmor %vm784_vm1, %vm785_vm0  ;;  %v805_v10 = vand.u32 2147483648, %v748_v53  ;;  %v803_v13 = vand.u32 2147483647, %v748_v53  ;;  %vm799_vm5 = vweird.f32 %v748_v53 }
  0xf1   : > { %v781_v56 = vsub.f32 1.0, %v780_v55 }
  0xf2   : > { %v564_v58 = vpop.f32.mrf.mxu0  ;;  %v5578_v7 = vpop.f32.mrf.mxu1  ;;  %v806_v18 = vor.u32 1.1754944e-38, %v805_v10  ;;  %vm804_vm7 = vcmp.eq.f32.partialorder %v803_v13, 8.507059e+37 }
  0xf3   : > { %v782_v59 = vmul.f32 %v4794_v52, %v781_v56  ;;  %v5574_v61 = vadd.f32 %v5553_v30, %v564_v58 }
  0xf5   : > { %v4796_v62 = vpop.eup %4795  ;;  %v783_v63 = vadd.f32 %v4794_v52, %v782_v59  ;;  %v4591_v0 = vmul.f32 -1.442695, %v5574_v61  ;;  %1953 = vmatmul.f32.gmra.mxu0 %v8099_v51 }
  0xf6   : > { %v4798_v1 = vpop.eup %4797  ;;  %v749_v3 = vadd.f32 1.0, %v4796_v62 }
  0xf7   : > { %v787_v4 = vsel %vm786_vm2, %v4794_v52, %v783_v63  ;;  %v795_v5 = vmul.f32 %v4798_v1, %v748_v53  ;;  %4799 = vpow2.f32 %v4591_v0  ;;  %vm800_vm4 = vweird.f32 %v4798_v1 }
  0xf8   : > { %v792_v6 = vsel %vm789_vm3, %v791_v2, %v787_v4  ;;  %4801 = vrcp.f32 %v749_v3  ;;  %vm801_vm6 = vmor %vm799_vm5, %vm800_vm4  ;;  %v820_v26 = vand.u32 2147483648, %v749_v3  ;;  %v818_v31 = vand.u32 2147483647, %v749_v3 }
  0xf9   : > { %v5580_v8 = vmul.f32 %v792_v6, %v556_v36  ;;  %v796_v9 = vsub.f32 1.0, %v795_v5  ;;  %vm814_vm9 = vweird.f32 %v749_v3 }
  0xfa   : > { %v567_v11 = vpop.f32.mrf.mxu0  ;;  %v5592_v28 = vpop.f32.mrf.mxu1  ;;  %v821_v37 = vor.u32 1.1754944e-38, %v820_v26  ;;  %vm819_vm11 = vcmp.eq.f32.partialorder %v818_v31, 8.507059e+37 }
  0xfb   : > { %v797_v12 = vmul.f32 %v4798_v1, %v796_v9  ;;  %v5583_v14 = vadd.f32 %v5553_v30, %v567_v11  ;;  %1611 = vmatmul.f32.vlgmr.msrb.gmra.mxu2 %v5580_v8  ;;  %1724 = vmatmul.f32.vlgmr.msra.gmra.mxu1 %v5580_v8 }
  0xfd   : > { %v4800_v15 = vpop.eup %4799  ;;  %v798_v16 = vadd.f32 %v4798_v1, %v797_v12  ;;  %1956 = vmatmul.f32.gmra.mxu0 %v5580_v8  ;;  %v4592_v20 = vmul.f32 -1.442695, %v5583_v14 }
  0xfe   : > { %v4802_v17 = vpop.eup %4801  ;;  %v750_v19 = vadd.f32 1.0, %v4800_v15 }
  0xff   : > { %v802_v21 = vsel %vm801_vm6, %v4798_v1, %v798_v16  ;;  %v810_v22 = vmul.f32 %v4802_v17, %v749_v3  ;;  %vm815_vm8 = vweird.f32 %v4802_v17 }
 0x100   : > { %v807_v23 = vsel %vm804_vm7, %v806_v18, %v802_v21  ;;  %4803 = vrcp.f32 %v750_v19  ;;  %vm816_vm10 = vmor %vm814_vm9, %vm815_vm8  ;;  %v835_v46 = vand.u32 2147483648, %v750_v19  ;;  %v833_v50 = vand.u32 2147483647, %v750_v19 }
 0x101   : > { %v5590_v24 = vmul.f32 %v807_v23, %v5561_v42  ;;  %v811_v25 = vsub.f32 1.0, %v810_v22  ;;  %4805 = vpow2.f32 %v4592_v20  ;;  %vm829_vm13 = vweird.f32 %v750_v19 }
 0x102   : > { %v570_v27 = vpop.f32.mrf.mxu0  ;;  %v5606_v52 = vpop.f32.mrf.mxu1  ;;  %v836_v55 = vor.u32 1.1754944e-38, %v835_v46  ;;  %vm834_vm15 = vcmp.eq.f32.partialorder %v833_v50, 8.507059e+37 }
 0x103   : > { %v812_v29 = vmul.f32 %v4802_v17, %v811_v25  ;;  %v5595_v32 = vadd.f32 %v5553_v30, %v570_v27  ;;  %1614 = vmatmul.f32.gmra.mxu2 %v5590_v24  ;;  %1727 = vmatmul.f32.gmra.mxu1 %v5590_v24 }
 0x105   : > { %v813_v33 = vadd.f32 %v4802_v17, %v812_v29  ;;  %v4593_v34 = vmul.f32 -1.442695, %v5595_v32  ;;  %1959 = vmatmul.f32.gmra.mxu0 %v5590_v24 }
 0x106   : > { %v4804_v36 = vpop.eup %4803 }
 0x107   : > { %v817_v38 = vsel %vm816_vm10, %v4802_v17, %v813_v33  ;;  %v825_v39 = vmul.f32 %v4804_v36, %v750_v19  ;;  %v4806_v40 = vpop.eup %4805  ;;  %4807 = vpow2.f32 %v4593_v34  ;;  %vm830_vm12 = vweird.f32 %v4804_v36 }
 0x108   : > { %v822_v41 = vsel %vm819_vm11, %v821_v37, %v817_v38  ;;  %v751_v45 = vadd.f32 1.0, %v4806_v40  ;;  %vm831_vm14 = vmor %vm829_vm13, %vm830_vm12 }
 0x109   : > { %v5602_v42 = vmul.f32 %v822_v41, %v5567_v48  ;;  %v826_v44 = vsub.f32 1.0, %v825_v39 }
 0x10a   : > { %v573_v47 = vpop.f32.mrf.mxu0  ;;  %4809 = vrcp.f32 %v751_v45  ;;  %v850_v3 = vand.u32 2147483648, %v751_v45  ;;  %v848_v5 = vand.u32 2147483647, %v751_v45  ;;  %v5619_v6 = vpop.f32.mrf.mxu1  ;;  %vm844_vm1 = vweird.f32 %v751_v45 }
 0x10b   : > { %v827_v49 = vmul.f32 %v4804_v36, %v826_v44  ;;  %1617 = vmatmul.f32.gmra.mxu2 %v5602_v42  ;;  %1730 = vmatmul.f32.gmra.mxu1 %v5602_v42  ;;  %v5610_v56 = vadd.f32 %v5553_v30, %v573_v47 }
 0x10c   : > { %v851_v11 = vor.u32 1.1754944e-38, %v850_v3  ;;  %vm849_vm3 = vcmp.eq.f32.partialorder %v848_v5, 8.507059e+37 }
 0x10d   : > { %v828_v53 = vadd.f32 %v4804_v36, %v827_v49  ;;  %1962 = vmatmul.f32.gmra.mxu0 %v5602_v42  ;;  %v4808_v48 = vpop.eup %4807  ;;  %v4594_v0 = vmul.f32 -1.442695, %v5610_v56 }
 0x10e   : > { %v752_v59 = vadd.f32 1.0, %v4808_v48 }
 0x10f   : > { %v832_v57 = vsel %vm831_vm14, %v4804_v36, %v828_v53 }
 0x110   : > { %v837_v58 = vsel %vm834_vm15, %v836_v55, %v832_v57  ;;  %v4810_v60 = vpop.eup %4809  ;;  %4811 = vrcp.f32 %v752_v59  ;;  %v865_v21 = vand.u32 2147483648, %v752_v59  ;;  %v863_v25 = vand.u32 2147483647, %v752_v59 }
 0x111   : > { %v5613_v62 = vmul.f32 %v837_v58, %v5574_v61  ;;  %v840_v63 = vmul.f32 %v4810_v60, %v751_v45  ;;  %vm845_vm0 = vweird.f32 %v4810_v60  ;;  %4813 = vpow2.f32 %v4594_v0 }
 0x112   : > { %v576_v1 = vpop.f32.mrf.mxu0  ;;  %vm846_vm2 = vmor %vm844_vm1, %vm845_vm0  ;;  %v5634_v29 = vpop.f32.mrf.mxu1  ;;  %vm859_vm5 = vweird.f32 %v752_v59  ;;  %vm864_vm7 = vcmp.eq.f32.partialorder %v863_v25, 8.507059e+37 }
 0x113   : > { %1620 = vmatmul.f32.gmra.mxu2 %v5613_v62  ;;  %1733 = vmatmul.f32.gmra.mxu1 %v5613_v62  ;;  %v841_v2 = vsub.f32 1.0, %v840_v63  ;;  %v5622_v61 = vadd.f32 %v5553_v30, %v576_v1 }
 0x115   : > { %1965 = vmatmul.f32.gmra.mxu0 %v5613_v62  ;;  %v842_v4 = vmul.f32 %v4810_v60, %v841_v2  ;;  %v4595_v15 = vmul.f32 -1.442695, %v5622_v61 }
 0x116   : > { %v4812_v9 = vpop.eup %4811 }
 0x117   : > { %v843_v10 = vadd.f32 %v4810_v60, %v842_v4  ;;  %v855_v12 = vmul.f32 %v4812_v9, %v752_v59  ;;  %v4814_v19 = vpop.eup %4813  ;;  %4815 = vpow2.f32 %v4595_v15  ;;  %vm860_vm4 = vweird.f32 %v4812_v9 }
 0x118   : > { %v753_v26 = vadd.f32 1.0, %v4814_v19  ;;  %vm861_vm6 = vmor %vm859_vm5, %vm860_vm4 }
 0x119   : > { %v847_v13 = vsel %vm846_vm2, %v4810_v60, %v843_v10  ;;  %v856_v18 = vsub.f32 1.0, %v855_v12 }
 0x11a   : > { %v579_v16 = vpop.f32.mrf.mxu0  ;;  %v852_v17 = vsel %vm849_vm3, %v851_v11, %v847_v13  ;;  %4817 = vrcp.f32 %v753_v26  ;;  %v5642_v44 = vpop.f32.mrf.mxu1  ;;  %v880_v47 = vand.u32 2147483648, %v753_v26  ;;  %vm874_vm9 = vweird.f32 %v753_v26 }
 0x11b   : > { %v5626_v20 = vmul.f32 %v852_v17, %v5583_v14  ;;  %v5629_v22 = vadd.f32 %v5553_v30, %v579_v16  ;;  %v857_v23 = vmul.f32 %v4812_v9, %v856_v18  ;;  %v866_v14 = vor.u32 1.1754944e-38, %v865_v21 }
 0x11c   : > { %v881_v58 = vor.u32 1.1754944e-38, %v880_v47 }
 0x11d   : > { %v4596_v27 = vmul.f32 -1.442695, %v5629_v22  ;;  %1623 = vmatmul.f32.gmra.mxu2 %v5626_v20  ;;  %1736 = vmatmul.f32.gmra.mxu1 %v5626_v20  ;;  %v858_v31 = vadd.f32 %v4812_v9, %v857_v23  ;;  %v4816_v34 = vpop.eup %4815 }
 0x11e   : > { %1968 = vmatmul.f32.gmra.mxu0 %v5626_v20  ;;  %v754_v39 = vadd.f32 1.0, %v4816_v34 }
 0x11f   : > { %v862_v33 = vsel %vm861_vm6, %v4812_v9, %v858_v31  ;;  %4819 = vpow2.f32 %v4596_v27 }
 0x120   : > { %v867_v36 = vsel %vm864_vm7, %v866_v14, %v862_v33  ;;  %v4818_v40 = vpop.eup %4817  ;;  %4821 = vrcp.f32 %v754_v39  ;;  %v893_v2 = vand.u32 2147483647, %v754_v39  ;;  %v895_v9 = vand.u32 2147483648, %v754_v39 }
 0x121   : > { %v5638_v38 = vmul.f32 %v867_v36, %v5595_v32  ;;  %v870_v41 = vmul.f32 %v4818_v40, %v753_v26  ;;  %vm875_vm8 = vweird.f32 %v4818_v40  ;;  %v878_v32 = vand.u32 2147483647, %v753_v26 }
 0x122   : > { %v582_v37 = vpop.f32.mrf.mxu0  ;;  %vm876_vm10 = vmor %vm874_vm9, %vm875_vm8  ;;  %v5652_v4 = vpop.f32.mrf.mxu1  ;;  %vm889_vm13 = vweird.f32 %v754_v39  ;;  %vm894_vm14 = vcmp.eq.f32.partialorder %v893_v2, 8.507059e+37  ;;  %v896_v16 = vor.u32 1.1754944e-38, %v895_v9 }
 0x123   : > { %v871_v46 = vsub.f32 1.0, %v870_v41  ;;  %v5646_v55 = vadd.f32 %v5553_v30, %v582_v37  ;;  %vm879_vm11 = vcmp.eq.f32.partialorder %v878_v32, 8.507059e+37 }
 0x125   : > { %1626 = vmatmul.f32.gmra.mxu2 %v5638_v38  ;;  %1739 = vmatmul.f32.gmra.mxu1 %v5638_v38  ;;  %v4820_v45 = vpop.eup %4819  ;;  %v872_v50 = vmul.f32 %v4818_v40, %v871_v46  ;;  %v4597_v3 = vmul.f32 -1.442695, %v5646_v55 }
 0x126   : > { %1971 = vmatmul.f32.gmra.mxu0 %v5638_v38  ;;  %v755_v49 = vadd.f32 1.0, %v4820_v45  ;;  %v4822_v57 = vpop.eup %4821  ;;  %v1594_v45 = vld [vmem:[#allocation10 + $0x2f8] sm:$0xff] }
 0x127   : > { %v873_v48 = vadd.f32 %v4818_v40, %v872_v50  ;;  %v885_v60 = vmul.f32 %v4822_v57, %v754_v39  ;;  %vm890_vm12 = vweird.f32 %v4822_v57  ;;  %1821 = vmatpush.msra.mxu2 %v1594_v45 }
 0x128   : > { %4823 = vrcp.f32 %v755_v49  ;;  %vm891_vm15 = vmor %vm889_vm13, %vm890_vm12  ;;  %v908_v17 = vand.u32 2147483647, %v755_v49  ;;  %v910_v18 = vand.u32 2147483648, %v755_v49  ;;  %vm904_vm1 = vweird.f32 %v755_v49 }
 0x129   : > { %v877_v59 = vsel %vm876_vm10, %v4818_v40, %v873_v48  ;;  %v886_v1 = vsub.f32 1.0, %v885_v60  ;;  %4825 = vpow2.f32 %v4597_v3 }
 0x12a   : > { %v585_v53 = vpop.f32.mrf.mxu0  ;;  %v882_v63 = vsel %vm879_vm11, %v881_v58, %v877_v59  ;;  %v911_v14 = vor.u32 1.1754944e-38, %v910_v18  ;;  %vm909_vm3 = vcmp.eq.f32.partialorder %v908_v17, 8.507059e+37  ;;  %v5670_v39 = vpop.f32.mrf.mxu1  ;;  %v1585_v59 = vld [vmem:[#allocation10 + $0x2b0] sm:$0xff] }
 0x12b   : > { %v5649_v0 = vmul.f32 %v882_v63, %v5610_v56  ;;  %v5655_v10 = vadd.f32 %v5553_v30, %v585_v53  ;;  %v887_v11 = vmul.f32 %v4822_v57, %v886_v1  ;;  %v1588_v53 = vld [vmem:[#allocation10 + $0x2c8] sm:$0xff]  ;;  %v1582_v1 = vld [vmem:[#allocation10 + $0x298] sm:$0xff] }
 0x12d   : > { %1629 = vmatmul.f32.gmra.mxu2 %v5649_v0  ;;  %1742 = vmatmul.f32.gmra.mxu1 %v5649_v0  ;;  %v888_v13 = vadd.f32 %v4822_v57, %v887_v11  ;;  %v4598_v19 = vmul.f32 -1.442695, %v5655_v10 }
 0x12e   : > { %v4824_v5 = vpop.eup %4823  ;;  %1974 = vmatmul.f32.gmra.mxu0 %v5649_v0 }
 0x12f   : > { %v900_v12 = vmul.f32 %v4824_v5, %v755_v49  ;;  %v892_v21 = vsel %vm891_vm15, %v4822_v57, %v888_v13  ;;  %vm905_vm0 = vweird.f32 %v4824_v5  ;;  %4827 = vpow2.f32 %v4598_v19  ;;  %v4826_v33 = vpop.eup %4825  ;;  %v1591_v49 = vld [vmem:[#allocation10 + $0x2e0] sm:$0xff]  ;;  %v1576_v13 = vld [vmem:[#allocation10 + $0x268] sm:$0xff] }
 0x130   : > { %v897_v26 = vsel %vm894_vm14, %v896_v16, %v892_v21  ;;  %vm906_vm2 = vmor %vm904_vm1, %vm905_vm0  ;;  %1822 = vmatpush.msra.mxu2 %v1591_v49  ;;  %v1567_v49 = vld [vmem:[#allocation10 + $0x220] sm:$0xff] }
 0x131   : > { %v901_v15 = vsub.f32 1.0, %v900_v12  ;;  %v5665_v27 = vmul.f32 %v897_v26, %v5622_v61  ;;  %v756_v61 = vadd.f32 1.0, %v4826_v33 }
 0x132   : > { %v588_v56 = vpop.f32.mrf.mxu0  ;;  %v5685_v58 = vpop.f32.mrf.mxu1  ;;  %1823 = vmatpush.msra.mxu2 %v1588_v53 }
 0x133   : > { %v902_v23 = vmul.f32 %v4824_v5, %v901_v15  ;;  %v5662_v25 = vadd.f32 %v5553_v30, %v588_v56  ;;  %v925_v3 = vand.u32 2147483648, %v756_v61  ;;  %v923_v12 = vand.u32 2147483647, %v756_v61 }
 0x134   : > { %1824 = vmatpush.msra.mxu2 %v1585_v59  ;;  %vm919_vm5 = vweird.f32 %v756_v61 }
 0x135   : > { %v903_v31 = vadd.f32 %v4824_v5, %v902_v23  ;;  %v4599_v36 = vmul.f32 -1.442695, %v5662_v25  ;;  %1632 = vmatmul.f32.gmra.mxu2 %v5665_v27  ;;  %1745 = vmatmul.f32.gmra.mxu1 %v5665_v27  ;;  %v4828_v47 = vpop.eup %4827  ;;  %v926_v19 = vor.u32 1.1754944e-38, %v925_v3  ;;  %v1573_v23 = vld [vmem:[#allocation10 + $0x250] sm:$0xff]  ;;  %vm924_vm7 = vcmp.eq.f32.partialorder %v923_v12, 8.507059e+37 }
 0x136   : > { %1977 = vmatmul.f32.gmra.mxu0 %v5665_v27  ;;  %v5679_v50 = vadd.f32 1.0, %v4828_v47  ;;  %1825 = vmatpush.msra.mxu2 %v1582_v1 }
 0x137   : > { %v907_v34 = vsel %vm906_vm2, %v4824_v5, %v903_v31  ;;  %4829 = vpow2.f32 %v4599_v36  ;;  %v1579_v5 = vld [vmem:[#allocation10 + $0x280] sm:$0xff] }
 0x138   : > { %v912_v40 = vsel %vm909_vm3, %v911_v14, %v907_v34  ;;  %4831 = vrcp.f32 %v756_v61  ;;  %1826 = vmatpush.msra.mxu2 %v1579_v5  ;;  %v938_v31 = vand.u32 2147483647, %v5679_v50  ;;  %v940_v14 = vand.u32 2147483648, %v5679_v50 }
 0x139   : > { %v5677_v46 = vmul.f32 %v912_v40, %v5629_v22  ;;  %4833 = vrcp.f32 %v5679_v50  ;;  %vm934_vm9 = vweird.f32 %v5679_v50 }
 0x13a   : > { %v591_v37 = vpop.f32.mrf.mxu0  ;;  %v5692_v18 = vpop.f32.mrf.mxu1  ;;  %1827 = vmatpush.msra.mxu2 %v1576_v13  ;;  %vm939_vm11 = vcmp.eq.f32.partialorder %v938_v31, 8.507059e+37  ;;  %v1558_v31 = vld [vmem:[#allocation10 + $0x1d8] sm:$0xff] }
 0x13b   : > { %v5674_v41 = vadd.f32 %v5553_v30, %v591_v37  ;;  %v1570_v37 = vld [vmem:[#allocation10 + $0x238] sm:$0xff] }
 0x13c   : > { %1828 = vmatpush.msra.mxu2 %v1573_v23 }
 0x13d   : > { %v4600_v32 = vmul.f32 -1.442695, %v5674_v41  ;;  %v4830_v48 = vpop.eup %4829  ;;  %1635 = vmatmul.f32.gmra.mxu2 %v5677_v46  ;;  %1748 = vmatmul.f32.gmra.mxu1 %v5677_v46 }
 0x13e   : > { %v4832_v22 = vpop.eup %4831  ;;  %1980 = vmatmul.f32.gmra.mxu0 %v5677_v46  ;;  %v5688_v63 = vadd.f32 1.0, %v4830_v48  ;;  %1829 = vmatpush.msra.mxu2 %v1570_v37 }
 0x13f   : > { %v915_v60 = vmul.f32 %v4832_v22, %v756_v61  ;;  %4835 = vpow2.f32 %v4600_v32  ;;  %v4834_v9 = vpop.eup %4833  ;;  %vm920_vm4 = vweird.f32 %v4832_v22  ;;  %v941_v32 = vor.u32 1.1754944e-38, %v940_v14 }
 0x140   : > { %4837 = vrcp.f32 %v5688_v63  ;;  %v930_v56 = vmul.f32 %v4834_v9, %v5679_v50  ;;  %vm921_vm6 = vmor %vm919_vm5, %vm920_vm4  ;;  %vm935_vm8 = vweird.f32 %v4834_v9  ;;  %1830 = vmatpush.msra.mxu2 %v1567_v49  ;;  %v1564_v50 = vld [vmem:[#allocation10 + $0x208] sm:$0xff]  ;;  %v955_v3 = vand.u32 2147483648, %v5688_v63 }
 0x141   : > { %v916_v2 = vsub.f32 1.0, %v915_v60  ;;  %vm936_vm10 = vmor %vm934_vm9, %vm935_vm8  ;;  %vm949_vm13 = vweird.f32 %v5688_v63 }
 0x142   : > { %v594_v57 = vpop.f32.mrf.mxu0  ;;  %v931_v21 = vsub.f32 1.0, %v930_v56  ;;  %v5710_v1 = vpop.f32.mrf.mxu1  ;;  %1831 = vmatpush.msra.mxu2 %v1564_v50 }
 0x143   : > { %v917_v11 = vmul.f32 %v4832_v22, %v916_v2 }
 0x144   : > { %v932_v34 = vmul.f32 %v4834_v9, %v931_v21 }
 0x145   : > { %v4836_v15 = vpop.eup %4835  ;;  %v918_v16 = vadd.f32 %v4832_v22, %v917_v11 }
 0x146   : > { %v5696_v36 = vadd.f32 1.0, %v4836_v15  ;;  %v4838_v40 = vpop.eup %4837  ;;  %v933_v45 = vadd.f32 %v4834_v9, %v932_v34  ;;  %v956_v15 = vor.u32 1.1754944e-38, %v955_v3 }
 0x147   : > { %v922_v26 = vsel %vm921_vm6, %v4832_v22, %v918_v16  ;;  %v945_v47 = vmul.f32 %v4838_v40, %v5688_v63  ;;  %v1415_v22 = vpop.f32.mrf.mxu2  ;;  %vm950_vm12 = vweird.f32 %v4838_v40 }
 0x148   : > { %v927_v33 = vsel %vm924_vm7, %v926_v19, %v922_v26  ;;  %4839 = vrcp.f32 %v5696_v36  ;;  %v937_v53 = vsel %vm936_vm10, %v4834_v9, %v933_v45  ;;  %vm951_vm14 = vmor %vm949_vm13, %vm950_vm12  ;;  %v970_v34 = vand.u32 2147483648, %v5696_v36  ;;  %v1555_v45 = vld [vmem:[#allocation10 + $0x1c0] sm:$0xff] }
 0x149   : > { %v5699_v61 = vmul.f32 %v927_v33, %v5646_v55  ;;  %v946_v48 = vsub.f32 1.0, %v945_v47  ;;  %v5707_v55 = vadd.f32 %v5553_v30, %v594_v57  ;;  %v942_v59 = vsel %vm939_vm11, %v941_v32, %v937_v53  ;;  %v1552_v32 = vld [vmem:[#allocation10 + $0x1a8] sm:$0xff] }
 0x14a   : > { %v597_v17 = vpop.f32.mrf.mxu0  ;;  %v5714_v5 = vmul.f32 %v942_v59, %v5655_v10  ;;  %v953_v57 = vand.u32 2147483647, %v5688_v63  ;;  %v1561_v10 = vld [vmem:[#allocation10 + $0x1f0] sm:$0xff]  ;;  %v1342_v14 = vpop.f32.mrf.mxu1  ;;  %vm964_vm1 = vweird.f32 %v5696_v36  ;;  %v971_v50 = vor.u32 1.1754944e-38, %v970_v34 }
 0x14b   : > { %1638 = vmatmul.f32.gmra.mxu2 %v5699_v61  ;;  %1751 = vmatmul.f32.gmra.mxu1 %v5699_v61  ;;  %v947_v2 = vmul.f32 %v4838_v40, %v946_v48  ;;  %v4601_v11 = vmul.f32 -1.442695, %v5707_v55  ;;  %v5720_v56 = vadd.f32 %v5553_v30, %v597_v17 }
 0x14c   : > { %1983 = vmatmul.f32.gmra.mxu0 %v5699_v61  ;;  %vm954_vm15 = vcmp.eq.f32.partialorder %v953_v57, 8.507059e+37  ;;  %1832 = vmatpush.msra.mxu2 %v1561_v10  ;;  %v5754_v10 = vadd.f32 %v5553_v30, %v5556_v35 }
 0x14d   : > { %v948_v9 = vadd.f32 %v4838_v40, %v947_v2  ;;  %4841 = vpow2.f32 %v4601_v11  ;;  %v4602_v17 = vmul.f32 -1.442695, %v5720_v56 }
 0x14e   : > { %v4840_v12 = vpop.eup %4839  ;;  %1833 = vmatpush.msra.mxu2 %v1558_v31  ;;  %v4606_v14 = vmul.f32 -1.442695, %v5754_v10 }
 0x14f   : > { %v952_v13 = vsel %vm951_vm14, %v4838_v40, %v948_v9  ;;  %v960_v16 = vmul.f32 %v4840_v12, %v5696_v36  ;;  %v1418_v63 = vpop.f32.mrf.mxu2  ;;  %vm965_vm0 = vweird.f32 %v4840_v12  ;;  %v968_v40 = vand.u32 2147483647, %v5696_v36 }
 0x150   : > { %v957_v19 = vsel %vm954_vm15, %v956_v15, %v952_v13  ;;  %4843 = vpow2.f32 %v4602_v17  ;;  %1834 = vmatpush.msra.mxu2 %v1555_v45  ;;  %vm966_vm2 = vmor %vm964_vm1, %vm965_vm0 }
 0x151   : > { %v961_v21 = vsub.f32 1.0, %v960_v16  ;;  %v5732_v37 = vmul.f32 %v957_v19, %v5662_v25  ;;  %vm969_vm3 = vcmp.eq.f32.partialorder %v968_v40, 8.507059e+37  ;;  %v1549_v25 = vld [vmem:[#allocation10 + $0x190] sm:$0xff] }
 0x152   : > { %v600_v60 = vpop.f32.mrf.mxu0  ;;  %1835 = vmatpush.msra.mxu2 %v1552_v32  ;;  %v1345_v3 = vpop.f32.mrf.mxu1 }
 0x153   : > { %1641 = vmatmul.f32.gmra.mxu2 %v5714_v5  ;;  %1754 = vmatmul.f32.gmra.mxu1 %v5714_v5  ;;  %v5728_v23 = vadd.f32 %v5553_v30, %v600_v60  ;;  %v962_v33 = vmul.f32 %v4840_v12, %v961_v21  ;;  %v4842_v53 = vpop.eup %4841 }
 0x154   : > { %1986 = vmatmul.f32.gmra.mxu0 %v5714_v5  ;;  %v760_v22 = vadd.f32 1.0, %v4842_v53  ;;  %1836 = vmatpush.msra.mxu2 %v1549_v25 }
 0x155   : > { %v963_v47 = vadd.f32 %v4840_v12, %v962_v33  ;;  %v4603_v49 = vmul.f32 -1.442695, %v5728_v23 }
 0x156   : > { %v4844_v36 = vpop.eup %4843  ;;  %v983_v63 = vand.u32 2147483647, %v760_v22  ;;  %v985_v17 = vand.u32 2147483648, %v760_v22  ;;  %vm979_vm5 = vweird.f32 %v760_v22 }
 0x157   : > { %v967_v48 = vsel %vm966_vm2, %v4840_v12, %v963_v47  ;;  %4845 = vpow2.f32 %v4603_v49  ;;  %v761_v57 = vadd.f32 1.0, %v4844_v36 }
 0x158   : > { %v972_v59 = vsel %vm969_vm3, %v971_v50, %v967_v48  ;;  %4847 = vrcp.f32 %v760_v22  ;;  %vm984_vm7 = vcmp.eq.f32.partialorder %v983_v63, 8.507059e+37  ;;  %v986_v35 = vor.u32 1.1754944e-38, %v985_v17  ;;  %v1540_v17 = vld [vmem:[#allocation10 + $0x158] sm:$0xff] }
 0x159   : > { %v5744_v9 = vmul.f32 %v972_v59, %v5674_v41  ;;  %4849 = vrcp.f32 %v761_v57  ;;  %v1000_v45 = vand.u32 2147483648, %v761_v57  ;;  %v998_v53 = vand.u32 2147483647, %v761_v57 }
 0x15a   : > { %v603_v26 = vpop.f32.mrf.mxu0  ;;  %v5762_v48 = vadd.f32 %v5553_v30, %v5563_v43  ;;  %vm994_vm9 = vweird.f32 %v761_v57 }
 0x15b   : > { %1644 = vmatmul.f32.gmra.mxu2 %v5732_v37  ;;  %1757 = vmatmul.f32.gmra.mxu1 %v5732_v37  ;;  %v5741_v60 = vadd.f32 %v5553_v30, %v603_v26  ;;  %vm999_vm11 = vcmp.eq.f32.partialorder %v998_v53, 8.507059e+37 }
 0x15c   : > { %1989 = vmatmul.f32.gmra.mxu0 %v5732_v37  ;;  %v4607_v63 = vmul.f32 -1.442695, %v5762_v48 }
 0x15d   : > { %v4604_v11 = vmul.f32 -1.442695, %v5741_v60  ;;  %v4846_v12 = vpop.eup %4845 }
 0x15e   : > { %v4848_v13 = vpop.eup %4847  ;;  %v5747_v15 = vadd.f32 1.0, %v4846_v12 }
 0x15f   : > { %v975_v16 = vmul.f32 %v4848_v13, %v760_v22  ;;  %4851 = vpow2.f32 %v4604_v11  ;;  %v4850_v21 = vpop.eup %4849  ;;  %vm980_vm4 = vweird.f32 %v4848_v13  ;;  %v1001_v11 = vor.u32 1.1754944e-38, %v1000_v45 }
 0x160   : > { %4853 = vrcp.f32 %v5747_v15  ;;  %v990_v31 = vmul.f32 %v4850_v21, %v761_v57  ;;  %vm981_vm6 = vmor %vm979_vm5, %vm980_vm4  ;;  %vm995_vm8 = vweird.f32 %v4850_v21  ;;  %v1015_v43 = vand.u32 2147483648, %v5747_v15 }
 0x161   : > { %v976_v19 = vsub.f32 1.0, %v975_v16  ;;  %4855 = vpow2.f32 %v4606_v14  ;;  %vm996_vm10 = vmor %vm994_vm9, %vm995_vm8  ;;  %v1013_v57 = vand.u32 2147483647, %v5747_v15  ;;  %vm1009_vm13 = vweird.f32 %v5747_v15 }
 0x162   : > { %v606_v2 = vpop.f32.mrf.mxu0  ;;  %v991_v34 = vsub.f32 1.0, %v990_v31  ;;  %v1016_v14 = vor.u32 1.1754944e-38, %v1015_v43  ;;  %v5794_v45 = vadd.f32 %v5553_v30, %v5571_v54 }
 0x163   : > { %1647 = vmatmul.f32.gmra.mxu2 %v5744_v9  ;;  %1760 = vmatmul.f32.gmra.mxu1 %v5744_v9  ;;  %v977_v26 = vmul.f32 %v4848_v13, %v976_v19  ;;  %v5774_v16 = vadd.f32 %v5553_v30, %v606_v2  ;;  %v1543_v2 = vld [vmem:[#allocation10 + $0x170] sm:$0xff]  ;;  %vm1014_vm15 = vcmp.eq.f32.partialorder %v1013_v57, 8.507059e+37 }
 0x164   : > { %1992 = vmatmul.f32.gmra.mxu0 %v5744_v9  ;;  %v992_v32 = vmul.f32 %v4850_v21, %v991_v34  ;;  %2047 = vmatpush.msrb.mxu3 %v1543_v2  ;;  %v1537_v34 = vld [vmem:[#allocation10 + $0x140] sm:$0xff]  ;;  %v4608_v30 = vmul.f32 -1.442695, %v5794_v45 }
 0x165   : > { %v978_v33 = vadd.f32 %v4848_v13, %v977_v26  ;;  %v4852_v40 = vpop.eup %4851 }
 0x166   : > { %v4854_v47 = vpop.eup %4853  ;;  %v993_v36 = vadd.f32 %v4850_v21, %v992_v32  ;;  %v5770_v3 = vadd.f32 1.0, %v4852_v40  ;;  %2048 = vmatpush.msrb.mxu3 %v1540_v17 }
 0x167   : > { %v982_v49 = vsel %vm981_vm6, %v4848_v13, %v978_v33  ;;  %v1005_v25 = vmul.f32 %v4854_v47, %v5747_v15  ;;  %vm1010_vm12 = vweird.f32 %v4854_v47  ;;  %v4856_v26 = vpop.eup %4855  ;;  %v4605_v33 = vmul.f32 -1.442695, %v5774_v16 }
 0x168   : > { %v987_v50 = vsel %vm984_vm7, %v986_v35, %v982_v49  ;;  %v997_v13 = vsel %vm996_vm10, %v4850_v21, %v993_v36  ;;  %4857 = vrcp.f32 %v5770_v3  ;;  %vm1011_vm14 = vmor %vm1009_vm13, %vm1010_vm12  ;;  %v5790_v35 = vadd.f32 1.0, %v4856_v26  ;;  %v1534_v49 = vld [vmem:[#allocation10 + $0x128] sm:$0xff]  ;;  %2049 = vmatpush.msrb.mxu3 %v1537_v34 }
 0x169   : > { %v5768_v59 = vmul.f32 %v987_v50, %v5707_v55  ;;  %v1006_v12 = vsub.f32 1.0, %v1005_v25  ;;  %v1002_v55 = vsel %vm999_vm11, %v1001_v11, %v997_v13  ;;  %4859 = vpow2.f32 %v4607_v63  ;;  %v1531_v13 = vld [vmem:[#allocation10 + $0x110] sm:$0xff] }
 0x16a   : > { %v5756_v41 = vpop.f32.mrf.mxu0  ;;  %v5782_v21 = vmul.f32 %v1002_v55, %v5720_v56  ;;  %4861 = vpow2.f32 %v4605_v33  ;;  %2050 = vmatpush.msrb.mxu3 %v1534_v49  ;;  %v1028_v11 = vand.u32 2147483647, %v5770_v3  ;;  %v5815_v55 = vld [vmem:[%s8086_s4] ss:$0 sm:$0xff]  ;;  %vm1024_vm1 = vweird.f32 %v5770_v3 }
 0x16b   : > { %8132 = vst [vmem:[#allocation19_spill] sm:$0xff] %v5756_v41  ;;  %1650 = vmatmul.f32.gmra.mxu2 %v5768_v59  ;;  %1763 = vmatmul.f32.gmra.mxu1 %v5768_v59  ;;  %v1007_v19 = vmul.f32 %v4854_v47, %v1006_v12  ;;  %4863 = vrcp.f32 %v5790_v35  ;;  %vm1054_vm5 = vweird.f32 %v5790_v35 }
 0x16c   : > { %1995 = vmatmul.f32.gmra.mxu0 %v5768_v59  ;;  %8134 = vst [vmem:[#allocation21_spill] sm:$0xff] %v5782_v21  ;;  %1653 = vmatmul.f32.vlgmr.msra.gmra.mxu3 %v5782_v21  ;;  %4865 = vpow2.f32 %v4608_v30  ;;  %vm1029_vm3 = vcmp.eq.f32.partialorder %v1028_v11, 8.507059e+37 }
 0x16d   : > { %v1008_v31 = vadd.f32 %v4854_v47, %v1007_v19  ;;  %v5819_v19 = vadd.f32 %v5815_v55, %v5578_v7  ;;  %2051 = vmatpush.msrb.mxu3 %v1531_v13 }
 0x16e   : > { %v4858_v32 = vpop.eup %4857 }
 0x16f   : > { %v1012_v40 = vsel %vm1011_vm14, %v4854_v47, %v1008_v31  ;;  %v1020_v47 = vmul.f32 %v4858_v32, %v5770_v3  ;;  %v4860_v25 = vpop.eup %4859  ;;  %vm1025_vm0 = vweird.f32 %v4858_v32  ;;  %v4609_v33 = vmul.f32 -1.442695, %v5819_v19 }
 0x170   : > { %v1017_v15 = vsel %vm1014_vm15, %v1016_v14, %v1012_v40  ;;  %v4862_v43 = vpop.eup %4861  ;;  %v5823_v63 = vadd.f32 1.0, %v4860_v25  ;;  %vm1026_vm2 = vmor %vm1024_vm1, %vm1025_vm0 }
 0x171   : > { %v5797_v53 = vmul.f32 %v1017_v15, %v5728_v23  ;;  %v1021_v54 = vsub.f32 1.0, %v1020_v47  ;;  %v1030_v23 = vand.u32 2147483648, %v5770_v3  ;;  %v764_v17 = vadd.f32 1.0, %v4862_v43  ;;  %v5826_v26 = vpop.eup %4863 }
 0x172   : > { %v5765_v22 = vpop.f32.mrf.mxu0  ;;  %v1050_v34 = vmul.f32 %v5826_v26, %v5790_v35  ;;  %v4866_v15 = vpop.eup %4865  ;;  %v5846_v47 = vadd.f32 %v5815_v55, %v5592_v28  ;;  %vm1055_vm6 = vweird.f32 %v5826_v26  ;;  %vm1069_vm12 = vweird.f32 %v5823_v63 }
 0x173   : > { %8133 = vst [vmem:[#allocation20_spill] sm:$0xff] %v5765_v22  ;;  %1766 = vmatmul.f32.gmra.mxu1 %v5782_v21  ;;  %1837 = vmatmul.f32.vlgmr.msra.gmra.mxu2 %v5580_v8  ;;  %v1022_v36 = vmul.f32 %v4858_v32, %v1021_v54  ;;  %v1031_v31 = vor.u32 1.1754944e-38, %v1030_v23  ;;  %4867 = vrcp.f32 %v764_v17  ;;  %v5848_v25 = vadd.f32 1.0, %v4866_v15  ;;  %v1525_v15 = vld [vmem:[#allocation10 + $0xe0] sm:$0xff]  ;;  %vm5884_vm10 = vmor %vm1054_vm5, %vm1055_vm6 }
 0x174   : > { %8136 = vst [vmem:[#allocation23_spill] sm:$0xff] %v5797_v53  ;;  %1998 = vmatmul.f32.gmra.mxu0 %v5782_v21  ;;  %1656 = vmatmul.f32.gmra.mxu3 %v5797_v53  ;;  %4869 = vrcp.f32 %v5823_v63  ;;  %v1051_v54 = vsub.f32 1.0, %v1050_v34  ;;  %v4610_v28 = vmul.f32 -1.442695, %v5846_v47  ;;  %vm1039_vm7 = vweird.f32 %v764_v17 }
 0x175   : > { %v1023_v2 = vadd.f32 %v4858_v32, %v1022_v36  ;;  %4871 = vpow2.f32 %v4609_v33  ;;  %vm1084_vm0 = vweird.f32 %v5848_v25 }
 0x176   : > { %v1052_v43 = vmul.f32 %v5826_v26, %v1051_v54  ;;  %4873 = vrcp.f32 %v5848_v25 }
 0x177   : > { %v1027_v7 = vsel %vm1026_vm2, %v4858_v32, %v1023_v2  ;;  %v1528_v32 = vld [vmem:[#allocation10 + $0xf8] sm:$0xff]  ;;  %v1045_v2 = vand.u32 2147483648, %v764_v17  ;;  %4875 = vpow2.f32 %v4610_v28 }
 0x178   : > { %v5821_v57 = vpop.f32.mrf.mxu1  ;;  %v1032_v3 = vsel %vm1029_vm3, %v1031_v31, %v1027_v7  ;;  %2052 = vmatpush.msrb.mxu3 %v1528_v32  ;;  %v5870_v32 = vadd.f32 %v5815_v55, %v5606_v52 }
 0x179   : > { %v5839_v40 = vmul.f32 %v1032_v3, %v5741_v60  ;;  %v4868_v30 = vpop.eup %4867  ;;  %v1043_v3 = vand.u32 2147483647, %v764_v17 }
 0x17a   : > { %v5788_v56 = vpop.f32.mrf.mxu0  ;;  %v1035_v23 = vmul.f32 %v4868_v30, %v764_v17  ;;  %v5854_v36 = vpop.eup %4869  ;;  %vm1040_vm4 = vweird.f32 %v4868_v30  ;;  %2053 = vmatpush.msrb.mxu3 %v1525_v15 }
 0x17b   : > { %8135 = vst [vmem:[#allocation22_spill] sm:$0xff] %v5788_v56  ;;  %1769 = vmatmul.f32.gmra.mxu1 %v5797_v53  ;;  %1840 = vmatmul.f32.gmra.mxu2 %v5590_v24  ;;  %v4872_v31 = vpop.eup %4871  ;;  %v1065_v7 = vmul.f32 %v5854_v36, %v5823_v63  ;;  %vm1041_vm8 = vmor %vm1039_vm7, %vm1040_vm4  ;;  %vm1044_vm9 = vcmp.eq.f32.partialorder %v1043_v3, 8.507059e+37  ;;  %vm1070_vm13 = vweird.f32 %v5854_v36  ;;  %v1075_v3 = vand.u32 2147483648, %v5823_v63 }
 0x17c   : > { %2001 = vmatmul.f32.gmra.mxu0 %v5797_v53  ;;  %8140 = vst [vmem:[#allocation27_spill] sm:$0xff] %v5839_v40  ;;  %1659 = vmatmul.f32.gmra.mxu3 %v5839_v40  ;;  %v1036_v13 = vsub.f32 1.0, %v1035_v23  ;;  %v1058_v23 = vand.u32 2147483647, %v5790_v35  ;;  %v5874_v51 = vadd.f32 1.0, %v4872_v31  ;;  %v5878_v52 = vpop.eup %4873  ;;  %vm5922_vm14 = vmor %vm1069_vm12, %vm1070_vm13 }
 0x17d   : > { %vm1085_vm1 = vweird.f32 %v5878_v52 }
 0x17e   : > { %v5803_v50 = vpop.f32.mrf.mxu2  ;;  %v1037_v33 = vmul.f32 %v4868_v30, %v1036_v13  ;;  %v1060_v13 = vand.u32 2147483648, %v5790_v35  ;;  %4877 = vrcp.f32 %v5874_v51  ;;  %vm1059_vm11 = vcmp.eq.f32.partialorder %v1058_v23, 8.507059e+37  ;;  %vm5958_vm2 = vmor %vm1084_vm0, %vm1085_vm1 }
 0x17f   : > { %8137 = vst [vmem:[#allocation24_spill] sm:$0xff] %v5803_v50  ;;  %v1073_v23 = vand.u32 2147483647, %v5823_v63  ;;  %vm1099_vm4 = vweird.f32 %v5874_v51 }
 0x180   : > { %v5852_v60 = vpop.f32.mrf.mxu1  ;;  %v1038_v54 = vadd.f32 %v4868_v30, %v1037_v33  ;;  %v4876_v33 = vpop.eup %4875 }
 0x181   : > { %vm1074_vm15 = vcmp.eq.f32.partialorder %v1073_v23, 8.507059e+37  ;;  %v1088_v23 = vand.u32 2147483647, %v5848_v25 }
 0x182   : > { %v5810_v12 = vpop.f32.mrf.mxu0  ;;  %v1042_v56 = vsel %vm1041_vm8, %v4868_v30, %v1038_v54 }
 0x183   : > { %8138 = vst [vmem:[#allocation25_spill] sm:$0xff] %v5810_v12  ;;  %1772 = vmatmul.f32.gmra.mxu1 %v5839_v40  ;;  %1843 = vmatmul.f32.gmra.mxu2 %v5602_v42  ;;  %v1053_v12 = vadd.f32 %v5826_v26, %v1052_v43  ;;  %vm1089_vm3 = vcmp.eq.f32.partialorder %v1088_v23, 8.507059e+37  ;;  %v1105_v23 = vand.u32 2147483648, %v5874_v51 }
 0x184   : > { %2004 = vmatmul.f32.gmra.mxu0 %v5839_v40  ;;  %v5920_v17 = vpop.eup %4877 }
 0x185   : > { %v1057_v35 = vsel %vm5884_vm10, %v5826_v26, %v1053_v12  ;;  %v5910_v12 = vadd.f32 %v5815_v55, %v5619_v6  ;;  %vm1100_vm5 = vweird.f32 %v5920_v17 }
 0x186   : > { %v5832_v14 = vpop.f32.mrf.mxu2  ;;  %vm5996_vm6 = vmor %vm1099_vm4, %vm1100_vm5 }
 0x187   : > { %8139 = vst [vmem:[#allocation26_spill] sm:$0xff] %v5832_v14 }
 0x188   : > { %v5892_v30 = vpop.f32.mrf.mxu1 }
 0x18a   : > { %v5842_v49 = vpop.f32.mrf.mxu0 }
 0x18b   : > { %8141 = vst [vmem:[#allocation28_spill] sm:$0xff] %v5842_v49  ;;  %v1046_v49 = vor.u32 1.1754944e-38, %v1045_v2  ;;  %1846 = vmatmul.f32.gmra.mxu2 %v5613_v62  ;;  %v4611_v2 = vmul.f32 -1.442695, %v5870_v32 }
 0x18d   : > { %v1047_v28 = vsel %vm1044_vm9, %v1046_v49, %v1042_v56  ;;  %v1080_v49 = vmul.f32 %v5878_v52, %v5848_v25  ;;  %4879 = vpow2.f32 %v4611_v2  ;;  %v4612_v2 = vmul.f32 -1.442695, %v5910_v12 }
 0x18e   : > { %v5857_v11 = vpop.f32.mrf.mxu2  ;;  %v5890_v43 = vmul.f32 %v1047_v28, %v5774_v16  ;;  %v1522_v16 = vld [vmem:[#allocation10 + $0xc8] sm:$0xff] }
 0x18f   : > { %8142 = vst [vmem:[#allocation29_spill] sm:$0xff] %v5857_v11  ;;  %2054 = vmatpush.msrb.mxu3 %v1522_v16  ;;  %v2345_v11 = vld [vmem:[#allocation10 + $0x440] sm:$0xff] }
 0x190   : > { %8146 = vst [vmem:[#allocation31_spill] sm:$0xff] %v5890_v43  ;;  %1662 = vmatmul.f32.gmra.mxu3 %v5890_v43  ;;  %1775 = vmatmul.f32.gmra.mxu1 %v5890_v43 }
 0x191   : > { %2007 = vmatmul.f32.gmra.mxu0 %v5890_v43 }
 0x192   : > { %v5866_v34 = vpop.f32.mrf.mxu0 }
 0x193   : > { %8143 = vst [vmem:[#allocation30_spill] sm:$0xff] %v5866_v34  ;;  %v1066_v34 = vsub.f32 1.0, %v1065_v7  ;;  %v1061_v7 = vor.u32 1.1754944e-38, %v1060_v13  ;;  %v1081_v13 = vsub.f32 1.0, %v1080_v49  ;;  %1849 = vmatmul.f32.gmra.mxu2 %v5626_v20 }
 0x195   : > { %v1067_v56 = vmul.f32 %v5854_v36, %v1066_v34  ;;  %v1062_v26 = vsel %vm1059_vm11, %v1061_v7, %v1057_v35  ;;  %v5913_v34 = vadd.f32 1.0, %v4876_v33  ;;  %v1076_v7 = vor.u32 1.1754944e-38, %v1075_v3  ;;  %v4880_v33 = vpop.eup %4879 }
 0x196   : > { %v5894_v31 = vpop.f32.mrf.mxu2  ;;  %v5927_v28 = vmul.f32 %v1062_v26, %v5754_v10  ;;  %v1082_v35 = vmul.f32 %v5878_v52, %v1081_v13  ;;  %v5939_v10 = vpop.f32.mrf.mxu1  ;;  %v1090_v26 = vand.u32 2147483648, %v5848_v25  ;;  %v5951_v3 = vadd.f32 1.0, %v4880_v33 }
 0x197   : > { %8147 = vst [vmem:[#allocation32_spill] sm:$0xff] %v5894_v31  ;;  %v1068_v54 = vadd.f32 %v5854_v36, %v1067_v56  ;;  %4881 = vrcp.f32 %v5913_v34  ;;  %v1095_v56 = vmul.f32 %v5920_v17, %v5874_v51  ;;  %vm1114_vm8 = vweird.f32 %v5913_v34 }
 0x198   : > { %8151 = vst [vmem:[#allocation34_spill] sm:$0xff] %v5927_v28  ;;  %1665 = vmatmul.f32.gmra.mxu3 %v5927_v28  ;;  %1778 = vmatmul.f32.gmra.mxu1 %v5927_v28  ;;  %4883 = vpow2.f32 %v4612_v2  ;;  %vm1129_vm12 = vweird.f32 %v5951_v3 }
 0x199   : > { %v1072_v63 = vsel %vm5922_vm14, %v5854_v36, %v1068_v54  ;;  %2010 = vmatmul.f32.gmra.mxu0 %v5927_v28  ;;  %v5948_v36 = vadd.f32 %v5815_v55, %v5634_v29  ;;  %v1083_v54 = vadd.f32 %v5878_v52, %v1082_v35  ;;  %v1096_v13 = vsub.f32 1.0, %v1095_v56 }
 0x19a   : > { %v1077_v16 = vsel %vm1074_vm15, %v1076_v7, %v1072_v63  ;;  %v1091_v63 = vor.u32 1.1754944e-38, %v1090_v26  ;;  %4885 = vrcp.f32 %v5951_v3 }
 0x19b   : > { %v5915_v15 = vpop.f32.mrf.mxu0  ;;  %1852 = vmatmul.f32.gmra.mxu2 %v5638_v38  ;;  %v5965_v7 = vmul.f32 %v1077_v16, %v5762_v48  ;;  %v4613_v33 = vmul.f32 -1.442695, %v5948_v36  ;;  %v1087_v35 = vsel %vm5958_vm2, %v5878_v52, %v1083_v54  ;;  %v1097_v56 = vmul.f32 %v5920_v17, %v1096_v13  ;;  %v1519_v48 = vld [vmem:[#allocation10 + $0xb0] sm:$0xff] }
 0x19c   : > { %8148 = vst [vmem:[#allocation33_spill] sm:$0xff] %v5915_v15  ;;  %2055 = vmatpush.msrb.mxu3 %v1519_v48  ;;  %v5982_v52 = vadd.f32 %v5815_v55, %v5642_v44  ;;  %v1092_v54 = vsel %vm1089_vm3, %v1091_v63, %v1087_v35  ;;  %v1103_v48 = vand.u32 2147483647, %v5874_v51 }
 0x19d   : > { %v5956_v6 = vpop.eup %4881  ;;  %8156 = vst [vmem:[#allocation37_spill] sm:$0xff] %v5965_v7  ;;  %4887 = vpow2.f32 %v4613_v33  ;;  %v1098_v2 = vadd.f32 %v5920_v17, %v1097_v56 }
 0x19e   : > { %v4884_v25 = vpop.eup %4883  ;;  %v1110_v15 = vmul.f32 %v5956_v6, %v5913_v34  ;;  %v5984_v16 = vpop.f32.mrf.mxu1  ;;  %v4614_v63 = vmul.f32 -1.442695, %v5982_v52  ;;  %vm1104_vm7 = vcmp.eq.f32.partialorder %v1103_v48, 8.507059e+37  ;;  %vm1115_vm9 = vweird.f32 %v5956_v6 }
 0x19f   : > { %v5989_v13 = vadd.f32 1.0, %v4884_v25  ;;  %v1106_v25 = vor.u32 1.1754944e-38, %v1105_v23  ;;  %v1118_v48 = vand.u32 2147483647, %v5913_v34  ;;  %vm6034_vm10 = vmor %vm1114_vm8, %vm1115_vm9 }
 0x1a0   : > { %v5941_v49 = vpop.f32.mrf.mxu2  ;;  %1668 = vmatmul.f32.gmra.mxu3 %v5965_v7  ;;  %1781 = vmatmul.f32.gmra.mxu1 %v5965_v7  ;;  %v5994_v33 = vpop.eup %4885 }
 0x1a1   : > { %8152 = vst [vmem:[#allocation35_spill] sm:$0xff] %v5941_v49  ;;  %2013 = vmatmul.f32.gmra.mxu0 %v5965_v7  ;;  %4889 = vrcp.f32 %v5989_v13  ;;  %v1125_v49 = vmul.f32 %v5994_v33, %v5951_v3  ;;  %vm1119_vm11 = vcmp.eq.f32.partialorder %v1118_v48, 8.507059e+37  ;;  %vm1130_vm13 = vweird.f32 %v5994_v33 }
 0x1a2   : > { %4891 = vpow2.f32 %v4614_v63  ;;  %vm6068_vm14 = vmor %vm1129_vm12, %vm1130_vm13  ;;  %vm1144_vm0 = vweird.f32 %v5989_v13  ;;  %v1148_v14 = vand.u32 2147483647, %v5989_v13 }
 0x1a3   : > { %v5962_v29 = vpop.f32.mrf.mxu0  ;;  %1855 = vmatmul.f32.gmra.mxu2 %v5649_v0  ;;  %v4888_v51 = vpop.eup %4887  ;;  %v1126_v44 = vsub.f32 1.0, %v1125_v49 }
 0x1a4   : > { %8155 = vst [vmem:[#allocation36_spill] sm:$0xff] %v5962_v29  ;;  %v1111_v29 = vsub.f32 1.0, %v1110_v15  ;;  %v1102_v15 = vsel %vm5996_vm6, %v5920_v17, %v1098_v2  ;;  %v6020_v17 = vadd.f32 %v5815_v55, %v5652_v4  ;;  %v6023_v23 = vadd.f32 1.0, %v4888_v51 }
 0x1a5   : > { %v1133_v4 = vand.u32 2147483647, %v5951_v3  ;;  %vm6122_vm3 = vcmp.eq.f32.partialorder %v1148_v14, 8.507059e+37  ;;  %v1507_v14 = vld [vmem:[#allocation10 + $0x50] sm:$0xff] }
 0x1a6   : > { %v1112_v56 = vmul.f32 %v5956_v6, %v1111_v29  ;;  %v1107_v29 = vsel %vm1104_vm7, %v1106_v25, %v1102_v15  ;;  %v4615_v51 = vmul.f32 -1.442695, %v6020_v17  ;;  %4893 = vrcp.f32 %v6023_v23 }
 0x1a7   : > { %v6032_v63 = vpop.eup %4889  ;;  %v6039_v25 = vmul.f32 %v1107_v29, %v5819_v19  ;;  %v1513_v29 = vld [vmem:[#allocation10 + $0x80] sm:$0xff]  ;;  %vm1134_vm15 = vcmp.eq.f32.partialorder %v1133_v4, 8.507059e+37  ;;  %vm1159_vm4 = vweird.f32 %v6023_v23 }
 0x1a8   : > { %v5986_v26 = vpop.f32.mrf.mxu2  ;;  %v1113_v2 = vadd.f32 %v5956_v6, %v1112_v56  ;;  %v1127_v56 = vmul.f32 %v5994_v33, %v1126_v44  ;;  %4895 = vpow2.f32 %v4615_v51  ;;  %vm1145_vm1 = vweird.f32 %v6032_v63 }
 0x1a9   : > { %8157 = vst [vmem:[#allocation38_spill] sm:$0xff] %v5986_v26  ;;  %v6001_v26 = vmul.f32 %v1092_v54, %v5794_v45  ;;  %v1516_v45 = vld [vmem:[#allocation10 + $0x98] sm:$0xff]  ;;  %v1120_v54 = vand.u32 2147483648, %v5913_v34  ;;  %v4892_v34 = vpop.eup %4891  ;;  %vm6110_vm2 = vmor %vm1144_vm0, %vm1145_vm1 }
 0x1aa   : > { %2056 = vmatpush.msrb.mxu3 %v1516_v45  ;;  %v6027_v45 = vpop.f32.mrf.mxu1  ;;  %v1117_v49 = vsel %vm6034_vm10, %v5956_v6, %v1113_v2  ;;  %v6058_v6 = vadd.f32 %v5815_v55, %v5670_v39  ;;  %v1135_v2 = vand.u32 2147483648, %v5951_v3  ;;  %v6061_v48 = vadd.f32 1.0, %v4892_v34 }
 0x1ab   : > { %8160 = vst [vmem:[#allocation39_spill] sm:$0xff] %v6001_v26  ;;  %v6005_v35 = vpop.f32.mrf.mxu0  ;;  %1671 = vmatmul.f32.gmra.mxu3 %v6001_v26  ;;  %1784 = vmatmul.f32.gmra.mxu1 %v6001_v26  ;;  %v1121_v15 = vor.u32 1.1754944e-38, %v1120_v54  ;;  %v1128_v44 = vadd.f32 %v5994_v33, %v1127_v56 }
 0x1ac   : > { %8161 = vst [vmem:[#allocation40_spill] sm:$0xff] %v6005_v35  ;;  %2016 = vmatmul.f32.gmra.mxu0 %v6001_v26  ;;  %1858 = vmatmul.f32.gmra.mxu2 %v5665_v27  ;;  %v6066_v31 = vpop.eup %4893  ;;  %v1136_v56 = vor.u32 1.1754944e-38, %v1135_v2  ;;  %4897 = vrcp.f32 %v6061_v48  ;;  %v2351_v2 = vld [vmem:[#allocation10 + $0x470] sm:$0xff]  ;;  %vm1174_vm8 = vweird.f32 %v6061_v48 }
 0x1ad   : > { %2057 = vmatpush.msrb.mxu3 %v1513_v29  ;;  %v1122_v54 = vsel %vm1119_vm11, %v1121_v15, %v1117_v49  ;;  %v4616_v15 = vmul.f32 -1.442695, %v6058_v6  ;;  %2466 = vmatpush.msra.mxu0 %v2351_v2  ;;  %v2342_v2 = vld [vmem:[#allocation10 + $0x428] sm:$0xff]  ;;  %vm1160_vm5 = vweird.f32 %v6066_v31 }
 0x1ae   : > { %v6073_v39 = vmul.f32 %v1122_v54, %v5846_v47  ;;  %v4896_v3 = vpop.eup %4895  ;;  %v1155_v47 = vmul.f32 %v6066_v31, %v6023_v23  ;;  %v1510_v54 = vld [vmem:[#allocation10 + $0x68] sm:$0xff]  ;;  %vm6156_vm6 = vmor %vm1159_vm4, %vm1160_vm5 }
 0x1af   : > { %4899 = vpow2.f32 %v4616_v15  ;;  %2058 = vmatpush.msrb.mxu3 %v1510_v54  ;;  %v6097_v4 = vadd.f32 1.0, %v4896_v3  ;;  %v2336_v15 = vld [vmem:[#allocation10 + $0x3f8] sm:$0xff] }
 0x1b0   : > { %v6030_v35 = vpop.f32.mrf.mxu2  ;;  %v1156_v41 = vsub.f32 1.0, %v1155_v47 }
 0x1b1   : > { %8162 = vst [vmem:[#allocation41_spill] sm:$0xff] %v6030_v35  ;;  %v1140_v35 = vmul.f32 %v6032_v63, %v5989_v13  ;;  %4901 = vrcp.f32 %v6097_v4  ;;  %2059 = vmatpush.msrb.mxu3 %v1507_v14  ;;  %v1544_v14 = vld [vmem:[#allocation10 + $0x178] sm:$0xff]  ;;  %vm1189_vm12 = vweird.f32 %v6097_v4 }
 0x1b2   : > { %v6076_v34 = vpop.f32.mrf.mxu1  ;;  %v1157_v47 = vmul.f32 %v6066_v31, %v1156_v41  ;;  %v6140_v41 = vadd.f32 %v5815_v55, %v5692_v18  ;;  %2160 = vmatpush.msrb.mxu1 %v1544_v14  ;;  %v1180_v14 = vand.u32 2147483648, %v6061_v48 }
 0x1b3   : > { %1674 = vmatmul.f32.gmra.mxu3 %v6039_v25  ;;  %1787 = vmatmul.f32.gmra.mxu1 %v6039_v25  ;;  %v6052_v19 = vpop.f32.mrf.mxu0 }
 0x1b4   : > { %2019 = vmatmul.f32.gmra.mxu0 %v6039_v25  ;;  %8165 = vst [vmem:[#allocation42_spill] sm:$0xff] %v6052_v19  ;;  %v1141_v19 = vsub.f32 1.0, %v1140_v35  ;;  %1861 = vmatmul.f32.gmra.mxu2 %v5677_v46  ;;  %v1132_v35 = vsel %vm6068_vm14, %v5994_v33, %v1128_v44  ;;  %v6094_v33 = vadd.f32 %v5815_v55, %v5685_v58  ;;  %v1150_v44 = vand.u32 2147483648, %v5989_v13  ;;  %v6104_v58 = vpop.eup %4897 }
 0x1b5   : > { %vm1175_vm9 = vweird.f32 %v6104_v58 }
 0x1b6   : > { %v1142_v29 = vmul.f32 %v6032_v63, %v1141_v19  ;;  %v1137_v19 = vsel %vm1134_vm15, %v1136_v56, %v1132_v35  ;;  %v4617_v3 = vmul.f32 -1.442695, %v6094_v33  ;;  %v1151_v35 = vor.u32 1.1754944e-38, %v1150_v44  ;;  %vm6204_vm10 = vmor %vm1174_vm8, %vm1175_vm9 }
 0x1b7   : > { %v6115_v56 = vmul.f32 %v1137_v19, %v5870_v32  ;;  %v1170_v32 = vmul.f32 %v6104_v58, %v6061_v48  ;;  %v1165_v19 = vand.u32 2147483648, %v6023_v23 }
 0x1b8   : > { %v6078_v49 = vpop.f32.mrf.mxu2  ;;  %v1143_v22 = vadd.f32 %v6032_v63, %v1142_v29  ;;  %4903 = vpow2.f32 %v4617_v3 }
 0x1b9   : > { %8168 = vst [vmem:[#allocation43_spill] sm:$0xff] %v6078_v49  ;;  %v2348_v49 = vld [vmem:[#allocation10 + $0x458] sm:$0xff]  ;;  %v1171_v50 = vsub.f32 1.0, %v1170_v32  ;;  %v1166_v13 = vor.u32 1.1754944e-38, %v1165_v19  ;;  %v1541_v19 = vld [vmem:[#allocation10 + $0x160] sm:$0xff] }
 0x1ba   : > { %2467 = vmatpush.msra.mxu0 %v2348_v49  ;;  %v4900_v49 = vpop.eup %4899  ;;  %v1147_v29 = vsel %vm6110_vm2, %v6032_v63, %v1143_v22  ;;  %v6129_v54 = vpop.f32.mrf.mxu1  ;;  %v2339_v22 = vld [vmem:[#allocation10 + $0x410] sm:$0xff]  ;;  %2161 = vmatpush.msrb.mxu1 %v1541_v19 }
 0x1bb   : > { %1677 = vmatmul.f32.gmra.mxu3 %v6073_v39  ;;  %1790 = vmatmul.f32.gmra.mxu1 %v6073_v39  ;;  %v6099_v51 = vpop.f32.mrf.mxu0  ;;  %8174 = vst [vmem:[#allocation45_spill] sm:$0xff] %v6129_v54  ;;  %v1152_v63 = vsel %vm6122_vm3, %v1151_v35, %v1147_v29  ;;  %v6145_v44 = vadd.f32 1.0, %v4900_v49  ;;  %v6150_v18 = vpop.eup %4901  ;;  %v4618_v29 = vmul.f32 -1.442695, %v6140_v41 }
 0x1bc   : > { %2022 = vmatmul.f32.gmra.mxu0 %v6073_v39  ;;  %8169 = vst [vmem:[#allocation44_spill] sm:$0xff] %v6099_v51  ;;  %1864 = vmatmul.f32.gmra.mxu2 %v5699_v61  ;;  %v1158_v51 = vadd.f32 %v6066_v31, %v1157_v47  ;;  %v6163_v49 = vmul.f32 %v1152_v63, %v5910_v12  ;;  %v2333_v47 = vld [vmem:[#allocation10 + $0x3e0] sm:$0xff]  ;;  %v2330_v63 = vld [vmem:[#allocation10 + $0x3c8] sm:$0xff]  ;;  %vm1190_vm13 = vweird.f32 %v6150_v18 }
 0x1bd   : > { %2468 = vmatpush.msra.mxu0 %v2345_v11  ;;  %4905 = vrcp.f32 %v6145_v44  ;;  %v1185_v12 = vmul.f32 %v6150_v18, %v6097_v4  ;;  %vm6248_vm14 = vmor %vm1189_vm12, %vm1190_vm13  ;;  %vm1204_vm0 = vweird.f32 %v6145_v44 }
 0x1be   : > { %v4904_v32 = vpop.eup %4903  ;;  %4907 = vpow2.f32 %v4618_v29  ;;  %v2327_v29 = vld [vmem:[#allocation10 + $0x3b0] sm:$0xff] }
 0x1bf   : > { %2469 = vmatpush.msra.mxu0 %v2342_v2 }
 0x1c0   : > { %v6133_v11 = vpop.f32.mrf.mxu2 }
 0x1c1   : > { %8175 = vst [vmem:[#allocation46_spill] sm:$0xff] %v6133_v11  ;;  %v1163_v11 = vand.u32 2147483647, %v6023_v23  ;;  %2470 = vmatpush.msra.mxu0 %v2339_v22  ;;  %v1162_v23 = vsel %vm6156_vm6, %v6066_v31, %v1158_v51  ;;  %v1172_v22 = vmul.f32 %v6104_v58, %v1171_v50  ;;  %v1504_v31 = vld [vmem:[#allocation10 + $0x38] sm:$0xff]  ;;  %v6184_v50 = vadd.f32 %v5815_v55, %v5710_v1 }
 0x1c2   : > { %v6186_v51 = vpop.f32.mrf.mxu1  ;;  %2060 = vmatpush.msrb.mxu3 %v1504_v31  ;;  %v1178_v1 = vand.u32 2147483647, %v6061_v48  ;;  %v1186_v55 = vsub.f32 1.0, %v1185_v12  ;;  %v2324_v12 = vld [vmem:[#allocation10 + $0x398] sm:$0xff] }
 0x1c3   : > { %1680 = vmatmul.f32.gmra.mxu3 %v6115_v56  ;;  %1793 = vmatmul.f32.gmra.mxu1 %v6115_v56  ;;  %vm6170_vm7 = vcmp.eq.f32.partialorder %v1163_v11, 8.507059e+37  ;;  %8181 = vst [vmem:[#allocation48_spill] sm:$0xff] %v6186_v51  ;;  %v1173_v54 = vadd.f32 %v6104_v58, %v1172_v22  ;;  %v6198_v31 = vpop.eup %4905  ;;  %v4619_v2 = vmul.f32 -1.442695, %v6184_v50  ;;  %v1181_v22 = vor.u32 1.1754944e-38, %v1180_v14  ;;  %v2321_v14 = vld [vmem:[#allocation10 + $0x380] sm:$0xff] }
 0x1c4   : > { %2025 = vmatmul.f32.gmra.mxu0 %v6115_v56  ;;  %1867 = vmatmul.f32.gmra.mxu2 %v5714_v5  ;;  %v1167_v3 = vsel %vm6170_vm7, %v1166_v13, %v1162_v23  ;;  %vm6218_vm11 = vcmp.eq.f32.partialorder %v1178_v1, 8.507059e+37  ;;  %v1501_v1 = vld [vmem:[#allocation10 + $0x20] sm:$0xff]  ;;  %vm1205_vm1 = vweird.f32 %v6198_v31 }
 0x1c5   : > { %2471 = vmatpush.msra.mxu0 %v2336_v15  ;;  %v1538_v15 = vld [vmem:[#allocation10 + $0x148] sm:$0xff]  ;;  %v6211_v23 = vmul.f32 %v1167_v3, %v5948_v36  ;;  %v1177_v48 = vsel %vm6204_vm10, %v6104_v58, %v1173_v54  ;;  %v1187_v36 = vmul.f32 %v6150_v18, %v1186_v55  ;;  %v1532_v3 = vld [vmem:[#allocation10 + $0x118] sm:$0xff]  ;;  %2061 = vmatpush.msrb.mxu3 %v1501_v1  ;;  %v1517_v1 = vld [vmem:[#allocation10 + $0xa0] sm:$0xff] }
 0x1c6   : > { %2162 = vmatpush.msrb.mxu1 %v1538_v15  ;;  %v1200_v15 = vmul.f32 %v6198_v31, %v6145_v44  ;;  %v1526_v54 = vld [vmem:[#allocation10 + $0xe8] sm:$0xff]  ;;  %v1182_v55 = vsel %vm6218_vm11, %v1181_v22, %v1177_v48  ;;  %vm6283_vm2 = vmor %vm1204_vm0, %vm1205_vm1 }
 0x1c7   : > { %2472 = vmatpush.msra.mxu0 %v2333_v47  ;;  %v1535_v47 = vld [vmem:[#allocation10 + $0x130] sm:$0xff] }
 0x1c8   : > { %2163 = vmatpush.msrb.mxu1 %v1535_v47  ;;  %v1195_v47 = vand.u32 2147483648, %v6097_v4 }
 0x1c9   : > { %v6160_v35 = vpop.f32.mrf.mxu0  ;;  %2473 = vmatpush.msra.mxu0 %v2330_v63  ;;  %v4908_v63 = vpop.eup %4907 }
 0x1ca   : > { %8178 = vst [vmem:[#allocation47_spill] sm:$0xff] %v6160_v35  ;;  %v6193_v35 = vadd.f32 1.0, %v4904_v32  ;;  %2164 = vmatpush.msrb.mxu1 %v1532_v3  ;;  %v6235_v13 = vadd.f32 1.0, %v4908_v63  ;;  %v1188_v3 = vadd.f32 %v6150_v18, %v1187_v36  ;;  %v6239_v51 = vpop.f32.mrf.mxu1  ;;  %v6253_v63 = vmul.f32 %v1182_v55, %v5982_v52 }
 0x1cb   : > { %1683 = vmatmul.f32.gmra.mxu3 %v6163_v49  ;;  %1796 = vmatmul.f32.gmra.mxu1 %v6163_v49  ;;  %v1196_v36 = vor.u32 1.1754944e-38, %v1195_v47  ;;  %v1210_v47 = vand.u32 2147483648, %v6145_v44 }
 0x1cc   : > { %2028 = vmatmul.f32.gmra.mxu0 %v6163_v49  ;;  %1870 = vmatmul.f32.gmra.mxu2 %v5732_v37  ;;  %4909 = vrcp.f32 %v6193_v35  ;;  %8191 = vst [vmem:[#allocation52_spill] sm:$0xff] %v6253_v63  ;;  %vm1219_vm4 = vweird.f32 %v6193_v35  ;;  %vm1234_vm8 = vweird.f32 %v6235_v13 }
 0x1cd   : > { %2474 = vmatpush.msra.mxu0 %v2327_v29  ;;  %v1529_v29 = vld [vmem:[#allocation10 + $0x100] sm:$0xff]  ;;  %4911 = vpow2.f32 %v4619_v2  ;;  %v1201_v2 = vsub.f32 1.0, %v1200_v15  ;;  %v2315_v15 = vld [vmem:[#allocation10 + $0x350] sm:$0xff] }
 0x1ce   : > { %v6188_v11 = vpop.f32.mrf.mxu2  ;;  %2165 = vmatpush.msrb.mxu1 %v1529_v29  ;;  %4913 = vrcp.f32 %v6235_v13 }
 0x1cf   : > { %8182 = vst [vmem:[#allocation49_spill] sm:$0xff] %v6188_v11  ;;  %2475 = vmatpush.msra.mxu0 %v2324_v12  ;;  %v1193_v11 = vand.u32 2147483647, %v6097_v4  ;;  %v1523_v12 = vld [vmem:[#allocation10 + $0xd0] sm:$0xff]  ;;  %v1192_v4 = vsel %vm6248_vm14, %v6150_v18, %v1188_v3  ;;  %v1202_v29 = vmul.f32 %v6198_v31, %v1201_v2  ;;  %v1514_v18 = vld [vmem:[#allocation10 + $0x88] sm:$0xff] }
 0x1d0   : > { %2166 = vmatpush.msrb.mxu1 %v1526_v54  ;;  %v2312_v54 = vld [vmem:[#allocation10 + $0x338] sm:$0xff] }
 0x1d1   : > { %v6208_v32 = vpop.f32.mrf.mxu0  ;;  %2476 = vmatpush.msra.mxu0 %v2321_v14  ;;  %vm1194_vm15 = vcmp.eq.f32.partialorder %v1193_v11, 8.507059e+37  ;;  %v1498_v11 = vld [vmem:[#allocation10 + $0x8] sm:$0xff]  ;;  %v1203_v22 = vadd.f32 %v6198_v31, %v1202_v29  ;;  %v1211_v29 = vor.u32 1.1754944e-38, %v1210_v47 }
 0x1d2   : > { %8185 = vst [vmem:[#allocation50_spill] sm:$0xff] %v6208_v32  ;;  %v2318_v32 = vld [vmem:[#allocation10 + $0x368] sm:$0xff]  ;;  %v6242_v19 = vpop.eup %4909  ;;  %2167 = vmatpush.msrb.mxu1 %v1523_v12  ;;  %v1197_v55 = vsel %vm1194_vm15, %v1196_v36, %v1192_v4  ;;  %v2309_v12 = vld [vmem:[#allocation10 + $0x320] sm:$0xff]  ;;  %2062 = vmatpush.msrb.mxu3 %v1498_v11  ;;  %v6290_v4 = vpop.f32.mrf.mxu1  ;;  %v1508_v11 = vld [vmem:[#allocation10 + $0x58] sm:$0xff] }
 0x1d3   : > { %1686 = vmatmul.f32.gmra.mxu3 %v6211_v23  ;;  %1799 = vmatmul.f32.gmra.mxu1 %v6211_v23  ;;  %v4912_v14 = vpop.eup %4911  ;;  %v1215_v52 = vmul.f32 %v6242_v19, %v6193_v35  ;;  %vm1220_vm5 = vweird.f32 %v6242_v19  ;;  %v1499_v36 = vld [vmem:[#allocation10 + $0x10] sm:$0xff] }
 0x1d4   : > { %2031 = vmatmul.f32.gmra.mxu0 %v6211_v23  ;;  %1873 = vmatmul.f32.gmra.mxu2 %v5744_v9  ;;  %v6270_v3 = vadd.f32 1.0, %v4912_v14  ;;  %v6288_v14 = vmul.f32 %v1197_v55, %v6020_v17  ;;  %v2350_v55 = vld [vmem:[#allocation10 + $0x468] sm:$0xff]  ;;  %vm6316_vm6 = vmor %vm1219_vm4, %vm1220_vm5 }
 0x1d5   : > { %2477 = vmatpush.msra.mxu0 %v2318_v32  ;;  %v1520_v32 = vld [vmem:[#allocation10 + $0xb8] sm:$0xff]  ;;  %2353 = vmatpush.msrb.mxu2 %v2350_v55 }
 0x1d6   : > { %v6230_v58 = vpop.f32.mrf.mxu2  ;;  %2168 = vmatpush.msrb.mxu1 %v1520_v32  ;;  %v1208_v32 = vand.u32 2147483647, %v6145_v44  ;;  %4915 = vrcp.f32 %v6270_v3  ;;  %v1207_v44 = vsel %vm6283_vm2, %v6198_v31, %v1203_v22  ;;  %v1505_v31 = vld [vmem:[#allocation10 + $0x40] sm:$0xff]  ;;  %vm1249_vm12 = vweird.f32 %v6270_v3 }
 0x1d7   : > { %8188 = vst [vmem:[#allocation51_spill] sm:$0xff] %v6230_v58  ;;  %2478 = vmatpush.msra.mxu0 %v2315_v15  ;;  %v1511_v15 = vld [vmem:[#allocation10 + $0x70] sm:$0xff]  ;;  %v6277_v58 = vpop.eup %4913 }
 0x1d8   : > { %2169 = vmatpush.msrb.mxu1 %v1517_v1  ;;  %vm6296_vm3 = vcmp.eq.f32.partialorder %v1208_v32, 8.507059e+37  ;;  %v1230_v17 = vmul.f32 %v6277_v58, %v6235_v13  ;;  %v1223_v32 = vand.u32 2147483647, %v6193_v35  ;;  %vm1235_vm9 = vweird.f32 %v6277_v58 }
 0x1d9   : > { %v6255_v48 = vpop.f32.mrf.mxu0  ;;  %2479 = vmatpush.msra.mxu0 %v2312_v54  ;;  %v1212_v47 = vsel %vm6296_vm3, %v1211_v29, %v1207_v44  ;;  %vm1236_vm10 = vmor %vm1234_vm8, %vm1235_vm9 }
 0x1da   : > { %8192 = vst [vmem:[#allocation53_spill] sm:$0xff] %v6255_v48  ;;  %v1216_v48 = vsub.f32 1.0, %v1215_v52  ;;  %2170 = vmatpush.msrb.mxu1 %v1514_v18  ;;  %v2306_v52 = vld [vmem:[#allocation10 + $0x308] sm:$0xff]  ;;  %v6323_v29 = vmul.f32 %v1212_v47, %v6058_v6  ;;  %vm1224_vm7 = vcmp.eq.f32.partialorder %v1223_v32, 8.507059e+37 }
 0x1db   : > { %1689 = vmatmul.f32.gmra.mxu3 %v6253_v63  ;;  %1802 = vmatmul.f32.gmra.mxu1 %v6253_v63 }
 0x1dc   : > { %2034 = vmatmul.f32.gmra.mxu0 %v6253_v63  ;;  %1876 = vmatmul.f32.gmra.mxu2 %v5768_v59  ;;  %v1217_v1 = vmul.f32 %v6242_v19, %v1216_v48  ;;  %v1502_v48 = vld [vmem:[#allocation10 + $0x28] sm:$0xff] }
 0x1dd   : > { %2480 = vmatpush.msra.mxu0 %v2309_v12  ;;  %2171 = vmatpush.msrb.mxu1 %v1511_v15  ;;  %v1225_v12 = vand.u32 2147483648, %v6193_v35  ;;  %v1231_v15 = vsub.f32 1.0, %v1230_v17  ;;  %v6330_v17 = vpop.f32.mrf.mxu1 }
 0x1de   : > { %v6272_v2 = vpop.f32.mrf.mxu2  ;;  %v1218_v22 = vadd.f32 %v6242_v19, %v1217_v1 }
 0x1df   : > { %2172 = vmatpush.msrb.mxu1 %v1508_v11  ;;  %2481 = vmatpush.msra.mxu0 %v2306_v52  ;;  %v4916_v11 = vpop.eup %4915  ;;  %v1226_v44 = vor.u32 1.1754944e-38, %v1225_v12  ;;  %v1232_v54 = vmul.f32 %v6277_v58, %v1231_v15 }
 0x1e0   : > { %v1222_v35 = vsel %vm6316_vm6, %v6242_v19, %v1218_v22  ;;  %v1245_v1 = vmul.f32 %v4916_v11, %v6270_v3  ;;  %vm1250_vm13 = vweird.f32 %v4916_v11 }
 0x1e1   : > { %v6305_v18 = vpop.f32.mrf.mxu0  ;;  %2173 = vmatpush.msrb.mxu1 %v1505_v31  ;;  %v2352_v31 = vld [vmem:[#allocation10 + $0x478] sm:$0xff]  ;;  %v1227_v19 = vsel %vm1224_vm7, %v1226_v44, %v1222_v35  ;;  %v1233_v55 = vadd.f32 %v6277_v58, %v1232_v54  ;;  %v1255_v35 = vand.u32 2147483648, %v6270_v3  ;;  %vm6360_vm14 = vmor %vm1249_vm12, %vm1250_vm13 }
 0x1e2   : > { %8197 = vst [vmem:[#allocation54_spill] sm:$0xff] %v6305_v18  ;;  %2579 = vmatpush.msra.mxu3 %v2352_v31  ;;  %v1240_v18 = vand.u32 2147483648, %v6235_v13  ;;  %v1246_v47 = vsub.f32 1.0, %v1245_v1  ;;  %v6344_v12 = vmul.f32 %v1227_v19, %v6094_v33  ;;  %v2347_v19 = vld [vmem:[#allocation10 + $0x450] sm:$0xff] }
 0x1e3   : > { %1692 = vmatmul.f32.gmra.mxu3 %v6288_v14  ;;  %1805 = vmatmul.f32.gmra.mxu1 %v6288_v14  ;;  %v1237_v15 = vsel %vm1236_vm10, %v6277_v58, %v1233_v55  ;;  %v1253_v58 = vand.u32 2147483647, %v6270_v3  ;;  %v1256_v55 = vor.u32 1.1754944e-38, %v1255_v35  ;;  %v2349_v3 = vld [vmem:[#allocation10 + $0x460] sm:$0xff] }
 0x1e4   : > { %2037 = vmatmul.f32.gmra.mxu0 %v6288_v14  ;;  %1879 = vmatmul.f32.gmra.mxu2 %v5782_v21  ;;  %v1241_v22 = vor.u32 1.1754944e-38, %v1240_v18 }
 0x1e5   : > { %2174 = vmatpush.msrb.mxu1 %v1502_v48  ;;  %v1238_v48 = vand.u32 2147483647, %v6235_v13  ;;  %v6353_v13 = vpop.f32.mrf.mxu1  ;;  %2354 = vmatpush.msrb.mxu2 %v2347_v19  ;;  %vm1254_vm15 = vcmp.eq.f32.partialorder %v1253_v58, 8.507059e+37  ;;  %v2346_v19 = vld [vmem:[#allocation10 + $0x448] sm:$0xff] }
 0x1e6   : > { %v6320_v52 = vpop.f32.mrf.mxu2  ;;  %2580 = vmatpush.msra.mxu3 %v2349_v3 }
 0x1e7   : > { %2175 = vmatpush.msrb.mxu1 %v1499_v36  ;;  %vm1239_vm11 = vcmp.eq.f32.partialorder %v1238_v48, 8.507059e+37  ;;  %v1247_v36 = vmul.f32 %v4916_v11, %v1246_v47 }
 0x1e8   : > { %v1242_v44 = vsel %vm1239_vm11, %v1241_v22, %v1237_v15  ;;  %2581 = vmatpush.msra.mxu3 %v2346_v19 }
 0x1e9   : > { %v6337_v6 = vpop.f32.mrf.mxu0  ;;  %v1248_v54 = vadd.f32 %v4916_v11, %v1247_v36  ;;  %v6367_v18 = vmul.f32 %v1242_v44, %v6140_v41 }
 0x1ea   : > { %8200 = vst [vmem:[#allocation55_spill] sm:$0xff] %v6337_v6 }
 0x1eb   : > { %1695 = vmatmul.f32.gmra.mxu3 %v6323_v29  ;;  %1808 = vmatmul.f32.gmra.mxu1 %v6323_v29  ;;  %v1252_v47 = vsel %vm6360_vm14, %v4916_v11, %v1248_v54  ;;  %v2344_v54 = vld [vmem:[#allocation10 + $0x438] sm:$0xff] }
 0x1ec   : > { %2040 = vmatmul.f32.gmra.mxu0 %v6323_v29  ;;  %1882 = vmatmul.f32.gmra.mxu2 %v5797_v53  ;;  %v1257_v15 = vsel %vm1254_vm15, %v1256_v55, %v1252_v47 }
 0x1ed   : > { %v6376_v41 = vpop.f32.mrf.mxu1  ;;  %v6380_v36 = vmul.f32 %v1257_v15, %v6184_v50  ;;  %2355 = vmatpush.msrb.mxu2 %v2344_v54  ;;  %v8209_v50 = vmov 0.0  }
 0x1ee   : > { %v6346_v32 = vpop.f32.mrf.mxu2 }
 0x1ef   : > { %v6364_v31 = vpop.f32.mrf.mxu3 }
 0x1f1   : > { %v6355_v33 = vpop.f32.mrf.mxu0 }
 0x1f2   : > { %8201 = vst [vmem:[#allocation56_spill] sm:$0xff] %v6355_v33 }
 0x1f3   : > { %1698 = vmatmul.f32.gmra.mxu3 %v6344_v12  ;;  %1811 = vmatmul.f32.gmra.mxu1 %v6344_v12 }
 0x1f4   : > { %2043 = vmatmul.f32.gmra.mxu0 %v6344_v12  ;;  %1885 = vmatmul.f32.gmra.mxu2 %v5839_v40 }
 0x1f5   : > { %v6390_v58 = vpop.f32.mrf.mxu1 }
 0x1f6   : > { %v6369_v48 = vpop.f32.mrf.mxu2  ;;  %8207 = vst [vmem:[#allocation60_spill] sm:$0xff] %v6390_v58 }
 0x1f7   : > { %8204 = vst [vmem:[#allocation57_spill] sm:$0xff] %v6369_v48  ;;  %v6382_v44 = vpop.f32.mrf.mxu3 }
 0x1f8   : > { %8205 = vst [vmem:[#allocation58_spill] sm:$0xff] %v6382_v44 }
 0x1f9   : > { %v2002_v22 = vpop.f32.mrf.mxu0 }
 0x1fb   : > { %1701 = vmatmul.f32.gmra.mxu3 %v6367_v18  ;;  %1814 = vmatmul.f32.gmra.mxu1 %v6367_v18 }
 0x1fc   : > { %2482 = vmatmul.f32.vlgmr.msra.gmra.mxu0 %v5602_v42  ;;  %1888 = vmatmul.f32.gmra.mxu2 %v5890_v43 }
 0x1fd   : > { %v6402_v15 = vpop.f32.mrf.mxu1 }
 0x1fe   : > { %v6384_v11 = vpop.f32.mrf.mxu2  ;;  %8212 = vst [vmem:[#allocation64_spill] sm:$0xff] %v6402_v15 }
 0x1ff   : > { %8206 = vst [vmem:[#allocation59_spill] sm:$0xff] %v6384_v11  ;;  %v6397_v55 = vpop.f32.mrf.mxu3 }
 0x200   : > { %8210 = vst [vmem:[#allocation62_spill] sm:$0xff] %v6397_v55 }
 0x201   : > { %v2005_v35 = vpop.f32.mrf.mxu0 }
 0x203   : > { %1704 = vmatmul.f32.gmra.mxu3 %v6380_v36  ;;  %1817 = vmatmul.f32.gmra.mxu1 %v6380_v36 }
 0x204   : > { %2485 = vmatmul.f32.gmra.mxu0 %v5613_v62  ;;  %1891 = vmatmul.f32.gmra.mxu2 %v5927_v28 }
 0x205   : > { %v6415_v33 = vpop.f32.mrf.mxu1 }
 0x206   : > { %v6392_v1 = vpop.f32.mrf.mxu2  ;;  %8215 = vst [vmem:[#allocation67_spill] sm:$0xff] %v6415_v33  ;;  %v2317_v33 = vld [vmem:[#allocation10 + $0x360] sm:$0xff] }
 0x207   : > { %8208 = vst [vmem:[#allocation61_spill] sm:$0xff] %v6392_v1  ;;  %v2341_v1 = vld [vmem:[#allocation10 + $0x420] sm:$0xff] }
 0x208   : > { %2356 = vmatpush.msrb.mxu2 %v2341_v1 }
 0x20b   : > { %2063 = vmatmul.f32.vlgmr.msrb.gmra.mxu3 %v8209_v50  ;;  %2176 = vmatmul.f32.vlgmr.msrb.gmra.mxu1 %v8209_v50 }
 0x20c   : > { %2488 = vmatmul.f32.gmra.mxu0 %v5626_v20  ;;  %1894 = vmatmul.f32.gmra.mxu2 %v5965_v7 }
 0x20d   : > { %v6425_v1 = vpop.f32.mrf.mxu1 }
 0x20e   : > { %v2008_v47 = vpop.f32.mrf.mxu0  ;;  %v6400_v3 = vpop.f32.mrf.mxu2  ;;  %8218 = vst [vmem:[#allocation70_spill] sm:$0xff] %v6425_v1  ;;  %v2326_v1 = vld [vmem:[#allocation10 + $0x3a8] sm:$0xff] }
 0x20f   : > { %8211 = vst [vmem:[#allocation63_spill] sm:$0xff] %v6400_v3  ;;  %v2343_v3 = vld [vmem:[#allocation10 + $0x430] sm:$0xff] }
 0x210   : > { %2582 = vmatpush.msra.mxu3 %v2343_v3 }
 0x213   : > { %2066 = vmatmul.f32.gmra.mxu3 %v8209_v50  ;;  %2179 = vmatmul.f32.gmra.mxu1 %v8209_v50  ;;  %v1663_v54 = vpop.f32.mrf.mxu3 }
 0x214   : > { %2491 = vmatmul.f32.gmra.mxu0 %v5638_v38  ;;  %v6407_v48 = vadd.f32 %v2002_v22, %v1663_v54  ;;  %1897 = vmatmul.f32.gmra.mxu2 %v6001_v26 }
 0x216   : > { %8213 = vst [vmem:[#allocation65_spill] sm:$0xff] %v6407_v48  ;;  %v2011_v19 = vpop.f32.mrf.mxu0  ;;  %v6410_v11 = vpop.f32.mrf.mxu2 }
 0x217   : > { %8214 = vst [vmem:[#allocation66_spill] sm:$0xff] %v6410_v11 }
 0x21b   : > { %2069 = vmatmul.f32.gmra.mxu3 %v5580_v8  ;;  %2182 = vmatmul.f32.gmra.mxu1 %v5580_v8  ;;  %v1666_v55 = vpop.f32.mrf.mxu3 }
 0x21c   : > { %2494 = vmatmul.f32.gmra.mxu0 %v5649_v0  ;;  %v6417_v22 = vadd.f32 %v2005_v35, %v1666_v55  ;;  %1900 = vmatmul.f32.gmra.mxu2 %v6039_v25  ;;  %v2338_v35 = vld [vmem:[#allocation10 + $0x408] sm:$0xff] }
 0x21d   : > { %2357 = vmatpush.msrb.mxu2 %v2338_v35 }
 0x21e   : > { %8216 = vst [vmem:[#allocation68_spill] sm:$0xff] %v6417_v22  ;;  %v2014_v54 = vpop.f32.mrf.mxu0  ;;  %v6420_v48 = vpop.f32.mrf.mxu2 }
 0x21f   : > { %8217 = vst [vmem:[#allocation69_spill] sm:$0xff] %v6420_v48  ;;  %v2340_v48 = vld [vmem:[#allocation10 + $0x418] sm:$0xff] }
 0x220   : > { %2583 = vmatpush.msra.mxu3 %v2340_v48  ;;  %v2335_v48 = vld [vmem:[#allocation10 + $0x3f0] sm:$0xff] }
 0x221   : > { %2358 = vmatpush.msrb.mxu2 %v2335_v48 }
 0x223   : > { %2072 = vmatmul.f32.gmra.mxu3 %v5590_v24  ;;  %2185 = vmatmul.f32.gmra.mxu1 %v5590_v24  ;;  %v1669_v8 = vpop.f32.mrf.mxu3 }
 0x224   : > { %2497 = vmatmul.f32.gmra.mxu0 %v5665_v27  ;;  %v6427_v3 = vadd.f32 %v2008_v47, %v1669_v8  ;;  %1903 = vmatmul.f32.gmra.mxu2 %v6073_v39  ;;  %v6438_v47 = vpop.f32.mrf.mxu1 }
 0x225   : > { %8222 = vst [vmem:[#allocation74_spill] sm:$0xff] %v6438_v47 }
 0x226   : > { %8219 = vst [vmem:[#allocation71_spill] sm:$0xff] %v6427_v3  ;;  %v6430_v11 = vpop.f32.mrf.mxu2 }
 0x227   : > { %8220 = vst [vmem:[#allocation72_spill] sm:$0xff] %v6430_v11 }
 0x229   : > { %v2017_v55 = vpop.f32.mrf.mxu0 }
 0x22b   : > { %2075 = vmatmul.f32.gmra.mxu3 %v5602_v42  ;;  %2188 = vmatmul.f32.gmra.mxu1 %v5602_v42 }
 0x22c   : > { %2500 = vmatmul.f32.gmra.mxu0 %v5677_v46  ;;  %1906 = vmatmul.f32.gmra.mxu2 %v6115_v56 }
 0x22e   : > { %v1672_v24 = vpop.f32.mrf.mxu3 }
 0x22f   : > { %v6435_v22 = vadd.f32 %v2011_v19, %v1672_v24  ;;  %v6440_v3 = vpop.f32.mrf.mxu2 }
 0x230   : > { %8223 = vst [vmem:[#allocation75_spill] sm:$0xff] %v6440_v3  ;;  %v2337_v3 = vld [vmem:[#allocation10 + $0x400] sm:$0xff] }
 0x231   : > { %8221 = vst [vmem:[#allocation73_spill] sm:$0xff] %v6435_v22  ;;  %v2020_v8 = vpop.f32.mrf.mxu0  ;;  %v6450_v22 = vpop.f32.mrf.mxu1  ;;  %2584 = vmatpush.msra.mxu3 %v2337_v3  ;;  %v2332_v3 = vld [vmem:[#allocation10 + $0x3d8] sm:$0xff] }
 0x232   : > { %8226 = vst [vmem:[#allocation78_spill] sm:$0xff] %v6450_v22  ;;  %2359 = vmatpush.msrb.mxu2 %v2332_v3  ;;  %v2320_v3 = vld [vmem:[#allocation10 + $0x378] sm:$0xff] }
 0x233   : > { %2078 = vmatmul.f32.gmra.mxu3 %v5613_v62  ;;  %2191 = vmatmul.f32.gmra.mxu1 %v5613_v62 }
 0x234   : > { %2503 = vmatmul.f32.gmra.mxu0 %v5699_v61  ;;  %1909 = vmatmul.f32.gmra.mxu2 %v6163_v49 }
 0x236   : > { %v1675_v35 = vpop.f32.mrf.mxu3 }
 0x237   : > { %v6445_v11 = vadd.f32 %v2014_v54, %v1675_v35  ;;  %v6448_v24 = vpop.f32.mrf.mxu2 }
 0x238   : > { %8225 = vst [vmem:[#allocation77_spill] sm:$0xff] %v6448_v24 }
 0x239   : > { %8224 = vst [vmem:[#allocation76_spill] sm:$0xff] %v6445_v11  ;;  %v2023_v19 = vpop.f32.mrf.mxu0  ;;  %v6463_v48 = vpop.f32.mrf.mxu1 }
 0x23a   : > { %8229 = vst [vmem:[#allocation81_spill] sm:$0xff] %v6463_v48 }
 0x23b   : > { %2081 = vmatmul.f32.gmra.mxu3 %v5626_v20  ;;  %2194 = vmatmul.f32.gmra.mxu1 %v5626_v20 }
 0x23c   : > { %2506 = vmatmul.f32.gmra.mxu0 %v5714_v5  ;;  %1912 = vmatmul.f32.gmra.mxu2 %v6211_v23 }
 0x23e   : > { %v1678_v47 = vpop.f32.mrf.mxu3 }
 0x23f   : > { %v6455_v54 = vadd.f32 %v2017_v55, %v1678_v47  ;;  %v6458_v11 = vpop.f32.mrf.mxu2  ;;  %v2329_v47 = vld [vmem:[#allocation10 + $0x3c0] sm:$0xff] }
 0x240   : > { %8228 = vst [vmem:[#allocation80_spill] sm:$0xff] %v6458_v11  ;;  %v2334_v11 = vld [vmem:[#allocation10 + $0x3e8] sm:$0xff]  ;;  %2360 = vmatpush.msrb.mxu2 %v2329_v47 }
 0x241   : > { %8227 = vst [vmem:[#allocation79_spill] sm:$0xff] %v6455_v54  ;;  %v2026_v35 = vpop.f32.mrf.mxu0  ;;  %2585 = vmatpush.msra.mxu3 %v2334_v11  ;;  %v2314_v11 = vld [vmem:[#allocation10 + $0x348] sm:$0xff] }
 0x242   : > { %2361 = vmatpush.msrb.mxu2 %v2326_v1 }
 0x243   : > { %2084 = vmatmul.f32.gmra.mxu3 %v5638_v38  ;;  %2197 = vmatmul.f32.gmra.mxu1 %v5638_v38 }
 0x244   : > { %2509 = vmatmul.f32.gmra.mxu0 %v5732_v37  ;;  %1915 = vmatmul.f32.gmra.mxu2 %v6253_v63 }
 0x246   : > { %v1681_v24 = vpop.f32.mrf.mxu3 }
 0x247   : > { %v6465_v22 = vadd.f32 %v2020_v8, %v1681_v24  ;;  %v6468_v54 = vpop.f32.mrf.mxu2  ;;  %v2323_v24 = vld [vmem:[#allocation10 + $0x390] sm:$0xff] }
 0x248   : > { %8231 = vst [vmem:[#allocation83_spill] sm:$0xff] %v6468_v54  ;;  %2362 = vmatpush.msrb.mxu2 %v2323_v24 }
 0x249   : > { %8230 = vst [vmem:[#allocation82_spill] sm:$0xff] %v6465_v22  ;;  %v2029_v55 = vpop.f32.mrf.mxu0  ;;  %v6473_v22 = vpop.f32.mrf.mxu1 }
 0x24a   : > { %8232 = vst [vmem:[#allocation84_spill] sm:$0xff] %v6473_v22  ;;  %2363 = vmatpush.msrb.mxu2 %v2320_v3  ;;  %v2305_v3 = vld [vmem:[#allocation10 + $0x300] sm:$0xff]  ;;  %v8282_v22 = vld [vmem:[#allocation24_spill] sm:$0xff] }
 0x24b   : > { %2087 = vmatmul.f32.gmra.mxu3 %v5649_v0  ;;  %2200 = vmatmul.f32.gmra.mxu1 %v5649_v0 }
 0x24c   : > { %2512 = vmatmul.f32.gmra.mxu0 %v5744_v9  ;;  %1918 = vmatmul.f32.gmra.mxu2 %v6288_v14 }
 0x24d   : > { %2364 = vmatpush.msrb.mxu2 %v2317_v33  ;;  %v2331_v33 = vld [vmem:[#allocation10 + $0x3d0] sm:$0xff] }
 0x24e   : > { %v1684_v8 = vpop.f32.mrf.mxu3  ;;  %2586 = vmatpush.msra.mxu3 %v2331_v33 }
 0x24f   : > { %v6475_v48 = vadd.f32 %v2023_v19, %v1684_v8  ;;  %v6478_v15 = vpop.f32.mrf.mxu2  ;;  %2365 = vmatpush.msrb.mxu2 %v2314_v11  ;;  %v2311_v19 = vld [vmem:[#allocation10 + $0x330] sm:$0xff]  ;;  %v2308_v8 = vld [vmem:[#allocation10 + $0x318] sm:$0xff] }
 0x250   : > { %8234 = vst [vmem:[#allocation86_spill] sm:$0xff] %v6478_v15 }
 0x251   : > { %8233 = vst [vmem:[#allocation85_spill] sm:$0xff] %v6475_v48  ;;  %v2032_v54 = vpop.f32.mrf.mxu0  ;;  %2366 = vmatpush.msrb.mxu2 %v2311_v19  ;;  %v6486_v24 = vpop.f32.mrf.mxu1 }
 0x252   : > { %8236 = vst [vmem:[#allocation88_spill] sm:$0xff] %v6486_v24 }
 0x253   : > { %2090 = vmatmul.f32.gmra.mxu3 %v5665_v27  ;;  %2203 = vmatmul.f32.gmra.mxu1 %v5665_v27 }
 0x254   : > { %2515 = vmatmul.f32.gmra.mxu0 %v5768_v59  ;;  %1921 = vmatmul.f32.gmra.mxu2 %v6323_v29 }
 0x255   : > { %2367 = vmatpush.msrb.mxu2 %v2308_v8 }
 0x256   : > { %v1687_v1 = vpop.f32.mrf.mxu3 }
 0x257   : > { %v6483_v47 = vadd.f32 %v2026_v35, %v1687_v1  ;;  %v6488_v15 = vpop.f32.mrf.mxu2  ;;  %2368 = vmatpush.msrb.mxu2 %v2305_v3  ;;  %v2328_v3 = vld [vmem:[#allocation10 + $0x3b8] sm:$0xff] }
 0x258   : > { %8237 = vst [vmem:[#allocation89_spill] sm:$0xff] %v6488_v15  ;;  %2587 = vmatpush.msra.mxu3 %v2328_v3 }
 0x259   : > { %8235 = vst [vmem:[#allocation87_spill] sm:$0xff] %v6483_v47  ;;  %v2035_v48 = vpop.f32.mrf.mxu0  ;;  %v6498_v19 = vpop.f32.mrf.mxu1 }
 0x25a   : > { %8240 = vst [vmem:[#allocation92_spill] sm:$0xff] %v6498_v19 }
 0x25b   : > { %2093 = vmatmul.f32.gmra.mxu3 %v5677_v46  ;;  %2206 = vmatmul.f32.gmra.mxu1 %v5677_v46 }
 0x25c   : > { %2518 = vmatmul.f32.gmra.mxu0 %v5782_v21  ;;  %1924 = vmatmul.f32.gmra.mxu2 %v6344_v12 }
 0x25e   : > { %v1690_v35 = vpop.f32.mrf.mxu3 }
 0x25f   : > { %v6493_v11 = vadd.f32 %v2029_v55, %v1690_v35  ;;  %v6496_v1 = vpop.f32.mrf.mxu2 }
 0x260   : > { %8239 = vst [vmem:[#allocation91_spill] sm:$0xff] %v6496_v1 }
 0x261   : > { %8238 = vst [vmem:[#allocation90_spill] sm:$0xff] %v6493_v11  ;;  %v2038_v8 = vpop.f32.mrf.mxu0  ;;  %v6511_v33 = vpop.f32.mrf.mxu1 }
 0x262   : > { %8243 = vst [vmem:[#allocation95_spill] sm:$0xff] %v6511_v33 }
 0x263   : > { %2096 = vmatmul.f32.gmra.mxu3 %v5699_v61  ;;  %2209 = vmatmul.f32.gmra.mxu1 %v5699_v61 }
 0x264   : > { %2521 = vmatmul.f32.gmra.mxu0 %v5797_v53  ;;  %1927 = vmatmul.f32.gmra.mxu2 %v6367_v18 }
 0x266   : > { %v1693_v47 = vpop.f32.mrf.mxu3 }
 0x267   : > { %v6503_v15 = vadd.f32 %v2032_v54, %v1693_v47  ;;  %v6506_v55 = vpop.f32.mrf.mxu2 }
 0x268   : > { %8242 = vst [vmem:[#allocation94_spill] sm:$0xff] %v6506_v55 }
 0x269   : > { %8241 = vst [vmem:[#allocation93_spill] sm:$0xff] %v6503_v15  ;;  %v2041_v35 = vpop.f32.mrf.mxu0  ;;  %v6521_v55 = vpop.f32.mrf.mxu1 }
 0x26a   : > { %8246 = vst [vmem:[#allocation98_spill] sm:$0xff] %v6521_v55 }
 0x26b   : > { %2099 = vmatmul.f32.gmra.mxu3 %v5714_v5  ;;  %2212 = vmatmul.f32.gmra.mxu1 %v5714_v5 }
 0x26c   : > { %2524 = vmatmul.f32.gmra.mxu0 %v5839_v40  ;;  %1930 = vmatmul.f32.gmra.mxu2 %v6380_v36 }
 0x26e   : > { %v1696_v11 = vpop.f32.mrf.mxu3 }
 0x26f   : > { %v6513_v1 = vadd.f32 %v2035_v48, %v1696_v11  ;;  %v6516_v54 = vpop.f32.mrf.mxu2  ;;  %v2325_v11 = vld [vmem:[#allocation10 + $0x3a0] sm:$0xff] }
 0x270   : > { %8245 = vst [vmem:[#allocation97_spill] sm:$0xff] %v6516_v54  ;;  %2588 = vmatpush.msra.mxu3 %v2325_v11  ;;  %v2322_v11 = vld [vmem:[#allocation10 + $0x388] sm:$0xff] }
 0x271   : > { %8244 = vst [vmem:[#allocation96_spill] sm:$0xff] %v6513_v1  ;;  %v2044_v15 = vpop.f32.mrf.mxu0 }
 0x272   : > { %2589 = vmatpush.msra.mxu3 %v2322_v11 }
 0x273   : > { %2102 = vmatmul.f32.gmra.mxu3 %v5732_v37  ;;  %2215 = vmatmul.f32.gmra.mxu1 %v5732_v37 }
 0x274   : > { %2527 = vmatmul.f32.gmra.mxu0 %v5890_v43  ;;  %2369 = vmatmul.f32.vlgmr.msrb.gmra.mxu2 %v5602_v42 }
 0x276   : > { %v1699_v47 = vpop.f32.mrf.mxu3 }
 0x277   : > { %v6523_v3 = vadd.f32 %v2038_v8, %v1699_v47  ;;  %v6526_v48 = vpop.f32.mrf.mxu2  ;;  %v6534_v8 = vpop.f32.mrf.mxu1 }
 0x278   : > { %8248 = vst [vmem:[#allocation100_spill] sm:$0xff] %v6526_v48 }
 0x279   : > { %8247 = vst [vmem:[#allocation99_spill] sm:$0xff] %v6523_v3  ;;  %v2483_v47 = vpop.f32.mrf.mxu0 }
 0x27a   : > { %8250 = vst [vmem:[#allocation102_spill] sm:$0xff] %v6534_v8 }
 0x27b   : > { %2105 = vmatmul.f32.gmra.mxu3 %v5744_v9  ;;  %2218 = vmatmul.f32.gmra.mxu1 %v5744_v9 }
 0x27c   : > { %2530 = vmatmul.f32.gmra.mxu0 %v5927_v28  ;;  %2372 = vmatmul.f32.gmra.mxu2 %v5613_v62 }
 0x27e   : > { %v1702_v54 = vpop.f32.mrf.mxu3 }
 0x27f   : > { %v6531_v1 = vadd.f32 %v2041_v35, %v1702_v54  ;;  %v6536_v3 = vpop.f32.mrf.mxu2  ;;  %v6546_v54 = vpop.f32.mrf.mxu1 }
 0x280   : > { %8251 = vst [vmem:[#allocation103_spill] sm:$0xff] %v6536_v3 }
 0x281   : > { %8249 = vst [vmem:[#allocation101_spill] sm:$0xff] %v6531_v1  ;;  %v2486_v3 = vpop.f32.mrf.mxu0 }
 0x282   : > { %8254 = vst [vmem:[#allocation106_spill] sm:$0xff] %v6546_v54 }
 0x283   : > { %2108 = vmatmul.f32.gmra.mxu3 %v5768_v59  ;;  %2221 = vmatmul.f32.gmra.mxu1 %v5768_v59 }
 0x284   : > { %2533 = vmatmul.f32.gmra.mxu0 %v5965_v7  ;;  %2375 = vmatmul.f32.gmra.mxu2 %v5626_v20 }
 0x286   : > { %v1705_v48 = vpop.f32.mrf.mxu3 }
 0x287   : > { %v6541_v55 = vadd.f32 %v2044_v15, %v1705_v48  ;;  %v6544_v35 = vpop.f32.mrf.mxu2 }
 0x288   : > { %8253 = vst [vmem:[#allocation105_spill] sm:$0xff] %v6544_v35  ;;  %v6560_v35 = vpop.f32.mrf.mxu1 }
 0x289   : > { %8252 = vst [vmem:[#allocation104_spill] sm:$0xff] %v6541_v55  ;;  %v2489_v55 = vpop.f32.mrf.mxu0 }
 0x28a   : > { %8257 = vst [vmem:[#allocation109_spill] sm:$0xff] %v6560_v35 }
 0x28b   : > { %2111 = vmatmul.f32.gmra.mxu3 %v5782_v21  ;;  %2224 = vmatmul.f32.gmra.mxu1 %v5782_v21 }
 0x28c   : > { %2536 = vmatmul.f32.gmra.mxu0 %v6001_v26  ;;  %2378 = vmatmul.f32.gmra.mxu2 %v5638_v38 }
 0x28e   : > { %v2064_v1 = vpop.f32.mrf.mxu3 }
 0x28f   : > { %v2065_v8 = vadd.f32 %v2064_v1, %v5821_v57  ;;  %v6555_v48 = vpop.f32.mrf.mxu2 }
 0x290   : > { %8256 = vst [vmem:[#allocation108_spill] sm:$0xff] %v6555_v48  ;;  %v6571_v48 = vpop.f32.mrf.mxu1 }
 0x291   : > { %v6553_v15 = vadd.f32 %v2483_v47, %v2065_v8  ;;  %v2319_v8 = vld [vmem:[#allocation10 + $0x370] sm:$0xff]  ;;  %8259 = vst [vmem:[#allocation111_spill] sm:$0xff] %v6571_v48 }
 0x292   : > { %2590 = vmatpush.msra.mxu3 %v2319_v8 }
 0x293   : > { %8255 = vst [vmem:[#allocation107_spill] sm:$0xff] %v6553_v15  ;;  %2114 = vmatmul.f32.gmra.mxu3 %v5797_v53  ;;  %2227 = vmatmul.f32.gmra.mxu1 %v5797_v53 }
 0x294   : > { %2539 = vmatmul.f32.gmra.mxu0 %v6039_v25  ;;  %2381 = vmatmul.f32.gmra.mxu2 %v5649_v0 }
 0x296   : > { %v2067_v54 = vpop.f32.mrf.mxu3 }
 0x297   : > { %v2068_v11 = vadd.f32 %v2067_v54, %v5852_v60  ;;  %v6566_v1 = vpop.f32.mrf.mxu2  ;;  %v2492_v60 = vpop.f32.mrf.mxu0 }
 0x298   : > { %8258 = vst [vmem:[#allocation110_spill] sm:$0xff] %v6566_v1  ;;  %v6584_v1 = vpop.f32.mrf.mxu1 }
 0x299   : > { %v6564_v57 = vadd.f32 %v2486_v3, %v2068_v11  ;;  %8261 = vst [vmem:[#allocation113_spill] sm:$0xff] %v6584_v1 }
 0x29b   : > { %2117 = vmatmul.f32.gmra.mxu3 %v5839_v40  ;;  %2230 = vmatmul.f32.gmra.mxu1 %v5839_v40 }
 0x29c   : > { %2542 = vmatmul.f32.gmra.mxu0 %v6073_v39  ;;  %2384 = vmatmul.f32.gmra.mxu2 %v5665_v27 }
 0x29e   : > { %v2070_v47 = vpop.f32.mrf.mxu3 }
 0x29f   : > { %v2071_v15 = vadd.f32 %v2070_v47, %v5892_v30  ;;  %v6577_v54 = vpop.f32.mrf.mxu2  ;;  %v2495_v47 = vpop.f32.mrf.mxu0 }
 0x2a0   : > { %8260 = vst [vmem:[#allocation112_spill] sm:$0xff] %v6577_v54 }
 0x2a1   : > { %v6575_v3 = vadd.f32 %v2489_v55, %v2071_v15  ;;  %v2316_v15 = vld [vmem:[#allocation10 + $0x358] sm:$0xff] }
 0x2a2   : > { %2591 = vmatpush.msra.mxu3 %v2316_v15 }
 0x2a3   : > { %2120 = vmatmul.f32.gmra.mxu3 %v5890_v43  ;;  %2233 = vmatmul.f32.gmra.mxu1 %v5890_v43 }
 0x2a4   : > { %2545 = vmatmul.f32.gmra.mxu0 %v6115_v56  ;;  %2387 = vmatmul.f32.gmra.mxu2 %v5677_v46 }
 0x2a6   : > { %v2073_v11 = vpop.f32.mrf.mxu3 }
 0x2a7   : > { %v2074_v8 = vadd.f32 %v2073_v11, %v5939_v10  ;;  %v6588_v55 = vpop.f32.mrf.mxu2 }
 0x2a8   : > { %8262 = vst [vmem:[#allocation114_spill] sm:$0xff] %v6588_v55  ;;  %v2498_v55 = vpop.f32.mrf.mxu0 }
 0x2a9   : > { %v6586_v30 = vadd.f32 %v2492_v60, %v2074_v8  ;;  %v6599_v8 = vpop.f32.mrf.mxu1 }
 0x2aa   : > { %8264 = vst [vmem:[#allocation116_spill] sm:$0xff] %v6599_v8 }
 0x2ab   : > { %2123 = vmatmul.f32.gmra.mxu3 %v5927_v28  ;;  %2236 = vmatmul.f32.gmra.mxu1 %v5927_v28 }
 0x2ac   : > { %2548 = vmatmul.f32.gmra.mxu0 %v6163_v49  ;;  %2390 = vmatmul.f32.gmra.mxu2 %v5699_v61 }
 0x2ae   : > { %v2076_v54 = vpop.f32.mrf.mxu3 }
 0x2af   : > { %v2077_v10 = vadd.f32 %v2076_v54, %v5984_v16  ;;  %v6597_v60 = vpop.f32.mrf.mxu2 }
 0x2b0   : > { %8263 = vst [vmem:[#allocation115_spill] sm:$0xff] %v6597_v60  ;;  %v2501_v60 = vpop.f32.mrf.mxu0 }
 0x2b1   : > { %v6595_v11 = vadd.f32 %v2495_v47, %v2077_v10  ;;  %v2313_v47 = vld [vmem:[#allocation10 + $0x340] sm:$0xff]  ;;  %v6613_v10 = vpop.f32.mrf.mxu1 }
 0x2b2   : > { %2592 = vmatpush.msra.mxu3 %v2313_v47  ;;  %8266 = vst [vmem:[#allocation118_spill] sm:$0xff] %v6613_v10 }
 0x2b3   : > { %2126 = vmatmul.f32.gmra.mxu3 %v5965_v7  ;;  %2239 = vmatmul.f32.gmra.mxu1 %v5965_v7 }
 0x2b4   : > { %2551 = vmatmul.f32.gmra.mxu0 %v6211_v23  ;;  %2393 = vmatmul.f32.gmra.mxu2 %v5714_v5 }
 0x2b6   : > { %v2079_v1 = vpop.f32.mrf.mxu3 }
 0x2b7   : > { %v2080_v15 = vadd.f32 %v2079_v1, %v6027_v45  ;;  %v6608_v54 = vpop.f32.mrf.mxu2 }
 0x2b8   : > { %8265 = vst [vmem:[#allocation117_spill] sm:$0xff] %v6608_v54  ;;  %v8269_v54 = vld [vmem:[#allocation45_spill] sm:$0xff] }
 0x2b9   : > { %v6606_v16 = vadd.f32 %v2498_v55, %v2080_v15  ;;  %v6624_v47 = vpop.f32.mrf.mxu1 }
 0x2ba   : > { %8268 = vst [vmem:[#allocation120_spill] sm:$0xff] %v6624_v47 }
 0x2bb   : > { %2129 = vmatmul.f32.gmra.mxu3 %v6001_v26  ;;  %2242 = vmatmul.f32.gmra.mxu1 %v6001_v26 }
 0x2bc   : > { %2554 = vmatmul.f32.gmra.mxu0 %v6253_v63  ;;  %2396 = vmatmul.f32.gmra.mxu2 %v5732_v37 }
 0x2be   : > { %v2082_v8 = vpop.f32.mrf.mxu3 }
 0x2bf   : > { %v2083_v45 = vadd.f32 %v2082_v8, %v6076_v34  ;;  %v6619_v55 = vpop.f32.mrf.mxu2  ;;  %v2504_v34 = vpop.f32.mrf.mxu0 }
 0x2c0   : > { %8267 = vst [vmem:[#allocation119_spill] sm:$0xff] %v6619_v55 }
 0x2c1   : > { %v6617_v1 = vadd.f32 %v2501_v60, %v2083_v45  ;;  %v2310_v45 = vld [vmem:[#allocation10 + $0x328] sm:$0xff] }
 0x2c2   : > { %2593 = vmatpush.msra.mxu3 %v2310_v45 }
 0x2c3   : > { %2132 = vmatmul.f32.gmra.mxu3 %v6039_v25  ;;  %2245 = vmatmul.f32.gmra.mxu1 %v6039_v25 }
 0x2c4   : > { %2557 = vmatmul.f32.gmra.mxu0 %v6288_v14  ;;  %2399 = vmatmul.f32.gmra.mxu2 %v5744_v9 }
 0x2c6   : > { %v2085_v15 = vpop.f32.mrf.mxu3 }
 0x2c7   : > { %v2086_v48 = vadd.f32 %v2085_v15, %v8269_v54  ;;  %v6630_v60 = vpop.f32.mrf.mxu2  ;;  %v6638_v54 = vpop.f32.mrf.mxu1 }
 0x2c8   : > { %8270 = vst [vmem:[#allocation45_spill] sm:$0xff] %v6630_v60  ;;  %v2307_v60 = vld [vmem:[#allocation10 + $0x310] sm:$0xff] }
 0x2c9   : > { %v6628_v8 = vadd.f32 %v2504_v34, %v2086_v48  ;;  %8271 = vst [vmem:[#allocation121_spill] sm:$0xff] %v6638_v54  ;;  %2594 = vmatpush.msra.mxu3 %v2307_v60  ;;  %v8283_v54 = vld [vmem:[#allocation19_spill] sm:$0xff] }
 0x2ca   : > { %v1952_v47 = vadd.f32 %v8283_v54, %v8282_v22 }
 0x2cb   : > { %2135 = vmatmul.f32.gmra.mxu3 %v6073_v39  ;;  %2248 = vmatmul.f32.gmra.mxu1 %v6073_v39 }
 0x2cc   : > { %2560 = vmatmul.f32.gmra.mxu0 %v6323_v29  ;;  %2402 = vmatmul.f32.gmra.mxu2 %v5768_v59 }
 0x2ce   : > { %v6635_v55 = vpop.f32.mrf.mxu3 }
 0x2cf   : > { %v6640_v15 = vpop.f32.mrf.mxu2  ;;  %v6650_v45 = vpop.f32.mrf.mxu1 }
 0x2d0   : > { %8272 = vst [vmem:[#allocation122_spill] sm:$0xff] %v6640_v15 }
 0x2d1   : > { %8274 = vst [vmem:[#allocation124_spill] sm:$0xff] %v6650_v45  ;;  %v6690_v45 = vpop.f32.mrf.mxu0 }
 0x2d3   : > { %2138 = vmatmul.f32.gmra.mxu3 %v6115_v56  ;;  %2251 = vmatmul.f32.gmra.mxu1 %v6115_v56 }
 0x2d4   : > { %2563 = vmatmul.f32.gmra.mxu0 %v6344_v12  ;;  %2405 = vmatmul.f32.gmra.mxu2 %v5782_v21 }
 0x2d6   : > { %v6645_v48 = vpop.f32.mrf.mxu3 }
 0x2d7   : > { %v6648_v34 = vpop.f32.mrf.mxu2 }
 0x2d8   : > { %8273 = vst [vmem:[#allocation123_spill] sm:$0xff] %v6648_v34  ;;  %v6663_v34 = vpop.f32.mrf.mxu1 }
 0x2d9   : > { %8276 = vst [vmem:[#allocation126_spill] sm:$0xff] %v6663_v34 }
 0x2db   : > { %2141 = vmatmul.f32.gmra.mxu3 %v6163_v49  ;;  %2254 = vmatmul.f32.gmra.mxu1 %v6163_v49 }
 0x2dc   : > { %2566 = vmatmul.f32.gmra.mxu0 %v6367_v18  ;;  %2408 = vmatmul.f32.gmra.mxu2 %v5797_v53 }
 0x2de   : > { %v6655_v15 = vpop.f32.mrf.mxu3 }
 0x2df   : > { %v6658_v35 = vpop.f32.mrf.mxu2 }
 0x2e0   : > { %8275 = vst [vmem:[#allocation125_spill] sm:$0xff] %v6658_v35  ;;  %v6675_v35 = vpop.f32.mrf.mxu1 }
 0x2e1   : > { %8278 = vst [vmem:[#allocation128_spill] sm:$0xff] %v6675_v35  ;;  %v2788_v35 = vlaneseq }
 0x2e3   : > { %2144 = vmatmul.f32.gmra.mxu3 %v6211_v23  ;;  %2257 = vmatmul.f32.gmra.mxu1 %v6211_v23 }
 0x2e4   : > { %2569 = vmatmul.f32.gmra.mxu0 %v6380_v36  ;;  %2411 = vmatmul.f32.gmra.mxu2 %v5839_v40  ;;  %v8285_v40 = vld [vmem:[#allocation20_spill] sm:$0xff] }
 0x2e6   : > { %v6665_v33 = vpop.f32.mrf.mxu3 }
 0x2e7   : > { %v6668_v10 = vpop.f32.mrf.mxu2 }
 0x2e8   : > { %8277 = vst [vmem:[#allocation127_spill] sm:$0xff] %v6668_v10  ;;  %v6686_v34 = vpop.f32.mrf.mxu1 }
 0x2e9   : > { %8280 = vst [vmem:[#allocation130_spill] sm:$0xff] %v6686_v34 }
 0x2eb   : > { %2147 = vmatmul.f32.gmra.mxu3 %v6253_v63  ;;  %2260 = vmatmul.f32.gmra.mxu1 %v6253_v63 }
 0x2ec   : > { %2572 = vmatmul.f32.gmra.mxu0 %v8209_v50  ;;  %2414 = vmatmul.f32.gmra.mxu2 %v5890_v43  ;;  %v6697_v43 = vshrl.u32 %v2788_v35, 7 }
 0x2ee   : > { %v6673_v60 = vpop.f32.mrf.mxu3  ;;  %vm3237_vm0 = vcmp.lt.s32.totalorder %v6697_v43, 1  ;;  %v2791_v35 = vadd.s32 16, %v6697_v43  ;;  %vm3302_vm12 = vcmp.lt.s32.totalorder %v6697_v43, 7 }
 0x2ef   : > { %v6678_v19 = vpop.f32.mrf.mxu2 }
 0x2f0   : > { %8279 = vst [vmem:[#allocation129_spill] sm:$0xff] %v6678_v19  ;;  %v6703_v44 = vpop.f32.mrf.mxu1 }
 0x2f1   : > { %8287 = vst [vmem:[#allocation19_spill] sm:$0xff] %v6703_v44 }
 0x2f3   : > { %2150 = vmatmul.f32.gmra.mxu3 %v6288_v14  ;;  %2263 = vmatmul.f32.gmra.mxu1 %v6288_v14 }
 0x2f4   : > { %2575 = vmatmul.f32.gmra.mxu0 %v8209_v50  ;;  %2417 = vmatmul.f32.gmra.mxu2 %v5927_v28  ;;  %v8284_v28 = vld [vmem:[#allocation26_spill] sm:$0xff] }
 0x2f5   : > { %v1955_v34 = vadd.f32 %v8285_v40, %v8284_v28  ;;  %v6712_v40 = vpop.f32.mrf.mxu0 }
 0x2f6   : > { %v6683_v10 = vpop.f32.mrf.mxu3 }
 0x2f7   : > { %v2370_v24 = vpop.f32.mrf.mxu2 }
 0x2f8   : > { %v6701_v53 = vadd.f32 %v2370_v24, %v1952_v47  ;;  %v8290_v24 = vld [vmem:[#allocation29_spill] sm:$0xff]  ;;  %v8291_v47 = vld [vmem:[#allocation22_spill] sm:$0xff] }
 0x2fa   : > { %8286 = vst [vmem:[#allocation24_spill] sm:$0xff] %v6701_v53  ;;  %v8107_v22 = vrot.slane %v6701_v53, 7 }
 0x2fb   : > { %2153 = vmatmul.f32.gmra.mxu3 %v6323_v29  ;;  %2266 = vmatmul.f32.gmra.mxu1 %v6323_v29 }
 0x2fc   : > { %2420 = vmatmul.f32.gmra.mxu2 %v5965_v7 }
 0x2fe   : > { %v6692_v19 = vpop.f32.mrf.mxu3 }
 0x2ff   : > { %8281 = vst [vmem:[#allocation131_spill] sm:$0xff] %v6692_v19  ;;  %v2373_v6 = vpop.f32.mrf.mxu2 }
 0x300   : > { %v2695_v21 = vadd.f32 %v2373_v6, %v1955_v34  ;;  %v1958_v34 = vadd.f32 %v8291_v47, %v8290_v24  ;;  %v2793_v24 = vadd.s32 32, %v6697_v43 }
 0x302   : > { %v3206_v54 = vrot.slane %v2695_v21, 7  ;;  %v2839_v21 = vand.u32 15, %v2791_v35 }
 0x303   : > { %2156 = vmatmul.f32.gmra.mxu3 %v6344_v12  ;;  %2269 = vmatmul.f32.gmra.mxu1 %v6344_v12 }
 0x304   : > { %v3268_v28 = vsel %vm3237_vm0, %v8107_v22, %v3206_v54  ;;  %2423 = vmatmul.f32.gmra.mxu2 %v6001_v26  ;;  %vm3337_vm1 = vcmp.eq.s32.totalorder %v2839_v21, 0  ;;  %v6732_v26 = vpop.f32.mrf.mxu0  ;;  %v2853_v21 = vand.u32 15, %v2793_v24 }
 0x305   : > { %v6720_v6 = vadd.f32 %v3268_v28, %v6564_v57  ;;  %v8292_v57 = vld [vmem:[#allocation32_spill] sm:$0xff]  ;;  %v8293_v28 = vld [vmem:[#allocation25_spill] sm:$0xff] }
 0x306   : > { %v6710_v7 = vpop.f32.mrf.mxu3  ;;  %vm3339_vm2 = vcmp.eq.s32.totalorder %v2853_v21, 0 }
 0x307   : > { %8288 = vst [vmem:[#allocation26_spill] sm:$0xff] %v6710_v7  ;;  %v2376_v44 = vpop.f32.mrf.mxu2 }
 0x308   : > { %8289 = vst [vmem:[#allocation20_spill] sm:$0xff] %v6720_v6  ;;  %v2698_v7 = vadd.f32 %v2376_v44, %v1958_v34  ;;  %v1961_v6 = vadd.f32 %v8293_v28, %v8292_v57  ;;  %v8294_v34 = vld [vmem:[#allocation35_spill] sm:$0xff] }
 0x30a   : > { %v3207_v19 = vrot.slane %v2698_v7, 7 }
 0x30b   : > { %2595 = vmatmul.f32.vlgmr.msra.gmra.mxu3 %v5602_v42 }
 0x30c   : > { %v3267_v22 = vsel %vm3237_vm0, %v3206_v54, %v3207_v19  ;;  %2426 = vmatmul.f32.gmra.mxu2 %v6039_v25 }
 0x30d   : > { %v3433_v53 = vsel %vm3337_vm1, 0.0, %v3267_v22 }
 0x30e   : > { %v6725_v58 = vpop.f32.mrf.mxu3  ;;  %v6735_v35 = vadd.f32 %v3433_v53, %v6575_v3  ;;  %v8295_v53 = vld [vmem:[#allocation28_spill] sm:$0xff] }
 0x30f   : > { %v2379_v42 = vpop.f32.mrf.mxu2  ;;  %v1964_v3 = vadd.f32 %v8295_v53, %v8294_v34 }
 0x310   : > { %v2701_v7 = vadd.f32 %v2379_v42, %v1961_v6 }
 0x312   : > { %v3208_v44 = vrot.slane %v2701_v7, 7  ;;  %v8296_v7 = vld [vmem:[#allocation38_spill] sm:$0xff] }
 0x313   : > { %2598 = vmatmul.f32.gmra.mxu3 %v5613_v62  ;;  %v6749_v62 = vpop.f32.mrf.mxu0 }
 0x314   : > { %v3266_v22 = vsel %vm3237_vm0, %v3207_v19, %v3208_v44  ;;  %2429 = vmatmul.f32.gmra.mxu2 %v6073_v39 }
 0x315   : > { %v6745_v54 = vadd.f32 %v3266_v22, %v6586_v30  ;;  %v8297_v22 = vld [vmem:[#allocation30_spill] sm:$0xff] }
 0x316   : > { %v6739_v47 = vpop.f32.mrf.mxu3  ;;  %v1967_v34 = vadd.f32 %v8297_v22, %v8296_v7 }
 0x317   : > { %v2382_v57 = vpop.f32.mrf.mxu2 }
 0x318   : > { %v2704_v6 = vadd.f32 %v2382_v57, %v1964_v3  ;;  %v2795_v57 = vadd.s32 48, %v6697_v43 }
 0x31a   : > { %v3209_v28 = vrot.slane %v2704_v6, 7 }
 0x31b   : > { %2601 = vmatmul.f32.gmra.mxu3 %v5626_v20  ;;  %v6763_v3 = vpop.f32.mrf.mxu0 }
 0x31c   : > { %v3265_v19 = vsel %vm3237_vm0, %v3208_v44, %v3209_v28  ;;  %2432 = vmatmul.f32.gmra.mxu2 %v6115_v56 }
 0x31d   : > { %v3435_v30 = vsel %vm3339_vm2, 0.0, %v3265_v19 }
 0x31e   : > { %v6752_v42 = vpop.f32.mrf.mxu3  ;;  %v6760_v24 = vadd.f32 %v3435_v30, %v6595_v11  ;;  %v8300_v11 = vld [vmem:[#allocation41_spill] sm:$0xff] }
 0x31f   : > { %v2385_v53 = vpop.f32.mrf.mxu2  ;;  %v8301_v30 = vld [vmem:[#allocation33_spill] sm:$0xff] }
 0x320   : > { %8298 = vst [vmem:[#allocation29_spill] sm:$0xff] %v6760_v24  ;;  %v2707_v20 = vadd.f32 %v2385_v53, %v1967_v34  ;;  %v1970_v7 = vadd.f32 %v8301_v30, %v8300_v11 }
 0x322   : > { %v3210_v21 = vrot.slane %v2707_v20, 7 }
 0x323   : > { %2604 = vmatmul.f32.gmra.mxu3 %v5638_v38  ;;  %v2867_v38 = vand.u32 15, %v2795_v57  ;;  %v6779_v24 = vpop.f32.mrf.mxu0 }
 0x324   : > { %v3264_v44 = vsel %vm3237_vm0, %v3209_v28, %v3210_v21  ;;  %2435 = vmatmul.f32.gmra.mxu2 %v6163_v49 }
 0x325   : > { %v6772_v19 = vadd.f32 %v3264_v44, %v6606_v16  ;;  %vm3341_vm3 = vcmp.eq.s32.totalorder %v2867_v38, 0  ;;  %v8302_v44 = vld [vmem:[#allocation43_spill] sm:$0xff]  ;;  %v2797_v38 = vadd.s32 64, %v6697_v43 }
 0x326   : > { %v6766_v6 = vpop.f32.mrf.mxu3 }
 0x327   : > { %8299 = vst [vmem:[#allocation22_spill] sm:$0xff] %v6772_v19  ;;  %v2388_v22 = vpop.f32.mrf.mxu2  ;;  %v8303_v19 = vld [vmem:[#allocation36_spill] sm:$0xff] }
 0x328   : > { %v2710_v34 = vadd.f32 %v2388_v22, %v1970_v7  ;;  %v1973_v11 = vadd.f32 %v8303_v19, %v8302_v44  ;;  %v8306_v19 = vld [vmem:[#allocation46_spill] sm:$0xff] }
 0x32a   : > { %v3211_v53 = vrot.slane %v2710_v34, 7 }
 0x32b   : > { %2607 = vmatmul.f32.gmra.mxu3 %v5649_v0 }
 0x32c   : > { %v3263_v28 = vsel %vm3237_vm0, %v3210_v21, %v3211_v53  ;;  %2438 = vmatmul.f32.gmra.mxu2 %v6211_v23 }
 0x32d   : > { %v3437_v16 = vsel %vm3341_vm3, 0.0, %v3263_v28 }
 0x32e   : > { %v6777_v20 = vpop.f32.mrf.mxu3  ;;  %v6787_v57 = vadd.f32 %v3437_v16, %v6617_v1  ;;  %v8307_v1 = vld [vmem:[#allocation40_spill] sm:$0xff]  ;;  %v6801_v16 = vpop.f32.mrf.mxu0 }
 0x32f   : > { %v2391_v0 = vpop.f32.mrf.mxu2  ;;  %v1976_v28 = vadd.f32 %v8307_v1, %v8306_v19  ;;  %v8310_v1 = vld [vmem:[#allocation42_spill] sm:$0xff] }
 0x330   : > { %8304 = vst [vmem:[#allocation32_spill] sm:$0xff] %v6787_v57  ;;  %v2713_v30 = vadd.f32 %v2391_v0, %v1973_v11  ;;  %v8308_v11 = vld [vmem:[#allocation48_spill] sm:$0xff] }
 0x331   : > { %v2089_v0 = vadd.f32 %v6635_v55, %v8308_v11 }
 0x332   : > { %v3212_v7 = vrot.slane %v2713_v30, 7 }
 0x333   : > { %2610 = vmatmul.f32.gmra.mxu3 %v5665_v27  ;;  %v2881_v27 = vand.u32 15, %v2797_v38  ;;  %v8309_v38 = vld [vmem:[#allocation49_spill] sm:$0xff] }
 0x334   : > { %v3262_v21 = vsel %vm3237_vm0, %v3211_v53, %v3212_v7  ;;  %2441 = vmatmul.f32.gmra.mxu2 %v6253_v63 }
 0x335   : > { %v6797_v34 = vadd.f32 %v3262_v21, %v6628_v8  ;;  %vm3343_vm4 = vcmp.eq.s32.totalorder %v2881_v27, 0  ;;  %v2717_v8 = vadd.f32 %v6690_v45, %v2089_v0 }
 0x336   : > { %v6791_v22 = vpop.f32.mrf.mxu3 }
 0x337   : > { %8305 = vst [vmem:[#allocation25_spill] sm:$0xff] %v6797_v34  ;;  %v2394_v44 = vpop.f32.mrf.mxu2  ;;  %v1979_v34 = vadd.f32 %v8310_v1, %v8309_v38 }
 0x338   : > { %v2716_v30 = vadd.f32 %v2394_v44, %v1976_v28  ;;  %v6818_v28 = vpop.f32.mrf.mxu0 }
 0x33a   : > { %v3213_v57 = vrot.slane %v2716_v30, 7 }
 0x33b   : > { %2613 = vmatmul.f32.gmra.mxu3 %v5677_v46  ;;  %v2092_v46 = vadd.f32 %v6645_v48, %v6239_v51  ;;  %v8311_v51 = vld [vmem:[#allocation51_spill] sm:$0xff]  ;;  %v8312_v48 = vld [vmem:[#allocation44_spill] sm:$0xff] }
 0x33c   : > { %v3261_v21 = vsel %vm3237_vm0, %v3212_v7, %v3213_v57  ;;  %2444 = vmatmul.f32.gmra.mxu2 %v6288_v14  ;;  %v2799_v7 = vadd.s32 80, %v6697_v43 }
 0x33d   : > { %v3439_v19 = vsel %vm3343_vm4, 0.0, %v3261_v21  ;;  %v2720_v44 = vadd.f32 %v6712_v40, %v2092_v46  ;;  %vm4363_vm4 = vcmask 31744  }
 0x33e   : > { %v6806_v53 = vpop.f32.mrf.mxu3  ;;  %v6814_v63 = vadd.f32 %v3439_v19, %v2717_v8  ;;  %v1982_v8 = vadd.f32 %v8312_v48, %v8311_v51  ;;  %v2895_v21 = vand.u32 15, %v2799_v7 }
 0x33f   : > { %v2397_v55 = vpop.f32.mrf.mxu2 }
 0x340   : > { %v2719_v45 = vadd.f32 %v2397_v55, %v1979_v34  ;;  %v2095_v34 = vadd.f32 %v6655_v15, %v6290_v4  ;;  %v6835_v19 = vpop.f32.mrf.mxu0  ;;  %vm3345_vm5 = vcmp.eq.s32.totalorder %v2895_v21, 0 }
 0x342   : > { %v3214_v27 = vrot.slane %v2719_v45, 7  ;;  %v2723_v1 = vadd.f32 %v6732_v26, %v2095_v34  ;;  %v8313_v45 = vld [vmem:[#allocation47_spill] sm:$0xff]  ;;  %v2801_v26 = vadd.s32 96, %v6697_v43 }
 0x343   : > { %2616 = vmatmul.f32.gmra.mxu3 %v5699_v61  ;;  %v1985_v4 = vadd.f32 %v8313_v45, %v6272_v2 }
 0x344   : > { %v3260_v0 = vsel %vm3237_vm0, %v3213_v57, %v3214_v27  ;;  %2447 = vmatmul.f32.gmra.mxu2 %v6323_v29 }
 0x345   : > { %v6828_v30 = vadd.f32 %v3260_v0, %v2720_v44 }
 0x346   : > { %v6823_v11 = vpop.f32.mrf.mxu3 }
 0x347   : > { %v2400_v61 = vpop.f32.mrf.mxu2 }
 0x348   : > { %v2722_v40 = vadd.f32 %v2400_v61, %v1982_v8  ;;  %v6854_v48 = vpop.f32.mrf.mxu0  ;;  %v2101_v61 = vadd.f32 %v6673_v60, %v6353_v13 }
 0x34a   : > { %v3215_v38 = vrot.slane %v2722_v40, 7 }
 0x34b   : > { %2619 = vmatmul.f32.gmra.mxu3 %v5714_v5  ;;  %v2098_v5 = vadd.f32 %v6665_v33, %v6330_v17  ;;  %v8314_v17 = vld [vmem:[#allocation50_spill] sm:$0xff]  ;;  %v2909_v33 = vand.u32 15, %v2801_v26 }
 0x34c   : > { %v3259_v46 = vsel %vm3237_vm0, %v3214_v27, %v3215_v38  ;;  %2450 = vmatmul.f32.gmra.mxu2 %v6344_v12 }
 0x34d   : > { %v3441_v55 = vsel %vm3345_vm5, 0.0, %v3259_v46  ;;  %v2726_v27 = vadd.f32 %v6749_v62, %v2098_v5  ;;  %vm3347_vm6 = vcmp.eq.s32.totalorder %v2909_v33, 0  ;;  %v8315_v46 = vld [vmem:[#allocation53_spill] sm:$0xff]  ;;  %v2803_v5 = vadd.s32 112, %v6697_v43 }
 0x34e   : > { %v6837_v57 = vpop.f32.mrf.mxu3  ;;  %v6845_v15 = vadd.f32 %v3441_v55, %v2723_v1  ;;  %v1991_v55 = vadd.f32 %v8315_v46, %v6346_v32 }
 0x34f   : > { %v2403_v7 = vpop.f32.mrf.mxu2  ;;  %v2923_v26 = vand.u32 15, %v2803_v5  ;;  %v8324_v5 = vld [vmem:[#allocation23_spill] sm:$0xff] }
 0x350   : > { %v2725_v44 = vadd.f32 %v2403_v7, %v1985_v4  ;;  %v6874_v45 = vpop.f32.mrf.mxu0 }
 0x351   : > { %vm3349_vm7 = vcmp.eq.s32.totalorder %v2923_v26, 0 }
 0x352   : > { %v3216_v0 = vrot.slane %v2725_v44, 7 }
 0x353   : > { %2622 = vmatmul.f32.gmra.mxu3 %v5732_v37  ;;  %v1988_v37 = vadd.f32 %v8314_v17, %v6320_v52 }
 0x354   : > { %v3258_v2 = vsel %vm3237_vm0, %v3215_v38, %v3216_v0  ;;  %2453 = vmatmul.f32.gmra.mxu2 %v6367_v18  ;;  %v2729_v38 = vadd.f32 %v6763_v3, %v2101_v61 }
 0x355   : > { %v6859_v8 = vadd.f32 %v3258_v2, %v2726_v27  ;;  %v8317_v27 = vld [vmem:[#allocation60_spill] sm:$0xff]  ;;  %v8318_v2 = vld [vmem:[#allocation131_spill] sm:$0xff] }
 0x356   : > { %v6852_v51 = vpop.f32.mrf.mxu3  ;;  %v2107_v17 = vadd.f32 %v8318_v2, %v8317_v27  ;;  %v8326_v27 = vld [vmem:[#allocation62_spill] sm:$0xff]  ;;  %v8327_v2 = vld [vmem:[#allocation56_spill] sm:$0xff] }
 0x357   : > { %v2406_v21 = vpop.f32.mrf.mxu2 }
 0x358   : > { %v2728_v62 = vadd.f32 %v2406_v21, %v1988_v37  ;;  %v6894_v37 = vpop.f32.mrf.mxu0 }
 0x35a   : > { %v3217_v34 = vrot.slane %v2728_v62, 7  ;;  %v2735_v62 = vadd.f32 %v6801_v16, %v2107_v17  ;;  %v2000_v17 = vadd.f32 %v8327_v2, %v8326_v27 }
 0x35b   : > { %2625 = vmatmul.f32.gmra.mxu3 %v5744_v9  ;;  %v2104_v9 = vadd.f32 %v6683_v10, %v6376_v41  ;;  %v8316_v41 = vld [vmem:[#allocation54_spill] sm:$0xff] }
 0x35c   : > { %v3257_v1 = vsel %vm3237_vm0, %v3216_v0, %v3217_v34  ;;  %2456 = vmatmul.f32.gmra.mxu2 %v6380_v36  ;;  %v1994_v10 = vadd.f32 %v8316_v41, %v6364_v31 }
 0x35d   : > { %v3443_v52 = vsel %vm3347_vm6, 0.0, %v3257_v1  ;;  %v2732_v7 = vadd.f32 %v6779_v24, %v2104_v9  ;;  %v8319_v24 = vld [vmem:[#allocation21_spill] sm:$0xff]  ;;  %v8321_v1 = vld [vmem:[#allocation55_spill] sm:$0xff]  ;;  %v8323_v9 = vld [vmem:[#allocation26_spill] sm:$0xff] }
 0x35e   : > { %v6866_v40 = vpop.f32.mrf.mxu3  ;;  %v6876_v13 = vadd.f32 %v3443_v52, %v2729_v38  ;;  %v8320_v38 = vld [vmem:[#allocation58_spill] sm:$0xff] }
 0x35f   : > { %v2409_v60 = vpop.f32.mrf.mxu2  ;;  %v1997_v52 = vadd.f32 %v8321_v1, %v8320_v38 }
 0x360   : > { %v2731_v3 = vadd.f32 %v2409_v60, %v1991_v55  ;;  %v8322_v55 = vld [vmem:[#allocation64_spill] sm:$0xff] }
 0x361   : > { %v2110_v60 = vadd.f32 %v8323_v9, %v8322_v55 }
 0x362   : > { %v3218_v4 = vrot.slane %v2731_v3, 7 }
 0x363   : > { %2628 = vmatmul.f32.gmra.mxu3 %v5768_v59  ;;  %v2738_v41 = vadd.f32 %v6818_v28, %v2110_v60 }
 0x364   : > { %v3256_v32 = vsel %vm3237_vm0, %v3217_v34, %v3218_v4  ;;  %2459 = vmatmul.f32.gmra.mxu2 %v8209_v50 }
 0x365   : > { %v6888_v0 = vadd.f32 %v3256_v32, %v2732_v7  ;;  %v6910_v32 = vpop.f32.mrf.mxu0 }
 0x366   : > { %v6883_v44 = vpop.f32.mrf.mxu3 }
 0x367   : > { %v2412_v59 = vpop.f32.mrf.mxu2 }
 0x368   : > { %v2734_v33 = vadd.f32 %v2412_v59, %v1994_v10 }
 0x36a   : > { %v3219_v21 = vrot.slane %v2734_v33, 7 }
 0x36b   : > { %2631 = vmatmul.f32.gmra.mxu3 %v8319_v24 }
 0x36c   : > { %v3255_v34 = vsel %vm3237_vm0, %v3218_v4, %v3219_v21  ;;  %2462 = vmatmul.f32.gmra.mxu2 %v8209_v50  ;;  %v2805_v4 = vadd.s32 128, %v6697_v43 }
 0x36d   : > { %v3445_v31 = vsel %vm3349_vm7, 0.0, %v3255_v34 }
 0x36e   : > { %v6897_v61 = vpop.f32.mrf.mxu3  ;;  %v6905_v46 = vadd.f32 %v3445_v31, %v2735_v62  ;;  %v2937_v24 = vand.u32 15, %v2805_v4  ;;  %v8328_v62 = vld [vmem:[#allocation67_spill] sm:$0xff]  ;;  %v8333_v4 = vld [vmem:[#allocation65_spill] sm:$0xff] }
 0x36f   : > { %v2415_v3 = vpop.f32.mrf.mxu2  ;;  %v2113_v34 = vadd.f32 %v6725_v58, %v8328_v62  ;;  %v8329_v31 = vld [vmem:[#allocation27_spill] sm:$0xff] }
 0x370   : > { %v2737_v7 = vadd.f32 %v2415_v3, %v1997_v52  ;;  %vm3351_vm8 = vcmp.eq.s32.totalorder %v2937_v24, 0  ;;  %v8331_v3 = vld [vmem:[#allocation70_spill] sm:$0xff] }
 0x371   : > { %v2741_v52 = vadd.f32 %v6835_v19, %v2113_v34  ;;  %v2116_v58 = vadd.f32 %v6739_v47, %v8331_v3  ;;  %v2807_v19 = vadd.s32 144, %v6697_v43  ;;  %v8335_v34 = vld [vmem:[#allocation74_spill] sm:$0xff] }
 0x372   : > { %v3220_v16 = vrot.slane %v2737_v7, 7  ;;  %v8332_v7 = vld [vmem:[#allocation31_spill] sm:$0xff] }
 0x373   : > { %2634 = vmatmul.f32.gmra.mxu3 %v8324_v5  ;;  %v2744_v2 = vadd.f32 %v6854_v48, %v2116_v58 }
 0x374   : > { %v3254_v26 = vsel %vm3237_vm0, %v3219_v21, %v3220_v16  ;;  %v6928_v21 = vpop.f32.mrf.mxu0 }
 0x375   : > { %v6918_v59 = vadd.f32 %v3254_v26, %v2738_v41  ;;  %v6938_v26 = vpop.f32.mrf.mxu1 }
 0x376   : > { %v6914_v10 = vpop.f32.mrf.mxu3 }
 0x377   : > { %8325 = vst [vmem:[#allocation35_spill] sm:$0xff] %v6918_v59  ;;  %v2418_v33 = vpop.f32.mrf.mxu2 }
 0x378   : > { %v2740_v38 = vadd.f32 %v2418_v33, %v2000_v17  ;;  %v2951_v33 = vand.u32 15, %v2807_v19 }
 0x37a   : > { %v3221_v1 = vrot.slane %v2740_v38, 7  ;;  %v8336_v38 = vld [vmem:[#allocation34_spill] sm:$0xff]  ;;  %vm3353_vm9 = vcmp.eq.s32.totalorder %v2951_v33, 0 }
 0x37b   : > { %2637 = vmatmul.f32.gmra.mxu3 %v8329_v31  ;;  %v2119_v31 = vadd.f32 %v6752_v42, %v8335_v34  ;;  %v2809_v34 = vadd.s32 160, %v6697_v43 }
 0x37c   : > { %v3253_v55 = vsel %vm3237_vm0, %v3220_v16, %v3221_v1  ;;  %v6948_v47 = vpop.f32.mrf.mxu0 }
 0x37d   : > { %v3447_v9 = vsel %vm3351_vm8, 0.0, %v3253_v55  ;;  %v6956_v3 = vpop.f32.mrf.mxu1 }
 0x37e   : > { %v6925_v28 = vpop.f32.mrf.mxu3  ;;  %v6932_v60 = vadd.f32 %v3447_v9, %v2741_v52  ;;  %v8337_v52 = vld [vmem:[#allocation68_spill] sm:$0xff] }
 0x37f   : > { %v2421_v5 = vpop.f32.mrf.mxu2 }
 0x380   : > { %8330 = vst [vmem:[#allocation28_spill] sm:$0xff] %v6932_v60  ;;  %v2743_v41 = vadd.f32 %v2421_v5, %v8333_v4  ;;  %v8339_v4 = vld [vmem:[#allocation78_spill] sm:$0xff] }
 0x381   : > { %v2122_v42 = vadd.f32 %v6766_v6, %v8339_v4  ;;  %v2965_v6 = vand.u32 15, %v2809_v34 }
 0x382   : > { %v3222_v27 = vrot.slane %v2743_v41, 7 }
 0x383   : > { %2640 = vmatmul.f32.gmra.mxu3 %v8332_v7  ;;  %vm3355_vm10 = vcmp.eq.s32.totalorder %v2965_v6, 0 }
 0x384   : > { %v3252_v16 = vsel %vm3237_vm0, %v3221_v1, %v3222_v27  ;;  %v2747_v1 = vadd.f32 %v6874_v45, %v2119_v31  ;;  %v6965_v19 = vpop.f32.mrf.mxu0  ;;  %v2750_v45 = vadd.f32 %v6894_v37, %v2122_v42  ;;  %v8347_v37 = vld [vmem:[#allocation73_spill] sm:$0xff] }
 0x385   : > { %v6946_v24 = vadd.f32 %v3252_v16, %v2744_v2  ;;  %v8340_v2 = vld [vmem:[#allocation37_spill] sm:$0xff]  ;;  %v8341_v16 = vld [vmem:[#allocation71_spill] sm:$0xff] }
 0x386   : > { %v6942_v17 = vpop.f32.mrf.mxu3 }
 0x387   : > { %8334 = vst [vmem:[#allocation38_spill] sm:$0xff] %v6946_v24  ;;  %v2424_v62 = vpop.f32.mrf.mxu2 }
 0x388   : > { %v2746_v55 = vadd.f32 %v2424_v62, %v8337_v52  ;;  %v6975_v52 = vpop.f32.mrf.mxu1 }
 0x38a   : > { %v3223_v9 = vrot.slane %v2746_v55, 7  ;;  %v2790_v55 = vadd.s32 8, %v6697_v43 }
 0x38b   : > { %2643 = vmatmul.f32.gmra.mxu3 %v8336_v38 }
 0x38c   : > { %v3251_v58 = vsel %vm3237_vm0, %v3222_v27, %v3223_v9 }
 0x38d   : > { %v3449_v5 = vsel %vm3353_vm9, 0.0, %v3251_v58  ;;  %v8343_v58 = vld [vmem:[#allocation59_spill] sm:$0xff] }
 0x38e   : > { %v6954_v48 = vpop.f32.mrf.mxu3  ;;  %v6961_v7 = vadd.f32 %v3449_v5, %v2747_v1  ;;  %v8344_v5 = vld [vmem:[#allocation120_spill] sm:$0xff] }
 0x38f   : > { %v2427_v41 = vpop.f32.mrf.mxu2  ;;  %v2181_v4 = vadd.f32 %v8344_v5, %v8343_v58 }
 0x390   : > { %8338 = vst [vmem:[#allocation30_spill] sm:$0xff] %v6961_v7  ;;  %v2749_v33 = vadd.f32 %v2427_v41, %v8341_v16  ;;  %v8345_v41 = vld [vmem:[#allocation81_spill] sm:$0xff]  ;;  %v8346_v16 = vld [vmem:[#allocation39_spill] sm:$0xff]  ;;  %v2832_v7 = vand.u32 15, %v2790_v55  ;;  %v6999_v55 = vpop.f32.mrf.mxu1 }
 0x392   : > { %v3224_v62 = vrot.slane %v2749_v33, 7  ;;  %v8348_v33 = vld [vmem:[#allocation61_spill] sm:$0xff]  ;;  %vm3496_vm11 = vcmp.eq.s32.totalorder %v2832_v7, 15  ;;  %v8352_v7 = vld [vmem:[#allocation76_spill] sm:$0xff] }
 0x393   : > { %2646 = vmatmul.f32.gmra.mxu3 %v8340_v2  ;;  %v2125_v2 = vadd.f32 %v6777_v20, %v8345_v41 }
 0x394   : > { %v3250_v27 = vsel %vm3237_vm0, %v3223_v9, %v3224_v62  ;;  %v8349_v9 = vld [vmem:[#allocation121_spill] sm:$0xff] }
 0x395   : > { %v6973_v38 = vadd.f32 %v3250_v27, %v2750_v45  ;;  %v2184_v45 = vadd.f32 %v8349_v9, %v8348_v33  ;;  %v6986_v27 = vpop.f32.mrf.mxu0  ;;  %v2753_v58 = vadd.f32 %v6910_v32, %v2125_v2  ;;  %v8351_v33 = vld [vmem:[#allocation84_spill] sm:$0xff] }
 0x396   : > { %v2599_v31 = vpop.f32.mrf.mxu3  ;;  %v8354_v2 = vld [vmem:[#allocation124_spill] sm:$0xff] }
 0x397   : > { %8342 = vst [vmem:[#allocation41_spill] sm:$0xff] %v6973_v38  ;;  %v2430_v1 = vpop.f32.mrf.mxu2  ;;  %v6988_v38 = vadd.f32 %v2599_v31, %v2181_v4  ;;  %v2128_v31 = vadd.f32 %v6791_v22, %v8351_v33  ;;  %v8353_v4 = vld [vmem:[#allocation63_spill] sm:$0xff]  ;;  %v8355_v9 = vld [vmem:[#allocation20_spill] sm:$0xff] }
 0x398   : > { %v2752_v42 = vadd.f32 %v2430_v1, %v8347_v37 }
 0x399   : > { %v8111_v1 = vrot.slane %v6988_v38, 1 }
 0x39a   : > { %v3225_v34 = vrot.slane %v2752_v42, 7  ;;  %v2187_v42 = vadd.f32 %v8354_v2, %v8353_v4  ;;  %v2792_v2 = vadd.s32 24, %v6697_v43 }
 0x39b   : > { %2649 = vmatmul.f32.gmra.mxu3 %v8346_v16 }
 0x39c   : > { %v3249_v20 = vsel %vm3237_vm0, %v3224_v62, %v3225_v34 }
 0x39d   : > { %v3451_v41 = vsel %vm3355_vm10, 0.0, %v3249_v20  ;;  %v2811_v20 = vadd.s32 176, %v6697_v43  ;;  %v7017_v33 = vpop.f32.mrf.mxu0 }
 0x39e   : > { %v2602_v24 = vpop.f32.mrf.mxu3  ;;  %v6994_v16 = vadd.f32 %v3451_v41, %v2753_v58 }
 0x39f   : > { %v2700_v5 = vadd.f32 %v2602_v24, %v2184_v45  ;;  %v2433_v6 = vpop.f32.mrf.mxu2  ;;  %v7008_v24 = vld [vmem:[%s8088_s6] ss:$0 sm:$0xff] }
 0x3a0   : > { %8350 = vst [vmem:[#allocation33_spill] sm:$0xff] %v6994_v16  ;;  %v2755_v62 = vadd.f32 %v2433_v6, %v8352_v7 }
 0x3a1   : > { %v3272_v37 = vrot.slane %v2700_v5, 1  ;;  %v2756_v5 = vadd.f32 %v6928_v21, %v2128_v31  ;;  %v8357_v21 = vld [vmem:[#allocation88_spill] sm:$0xff] }
 0x3a2   : > { %v3226_v58 = vrot.slane %v2755_v62, 7  ;;  %v2979_v62 = vand.u32 15, %v2811_v20  ;;  %v2131_v31 = vadd.f32 %v6806_v53, %v8357_v21  ;;  %v2213_v20 = vpop.f32.mrf.mxu1 }
 0x3a3   : > { %v3332_v32 = vsel %vm3302_vm12, %v8111_v1, %v3272_v37  ;;  %2652 = vmatmul.f32.gmra.mxu3 %v6039_v25 }
 0x3a4   : > { %v3592_v22 = vsel %vm3496_vm11, 0.0, %v3332_v32  ;;  %v3248_v25 = vsel %vm3237_vm0, %v3225_v34, %v3226_v58  ;;  %v8358_v34 = vld [vmem:[#allocation79_spill] sm:$0xff]  ;;  %vm3357_vm13 = vcmp.eq.s32.totalorder %v2979_v62, 0  ;;  %v2759_v21 = vadd.f32 %v6948_v47, %v2131_v31  ;;  %v8362_v62 = vld [vmem:[#allocation92_spill] sm:$0xff]  ;;  %v8366_v31 = vld [vmem:[#allocation118_spill] sm:$0xff] }
 0x3a5   : > { %v3624_v45 = vadd.f32 %v3592_v22, %v8355_v9  ;;  %v7024_v32 = vadd.f32 %v3248_v25, %v2756_v5  ;;  %v8359_v5 = vld [vmem:[#allocation66_spill] sm:$0xff] }
 0x3a6   : > { %v2605_v41 = vpop.f32.mrf.mxu3 }
 0x3a7   : > { %v7020_v1 = vadd.f32 %v7008_v24, %v3624_v45  ;;  %v2703_v6 = vadd.f32 %v2605_v41, %v2187_v42  ;;  %8356 = vst [vmem:[#allocation43_spill] sm:$0xff] %v7024_v32  ;;  %v2436_v4 = vpop.f32.mrf.mxu2  ;;  %v8360_v41 = vld [vmem:[#allocation126_spill] sm:$0xff] }
 0x3a8   : > { %v2758_v42 = vadd.f32 %v2436_v4, %v8358_v34  ;;  %v2190_v25 = vadd.f32 %v8360_v41, %v8359_v5  ;;  %v2561_v34 = vpop.f32.mrf.mxu0 }
 0x3a9   : > { %v4625_v7 = vmul.f32 -1.442695, %v7020_v1  ;;  %v3273_v22 = vrot.slane %v2703_v6, 1 }
 0x3aa   : > { %v3227_v6 = vrot.slane %v2758_v42, 7 }
 0x3ab   : > { %4917 = vpow2.f32 %v4625_v7  ;;  %v3331_v9 = vsel %vm3302_vm12, %v3272_v37, %v3273_v22  ;;  %2655 = vmatmul.f32.gmra.mxu3 %v6073_v39  ;;  %v2846_v7 = vand.u32 15, %v2792_v2  ;;  %v8365_v2 = vld [vmem:[#allocation57_spill] sm:$0xff] }
 0x3ac   : > { %v3625_v45 = vadd.f32 %v6735_v35, %v3331_v9  ;;  %v3247_v39 = vsel %vm3237_vm0, %v3226_v58, %v3227_v6 }
 0x3ad   : > { %v3453_v35 = vsel %vm3357_vm13, 0.0, %v3247_v39  ;;  %vm7050_vm14 = vcmp.eq.s32.totalorder %v2846_v7, 15  ;;  %v8368_v39 = vld [vmem:[#allocation128_spill] sm:$0xff] }
 0x3ae   : > { %v7038_v32 = vadd.f32 %v7008_v24, %v3625_v45  ;;  %v2608_v53 = vpop.f32.mrf.mxu3  ;;  %v7044_v5 = vadd.f32 %v3453_v35, %v2759_v21  ;;  %v2134_v45 = vadd.f32 %v6823_v11, %v8362_v62  ;;  %v8369_v11 = vld [vmem:[#allocation82_spill] sm:$0xff]  ;;  %v8370_v7 = vld [vmem:[#allocation72_spill] sm:$0xff]  ;;  %v8372_v62 = vld [vmem:[#allocation75_spill] sm:$0xff] }
 0x3af   : > { %v2706_v37 = vadd.f32 %v2608_v53, %v2190_v25  ;;  %v2439_v58 = vpop.f32.mrf.mxu2  ;;  %v7056_v25 = vadd.f32 %v8366_v31, %v8365_v2  ;;  %v8367_v53 = vld [vmem:[#allocation69_spill] sm:$0xff] }
 0x3b0   : > { %v4626_v4 = vmul.f32 -1.442695, %v7038_v32  ;;  %8361 = vst [vmem:[#allocation36_spill] sm:$0xff] %v7044_v5  ;;  %v2193_v21 = vadd.f32 %v8368_v39, %v8367_v53  ;;  %v7064_v35 = vadd.f32 %v2439_v58, %v8369_v11  ;;  %v8373_v5 = vld [vmem:[#allocation19_spill] sm:$0xff]  ;;  %v8374_v2 = vld [vmem:[#allocation77_spill] sm:$0xff]  ;;  %v8375_v53 = vld [vmem:[#allocation80_spill] sm:$0xff] }
 0x3b1   : > { %v4918_v9 = vpop.eup %4917  ;;  %v3274_v42 = vrot.slane %v2706_v37, 1  ;;  %v7070_v16 = vadd.f32 %v8373_v5, %v8372_v62  ;;  %v7074_v31 = vadd.f32 %v6938_v26, %v8374_v2  ;;  %v2813_v39 = vadd.s32 192, %v6697_v43  ;;  %v8376_v11 = vld [vmem:[#allocation83_spill] sm:$0xff] }
 0x3b2   : > { %v7048_v41 = vadd.f32 1.0, %v4918_v9  ;;  %4919 = vpow2.f32 %v4626_v4  ;;  %v8371_v4 = vld [vmem:[#allocation130_spill] sm:$0xff]  ;;  %v3228_v58 = vrot.slane %v7064_v35, 7  ;;  %v7087_v5 = vadd.f32 %v6975_v52, %v8376_v11  ;;  %v8377_v2 = vld [vmem:[#allocation95_spill] sm:$0xff] }
 0x3b3   : > { %v3330_v37 = vsel %vm3302_vm12, %v3273_v22, %v3274_v42  ;;  %2658 = vmatmul.f32.gmra.mxu3 %v6115_v56  ;;  %v2196_v9 = vadd.f32 %v8371_v4, %v8370_v7  ;;  %v7079_v22 = vadd.f32 %v6956_v3, %v8375_v53  ;;  %v2762_v26 = vadd.f32 %v6965_v19, %v2134_v45  ;;  %v2216_v3 = vpop.f32.mrf.mxu1  ;;  %v8379_v11 = vld [vmem:[#allocation102_spill] sm:$0xff] }
 0x3b4   : > { %4921 = vrcp.f32 %v7048_v41  ;;  %v3594_v56 = vsel %vm7050_vm14, 0.0, %v3330_v37  ;;  %v2794_v62 = vadd.s32 40, %v6697_v43  ;;  %v2137_v47 = vadd.f32 %v6837_v57, %v8377_v2  ;;  %v8378_v37 = vld [vmem:[#allocation98_spill] sm:$0xff] }
 0x3b5   : > { %v3626_v7 = vadd.f32 %v3594_v56, %v6745_v54  ;;  %v2140_v35 = vadd.f32 %v6852_v51, %v8378_v37  ;;  %v3246_v53 = vsel %vm3237_vm0, %v3227_v6, %v3228_v58  ;;  %v2143_v19 = vadd.f32 %v6866_v40, %v8379_v11  ;;  %v8380_v54 = vld [vmem:[#allocation106_spill] sm:$0xff]  ;;  %v8384_v40 = vld [vmem:[#allocation89_spill] sm:$0xff] }
 0x3b6   : > { %v2611_v4 = vpop.f32.mrf.mxu3  ;;  %v2146_v45 = vadd.f32 %v6883_v44, %v8380_v54  ;;  %v7107_v57 = vadd.f32 %v3246_v53, %v2762_v26  ;;  %v8383_v2 = vld [vmem:[#allocation86_spill] sm:$0xff]  ;;  %v7117_v11 = vadd.f32 %v2213_v20, %v8384_v40  ;;  %v8385_v44 = vld [vmem:[#allocation91_spill] sm:$0xff]  ;;  %v2860_v53 = vand.u32 15, %v2794_v62 }
 0x3b7   : > { %v7098_v60 = vadd.f32 %v2611_v4, %v2193_v21  ;;  %v7105_v56 = vadd.f32 %v7008_v24, %v3626_v7  ;;  %v7111_v51 = vadd.f32 %v6999_v55, %v8383_v2  ;;  %v2993_v4 = vand.u32 15, %v2813_v39  ;;  %v2442_v26 = vpop.f32.mrf.mxu2  ;;  %v2564_v55 = vpop.f32.mrf.mxu0 }
 0x3b8   : > { %v4920_v52 = vpop.eup %4919  ;;  %8382 = vst [vmem:[#allocation46_spill] sm:$0xff] %v7107_v57  ;;  %v7120_v54 = vadd.f32 %v2216_v3, %v8385_v44  ;;  %v2765_v57 = vadd.f32 %v6986_v27, %v2137_v47  ;;  %v7131_v20 = vadd.f32 %v2561_v34, %v2143_v19  ;;  %v7133_v39 = vadd.f32 %v2564_v55, %v2146_v45  ;;  %v8387_v47 = vld [vmem:[#allocation85_spill] sm:$0xff] }
 0x3b9   : > { %v7113_v6 = vadd.f32 1.0, %v4920_v52  ;;  %v3275_v21 = vrot.slane %v7098_v60, 1  ;;  %v4627_v7 = vmul.f32 -1.442695, %v7105_v56  ;;  %v7125_v52 = vadd.f32 %v7017_v33, %v2140_v35  ;;  %v8386_v33 = vld [vmem:[#allocation29_spill] sm:$0xff] }
 0x3ba   : > { %v4922_v37 = vpop.eup %4921  ;;  %v2764_v35 = vadd.f32 %v2442_v26, %v8387_v47  ;;  %vm7139_vm15 = vcmp.eq.s32.totalorder %v2993_v4, 0  ;;  %v3845_v34 = vand.u32 2147483648, %v7048_v41  ;;  %vm7145_vm2 = vcmp.eq.s32.totalorder %v2860_v53, 15 }
 0x3bb   : > { %v3835_v60 = vmul.f32 %v4922_v37, %v7048_v41  ;;  %4923 = vrcp.f32 %v7113_v6  ;;  %2661 = vmatmul.f32.gmra.mxu3 %v6163_v49  ;;  %v3329_v27 = vsel %vm3302_vm12, %v3274_v42, %v3275_v21  ;;  %vm3840_vm1 = vweird.f32 %v4922_v37 }
 0x3bc   : > { %4925 = vpow2.f32 %v4627_v7  ;;  %v3627_v3 = vadd.f32 %v8386_v33, %v3329_v27  ;;  %v3843_v49 = vand.u32 2147483647, %v7048_v41  ;;  %v3229_v4 = vrot.slane %v2764_v35, 7 }
 0x3bd   : > { %v3836_v62 = vsub.f32 1.0, %v3835_v60  ;;  %vm3839_vm3 = vweird.f32 %v7048_v41  ;;  %v7161_v7 = vadd.s32 208, %v6697_v43  ;;  %v7164_v26 = vadd.s32 56, %v6697_v43 }
 0x3be   : > { %v2614_v19 = vpop.f32.mrf.mxu3  ;;  %v7155_v40 = vadd.f32 %v7008_v24, %v3627_v3  ;;  %v3245_v27 = vsel %vm3237_vm0, %v3228_v58, %v3229_v4  ;;  %vm3841_vm5 = vmor %vm3839_vm3, %vm3840_vm1  ;;  %vm3844_vm6 = vcmp.eq.f32.partialorder %v3843_v49, 8.507059e+37  ;;  %v3846_v41 = vor.u32 1.1754944e-38, %v3845_v34  ;;  %v8392_v34 = vld [vmem:[#allocation87_spill] sm:$0xff] }
 0x3bf   : > { %v3837_v42 = vmul.f32 %v4922_v37, %v3836_v62  ;;  %v7157_v44 = vadd.f32 %v2614_v19, %v2196_v9  ;;  %v3455_v3 = vsel %vm7139_vm15, 0.0, %v3245_v27  ;;  %v2445_v47 = vpop.f32.mrf.mxu2  ;;  %v8394_v27 = vld [vmem:[#allocation109_spill] sm:$0xff]  ;;  %vm3854_vm8 = vweird.f32 %v7113_v6 }
 0x3c0   : > { %v4628_v60 = vmul.f32 -1.442695, %v7155_v40  ;;  %v7183_v59 = vadd.f32 %v2445_v47, %v8392_v34 }
 0x3c1   : > { %v4924_v53 = vpop.eup %4923  ;;  %v3838_v55 = vadd.f32 %v4922_v37, %v3837_v42  ;;  %v3276_v9 = vrot.slane %v7157_v44, 1  ;;  %v7177_v42 = vadd.f32 %v3455_v3, %v2765_v57  ;;  %v8395_v3 = vld [vmem:[#allocation22_spill] sm:$0xff] }
 0x3c2   : > { %v4926_v62 = vpop.eup %4925  ;;  %v3850_v33 = vmul.f32 %v4924_v53, %v7113_v6  ;;  %4927 = vpow2.f32 %v4628_v60  ;;  %vm3855_vm7 = vweird.f32 %v4924_v53  ;;  %v2567_v60 = vpop.f32.mrf.mxu0 }
 0x3c3   : > { %v3842_v35 = vsel %vm3841_vm5, %v4922_v37, %v3838_v55  ;;  %v7175_v19 = vadd.f32 1.0, %v4926_v62  ;;  %2664 = vmatmul.f32.gmra.mxu3 %v6211_v23  ;;  %v3328_v49 = vsel %vm3302_vm12, %v3275_v21, %v3276_v9  ;;  %v3858_v37 = vand.u32 2147483647, %v7113_v6  ;;  %vm3856_vm9 = vmor %vm3854_vm8, %vm3855_vm7 }
 0x3c4   : > { %v3847_v58 = vsel %vm3844_vm6, %v3846_v41, %v3842_v35  ;;  %v3851_v44 = vsub.f32 1.0, %v3850_v33  ;;  %v3860_v55 = vand.u32 2147483648, %v7113_v6  ;;  %v3596_v57 = vsel %vm7145_vm2, 0.0, %v3328_v49  ;;  %v5046_v41 = vld [vmem:[%s5466_s23 + $0x8] sm:$0xff] }
 0x3c5   : > { %v4300_v2 = vmul.f32 %v3847_v58, %v7020_v1  ;;  %4929 = vrcp.f32 %v7175_v19  ;;  %v3230_v21 = vrot.slane %v7183_v59, 7  ;;  %v2149_v62 = vadd.f32 %v6897_v61, %v8394_v27  ;;  %v8396_v27 = vld [vmem:[#allocation52_spill] sm:$0xff] }
 0x3c6   : > { %v3852_v23 = vmul.f32 %v4924_v53, %v3851_v44  ;;  %v2617_v1 = vpop.f32.mrf.mxu3  ;;  %v3628_v47 = vadd.f32 %v3596_v57, %v8395_v3  ;;  %v3007_v44 = vand.u32 15, %v7161_v7  ;;  %v3861_v61 = vor.u32 1.1754944e-38, %v3860_v55 }
 0x3c7   : > { %v4332_v33 = vadd.f32 %v5046_v41, %v4300_v2  ;;  %v2715_v35 = vadd.f32 %v2617_v1, %v7070_v16  ;;  %v3244_v45 = vsel %vm3237_vm0, %v3229_v4, %v3230_v21  ;;  %vm3859_vm10 = vcmp.eq.f32.partialorder %v3858_v37, 8.507059e+37  ;;  %v2448_v4 = vpop.f32.mrf.mxu2 }
 0x3c8   : > { %v3853_v58 = vadd.f32 %v4924_v53, %v3852_v23  ;;  %v4928_v59 = vpop.eup %4927  ;;  %v7210_v49 = vadd.f32 %v7008_v24, %v3628_v47  ;;  %v7213_v34 = vadd.f32 %v3244_v45, %v7125_v52  ;;  %v2874_v7 = vand.u32 15, %v7164_v26  ;;  %v8397_v52 = vld [vmem:[#allocation90_spill] sm:$0xff]  ;;  %v5047_v47 = vld [vmem:[%s5466_s23 + $0x10] sm:$0xff] }
 0x3c9   : > { %4365 = vst.msk [vmem:[%s7192_s16 + $0x8] sm:$0xff] %vm4363_vm4, %v4332_v33  ;;  %v3277_v16 = vrot.slane %v2715_v35, 1  ;;  %v7215_v6 = vadd.f32 1.0, %v4928_v59  ;;  %v2770_v41 = vadd.f32 %v2448_v4, %v8397_v52  ;;  %v7223_v33 = vadd.f32 %v2567_v60, %v2149_v62  ;;  %v8400_v62 = vld [vmem:[#allocation32_spill] sm:$0xff]  ;;  %v8401_v59 = vld [vmem:[#allocation111_spill] sm:$0xff] }
 0x3ca   : > { %v3857_v2 = vsel %vm3856_vm9, %v4924_v53, %v3853_v58  ;;  %v4629_v1 = vmul.f32 -1.442695, %v7210_v49  ;;  %v3873_v26 = vand.u32 2147483647, %v7175_v19  ;;  %v3875_v3 = vand.u32 2147483648, %v7175_v19 }
 0x3cb   : > { %v4930_v23 = vpop.eup %4929  ;;  %v3862_v57 = vsel %vm3859_vm10, %v3861_v61, %v3857_v2  ;;  %v3327_v55 = vsel %vm3302_vm12, %v3276_v9, %v3277_v16  ;;  %2667 = vmatmul.f32.gmra.mxu3 %v8396_v27  ;;  %4931 = vrcp.f32 %v7215_v6  ;;  %vm7230_vm11 = vcmp.eq.s32.totalorder %v3007_v44, 0 }
 0x3cc   : > { %v4301_v53 = vmul.f32 %v3862_v57, %v7038_v32  ;;  %v3865_v37 = vmul.f32 %v4930_v23, %v7175_v19  ;;  %4933 = vpow2.f32 %v4629_v1  ;;  %v3629_v58 = vadd.f32 %v8400_v62, %v3327_v55  ;;  %v2570_v1 = vpop.f32.mrf.mxu0 }
 0x3cd   : > { %v3231_v32 = vrot.slane %v2770_v41, 7  ;;  %v7238_v61 = vadd.f32 %v6914_v10, %v8401_v59  ;;  %vm3869_vm13 = vweird.f32 %v7175_v19  ;;  %vm7244_vm14 = vcmp.eq.s32.totalorder %v2874_v7, 15 }
 0x3ce   : > { %v4333_v35 = vadd.f32 %v5047_v47, %v4301_v53  ;;  %v3866_v60 = vsub.f32 1.0, %v3865_v37  ;;  %v2620_v45 = vpop.f32.mrf.mxu3  ;;  %vm3870_vm15 = vweird.f32 %v4930_v23  ;;  %v7251_v57 = vadd.f32 %v7008_v24, %v3629_v58 }
 0x3cf   : > { %v7242_v2 = vadd.f32 %v2620_v45, %v7074_v31  ;;  %v3243_v10 = vsel %vm3237_vm0, %v3230_v21, %v3231_v32  ;;  %vm7255_vm1 = vcmp.eq.f32.partialorder %v3873_v26, 8.507059e+37  ;;  %v3876_v31 = vor.u32 1.1754944e-38, %v3875_v3  ;;  %v2451_v47 = vpop.f32.mrf.mxu2  ;;  %vm3871_vm2 = vmor %vm3869_vm13, %vm3870_vm15 }
 0x3d0   : > { %4366 = vst.msk [vmem:[%s7192_s16 + $0x10] sm:$0xff] %vm4363_vm4, %v4333_v35  ;;  %v3867_v4 = vmul.f32 %v4930_v23, %v3866_v60  ;;  %v3457_v7 = vsel %vm7230_vm11, 0.0, %v3243_v10  ;;  %v4630_v53 = vmul.f32 -1.442695, %v7251_v57  ;;  %v2817_v21 = vadd.s32 224, %v6697_v43  ;;  %v8406_v35 = vld [vmem:[#allocation93_spill] sm:$0xff] }
 0x3d1   : > { %v3278_v27 = vrot.slane %v7242_v2, 1  ;;  %v4932_v52 = vpop.eup %4931  ;;  %v7264_v37 = vadd.f32 %v3457_v7, %v7131_v20  ;;  %v7275_v60 = vadd.f32 %v2451_v47, %v8406_v35  ;;  %v2798_v20 = vadd.s32 72, %v6697_v43  ;;  %v5048_v47 = vld [vmem:[%s5466_s23 + $0x18] sm:$0xff] }
 0x3d2   : > { %v3868_v41 = vadd.f32 %v4930_v23, %v3867_v4  ;;  %v4934_v26 = vpop.eup %4933  ;;  %v3880_v3 = vmul.f32 %v4932_v52, %v7215_v6  ;;  %4935 = vpow2.f32 %v4630_v53  ;;  %v3888_v10 = vand.u32 2147483647, %v7215_v6  ;;  %v8408_v53 = vld [vmem:[#allocation113_spill] sm:$0xff] }
 0x3d3   : > { %v3326_v9 = vsel %vm3302_vm12, %v3277_v16, %v3278_v27  ;;  %2670 = vmatmul.f32.gmra.mxu3 %v6288_v14  ;;  %v7278_v58 = vadd.f32 1.0, %v4934_v26  ;;  %v8407_v16 = vld [vmem:[#allocation25_spill] sm:$0xff]  ;;  %v3232_v14 = vrot.slane %v7275_v60, 7  ;;  %vm3885_vm3 = vweird.f32 %v4932_v52 }
 0x3d4   : > { %v3872_v62 = vsel %vm3871_vm2, %v4930_v23, %v3868_v41  ;;  %v3598_v19 = vsel %vm7244_vm14, 0.0, %v3326_v9  ;;  %v3881_v59 = vsub.f32 1.0, %v3880_v3  ;;  %v3890_v23 = vand.u32 2147483648, %v7215_v6  ;;  %v7295_v41 = vpop.f32.mrf.mxu1  ;;  %v2573_v35 = vpop.f32.mrf.mxu0 }
 0x3d5   : > { %v3877_v45 = vsel %vm7255_vm1, %v3876_v31, %v3872_v62  ;;  %v3630_v2 = vadd.f32 %v3598_v19, %v8407_v16  ;;  %4937 = vrcp.f32 %v7278_v58  ;;  %v3242_v31 = vsel %vm3237_vm0, %v3231_v32, %v3232_v14 }
 0x3d6   : > { %v4302_v4 = vmul.f32 %v3877_v45, %v7105_v56  ;;  %v2623_v7 = vpop.f32.mrf.mxu3  ;;  %v3882_v44 = vmul.f32 %v4932_v52, %v3881_v59  ;;  %v2155_v56 = vadd.f32 %v6925_v28, %v8408_v53  ;;  %v7301_v3 = vadd.f32 %v3242_v31, %v7133_v39 }
 0x3d7   : > { %v7291_v55 = vadd.f32 %v7008_v24, %v3630_v2  ;;  %v2721_v9 = vadd.f32 %v2623_v7, %v7079_v22  ;;  %vm3884_vm5 = vweird.f32 %v7215_v6  ;;  %v3021_v19 = vand.u32 15, %v2817_v21  ;;  %v2454_v59 = vpop.f32.mrf.mxu2  ;;  %v8409_v22 = vld [vmem:[#allocation96_spill] sm:$0xff] }
 0x3d8   : > { %v4334_v26 = vadd.f32 %v5048_v47, %v4302_v4  ;;  %v3883_v60 = vadd.f32 %v4932_v52, %v3882_v44  ;;  %v4936_v32 = vpop.eup %4935  ;;  %vm3886_vm6 = vmor %vm3884_vm5, %vm3885_vm3  ;;  %vm3889_vm7 = vcmp.eq.f32.partialorder %v3888_v10, 8.507059e+37  ;;  %v3891_v28 = vor.u32 1.1754944e-38, %v3890_v23 }
 0x3d9   : > { %v4631_v62 = vmul.f32 -1.442695, %v7291_v55  ;;  %v3279_v45 = vrot.slane %v2721_v9, 1  ;;  %v2888_v39 = vand.u32 15, %v2798_v20  ;;  %v7309_v2 = vadd.f32 1.0, %v4936_v32 }
 0x3da   : > { %4367 = vst.msk [vmem:[%s7192_s16 + $0x18] sm:$0xff] %vm4363_vm4, %v4334_v26  ;;  %v3887_v16 = vsel %vm3886_vm6, %v4932_v52, %v3883_v60  ;;  %v7313_v6 = vadd.f32 %v2454_v59, %v8409_v22  ;;  %v7316_v4 = vadd.f32 %v2570_v1, %v7238_v61  ;;  %v7318_v7 = vadd.f32 %v2573_v35, %v2155_v56  ;;  %v8410_v52 = vld [vmem:[#allocation116_spill] sm:$0xff] }
 0x3db   : > { %4939 = vpow2.f32 %v4631_v62  ;;  %2673 = vmatmul.f32.gmra.mxu3 %v6323_v29  ;;  %v4938_v21 = vpop.eup %4937  ;;  %v3892_v10 = vsel %vm3889_vm7, %v3891_v28, %v3887_v16  ;;  %v3325_v20 = vsel %vm3302_vm12, %v3278_v27, %v3279_v45  ;;  %v7324_v23 = vadd.f32 %v6942_v17, %v8410_v52  ;;  %v5050_v17 = vld [vmem:[%s5466_s23 + $0x28] sm:$0xff] }
 0x3dc   : > { %v4303_v29 = vmul.f32 %v3892_v10, %v7155_v40  ;;  %v3895_v44 = vmul.f32 %v4938_v21, %v7278_v58  ;;  %4941 = vrcp.f32 %v7309_v2  ;;  %v7331_v61 = vadd.f32 %v6954_v48, %v7056_v25  ;;  %v5049_v40 = vld [vmem:[%s5466_s23 + $0x20] sm:$0xff]  ;;  %v7358_v62 = vpop.f32.mrf.mxu1 }
 0x3dd   : > { %v3631_v1 = vadd.f32 %v6814_v63, %v3325_v20  ;;  %vm7334_vm8 = vcmp.eq.s32.totalorder %v3021_v19, 0  ;;  %vm7338_vm9 = vcmp.eq.s32.totalorder %v2888_v39, 15  ;;  %v3233_v47 = vrot.slane %v7313_v6, 7  ;;  %v8415_v10 = vld [vmem:[#allocation99_spill] sm:$0xff] }
 0x3de   : > { %v2626_v27 = vpop.f32.mrf.mxu3  ;;  %v4335_v53 = vadd.f32 %v5049_v40, %v4303_v29  ;;  %v3896_v56 = vsub.f32 1.0, %v3895_v44  ;;  %vm3899_vm10 = vweird.f32 %v7278_v58  ;;  %v3903_v63 = vand.u32 2147483647, %v7278_v58 }
 0x3df   : > { %v7345_v26 = vadd.f32 %v2626_v27, %v7087_v5  ;;  %v3905_v48 = vand.u32 2147483648, %v7278_v58  ;;  %v7351_v25 = vadd.f32 %v7008_v24, %v3631_v1  ;;  %vm3900_vm11 = vweird.f32 %v4938_v21  ;;  %v2457_v59 = vpop.f32.mrf.mxu2 }
 0x3e0   : > { %4368 = vst.msk [vmem:[%s7192_s16 + $0x20] sm:$0xff] %vm4363_vm4, %v4335_v53  ;;  %v3897_v35 = vmul.f32 %v4938_v21, %v3896_v56  ;;  %v3241_v60 = vsel %vm3237_vm0, %v3232_v14, %v3233_v47  ;;  %v2819_v39 = vadd.s32 240, %v6697_v43  ;;  %v7373_v20 = vadd.f32 %v2457_v59, %v8415_v10  ;;  %vm3901_vm13 = vmor %vm3899_vm10, %vm3900_vm11 }
 0x3e1   : > { %v4940_v9 = vpop.eup %4939  ;;  %v3280_v5 = vrot.slane %v7345_v26, 1  ;;  %v4632_v32 = vmul.f32 -1.442695, %v7351_v25  ;;  %v3459_v28 = vsel %vm7334_vm8, 0.0, %v3241_v60  ;;  %vm3904_vm14 = vcmp.eq.f32.partialorder %v3903_v63, 8.507059e+37 }
 0x3e2   : > { %v7360_v19 = vadd.f32 1.0, %v4940_v9  ;;  %v4942_v16 = vpop.eup %4941  ;;  %v3898_v22 = vadd.f32 %v4938_v21, %v3897_v35  ;;  %v7367_v6 = vadd.f32 %v3459_v28, %v7223_v33  ;;  %v3906_v52 = vor.u32 1.1754944e-38, %v3905_v48 }
 0x3e3   : > { %v3324_v14 = vsel %vm3302_vm12, %v3279_v45, %v3280_v5  ;;  %2676 = vmatmul.f32.gmra.mxu3 %v6344_v12  ;;  %v3910_v29 = vmul.f32 %v4942_v16, %v7309_v2  ;;  %v3918_v44 = vand.u32 2147483647, %v7309_v2  ;;  %v2800_v12 = vadd.s32 88, %v6697_v43 }
 0x3e4   : > { %4943 = vrcp.f32 %v7360_v19  ;;  %v3902_v33 = vsel %vm3901_vm13, %v4938_v21, %v3898_v22  ;;  %v3600_v31 = vsel %vm7338_vm9, 0.0, %v3324_v14  ;;  %v3234_v58 = vrot.slane %v7373_v20, 7  ;;  %v7415_v10 = vpop.f32.mrf.mxu1 }
 0x3e5   : > { %4945 = vpow2.f32 %v4632_v32  ;;  %v3907_v45 = vsel %vm3904_vm14, %v3906_v52, %v3902_v33  ;;  %v3911_v1 = vsub.f32 1.0, %v3910_v29  ;;  %v3920_v53 = vand.u32 2147483648, %v7309_v2 }
 0x3e6   : > { %v2629_v27 = vpop.f32.mrf.mxu3  ;;  %v4304_v40 = vmul.f32 %v3907_v45, %v7210_v49  ;;  %v3632_v21 = vadd.f32 %v3600_v31, %v6828_v30  ;;  %v3035_v56 = vand.u32 15, %v2819_v39  ;;  %vm3915_vm15 = vweird.f32 %v4942_v16 }
 0x3e7   : > { %v3912_v26 = vmul.f32 %v4942_v16, %v3911_v1  ;;  %v3240_v63 = vsel %vm3237_vm0, %v3233_v47, %v3234_v58  ;;  %v7391_v48 = vadd.f32 %v2629_v27, %v7111_v51  ;;  %v2902_v60 = vand.u32 15, %v2800_v12  ;;  %v2460_v47 = vpop.f32.mrf.mxu2 }
 0x3e8   : > { %v4336_v9 = vadd.f32 %v5050_v17, %v4304_v40  ;;  %v7395_v35 = vadd.f32 %v7008_v24, %v3632_v21  ;;  %v7398_v49 = vadd.f32 %v3240_v63, %v7316_v4  ;;  %vm3914_vm1 = vweird.f32 %v7309_v2  ;;  %v8418_v2 = vld [vmem:[#allocation101_spill] sm:$0xff]  ;;  %v2576_v17 = vpop.f32.mrf.mxu0 }
 0x3e9   : > { %v3913_v32 = vadd.f32 %v4942_v16, %v3912_v26  ;;  %vm7401_vm2 = vcmp.eq.f32.partialorder %v3918_v44, 8.507059e+37  ;;  %v3281_v51 = vrot.slane %v7391_v48, 1  ;;  %vm3916_vm3 = vmor %vm3914_vm1, %vm3915_vm15  ;;  %v3921_v39 = vor.u32 1.1754944e-38, %v3920_v53  ;;  %v5051_v53 = vld [vmem:[%s5466_s23 + $0x30] sm:$0xff] }
 0x3ea   : > { %v4944_v30 = vpop.eup %4943  ;;  %4369 = vst.msk [vmem:[%s7192_s16 + $0x28] sm:$0xff] %vm4363_vm4, %v4336_v9  ;;  %v4633_v22 = vmul.f32 -1.442695, %v7395_v35  ;;  %v7413_v14 = vadd.f32 %v2460_v47, %v8418_v2  ;;  %vm7421_vm5 = vcmp.eq.s32.totalorder %v3035_v56, 0  ;;  %v3935_v1 = vand.u32 2147483648, %v7360_v19 }
 0x3eb   : > { %v4946_v59 = vpop.eup %4945  ;;  %v3925_v4 = vmul.f32 %v4944_v30, %v7360_v19  ;;  %2679 = vmatmul.f32.gmra.mxu3 %v6367_v18  ;;  %v3917_v20 = vsel %vm3916_vm3, %v4942_v16, %v3913_v32  ;;  %v3323_v29 = vsel %vm3302_vm12, %v3280_v5, %v3281_v51  ;;  %v3933_v16 = vand.u32 2147483647, %v7360_v19 }
 0x3ec   : > { %v7417_v52 = vadd.f32 1.0, %v4946_v59  ;;  %v3922_v44 = vsel %vm7401_vm2, %v3921_v39, %v3917_v20  ;;  %4947 = vpow2.f32 %v4633_v22  ;;  %v3633_v12 = vadd.f32 %v6845_v15, %v3323_v29  ;;  %v7472_v33 = vpop.f32.mrf.mxu1 }
 0x3ed   : > { %v3926_v18 = vsub.f32 1.0, %v3925_v4  ;;  %v4305_v45 = vmul.f32 %v3922_v44, %v7251_v57  ;;  %vm3930_vm6 = vweird.f32 %v4944_v30  ;;  %v3235_v40 = vrot.slane %v7413_v14, 7  ;;  %v8424_v4 = vld [vmem:[#allocation94_spill] sm:$0xff] }
 0x3ee   : > { %4949 = vrcp.f32 %v7417_v52  ;;  %v2632_v5 = vpop.f32.mrf.mxu3  ;;  %v7433_v27 = vadd.f32 %v7008_v24, %v3633_v12  ;;  %vm7440_vm7 = vcmp.eq.s32.totalorder %v2902_v60, 15  ;;  %v2825_v56 = vand.u32 15, %v6697_v43 }
 0x3ef   : > { %v3927_v31 = vmul.f32 %v4944_v30, %v3926_v18  ;;  %v4337_v21 = vadd.f32 %v5051_v53, %v4305_v45  ;;  %v7438_v15 = vadd.f32 %v2632_v5, %v7117_v11  ;;  %vm3929_vm8 = vweird.f32 %v7360_v19  ;;  %v2463_v32 = vpop.f32.mrf.mxu2 }
 0x3f0   : > { %v4634_v63 = vmul.f32 -1.442695, %v7433_v27  ;;  %v3239_v48 = vsel %vm3237_vm0, %v3234_v58, %v3235_v40  ;;  %vm3931_vm9 = vmor %vm3929_vm8, %vm3930_vm6  ;;  %vm3934_vm10 = vcmp.eq.f32.partialorder %v3933_v16, 8.507059e+37  ;;  %v3936_v11 = vor.u32 1.1754944e-38, %v3935_v1  ;;  %v8423_v58 = vld [vmem:[#allocation104_spill] sm:$0xff] }
 0x3f1   : > { %v3928_v26 = vadd.f32 %v4944_v30, %v3927_v31  ;;  %4370 = vst.msk [vmem:[%s7192_s16 + $0x30] sm:$0xff] %vm4363_vm4, %v4337_v21  ;;  %v3461_v9 = vsel %vm7421_vm5, 0.0, %v3239_v48  ;;  %v3282_v60 = vrot.slane %v7438_v15, 1  ;;  %v2785_v59 = vadd.f32 %v2463_v32, %v8423_v58  ;;  %v8429_v32 = vld [vmem:[#allocation107_spill] sm:$0xff] }
 0x3f2   : > { %v4948_v28 = vpop.eup %4947  ;;  %4951 = vpow2.f32 %v4634_v63  ;;  %v7455_v19 = vadd.f32 %v3461_v9, %v7318_v7  ;;  %v2220_v22 = vadd.f32 %v7295_v41, %v8424_v4  ;;  %v2786_v7 = vadd.f32 %v2576_v17, %v7324_v23  ;;  %v5053_v15 = vld [vmem:[%s5466_s23 + $0x40] sm:$0xff] }
 0x3f3   : > { %v3932_v47 = vsel %vm3931_vm9, %v4944_v30, %v3928_v26  ;;  %2682 = vmatmul.f32.gmra.mxu3 %v6380_v36  ;;  %v7461_v14 = vadd.f32 1.0, %v4948_v28  ;;  %v3322_v30 = vsel %vm3302_vm12, %v3281_v51, %v3282_v60  ;;  %v3270_v41 = vrot.slane %v7331_v61, 1  ;;  %v8427_v26 = vld [vmem:[#allocation24_spill] sm:$0xff] }
 0x3f4   : > { %v4950_v39 = vpop.eup %4949  ;;  %v3937_v2 = vsel %vm3934_vm10, %v3936_v11, %v3932_v47  ;;  %v3602_v29 = vsel %vm7440_vm7, 0.0, %v3322_v30  ;;  %vm7476_vm11 = vcmp.eq.s32.totalorder %v2825_v56, 0  ;;  %v2802_v23 = vadd.s32 104, %v6697_v43 }
 0x3f5   : > { %v4306_v20 = vmul.f32 %v3937_v2, %v7291_v55  ;;  %v3940_v36 = vmul.f32 %v4950_v39, %v7417_v52  ;;  %4953 = vrcp.f32 %v7461_v14  ;;  %v5052_v55 = vld [vmem:[%s5466_s23 + $0x38] sm:$0xff]  ;;  %v3634_v45 = vadd.f32 %v3602_v29, %v6859_v8 }
 0x3f6   : > { %v2635_v51 = vpop.f32.mrf.mxu3  ;;  %v3236_v16 = vrot.slane %v2785_v59, 7  ;;  %vm3945_vm13 = vweird.f32 %v4950_v39  ;;  %v3948_v1 = vand.u32 2147483647, %v7417_v52  ;;  %v3950_v5 = vand.u32 2147483648, %v7417_v52 }
 0x3f7   : > { %v4338_v18 = vadd.f32 %v5052_v55, %v4306_v20  ;;  %v3941_v12 = vsub.f32 1.0, %v3940_v36  ;;  %v2733_v31 = vadd.f32 %v2635_v51, %v7120_v54  ;;  %v7489_v57 = vadd.f32 %v7008_v24, %v3634_v45 }
 0x3f8   : > { %v4952_v53 = vpop.eup %4951  ;;  %v3238_v56 = vsel %vm3237_vm0, %v3235_v40, %v3236_v16  ;;  %v8428_v8 = vrot.slane %v8427_v26, 7  ;;  %vm3944_vm14 = vweird.f32 %v7417_v52  ;;  %v8430_v58 = vrot.slane %v6988_v38, 1 }
 0x3f9   : > { %4371 = vst.msk [vmem:[%s7192_s16 + $0x38] sm:$0xff] %vm4363_vm4, %v4338_v18  ;;  %v3942_v21 = vmul.f32 %v4950_v39, %v3941_v12  ;;  %v7498_v48 = vadd.f32 1.0, %v4952_v53  ;;  %v7502_v17 = vadd.f32 %v3238_v56, %v2786_v7  ;;  %v4635_v9 = vmul.f32 -1.442695, %v7489_v57 }
 0x3fa   : > { %v3269_v63 = vsel %vm3237_vm0, %v3236_v16, %v8428_v8  ;;  %v3283_v40 = vrot.slane %v2733_v31, 1  ;;  %v3333_v52 = vsel %vm3302_vm12, %v3270_v41, %v8430_v58  ;;  %vm3946_vm0 = vmor %vm3944_vm14, %vm3945_vm13  ;;  %v3951_v59 = vor.u32 1.1754944e-38, %v3950_v5 }
 0x3fb   : > { %v3431_v54 = vsel %vm7476_vm11, 0.0, %v3269_v63  ;;  %v3943_v11 = vadd.f32 %v4950_v39, %v3942_v21  ;;  %2685 = vmatmul.f32.gmra.mxu3 %v8209_v50  ;;  %v4954_v47 = vpop.eup %4953  ;;  %4955 = vrcp.f32 %v7498_v48  ;;  %v2916_v4 = vand.u32 15, %v2802_v23 }
 0x3fc   : > { %v3463_v28 = vadd.f32 %v3431_v54, %v8429_v32  ;;  %vm3949_vm15 = vcmp.eq.f32.partialorder %v3948_v1, 8.507059e+37  ;;  %v3955_v30 = vmul.f32 %v4954_v47, %v7461_v14  ;;  %4957 = vpow2.f32 %v4635_v9  ;;  %v8433_v1 = vld [vmem:[#allocation97_spill] sm:$0xff] }
 0x3fd   : > { %v3947_v2 = vsel %vm3946_vm0, %v4950_v39, %v3943_v11  ;;  %v3965_v38 = vand.u32 2147483648, %v7461_v14  ;;  %v3321_v51 = vsel %vm3302_vm12, %v3282_v60, %v3283_v40  ;;  %v7524_v39 = vpop.f32.mrf.mxu1  ;;  %v3963_v55 = vand.u32 2147483647, %v7461_v14 }
 0x3fe   : > { %v3952_v7 = vsel %vm3949_vm15, %v3951_v59, %v3947_v2  ;;  %v3623_v20 = vadd.f32 %v3463_v28, %v3333_v52  ;;  %v2638_v36 = vpop.f32.mrf.mxu3  ;;  %v3956_v44 = vsub.f32 1.0, %v3955_v30  ;;  %v3635_v12 = vadd.f32 %v6876_v13, %v3321_v51 }
 0x3ff   : > { %v4307_v29 = vmul.f32 %v3952_v7, %v7351_v25  ;;  %v7522_v23 = vadd.f32 %v2638_v36, %v2220_v22  ;;  %vm7531_vm1 = vcmp.eq.s32.totalorder %v2916_v4, 15  ;;  %vm3960_vm2 = vweird.f32 %v4954_v47  ;;  %v5054_v4 = vld [vmem:[%s5466_s23 + $0x48] sm:$0xff] }
 0x400   : > { %v7528_v18 = vadd.f32 %v7008_v24, %v3623_v20  ;;  %v3957_v16 = vmul.f32 %v4954_v47, %v3956_v44  ;;  %v2223_v5 = vadd.f32 %v7358_v62, %v8433_v1  ;;  %vm3959_vm3 = vweird.f32 %v7461_v14 }
 0x401   : > { %v4339_v45 = vadd.f32 %v5053_v15, %v4307_v29  ;;  %v3284_v60 = vrot.slane %v7522_v23, 1  ;;  %v4956_v22 = vpop.eup %4955  ;;  %v7542_v13 = vadd.f32 %v7008_v24, %v3635_v12  ;;  %v3966_v56 = vor.u32 1.1754944e-38, %v3965_v38  ;;  %vm3961_vm5 = vmor %vm3959_vm3, %vm3960_vm2  ;;  %v8434_v12 = vld [vmem:[#allocation100_spill] sm:$0xff] }
 0x402   : > { %v4624_v31 = vmul.f32 -1.442695, %v7528_v18  ;;  %v4958_v53 = vpop.eup %4957  ;;  %v3958_v21 = vadd.f32 %v4954_v47, %v3957_v16  ;;  %v3970_v26 = vmul.f32 %v4956_v22, %v7498_v48  ;;  %vm3964_vm6 = vcmp.eq.f32.partialorder %v3963_v55, 8.507059e+37 }
 0x403   : > { %4372 = vst.msk [vmem:[%s7192_s16 + $0x40] sm:$0xff] %vm4363_vm4, %v4339_v45  ;;  %v3320_v8 = vsel %vm3302_vm12, %v3283_v40, %v3284_v60  ;;  %2688 = vmatmul.f32.gmra.mxu3 %v8209_v50  ;;  %v7550_v62 = vadd.f32 1.0, %v4958_v53  ;;  %v4636_v14 = vmul.f32 -1.442695, %v7542_v13  ;;  %v3978_v28 = vand.u32 2147483647, %v7498_v48 }
 0x404   : > { %4959 = vpow2.f32 %v4624_v31  ;;  %v3604_v63 = vsel %vm7531_vm1, 0.0, %v3320_v8  ;;  %v3962_v54 = vsel %vm3961_vm5, %v4954_v47, %v3958_v21  ;;  %v3971_v11 = vsub.f32 1.0, %v3970_v26  ;;  %v5055_v31 = vld [vmem:[%s5466_s23 + $0x50] sm:$0xff] }
 0x405   : > { %v3636_v9 = vadd.f32 %v3604_v63, %v6888_v0  ;;  %v3967_v32 = vsel %vm3964_vm6, %v3966_v56, %v3962_v54  ;;  %v3980_v50 = vand.u32 2147483648, %v7498_v48  ;;  %4961 = vrcp.f32 %v7550_v62  ;;  %v7565_v7 = vpop.f32.mrf.mxu1  ;;  %v8435_v63 = vld [vmem:[#allocation103_spill] sm:$0xff]  ;;  %v8436_v54 = vld [vmem:[#allocation105_spill] sm:$0xff] }
 0x406   : > { %v2641_v40 = vpop.f32.mrf.mxu3  ;;  %v4308_v58 = vmul.f32 %v3967_v32, %v7395_v35  ;;  %v3972_v52 = vmul.f32 %v4956_v22, %v3971_v11  ;;  %vm3975_vm7 = vweird.f32 %v4956_v22  ;;  %4963 = vpow2.f32 %v4636_v14 }
 0x407   : > { %v7561_v47 = vadd.f32 %v7008_v24, %v3636_v9  ;;  %v2739_v59 = vadd.f32 %v2641_v40, %v2223_v5  ;;  %vm3974_vm8 = vweird.f32 %v7498_v48  ;;  %v3981_v38 = vor.u32 1.1754944e-38, %v3980_v50 }
 0x408   : > { %v4340_v0 = vadd.f32 %v5054_v4, %v4308_v58  ;;  %v3973_v2 = vadd.f32 %v4956_v22, %v3972_v52  ;;  %vm3976_vm9 = vmor %vm3974_vm8, %vm3975_vm7  ;;  %v2804_v36 = vadd.s32 120, %v6697_v43  ;;  %vm3979_vm10 = vcmp.eq.f32.partialorder %v3978_v28, 8.507059e+37 }
 0x409   : > { %v4637_v35 = vmul.f32 -1.442695, %v7561_v47  ;;  %v3285_v20 = vrot.slane %v2739_v59, 1  ;;  %v2226_v25 = vadd.f32 %v7415_v10, %v8434_v12  ;;  %v3993_v16 = vand.u32 2147483647, %v7550_v62 }
 0x40a   : > { %v4960_v30 = vpop.eup %4959  ;;  %4373 = vst.msk [vmem:[%s7192_s16 + $0x48] sm:$0xff] %vm4363_vm4, %v4340_v0  ;;  %v3977_v29 = vsel %vm3976_vm9, %v4956_v22, %v3973_v2  ;;  %v2930_v5 = vand.u32 15, %v2804_v36  ;;  %v3995_v10 = vand.u32 2147483648, %v7550_v62  ;;  %v7601_v11 = vadd.f32 %v7524_v39, %v8436_v54 }
 0x40b   : > { %v7571_v44 = vadd.f32 1.0, %v4960_v30  ;;  %v4962_v51 = vpop.eup %4961  ;;  %v3982_v23 = vsel %vm3979_vm10, %v3981_v38, %v3977_v29  ;;  %4965 = vpow2.f32 %v4637_v35  ;;  %v3319_v48 = vsel %vm3302_vm12, %v3284_v60, %v3285_v20 }
 0x40c   : > { %v4964_v55 = vpop.eup %4963  ;;  %v4309_v15 = vmul.f32 %v3982_v23, %v7433_v27  ;;  %v3985_v45 = vmul.f32 %v4962_v51, %v7550_v62  ;;  %v3637_v21 = vadd.f32 %v6905_v46, %v3319_v48  ;;  %v7590_v27 = vadd.s32 136, %v6697_v43 }
 0x40d   : > { %4967 = vrcp.f32 %v7571_v44  ;;  %v7581_v22 = vadd.f32 1.0, %v4964_v55  ;;  %vm3990_vm11 = vweird.f32 %v4962_v51  ;;  %v2229_v46 = vadd.f32 %v7472_v33, %v8435_v63  ;;  %v7611_v40 = vpop.f32.mrf.mxu1  ;;  %v5056_v55 = vld [vmem:[%s5466_s23 + $0x58] sm:$0xff] }
 0x40e   : > { %v2644_v1 = vpop.f32.mrf.mxu3  ;;  %v4341_v53 = vadd.f32 %v5055_v31, %v4309_v15  ;;  %v3986_v60 = vsub.f32 1.0, %v3985_v45  ;;  %v7595_v8 = vadd.f32 %v7008_v24, %v3637_v21  ;;  %vm7604_vm13 = vcmp.eq.s32.totalorder %v2930_v5, 15  ;;  %v8441_v15 = vld [vmem:[#allocation35_spill] sm:$0xff] }
 0x40f   : > { %v7585_v56 = vadd.f32 %v2644_v1, %v2226_v25  ;;  %4969 = vrcp.f32 %v7581_v22  ;;  %vm3989_vm14 = vweird.f32 %v7550_v62  ;;  %vm3994_vm0 = vcmp.eq.f32.partialorder %v3993_v16, 8.507059e+37  ;;  %v7645_v21 = vld [vmem:[%s8088_s6] ss:$0 sm:$0xff] }
 0x410   : > { %4374 = vst.msk [vmem:[%s7192_s16 + $0x50] sm:$0xff] %vm4363_vm4, %v4341_v53  ;;  %v3987_v26 = vmul.f32 %v4962_v51, %v3986_v60  ;;  %vm3991_vm15 = vmor %vm3989_vm14, %vm3990_vm11  ;;  %v3996_v33 = vor.u32 1.1754944e-38, %v3995_v10  ;;  %v4638_v58 = vmul.f32 -1.442695, %v7595_v8  ;;  %v2944_v52 = vand.u32 15, %v7590_v27 }
 0x411   : > { %v4966_v14 = vpop.eup %4965  ;;  %v3286_v9 = vrot.slane %v7585_v56, 1  ;;  %v3828_v4 = vand.u32 2147483647, %v7571_v44  ;;  %v3830_v38 = vand.u32 2147483648, %v7571_v44  ;;  %vm3824_vm1 = vweird.f32 %v7571_v44 }
 0x412   : > { %v3988_v50 = vadd.f32 %v4962_v51, %v3987_v26  ;;  %v7609_v24 = vadd.f32 1.0, %v4966_v14  ;;  %v4010_v5 = vand.u32 2147483648, %v7581_v22  ;;  %vm4004_vm6 = vweird.f32 %v7581_v22 }
 0x413   : > { %v4968_v28 = vpop.eup %4967  ;;  %v3318_v62 = vsel %vm3302_vm12, %v3285_v20, %v3286_v9  ;;  %vm7630_vm3 = vcmp.eq.f32.partialorder %v3828_v4, 8.507059e+37  ;;  %v3831_v1 = vor.u32 1.1754944e-38, %v3830_v38  ;;  %v5058_v38 = vld [vmem:[%s5466_s23] sm:$0xff] }
 0x414   : > { %v3820_v39 = vmul.f32 %v4968_v28, %v7571_v44  ;;  %v3992_v59 = vsel %vm3991_vm15, %v4962_v51, %v3988_v50  ;;  %4971 = vrcp.f32 %v7609_v24  ;;  %v4008_v51 = vand.u32 2147483647, %v7581_v22 }
 0x415   : > { %v4970_v0 = vpop.eup %4969  ;;  %v3997_v2 = vsel %vm3994_vm0, %v3996_v33, %v3992_v59  ;;  %4973 = vpow2.f32 %v4638_v58  ;;  %vm3825_vm2 = vweird.f32 %v4968_v28  ;;  %v3606_v20 = vsel %vm7604_vm13, 0.0, %v3318_v62  ;;  %v7662_v33 = vpop.f32.mrf.mxu1 }
 0x416   : > { %v3821_v30 = vsub.f32 1.0, %v3820_v39  ;;  %v2647_v35 = vpop.f32.mrf.mxu3  ;;  %v4310_v36 = vmul.f32 %v3997_v2, %v7489_v57  ;;  %v4000_v29 = vmul.f32 %v4970_v0, %v7581_v22  ;;  %v3638_v45 = vadd.f32 %v3606_v20, %v8441_v15  ;;  %vm3826_vm5 = vmor %vm3824_vm1, %vm3825_vm2 }
 0x417   : > { %v7627_v48 = vadd.f32 %v2647_v35, %v2229_v46  ;;  %vm4005_vm7 = vweird.f32 %v4970_v0  ;;  %vm7650_vm8 = vcmp.eq.f32.partialorder %v4008_v51, 8.507059e+37  ;;  %v4011_v39 = vor.u32 1.1754944e-38, %v4010_v5 }
 0x418   : > { %v3822_v23 = vmul.f32 %v4968_v28, %v3821_v30  ;;  %v4342_v12 = vadd.f32 %v5056_v55, %v4310_v36  ;;  %v4001_v57 = vsub.f32 1.0, %v4000_v29  ;;  %v7648_v56 = vadd.f32 %v7645_v21, %v3638_v45  ;;  %vm4006_vm9 = vmor %vm4004_vm6, %vm4005_vm7 }
 0x419   : > { %v3287_v31 = vrot.slane %v7627_v48, 1  ;;  %v4023_v2 = vand.u32 2147483647, %v7609_v24  ;;  %v4025_v30 = vand.u32 2147483648, %v7609_v24  ;;  %vm4019_vm11 = vweird.f32 %v7609_v24 }
 0x41a   : > { %v3823_v16 = vadd.f32 %v4968_v28, %v3822_v23  ;;  %v4972_v53 = vpop.eup %4971  ;;  %4375 = vst.msk [vmem:[%s7192_s16 + $0x58] sm:$0xff] %vm4363_vm4, %v4342_v12  ;;  %v4002_v60 = vmul.f32 %v4970_v0, %v4001_v57  ;;  %v4639_v50 = vmul.f32 -1.442695, %v7648_v56  ;;  %v5059_v23 = vld [vmem:[%s5466_s23 + $0x60] sm:$0xff]  ;;  %vm7686_vm0 = vcmp.eq.s32.totalorder %v2944_v52, 15 }
 0x41b   : > { %v4974_v10 = vpop.eup %4973  ;;  %v4015_v44 = vmul.f32 %v4972_v53, %v7609_v24  ;;  %v3317_v63 = vsel %vm3302_vm12, %v3286_v9, %v3287_v31  ;;  %v8444_v9 = vld [vmem:[#allocation28_spill] sm:$0xff]  ;;  %vm4020_vm10 = vweird.f32 %v4972_v53  ;;  %v4026_v48 = vor.u32 1.1754944e-38, %v4025_v30 }
 0x41c   : > { %v3827_v26 = vsel %vm3826_vm5, %v4968_v28, %v3823_v16  ;;  %v4003_v54 = vadd.f32 %v4970_v0, %v4002_v60  ;;  %v7659_v32 = vadd.f32 1.0, %v4974_v10  ;;  %v3639_v59 = vadd.f32 %v8444_v9, %v3317_v63  ;;  %vm4021_vm13 = vmor %vm4019_vm11, %vm4020_vm10  ;;  %v8447_v24 = vld [vmem:[#allocation108_spill] sm:$0xff] }
 0x41d   : > { %v3832_v46 = vsel %vm7630_vm3, %v3831_v1, %v3827_v26  ;;  %v4016_v58 = vsub.f32 1.0, %v4015_v44  ;;  %vm4024_vm14 = vcmp.eq.f32.partialorder %v4023_v2, 8.507059e+37  ;;  %v7700_v60 = vpop.f32.mrf.mxu1  ;;  %v8448_v44 = vld [vmem:[#allocation38_spill] sm:$0xff] }
 0x41e   : > { %v4299_v28 = vmul.f32 %v3832_v46, %v7528_v18  ;;  %v2650_v4 = vpop.f32.mrf.mxu3  ;;  %v4007_v62 = vsel %vm4006_vm9, %v4970_v0, %v4003_v54  ;;  %4975 = vrcp.f32 %v7659_v32  ;;  %v7676_v29 = vadd.f32 %v7645_v21, %v3639_v59  ;;  %v8450_v2 = vld [vmem:[#allocation110_spill] sm:$0xff] }
 0x41f   : > { %v4012_v18 = vsel %vm7650_vm8, %v4011_v39, %v4007_v62  ;;  %v4017_v22 = vmul.f32 %v4972_v53, %v4016_v58  ;;  %4977 = vpow2.f32 %v4639_v50  ;;  %v2748_v51 = vadd.f32 %v2650_v4, %v7601_v11  ;;  %v8449_v4 = vld [vmem:[#allocation30_spill] sm:$0xff] }
 0x420   : > { %v4331_v35 = vadd.f32 %v5058_v38, %v4299_v28  ;;  %v4311_v36 = vmul.f32 %v4012_v18, %v7542_v13  ;;  %v4640_v55 = vmul.f32 -1.442695, %v7676_v29  ;;  %v2235_v11 = vadd.f32 %v7565_v7, %v8447_v24  ;;  %v5060_v7 = vld [vmem:[%s5466_s23 + $0x68] sm:$0xff] }
 0x421   : > { %v4018_v0 = vadd.f32 %v4972_v53, %v4017_v22  ;;  %v3288_v13 = vrot.slane %v2748_v51, 1  ;;  %v4040_v63 = vand.u32 2147483648, %v7659_v32  ;;  %v2808_v54 = vadd.s32 152, %v6697_v43 }
 0x422   : > { %4364 = vst.msk [vmem:[%s7192_s16] sm:$0xff] %vm4363_vm4, %v4331_v35  ;;  %v4343_v20 = vadd.f32 %v5059_v23, %v4311_v36  ;;  %4979 = vpow2.f32 %v4640_v55  ;;  %v4038_v50 = vand.u32 2147483647, %v7659_v32  ;;  %vm4034_vm1 = vweird.f32 %v7659_v32 }
 0x423   : > { %v4022_v12 = vsel %vm4021_vm13, %v4972_v53, %v4018_v0  ;;  %v3316_v27 = vsel %vm3302_vm12, %v3287_v31, %v3288_v13  ;;  %v2238_v30 = vadd.f32 %v7611_v40, %v8450_v2  ;;  %v4041_v38 = vor.u32 1.1754944e-38, %v4040_v63 }
 0x424   : > { %v4976_v57 = vpop.eup %4975  ;;  %4376 = vst.msk [vmem:[%s7192_s16 + $0x60] sm:$0xff] %vm4363_vm4, %v4343_v20  ;;  %v4027_v15 = vsel %vm4024_vm14, %v4026_v48, %v4022_v12  ;;  %v3608_v5 = vsel %vm7686_vm0, 0.0, %v3316_v27  ;;  %vm4039_vm3 = vcmp.eq.f32.partialorder %v4038_v50, 8.507059e+37  ;;  %v2958_v36 = vand.u32 15, %v2808_v54  ;;  %v5061_v12 = vld [vmem:[%s5466_s23 + $0x70] sm:$0xff] }
 0x425   : > { %v4312_v45 = vmul.f32 %v4027_v15, %v7561_v47  ;;  %v4030_v16 = vmul.f32 %v4976_v57, %v7659_v32  ;;  %v4978_v1 = vpop.eup %4977  ;;  %v3640_v47 = vadd.f32 %v3608_v5, %v8448_v44  ;;  %vm4035_vm15 = vweird.f32 %v4976_v57  ;;  %v7727_v55 = vpop.f32.mrf.mxu1 }
 0x426   : > { %v2653_v52 = vpop.f32.mrf.mxu3  ;;  %v3802_v14 = vadd.f32 1.0, %v4978_v1  ;;  %vm4036_vm2 = vmor %vm4034_vm1, %vm4035_vm15  ;;  %vm7730_vm5 = vcmp.eq.s32.totalorder %v2958_v36, 15 }
 0x427   : > { %v2751_v53 = vadd.f32 %v2653_v52, %v2235_v11  ;;  %v4344_v10 = vadd.f32 %v5060_v7, %v4312_v45  ;;  %v4031_v26 = vsub.f32 1.0, %v4030_v16  ;;  %v7710_v39 = vadd.f32 %v7645_v21, %v3640_v47  ;;  %v8453_v16 = vld [vmem:[#allocation112_spill] sm:$0xff] }
 0x428   : > { %4981 = vrcp.f32 %v3802_v14  ;;  %v4980_v28 = vpop.eup %4979  ;;  %v4053_v25 = vand.u32 2147483647, %v3802_v14  ;;  %v4055_v15 = vand.u32 2147483648, %v3802_v14  ;;  %vm4049_vm7 = vweird.f32 %v3802_v14 }
 0x429   : > { %v3289_v46 = vrot.slane %v2751_v53, 1  ;;  %4377 = vst.msk [vmem:[%s7192_s16 + $0x68] sm:$0xff] %vm4363_vm4, %v4344_v10  ;;  %v4032_v31 = vmul.f32 %v4976_v57, %v4031_v26  ;;  %v7715_v59 = vadd.f32 1.0, %v4980_v28  ;;  %v4641_v35 = vmul.f32 -1.442695, %v7710_v39 }
 0x42a   : > { %vm7743_vm8 = vcmp.eq.f32.partialorder %v4053_v25, 8.507059e+37  ;;  %v4056_v63 = vor.u32 1.1754944e-38, %v4055_v15 }
 0x42b   : > { %v3315_v58 = vsel %vm3302_vm12, %v3288_v13, %v3289_v46  ;;  %v4033_v9 = vadd.f32 %v4976_v57, %v4032_v31  ;;  %4983 = vrcp.f32 %v7715_v59  ;;  %v4068_v31 = vand.u32 2147483647, %v7715_v59 }
 0x42c   : > { %v3641_v62 = vadd.f32 %v8449_v4, %v3315_v58  ;;  %4985 = vpow2.f32 %v4641_v35  ;;  %v4070_v50 = vand.u32 2147483648, %v7715_v59  ;;  %vm4064_vm11 = vweird.f32 %v7715_v59 }
 0x42d   : > { %v4037_v18 = vsel %vm4036_vm2, %v4976_v57, %v4033_v9  ;;  %v7766_v36 = vpop.f32.mrf.mxu1  ;;  %vm4069_vm14 = vcmp.eq.f32.partialorder %v4068_v31, 8.507059e+37 }
 0x42e   : > { %v2656_v22 = vpop.f32.mrf.mxu3  ;;  %v4042_v0 = vsel %vm4039_vm3, %v4041_v38, %v4037_v18  ;;  %v7723_v32 = vadd.f32 %v7645_v21, %v3641_v62  ;;  %v4982_v51 = vpop.eup %4981 }
 0x42f   : > { %v4313_v40 = vmul.f32 %v4042_v0, %v7595_v8  ;;  %v2754_v23 = vadd.f32 %v2656_v22, %v2238_v30  ;;  %v4045_v20 = vmul.f32 %v4982_v51, %v3802_v14  ;;  %v2241_v8 = vadd.f32 %v7662_v33, %v8453_v16  ;;  %v8456_v33 = vld [vmem:[#allocation41_spill] sm:$0xff] }
 0x430   : > { %v4642_v48 = vmul.f32 -1.442695, %v7723_v32  ;;  %vm4050_vm6 = vweird.f32 %v4982_v51  ;;  %v2810_v30 = vadd.s32 168, %v6697_v43  ;;  %v4071_v0 = vor.u32 1.1754944e-38, %v4070_v50 }
 0x431   : > { %v4345_v13 = vadd.f32 %v5061_v12, %v4313_v40  ;;  %v3290_v57 = vrot.slane %v2754_v23, 1  ;;  %v4046_v11 = vsub.f32 1.0, %v4045_v20  ;;  %v4984_v45 = vpop.eup %4983  ;;  %vm4051_vm9 = vmor %vm4049_vm7, %vm4050_vm6 }
 0x432   : > { %4987 = vpow2.f32 %v4642_v48  ;;  %v4986_v52 = vpop.eup %4985  ;;  %v4060_v5 = vmul.f32 %v4984_v45, %v7715_v59  ;;  %vm4065_vm10 = vweird.f32 %v4984_v45  ;;  %v5062_v59 = vld [vmem:[%s5466_s23 + $0x78] sm:$0xff] }
 0x433   : > { %4378 = vst.msk [vmem:[%s7192_s16 + $0x70] sm:$0xff] %vm4363_vm4, %v4345_v13  ;;  %v3314_v27 = vsel %vm3302_vm12, %v3289_v46, %v3290_v57  ;;  %v4047_v1 = vmul.f32 %v4982_v51, %v4046_v11  ;;  %v7747_v10 = vadd.f32 1.0, %v4986_v52  ;;  %vm4066_vm13 = vmor %vm4064_vm11, %vm4065_vm10  ;;  %v8458_v48 = vld [vmem:[#allocation114_spill] sm:$0xff] }
 0x434   : > { %v3610_v53 = vsel %vm7730_vm5, 0.0, %v3314_v27  ;;  %v4061_v46 = vsub.f32 1.0, %v4060_v5  ;;  %v2244_v12 = vadd.f32 %v7700_v60, %v8458_v48 }
 0x435   : > { %v3642_v26 = vadd.f32 %v3610_v53, %v8456_v33  ;;  %v4048_v47 = vadd.f32 %v4982_v51, %v4047_v1  ;;  %4989 = vrcp.f32 %v7747_v10  ;;  %v4085_v60 = vand.u32 2147483648, %v7747_v10  ;;  %v8459_v53 = vld [vmem:[#allocation115_spill] sm:$0xff] }
 0x436   : > { %v2659_v44 = vpop.f32.mrf.mxu3  ;;  %v4062_v58 = vmul.f32 %v4984_v45, %v4061_v46  ;;  %v2247_v7 = vadd.f32 %v7727_v55, %v8459_v53  ;;  %vm4079_vm1 = vweird.f32 %v7747_v10 }
 0x437   : > { %v2757_v54 = vadd.f32 %v2659_v44, %v2241_v8  ;;  %v4052_v28 = vsel %vm4051_vm9, %v4982_v51, %v4048_v47  ;;  %v7754_v9 = vadd.f32 %v7645_v21, %v3642_v26  ;;  %v5063_v8 = vld [vmem:[%s5466_s23 + $0x80] sm:$0xff]  ;;  %v4086_v31 = vor.u32 1.1754944e-38, %v4085_v60 }
 0x438   : > { %v4988_v14 = vpop.eup %4987  ;;  %v4057_v62 = vsel %vm7743_vm8, %v4056_v63, %v4052_v28  ;;  %v4063_v35 = vadd.f32 %v4984_v45, %v4062_v58  ;;  %v7805_v28 = vpop.f32.mrf.mxu1 }
 0x439   : > { %v3291_v4 = vrot.slane %v2757_v54, 1  ;;  %v7759_v2 = vadd.f32 1.0, %v4988_v14  ;;  %v4314_v38 = vmul.f32 %v4057_v62, %v7648_v56  ;;  %v4643_v18 = vmul.f32 -1.442695, %v7754_v9  ;;  %v8457_v56 = vld [vmem:[#allocation33_spill] sm:$0xff] }
 0x43a   : > { %v4067_v40 = vsel %vm4066_vm13, %v4984_v45, %v4063_v35  ;;  %v4083_v45 = vand.u32 2147483647, %v7747_v10 }
 0x43b   : > { %v3313_v22 = vsel %vm3302_vm12, %v3290_v57, %v3291_v4  ;;  %4991 = vrcp.f32 %v7759_v2  ;;  %v4346_v51 = vadd.f32 %v5062_v59, %v4314_v38  ;;  %v4990_v20 = vpop.eup %4989  ;;  %v4072_v13 = vsel %vm4069_vm14, %v4071_v0, %v4067_v40  ;;  %v8464_v38 = vld [vmem:[#allocation43_spill] sm:$0xff] }
 0x43c   : > { %4993 = vpow2.f32 %v4643_v18  ;;  %v3643_v23 = vadd.f32 %v8457_v56, %v3313_v22  ;;  %v2972_v57 = vand.u32 15, %v2810_v30  ;;  %v4315_v24 = vmul.f32 %v4072_v13, %v7676_v29 }
 0x43d   : > { %4379 = vst.msk [vmem:[%s7192_s16 + $0x78] sm:$0xff] %vm4363_vm4, %v4346_v51  ;;  %v4075_v11 = vmul.f32 %v4990_v20, %v7747_v10  ;;  %vm4080_vm15 = vweird.f32 %v4990_v20  ;;  %vm7795_vm2 = vcmp.eq.f32.partialorder %v4083_v45, 8.507059e+37  ;;  %v4098_v10 = vand.u32 2147483647, %v7759_v2 }
 0x43e   : > { %v2662_v25 = vpop.f32.mrf.mxu3  ;;  %v7779_v15 = vadd.f32 %v7645_v21, %v3643_v23  ;;  %v4347_v27 = vadd.f32 %v5063_v8, %v4315_v24  ;;  %vm7787_vm0 = vcmp.eq.s32.totalorder %v2972_v57, 15  ;;  %vm4081_vm3 = vmor %vm4079_vm1, %vm4080_vm15  ;;  %v4100_v58 = vand.u32 2147483648, %v7759_v2 }
 0x43f   : > { %v2760_v16 = vadd.f32 %v2662_v25, %v2244_v12  ;;  %v4076_v52 = vsub.f32 1.0, %v4075_v11  ;;  %vm4094_vm6 = vweird.f32 %v7759_v2  ;;  %v2812_v0 = vadd.s32 184, %v6697_v43  ;;  %v5064_v12 = vld [vmem:[%s5466_s23 + $0x88] sm:$0xff]  ;;  %v8465_v11 = vld [vmem:[#allocation117_spill] sm:$0xff] }
 0x440   : > { %v4644_v1 = vmul.f32 -1.442695, %v7779_v15  ;;  %4380 = vst.msk [vmem:[%s7192_s16 + $0x80] sm:$0xff] %vm4363_vm4, %v4347_v27  ;;  %vm4099_vm8 = vcmp.eq.f32.partialorder %v4098_v10, 8.507059e+37  ;;  %v2250_v45 = vadd.f32 %v7766_v36, %v8465_v11  ;;  %v2255_v33 = vpop.f32.mrf.mxu1 }
 0x441   : > { %v4992_v5 = vpop.eup %4991  ;;  %v3292_v29 = vrot.slane %v2760_v16, 1  ;;  %v4077_v44 = vmul.f32 %v4990_v20, %v4076_v52  ;;  %v2986_v27 = vand.u32 15, %v2812_v0  ;;  %v8466_v52 = vld [vmem:[#allocation36_spill] sm:$0xff] }
 0x442   : > { %v4994_v26 = vpop.eup %4993  ;;  %v4090_v47 = vmul.f32 %v4992_v5, %v7759_v2  ;;  %4995 = vpow2.f32 %v4644_v1  ;;  %vm4095_vm5 = vweird.f32 %v4992_v5 }
 0x443   : > { %v7799_v55 = vadd.f32 1.0, %v4994_v26  ;;  %v3312_v46 = vsel %vm3302_vm12, %v3291_v4, %v3292_v29  ;;  %v4078_v54 = vadd.f32 %v4990_v20, %v4077_v44  ;;  %vm4096_vm7 = vmor %vm4094_vm6, %vm4095_vm5  ;;  %vm7842_vm10 = vcmp.eq.s32.totalorder %v2986_v27, 15 }
 0x444   : > { %v4091_v50 = vsub.f32 1.0, %v4090_v47  ;;  %v3612_v14 = vsel %vm7787_vm0, 0.0, %v3312_v46 }
 0x445   : > { %4997 = vrcp.f32 %v7799_v55  ;;  %v4082_v30 = vsel %vm4081_vm3, %v4990_v20, %v4078_v54  ;;  %v3644_v35 = vadd.f32 %v3612_v14, %v8464_v38  ;;  %v4101_v20 = vor.u32 1.1754944e-38, %v4100_v58 }
 0x446   : > { %v2665_v62 = vpop.f32.mrf.mxu3  ;;  %v4092_v4 = vmul.f32 %v4992_v5, %v4091_v50  ;;  %v4087_v22 = vsel %vm7795_vm2, %v4086_v31, %v4082_v30  ;;  %v4113_v26 = vand.u32 2147483647, %v7799_v55  ;;  %v4115_v36 = vand.u32 2147483648, %v7799_v55 }
 0x447   : > { %v2763_v18 = vadd.f32 %v2665_v62, %v2247_v7  ;;  %v4316_v51 = vmul.f32 %v4087_v22, %v7710_v39  ;;  %v7817_v56 = vadd.f32 %v7645_v21, %v3644_v35  ;;  %vm4109_vm11 = vweird.f32 %v7799_v55  ;;  %v8469_v35 = vld [vmem:[#allocation46_spill] sm:$0xff] }
 0x448   : > { %v4996_v59 = vpop.eup %4995  ;;  %v4093_v40 = vadd.f32 %v4992_v5, %v4092_v4  ;;  %vm4114_vm14 = vcmp.eq.f32.partialorder %v4113_v26, 8.507059e+37  ;;  %v4116_v58 = vor.u32 1.1754944e-38, %v4115_v36  ;;  %v5067_v26 = vld [vmem:[%s5466_s23 + $0xa0] sm:$0xff] }
 0x449   : > { %v3293_v23 = vrot.slane %v2763_v18, 1  ;;  %v7820_v48 = vadd.f32 1.0, %v4996_v59  ;;  %v4348_v2 = vadd.f32 %v5064_v12, %v4316_v51  ;;  %v4645_v25 = vmul.f32 -1.442695, %v7817_v56  ;;  %v8470_v18 = vld [vmem:[#allocation119_spill] sm:$0xff] }
 0x44a   : > { %v4097_v13 = vsel %vm4096_vm7, %v4992_v5, %v4093_v40  ;;  %v5065_v5 = vld [vmem:[%s5466_s23 + $0x90] sm:$0xff]  ;;  %v2253_v22 = vadd.f32 %v7805_v28, %v8470_v18 }
 0x44b   : > { %v3311_v39 = vsel %vm3302_vm12, %v3292_v29, %v3293_v23  ;;  %v4998_v57 = vpop.eup %4997  ;;  %v4102_v24 = vsel %vm4099_vm8, %v4101_v20, %v4097_v13  ;;  %4999 = vrcp.f32 %v7820_v48  ;;  %4381 = vst.msk [vmem:[%s7192_s16 + $0x88] sm:$0xff] %vm4363_vm4, %v4348_v2  ;;  %v4128_v59 = vand.u32 2147483647, %v7820_v48  ;;  %v5066_v13 = vld [vmem:[%s5466_s23 + $0x98] sm:$0xff] }
 0x44c   : > { %v4317_v16 = vmul.f32 %v4102_v24, %v7723_v32  ;;  %v4105_v8 = vmul.f32 %v4998_v57, %v7799_v55  ;;  %5001 = vpow2.f32 %v4645_v25  ;;  %v3645_v60 = vadd.f32 %v8466_v52, %v3311_v39 }
 0x44d   : > { %vm4110_vm9 = vweird.f32 %v4998_v57  ;;  %v4130_v51 = vand.u32 2147483648, %v7820_v48  ;;  %vm4124_vm15 = vweird.f32 %v7820_v48  ;;  %vm4129_vm2 = vcmp.eq.f32.partialorder %v4128_v59, 8.507059e+37 }
 0x44e   : > { %v2668_v1 = vpop.f32.mrf.mxu3  ;;  %v4349_v53 = vadd.f32 %v5065_v5, %v4317_v16  ;;  %v4106_v7 = vsub.f32 1.0, %v4105_v8  ;;  %v7838_v44 = vadd.f32 %v7645_v21, %v3645_v60  ;;  %vm4111_vm13 = vmor %vm4109_vm11, %vm4110_vm9  ;;  %v2814_v8 = vadd.s32 200, %v6697_v43  ;;  %v8471_v60 = vld [vmem:[#allocation45_spill] sm:$0xff] }
 0x44f   : > { %v2766_v29 = vadd.f32 %v2668_v1, %v2250_v45  ;;  %v4131_v24 = vor.u32 1.1754944e-38, %v4130_v51  ;;  %v2256_v1 = vadd.f32 %v2255_v33, %v8471_v60 }
 0x450   : > { %4382 = vst.msk [vmem:[%s7192_s16 + $0x90] sm:$0xff] %vm4363_vm4, %v4349_v53  ;;  %v4107_v32 = vmul.f32 %v4998_v57, %v4106_v7  ;;  %v4646_v54 = vmul.f32 -1.442695, %v7838_v44  ;;  %v3000_v63 = vand.u32 15, %v2814_v8 }
 0x451   : > { %v3294_v47 = vrot.slane %v2766_v29, 1  ;;  %v5000_v46 = vpop.eup %4999 }
 0x452   : > { %v4108_v31 = vadd.f32 %v4998_v57, %v4107_v32  ;;  %v4120_v50 = vmul.f32 %v5000_v46, %v7820_v48  ;;  %v5002_v10 = vpop.eup %5001  ;;  %5003 = vpow2.f32 %v4646_v54  ;;  %vm4125_vm0 = vweird.f32 %v5000_v46 }
 0x453   : > { %v3310_v14 = vsel %vm3302_vm12, %v3293_v23, %v3294_v47  ;;  %v7853_v38 = vadd.f32 1.0, %v5002_v10  ;;  %vm4126_vm1 = vmor %vm4124_vm15, %vm4125_vm0  ;;  %vm7893_vm5 = vcmp.eq.s32.totalorder %v3000_v63, 15 }
 0x454   : > { %v3614_v62 = vsel %vm7842_vm10, 0.0, %v3310_v14  ;;  %v4112_v30 = vsel %vm4111_vm13, %v4998_v57, %v4108_v31  ;;  %v4121_v4 = vsub.f32 1.0, %v4120_v50  ;;  %v2258_v57 = vpop.f32.mrf.mxu1 }
 0x455   : > { %v3646_v55 = vadd.f32 %v3614_v62, %v8469_v35  ;;  %v4117_v0 = vsel %vm4114_vm14, %v4116_v58, %v4112_v30  ;;  %5005 = vrcp.f32 %v7853_v38  ;;  %v4145_v33 = vand.u32 2147483648, %v7853_v38 }
 0x456   : > { %v2671_v40 = vpop.f32.mrf.mxu3  ;;  %v4318_v23 = vmul.f32 %v4117_v0, %v7754_v9  ;;  %v4122_v20 = vmul.f32 %v5000_v46, %v4121_v4  ;;  %v4143_v50 = vand.u32 2147483647, %v7853_v38  ;;  %vm4139_vm6 = vweird.f32 %v7853_v38 }
 0x457   : > { %v7863_v12 = vadd.f32 %v7645_v21, %v3646_v55  ;;  %v2769_v2 = vadd.f32 %v2671_v40, %v2253_v22  ;;  %v8474_v55 = vld [vmem:[#allocation122_spill] sm:$0xff]  ;;  %v4146_v22 = vor.u32 1.1754944e-38, %v4145_v33 }
 0x458   : > { %v4350_v25 = vadd.f32 %v5066_v13, %v4318_v23  ;;  %v4123_v28 = vadd.f32 %v5000_v46, %v4122_v20  ;;  %v5004_v39 = vpop.eup %5003  ;;  %v2259_v18 = vadd.f32 %v2258_v57, %v8474_v55  ;;  %vm4144_vm8 = vcmp.eq.f32.partialorder %v4143_v50, 8.507059e+37 }
 0x459   : > { %v4647_v9 = vmul.f32 -1.442695, %v7863_v12  ;;  %v3295_v11 = vrot.slane %v2769_v2, 1  ;;  %v7870_v16 = vadd.f32 1.0, %v5004_v39  ;;  %v2816_v57 = vadd.s32 216, %v6697_v43 }
 0x45a   : > { %4383 = vst.msk [vmem:[%s7192_s16 + $0x98] sm:$0xff] %vm4363_vm4, %v4350_v25  ;;  %v4127_v45 = vsel %vm4126_vm1, %v5000_v46, %v4123_v28 }
 0x45b   : > { %v4132_v27 = vsel %vm4129_vm2, %v4131_v24, %v4127_v45  ;;  %5007 = vpow2.f32 %v4647_v9  ;;  %v3309_v48 = vsel %vm3302_vm12, %v3294_v47, %v3295_v11  ;;  %v5006_v52 = vpop.eup %5005  ;;  %v4160_v20 = vand.u32 2147483648, %v7870_v16  ;;  %v5068_v9 = vld [vmem:[%s5466_s23 + $0xa8] sm:$0xff] }
 0x45c   : > { %v4319_v5 = vmul.f32 %v4132_v27, %v7779_v15  ;;  %5009 = vrcp.f32 %v7870_v16  ;;  %v4135_v53 = vmul.f32 %v5006_v52, %v7853_v38  ;;  %v3647_v7 = vadd.f32 %v7177_v42, %v3309_v48  ;;  %v2261_v30 = vpop.f32.mrf.mxu1 }
 0x45d   : > { %vm4140_vm3 = vweird.f32 %v5006_v52  ;;  %v4158_v38 = vand.u32 2147483647, %v7870_v16  ;;  %vm4154_vm10 = vweird.f32 %v7870_v16 }
 0x45e   : > { %v2674_v29 = vpop.f32.mrf.mxu3  ;;  %v4351_v36 = vadd.f32 %v5067_v26, %v4319_v5  ;;  %v4136_v46 = vsub.f32 1.0, %v4135_v53  ;;  %v7882_v54 = vadd.f32 %v7645_v21, %v3647_v7  ;;  %vm4141_vm7 = vmor %vm4139_vm6, %vm4140_vm3  ;;  %v8475_v5 = vld [vmem:[#allocation123_spill] sm:$0xff]  ;;  %v3014_v7 = vand.u32 15, %v2816_v57 }
 0x45f   : > { %v2772_v32 = vadd.f32 %v2674_v29, %v2256_v1  ;;  %vm4159_vm13 = vcmp.eq.f32.partialorder %v4158_v38, 8.507059e+37 }
 0x460   : > { %4384 = vst.msk [vmem:[%s7192_s16 + $0xa0] sm:$0xff] %vm4363_vm4, %v4351_v36  ;;  %v4137_v31 = vmul.f32 %v5006_v52, %v4136_v46  ;;  %v4648_v42 = vmul.f32 -1.442695, %v7882_v54  ;;  %vm7931_vm0 = vcmp.eq.s32.totalorder %v3014_v7, 15 }
 0x461   : > { %v3296_v15 = vrot.slane %v2772_v32, 1  ;;  %v5008_v47 = vpop.eup %5007 }
 0x462   : > { %v5010_v14 = vpop.eup %5009  ;;  %v7889_v10 = vadd.f32 1.0, %v5008_v47  ;;  %v4138_v4 = vadd.f32 %v5006_v52, %v4137_v31  ;;  %5011 = vpow2.f32 %v4648_v42  ;;  %v5069_v47 = vld [vmem:[%s5466_s23 + $0xb0] sm:$0xff] }
 0x463   : > { %v3308_v58 = vsel %vm3302_vm12, %v3295_v11, %v3296_v15  ;;  %v4150_v35 = vmul.f32 %v5010_v14, %v7870_v16  ;;  %vm4155_vm9 = vweird.f32 %v5010_v14  ;;  %v2262_v16 = vadd.f32 %v2261_v30, %v8475_v5 }
 0x464   : > { %5013 = vrcp.f32 %v7889_v10  ;;  %v4142_v0 = vsel %vm4141_vm7, %v5006_v52, %v4138_v4  ;;  %v3616_v51 = vsel %vm7893_vm5, 0.0, %v3308_v58  ;;  %vm4156_vm11 = vmor %vm4154_vm10, %vm4155_vm9  ;;  %v2264_v29 = vpop.f32.mrf.mxu1  ;;  %v4175_v63 = vand.u32 2147483648, %v7889_v10 }
 0x465   : > { %v4151_v59 = vsub.f32 1.0, %v4150_v35  ;;  %v4147_v23 = vsel %vm4144_vm8, %v4146_v22, %v4142_v0  ;;  %v3648_v2 = vadd.f32 %v3616_v51, %v7213_v34  ;;  %v4161_v34 = vor.u32 1.1754944e-38, %v4160_v20  ;;  %v8478_v51 = vld [vmem:[#allocation125_spill] sm:$0xff] }
 0x466   : > { %v2677_v40 = vpop.f32.mrf.mxu3  ;;  %v4320_v13 = vmul.f32 %v4147_v23, %v7817_v56  ;;  %v4173_v50 = vand.u32 2147483647, %v7889_v10  ;;  %vm4169_vm15 = vweird.f32 %v7889_v10  ;;  %v4176_v62 = vor.u32 1.1754944e-38, %v4175_v63  ;;  %v5071_v63 = vld [vmem:[%s5466_s23 + $0xc0] sm:$0xff] }
 0x467   : > { %v4152_v25 = vmul.f32 %v5010_v14, %v4151_v59  ;;  %v2775_v28 = vadd.f32 %v2677_v40, %v2259_v18  ;;  %v7908_v39 = vadd.f32 %v7645_v21, %v3648_v2  ;;  %v2265_v40 = vadd.f32 %v2264_v29, %v8478_v51 }
 0x468   : > { %v5012_v24 = vpop.eup %5011  ;;  %v4352_v11 = vadd.f32 %v5068_v9, %v4320_v13  ;;  %vm4174_vm2 = vcmp.eq.f32.partialorder %v4173_v50, 8.507059e+37 }
 0x469   : > { %v4153_v45 = vadd.f32 %v5010_v14, %v4152_v25  ;;  %v3297_v8 = vrot.slane %v2775_v28, 1  ;;  %v7913_v56 = vadd.f32 1.0, %v5012_v24  ;;  %v4649_v48 = vmul.f32 -1.442695, %v7908_v39  ;;  %v5070_v28 = vld [vmem:[%s5466_s23 + $0xb8] sm:$0xff] }
 0x46a   : > { %v5014_v27 = vpop.eup %5013  ;;  %4385 = vst.msk [vmem:[%s7192_s16 + $0xa8] sm:$0xff] %vm4363_vm4, %v4352_v11 }
 0x46b   : > { %v4157_v52 = vsel %vm4156_vm11, %v5010_v14, %v4153_v45  ;;  %v4165_v60 = vmul.f32 %v5014_v27, %v7889_v10  ;;  %v3307_v1 = vsel %vm3302_vm12, %v3296_v15, %v3297_v8  ;;  %5015 = vrcp.f32 %v7913_v56 }
 0x46c   : > { %v4162_v53 = vsel %vm4159_vm13, %v4161_v34, %v4157_v52  ;;  %5017 = vpow2.f32 %v4649_v48  ;;  %v3649_v46 = vadd.f32 %v7264_v37, %v3307_v1  ;;  %vm4170_vm14 = vweird.f32 %v5014_v27  ;;  %v2267_v25 = vpop.f32.mrf.mxu1 }
 0x46d   : > { %v4321_v26 = vmul.f32 %v4162_v53, %v7838_v44  ;;  %v4166_v36 = vsub.f32 1.0, %v4165_v60  ;;  %vm4171_vm1 = vmor %vm4169_vm15, %vm4170_vm14  ;;  %v4188_v2 = vand.u32 2147483647, %v7913_v56  ;;  %v4190_v13 = vand.u32 2147483648, %v7913_v56 }
 0x46e   : > { %v2680_v32 = vpop.f32.mrf.mxu3  ;;  %v7929_v42 = vadd.f32 %v7645_v21, %v3649_v46  ;;  %vm4184_vm5 = vweird.f32 %v7913_v56  ;;  %v2818_v34 = vadd.s32 232, %v6697_v43 }
 0x46f   : > { %v2778_v33 = vadd.f32 %v2680_v32, %v2262_v16  ;;  %v4353_v15 = vadd.f32 %v5069_v47, %v4321_v26  ;;  %v4167_v31 = vmul.f32 %v5014_v27, %v4166_v36  ;;  %vm4189_vm7 = vcmp.eq.f32.partialorder %v4188_v2, 8.507059e+37  ;;  %v8479_v16 = vld [vmem:[#allocation127_spill] sm:$0xff] }
 0x470   : > { %v4650_v30 = vmul.f32 -1.442695, %v7929_v42  ;;  %v2268_v53 = vadd.f32 %v2267_v25, %v8479_v16  ;;  %v3028_v32 = vand.u32 15, %v2818_v34 }
 0x471   : > { %v3298_v14 = vrot.slane %v2778_v33, 1  ;;  %4386 = vst.msk [vmem:[%s7192_s16 + $0xb0] sm:$0xff] %vm4363_vm4, %v4353_v15  ;;  %v4168_v58 = vadd.f32 %v5014_v27, %v4167_v31  ;;  %v5016_v37 = vpop.eup %5015  ;;  %v2820_v31 = vadd.s32 248, %v6697_v43 }
 0x472   : > { %v5018_v35 = vpop.eup %5017  ;;  %v4180_v18 = vmul.f32 %v5016_v37, %v7913_v56  ;;  %5019 = vpow2.f32 %v4650_v30  ;;  %vm4185_vm3 = vweird.f32 %v5016_v37  ;;  %vm7983_vm9 = vcmp.eq.s32.totalorder %v3028_v32, 15 }
 0x473   : > { %v3306_v4 = vsel %vm3302_vm12, %v3297_v8, %v3298_v14  ;;  %v4172_v55 = vsel %vm4171_vm1, %v5014_v27, %v4168_v58  ;;  %v7944_v59 = vadd.f32 1.0, %v5018_v35  ;;  %vm4186_vm6 = vmor %vm4184_vm5, %vm4185_vm3  ;;  %v4191_v27 = vor.u32 1.1754944e-38, %v4190_v13 }
 0x474   : > { %v3618_v22 = vsel %vm7931_vm0, 0.0, %v3306_v4  ;;  %v4177_v0 = vsel %vm4174_vm2, %v4176_v62, %v4172_v55  ;;  %v4181_v38 = vsub.f32 1.0, %v4180_v18  ;;  %v2270_v50 = vpop.f32.mrf.mxu1  ;;  %v8482_v55 = vld [vmem:[#allocation129_spill] sm:$0xff] }
 0x475   : > { %v3650_v10 = vadd.f32 %v3618_v22, %v7301_v3  ;;  %v4322_v23 = vmul.f32 %v4177_v0, %v7863_v12  ;;  %5021 = vrcp.f32 %v7944_v59  ;;  %v4203_v44 = vand.u32 2147483647, %v7944_v59 }
 0x476   : > { %v2683_v20 = vpop.f32.mrf.mxu3  ;;  %v4182_v24 = vmul.f32 %v5016_v37, %v4181_v38  ;;  %vm4199_vm10 = vweird.f32 %v7944_v59  ;;  %v2271_v18 = vadd.f32 %v2270_v50, %v8482_v55 }
 0x477   : > { %v4354_v57 = vadd.f32 %v5070_v28, %v4322_v23  ;;  %v7954_v9 = vadd.f32 %v7645_v21, %v3650_v10  ;;  %v2781_v3 = vadd.f32 %v2683_v20, %v2265_v40  ;;  %vm4204_vm13 = vcmp.eq.f32.partialorder %v4203_v44, 8.507059e+37 }
 0x478   : > { %v4183_v12 = vadd.f32 %v5016_v37, %v4182_v24  ;;  %v5020_v8 = vpop.eup %5019  ;;  %v3042_v23 = vand.u32 15, %v2820_v31 }
 0x479   : > { %4387 = vst.msk [vmem:[%s7192_s16 + $0xb8] sm:$0xff] %vm4363_vm4, %v4354_v57  ;;  %v4651_v11 = vmul.f32 -1.442695, %v7954_v9  ;;  %v3299_v45 = vrot.slane %v2781_v3, 1  ;;  %v7962_v52 = vadd.f32 1.0, %v5020_v8 }
 0x47a   : > { %v4187_v48 = vsel %vm4186_vm6, %v5016_v37, %v4183_v12  ;;  %vm8006_vm15 = vcmp.eq.s32.totalorder %v3042_v23, 15 }
 0x47b   : > { %5023 = vpow2.f32 %v4651_v11  ;;  %v3305_v60 = vsel %vm3302_vm12, %v3298_v14, %v3299_v45  ;;  %v5022_v1 = vpop.eup %5021  ;;  %v4192_v56 = vsel %vm4189_vm7, %v4191_v27, %v4187_v48  ;;  %v4218_v25 = vand.u32 2147483647, %v7962_v52  ;;  %v5072_v11 = vld [vmem:[%s5466_s23 + $0xc8] sm:$0xff] }
 0x47c   : > { %v3651_v5 = vadd.f32 %v7367_v6, %v3305_v60  ;;  %v4323_v7 = vmul.f32 %v4192_v56, %v7882_v54  ;;  %v4195_v29 = vmul.f32 %v5022_v1, %v7944_v59  ;;  %5025 = vrcp.f32 %v7962_v52 }
 0x47d   : > { %v4205_v6 = vand.u32 2147483648, %v7944_v59  ;;  %vm4200_vm8 = vweird.f32 %v5022_v1  ;;  %v4220_v28 = vand.u32 2147483648, %v7962_v52  ;;  %vm4214_vm0 = vweird.f32 %v7962_v52 }
 0x47e   : > { %v2686_v26 = vpop.f32.mrf.mxu3  ;;  %v7972_v36 = vadd.f32 %v7645_v21, %v3651_v5  ;;  %v4355_v46 = vadd.f32 %v5071_v63, %v4323_v7  ;;  %v4196_v33 = vsub.f32 1.0, %v4195_v29  ;;  %vm4201_vm11 = vmor %vm4199_vm10, %vm4200_vm8  ;;  %vm4219_vm2 = vcmp.eq.f32.partialorder %v4218_v25, 8.507059e+37  ;;  %v5073_v63 = vld [vmem:[%s5466_s23 + $0xd0] sm:$0xff] }
 0x47f   : > { %v2784_v47 = vadd.f32 %v2686_v26, %v2268_v53  ;;  %v4206_v22 = vor.u32 1.1754944e-38, %v4205_v6 }
 0x480   : > { %v4652_v15 = vmul.f32 -1.442695, %v7972_v36  ;;  %4388 = vst.msk [vmem:[%s7192_s16 + $0xc0] sm:$0xff] %vm4363_vm4, %v4355_v46  ;;  %v4197_v14 = vmul.f32 %v5022_v1, %v4196_v33 }
 0x481   : > { %v5024_v54 = vpop.eup %5023  ;;  %v3300_v58 = vrot.slane %v2784_v47, 1 }
 0x482   : > { %v7981_v37 = vadd.f32 1.0, %v5024_v54  ;;  %5027 = vpow2.f32 %v4652_v15  ;;  %v5026_v30 = vpop.eup %5025  ;;  %v4198_v4 = vadd.f32 %v5022_v1, %v4197_v14 }
 0x483   : > { %v3304_v35 = vsel %vm3302_vm12, %v3299_v45, %v3300_v58  ;;  %v4210_v0 = vmul.f32 %v5026_v30, %v7962_v52  ;;  %vm4215_vm14 = vweird.f32 %v5026_v30  ;;  %v4221_v52 = vor.u32 1.1754944e-38, %v4220_v28 }
 0x484   : > { %5029 = vrcp.f32 %v7981_v37  ;;  %v4202_v10 = vsel %vm4201_vm11, %v5022_v1, %v4198_v4  ;;  %v3620_v51 = vsel %vm7983_vm9, 0.0, %v3304_v35  ;;  %vm4216_vm1 = vmor %vm4214_vm0, %vm4215_vm14  ;;  %v4235_v53 = vand.u32 2147483648, %v7981_v37 }
 0x485   : > { %v4207_v59 = vsel %vm4204_vm13, %v4206_v22, %v4202_v10  ;;  %v4211_v38 = vsub.f32 1.0, %v4210_v0  ;;  %v3652_v20 = vadd.f32 %v3620_v51, %v7398_v49  ;;  %v4233_v26 = vand.u32 2147483647, %v7981_v37 }
 0x486   : > { %v2689_v40 = vpop.f32.mrf.mxu3  ;;  %v4324_v13 = vmul.f32 %v4207_v59, %v7908_v39  ;;  %vm4229_vm3 = vweird.f32 %v7981_v37 }
 0x487   : > { %v2787_v2 = vadd.f32 %v2689_v40, %v2271_v18  ;;  %v4212_v24 = vmul.f32 %v5026_v30, %v4211_v38  ;;  %v8000_v3 = vadd.f32 %v7645_v21, %v3652_v20  ;;  %vm4234_vm6 = vcmp.eq.f32.partialorder %v4233_v26, 8.507059e+37  ;;  %v5075_v38 = vld [vmem:[%s5466_s23 + $0xe0] sm:$0xff] }
 0x488   : > { %v5028_v57 = vpop.eup %5027  ;;  %v4356_v45 = vadd.f32 %v5072_v11, %v4324_v13 }
 0x489   : > { %v3301_v12 = vrot.slane %v2787_v2, 1  ;;  %v8004_v49 = vadd.f32 1.0, %v5028_v57  ;;  %v4213_v27 = vadd.f32 %v5026_v30, %v4212_v24  ;;  %v4653_v34 = vmul.f32 -1.442695, %v8000_v3 }
 0x48a   : > { %v5030_v8 = vpop.eup %5029  ;;  %4389 = vst.msk [vmem:[%s7192_s16 + $0xc8] sm:$0xff] %vm4363_vm4, %v4356_v45 }
 0x48b   : > { %v3303_v48 = vsel %vm3302_vm12, %v3300_v58, %v3301_v12  ;;  %v3334_v60 = vsel %vm3302_vm12, %v3301_v12, %v3270_v41  ;;  %v4225_v1 = vmul.f32 %v5030_v8, %v7981_v37  ;;  %5031 = vrcp.f32 %v8004_v49 }
 0x48c   : > { %v4217_v56 = vsel %vm4216_vm1, %v5026_v30, %v4213_v27  ;;  %5033 = vpow2.f32 %v4653_v34  ;;  %v3622_v61 = vsel %vm8006_vm15, 0.0, %v3334_v60  ;;  %v3653_v43 = vadd.f32 %v7455_v19, %v3303_v48  ;;  %v5074_v30 = vld [vmem:[%s5466_s23 + $0xd8] sm:$0xff] }
 0x48d   : > { %v4222_v5 = vsel %vm4219_vm2, %v4221_v52, %v4217_v56  ;;  %v4226_v16 = vsub.f32 1.0, %v4225_v1  ;;  %v3654_v7 = vadd.f32 %v3622_v61, %v7502_v17  ;;  %vm4230_vm12 = vweird.f32 %v5030_v8  ;;  %v5076_v56 = vld [vmem:[%s5466_s23 + $0xe8] sm:$0xff] }
 0x48e   : > { %v4325_v41 = vmul.f32 %v4222_v5, %v7929_v42  ;;  %v8029_v32 = vadd.f32 %v7645_v21, %v3653_v43  ;;  %vm4231_vm5 = vmor %vm4229_vm3, %vm4230_vm12  ;;  %v4236_v17 = vor.u32 1.1754944e-38, %v4235_v53  ;;  %v4250_v58 = vand.u32 2147483648, %v8004_v49 }
 0x48f   : > { %v4227_v29 = vmul.f32 %v5030_v8, %v4226_v16  ;;  %v8033_v33 = vadd.f32 %v7645_v21, %v3654_v7  ;;  %v4248_v62 = vand.u32 2147483647, %v8004_v49  ;;  %vm4244_vm8 = vweird.f32 %v8004_v49 }
 0x490   : > { %v4357_v46 = vadd.f32 %v5073_v63, %v4325_v41  ;;  %v4654_v42 = vmul.f32 -1.442695, %v8029_v32  ;;  %v4251_v18 = vor.u32 1.1754944e-38, %v4250_v58 }
 0x491   : > { %v5032_v19 = vpop.eup %5031  ;;  %v4228_v47 = vadd.f32 %v5030_v8, %v4227_v29  ;;  %v4655_v31 = vmul.f32 -1.442695, %v8033_v33  ;;  %vm4249_vm10 = vcmp.eq.f32.partialorder %v4248_v62, 8.507059e+37 }
 0x492   : > { %v5034_v6 = vpop.eup %5033  ;;  %4390 = vst.msk [vmem:[%s7192_s16 + $0xd0] sm:$0xff] %vm4363_vm4, %v4357_v46  ;;  %v4240_v15 = vmul.f32 %v5032_v19, %v8004_v49  ;;  %5035 = vpow2.f32 %v4654_v42  ;;  %vm4245_vm7 = vweird.f32 %v5032_v19 }
 0x493   : > { %v4232_v54 = vsel %vm4231_vm5, %v5030_v8, %v4228_v47  ;;  %v3816_v21 = vadd.f32 1.0, %v5034_v6  ;;  %5037 = vpow2.f32 %v4655_v31  ;;  %vm4246_vm9 = vmor %vm4244_vm8, %vm4245_vm7  ;;  %v5077_v47 = vld [vmem:[%s5466_s23 + $0xf0] sm:$0xff]  ;;  %v5078_v6 = vld [vmem:[%s5466_s23 + $0xf8] sm:$0xff] }
 0x494   : > { %v4237_v50 = vsel %vm4234_vm6, %v4236_v17, %v4232_v54  ;;  %v4241_v14 = vsub.f32 1.0, %v4240_v15 }
 0x495   : > { %v4326_v44 = vmul.f32 %v4237_v50, %v7954_v9  ;;  %5039 = vrcp.f32 %v3816_v21  ;;  %v4265_v13 = vand.u32 2147483648, %v3816_v21  ;;  %v4263_v28 = vand.u32 2147483647, %v3816_v21 }
 0x496   : > { %v4242_v37 = vmul.f32 %v5032_v19, %v4241_v14  ;;  %vm4259_vm13 = vweird.f32 %v3816_v21 }
 0x497   : > { %v4358_v4 = vadd.f32 %v5074_v30, %v4326_v44  ;;  %v4266_v11 = vor.u32 1.1754944e-38, %v4265_v13  ;;  %vm4264_vm0 = vcmp.eq.f32.partialorder %v4263_v28, 8.507059e+37 }
 0x498   : > { %v4243_v35 = vadd.f32 %v5032_v19, %v4242_v37  ;;  %v5036_v55 = vpop.eup %5035 }
 0x499   : > { %4391 = vst.msk [vmem:[%s7192_s16 + $0xd8] sm:$0xff] %vm4363_vm4, %v4358_v4  ;;  %v5038_v9 = vpop.eup %5037  ;;  %v3817_v0 = vadd.f32 1.0, %v5036_v55 }
 0x49a   : > { %v4247_v22 = vsel %vm4246_vm9, %v5032_v19, %v4243_v35  ;;  %v3818_v40 = vadd.f32 1.0, %v5038_v9 }
 0x49b   : > { %v5040_v10 = vpop.eup %5039  ;;  %v4252_v51 = vsel %vm4249_vm10, %v4251_v18, %v4247_v22  ;;  %5041 = vrcp.f32 %v3817_v0  ;;  %v4280_v34 = vand.u32 2147483648, %v3817_v0  ;;  %v4278_v52 = vand.u32 2147483647, %v3817_v0 }
 0x49c   : > { %v4327_v23 = vmul.f32 %v4252_v51, %v7972_v36  ;;  %v4255_v59 = vmul.f32 %v5040_v10, %v3816_v21  ;;  %5043 = vrcp.f32 %v3818_v40  ;;  %vm4260_vm11 = vweird.f32 %v5040_v10 }
 0x49d   : > { %vm4261_vm14 = vmor %vm4259_vm13, %vm4260_vm11  ;;  %v4295_v1 = vand.u32 2147483648, %v3818_v40  ;;  %v4293_v61 = vand.u32 2147483647, %v3818_v40  ;;  %vm4274_vm2 = vweird.f32 %v3817_v0  ;;  %v4281_v41 = vor.u32 1.1754944e-38, %v4280_v34 }
 0x49e   : > { %v4359_v20 = vadd.f32 %v5075_v38, %v4327_v23  ;;  %v4256_v2 = vsub.f32 1.0, %v4255_v59  ;;  %vm4289_vm3 = vweird.f32 %v3818_v40  ;;  %vm4279_vm5 = vcmp.eq.f32.partialorder %v4278_v52, 8.507059e+37 }
 0x49f   : > { %v4296_v7 = vor.u32 1.1754944e-38, %v4295_v1  ;;  %vm4294_vm7 = vcmp.eq.f32.partialorder %v4293_v61, 8.507059e+37 }
 0x4a0   : > { %4392 = vst.msk [vmem:[%s7192_s16 + $0xe0] sm:$0xff] %vm4363_vm4, %v4359_v20  ;;  %v4257_v25 = vmul.f32 %v5040_v10, %v4256_v2 }
 0x4a1   : > { %v5042_v57 = vpop.eup %5041 }
 0x4a2   : > { %v4258_v24 = vadd.f32 %v5040_v10, %v4257_v25  ;;  %v5044_v12 = vpop.eup %5043  ;;  %v4270_v36 = vmul.f32 %v5042_v57, %v3817_v0  ;;  %vm4275_vm15 = vweird.f32 %v5042_v57 }
 0x4a3   : > { %v4285_v49 = vmul.f32 %v5044_v12, %v3818_v40  ;;  %vm4290_vm1 = vweird.f32 %v5044_v12  ;;  %vm4276_vm12 = vmor %vm4274_vm2, %vm4275_vm15 }
 0x4a4   : > { %v4262_v45 = vsel %vm4261_vm14, %v5040_v10, %v4258_v24  ;;  %v4271_v8 = vsub.f32 1.0, %v4270_v36  ;;  %vm4291_vm6 = vmor %vm4289_vm3, %vm4290_vm1 }
 0x4a5   : > { %v4267_v39 = vsel %vm4264_vm0, %v4266_v11, %v4262_v45  ;;  %v4286_v48 = vsub.f32 1.0, %v4285_v49 }
 0x4a6   : > { %v4328_v27 = vmul.f32 %v4267_v39, %v8000_v3  ;;  %v4272_v60 = vmul.f32 %v5042_v57, %v4271_v8 }
 0x4a7   : > { %v4287_v16 = vmul.f32 %v5044_v12, %v4286_v48 }
 0x4a8   : > { %v4360_v5 = vadd.f32 %v5076_v56, %v4328_v27  ;;  %v4273_v43 = vadd.f32 %v5042_v57, %v4272_v60 }
 0x4a9   : > { %v4288_v3 = vadd.f32 %v5044_v12, %v4287_v16 }
 0x4aa   : > { %4393 = vst.msk [vmem:[%s7192_s16 + $0xe8] sm:$0xff] %vm4363_vm4, %v4360_v5  ;;  %v4277_v53 = vsel %vm4276_vm12, %v5042_v57, %v4273_v43 }
 0x4ab   : > { %v4282_v29 = vsel %vm4279_vm5, %v4281_v41, %v4277_v53  ;;  %v4292_v26 = vsel %vm4291_vm6, %v5044_v12, %v4288_v3 }
 0x4ac   : > { %v4297_v63 = vsel %vm4294_vm7, %v4296_v7, %v4292_v26  ;;  %v4329_v46 = vmul.f32 %v4282_v29, %v8029_v32 }
 0x4ad   : > { %v4330_v19 = vmul.f32 %v4297_v63, %v8033_v33 }
 0x4ae   : > { %v4361_v42 = vadd.f32 %v5077_v47, %v4329_v46 }
 0x4af   : > { %v4362_v17 = vadd.f32 %v5078_v6, %v4330_v19 }
 0x4b0   : > { %4394 = vst.msk [vmem:[%s7192_s16 + $0xf0] sm:$0xff] %vm4363_vm4, %v4361_v42 }
 0x4b1   : > { %4395 = vst.msk [vmem:[%s7192_s16 + $0xf8] sm:$0xff] %vm4363_vm4, %v4362_v17 }
 0x4b2 PF: > { %s24_s29 = sadd.s32 1, %s5287_s29   ;;  %s8485_s14 = sld [smem:[#allocation14_spill]] }
 0x4b3   : > { %p21_p2 = scmp.ge.s32.totalorder %s24_s29, 4   ;;  %s8486_s26 = sld [smem:[#allocation18_spill]] }
 0x4b4   : > { %s8487_s27 = sld [smem:[#allocation16_spill]]  ;;  %s8489_s24 = smov %s5271_s25 }
 0x4b5   : > { %s8488_s28 = sld [smem:[#allocation17_spill]]  ;;  %23 = sbr.rel (!%p21_p2) target bundleno = 12 (0xc), region = 120 }
 0x4b8   : > { %s8490_s25 = smov %s8485_s14 }
 0x4ba   :  { %4428 = vsyncpa [#allocation4], 1 }
 0x4bb   :  { %4430 = vsyncpa [#allocation4 + $0x1], 1 }
 0x4bc   :  { %4431 = vsyncpa [#allocation6], 1 }
 0x4bd   :  { %4433 = vsyncpa [#allocation6 + $0x1], 1 }
 0x4be   :  { %4434 = vsyncpa [#allocation9], 1 }

// kernel: tpu_custom_call.1
= control target key start
LH: loop header
LB: loop body
LE: loop exit
PB: predicated region body
PF: predicated region fallthrough
CT: control target
= control target key end

     0   :  { %s8082_s0 = inlined_call_operand.hbm [shape: f32[2,16,16,128], index: 0, kind: input, shape index: {}]   ;;  %s8083_s1 = inlined_call_operand.hbm [shape: f32[2,16,16,128], index: 1, kind: input, shape index: {}]   ;;  %s8084_s2 = inlined_call_operand.hbm [shape: f32[2,16,16,128], index: 2, kind: input, shape index: {}]   ;;  %s8085_s3 = inlined_call_operand.hbm [shape: f32[128,128], index: 3, kind: input, shape index: {}]   ;;  %s8086_s4 = inlined_call_operand.vmem [shape: f32[1,128], index: 4, kind: input, shape index: {}]   ;;  %s8087_s5 = inlined_call_operand.hbm [shape: f32[384,384], index: 5, kind: input, shape index: {}]   ;;  %s8088_s6 = inlined_call_operand.vmem [shape: f32[1,128], index: 6, kind: input, shape index: {}]   ;;  %s8089_s7 = inlined_call_operand.vmem [shape: f32[2,16,16,4], index: 7, kind: output, shape index: {}]  }
   0x1   :  { %8112 = sst [smem:[#allocation132_spill]] %s8083_s1 }
   0x2   :  { %8113 = sst [smem:[#allocation133_spill]] %s8085_s3 }
   0x3   :  { %8114 = sst [smem:[#allocation134_spill]] %s8087_s5 }
   0x4   :  { %8115 = sst [smem:[#allocation135_spill]] %s8089_s7 }
   0x5   :  { %12 = vsyncpa [#allocation4], 0 }
   0x6   :  { %14 = vsyncpa [#allocation4 + $0x1], 0 }
   0x7   :  { %15 = vsyncpa [#allocation6], 0 }
   0x8   :  { %17 = vsyncpa [#allocation6 + $0x1], 0 }
   0x9   :  { %18 = vsyncpa [#allocation9], 0  ;;  %s5336_s24 = smov 0   ;;  %s5338_s25 = smov 0  }
   0xa   :  { %s5340_s26 = smov 0   ;;  %s5342_s27 = smov 0  }
   0xb   :  { %s5344_s28 = smov 0   ;;  %s5346_s29 = smov 0  }
   0xc LB: > { %8116 = sst [smem:[#allocation14_spill]] %s5275_s26  ;;  %s8090_s30 = sadd.s32 4294967295, %s5287_s29   ;;  %s5287_s29 = sphi %s5346_s29, %s24_s29   ;;  %s5283_s28 = sphi %s5344_s28, %s8488_s28   ;;  %s5279_s27 = sphi %s5342_s27, %s8487_s27   ;;  %s5275_s26 = sphi %s5340_s26, %s8486_s26   ;;  %s5271_s25 = sphi %s5338_s25, %s8490_s25   ;;  %s5267_s24 = sphi %s5336_s24, %s8489_s24  }
   0xd   : > { %8117 = sst [smem:[#allocation15_spill]] %s5279_s27  ;;  %p58_p0 = scmp.ne.s32.totalorder %s5271_s25, %s5267_s24 }
   0xe   : > { %8118 = sst [smem:[#allocation16_spill]] %s5283_s28  ;;  %p5368_p1 = scmp.eq.s32.totalorder %s8090_s30, 0 }
   0xf   : > { %p4567_p2 = scmp.ge.s32.totalorder %s5287_s29, 1  ;;  %p253_p3 = scmp.lt.s32.totalorder %s5287_s29, 3 }
  0x10   : > { %p5376_p4 = por %p5368_p1, %p58_p0  ;;  %s8121_s3 = sld [smem:[#allocation133_spill]] }
  0x11   : > { %p5383_p5 = pnand %p4567_p2, %p253_p3  ;;  %s5289_s14 = smov [#allocation8]  }
  0x12   : > { %s266_s15 = sshll.u32 %s5289_s14, 4  ;;  %s8091_s17 = smov 128   ;;  %s267_s15 = int_to_ptr.vmem [resolvable:$true] %s266_s15 }
  0x13   : > { %p4710_p6 = pneg %p5383_p5  ;;  %s8093_s18 = smov 8  }
  0x14   : > { %s36_s19 = sadd.s32 1, %s5283_s28  ;;  %s45_s20 = sadd.s32 1, %s5275_s26 }
  0x15   : > { %p5391_p7 = pnand %p4710_p6, %p5368_p1  ;;  %p38_p8 = scmp.ge.s32.totalorder %s36_s19, 2 }
  0x16   : > { %s264_s12 = sshll.u32 %s8121_s3, 4  ;;  %p52_p9 = scmp.ne.s32.totalorder %s5275_s26, %s5271_s25  ;;  %s265_s12 = int_to_ptr.hbm [resolvable:$true] %s264_s12 }
  0x17   : > { %4713 = dma.hbm_to_vmem [thread:$0]  (!%p5391_p7), %s265_s12, 2048, %s267_s15, [#allocation9], %s8091_s17, %s8091_s17, %s8093_s18  }
  0x18   : > { %p53_p10 = scmp.eq.s32.totalorder %s5287_s29, 0  ;;  %s8492_s19 = smov (%p38_p8, %s36_s19), 0 }
  0x19   : > { %8124 = sst [smem:[#allocation17_spill]] %s8492_s19  ;;  %p4729_p12 = scmp.lt.s32.totalorder %s5287_s29, 2 }
  0x1a   : > { %p54_p11 = por %p53_p10, %p52_p9  ;;  %s40_s21 = ssub.s32 %s5283_s28, %s8492_s19 }
  0x1b   : > { %s5411_s22 = sand.u32 1, %s5275_s26   ;;  %p43_p13 = scmp.eq.s32.totalorder %s40_s21, 0 }
  0x1c   : > { %s5414_s23 = sshll.u32 %s5283_s28, 8  ;;  %p5416_p0 = pnand %p4729_p12, %p54_p11 }
  0x1d   : > { %s325_s10 = sand.u32 1, %s5287_s29   ;;  %s4574_s12 = sshll.u32 %s5411_s22, 4 }
  0x1e   : > { %s5422_s11 = scalar_select %p43_p13, %s5275_s26, %s45_s20  }
  0x1f   : > { %s8127_s1 = sld [smem:[#allocation132_spill]]  ;;  %s329_s21 = scalar_lea.vmem [#allocation5], %s4574_s12 }
  0x20   : > { %8126 = sst [smem:[#allocation18_spill]] %s5422_s11  ;;  %s343_s18 = sshll.u32 %s329_s21, 4  ;;  %s344_s18 = int_to_ptr.vmem [resolvable:$true] %s343_s18 }
  0x21   : > { %s5429_s3 = scalar_lea.sflag [#allocation6], %s325_s10  ;;  %s8128_s19 = smov 8  }
  0x22   : > { %s8129_s28 = smov 128   ;;  %s8130_s5 = sld [smem:[#allocation134_spill]] }
  0x23   : > { %s5292_s21 = smov [#allocation10]   ;;  %s5293_s10 = smov 384  }
  0x24   : > { %s5294_s26 = smov 24   ;;  %s312_s11 = scalar_lea.hbm %s8082_s0, %s5414_s23 }
  0x25   : > { %s340_s30 = scalar_lea.hbm %s8127_s1, %s5414_s23  ;;  %s283_s1 = sshll.u32 %s5292_s21, 4  ;;  %s284_s1 = int_to_ptr.vmem [resolvable:$true] %s283_s1 }
  0x26   : > { %s341_s17 = sshll.u32 %s340_s30, 4  ;;  %s357_s30 = scalar_lea.vmem [#allocation7], %s4574_s12  ;;  %s342_s17 = int_to_ptr.hbm [resolvable:$true] %s341_s17 }
  0x27   : > { %4723 = dma.hbm_to_vmem [thread:$0]  (!%p5416_p0), %s342_s17, 256, %s344_s18, %s5429_s3, %s8129_s28, %s8129_s28, %s8128_s19  }
  0x28   : > { %s281_s14 = sshll.u32 %s8130_s5, 4  ;;  %s371_s15 = sshll.u32 %s357_s30, 4  ;;  %s282_s14 = int_to_ptr.hbm [resolvable:$true] %s281_s14  ;;  %s372_s15 = int_to_ptr.vmem [resolvable:$true] %s371_s15 }
  0x29   : > { %4716 = dma.hbm_to_vmem [thread:$0]  (!%p5391_p7), %s282_s14, 18432, %s284_s1, [#allocation9], %s5293_s10, %s5293_s10, %s5294_s26  }
  0x2a   : > { %s4571_s17 = sshll.u32 %s5411_s22, 8  ;;  %s313_s12 = sshll.u32 %s312_s11, 4  ;;  %s314_s12 = int_to_ptr.hbm [resolvable:$true] %s313_s12 }
  0x2b   : > { %s304_s20 = scalar_lea.vmem [#allocation3], %s4571_s17  ;;  %s4661_s5 = sadd.s32 240, %s5414_s23 }
  0x2c   : > { %s315_s30 = sshll.u32 %s304_s20, 4  ;;  %s301_s27 = scalar_lea.sflag [#allocation4], %s5411_s22  ;;  %s316_s30 = int_to_ptr.vmem [resolvable:$true] %s315_s30 }
  0x2d   : > { %4720 = dma.hbm_to_vmem [thread:$0]  (!%p5416_p0), %s314_s12, 4096, %s316_s30, %s301_s27, %s8129_s28, %s8129_s28, %s8128_s19  }
  0x2e   : > { %s368_s26 = scalar_lea.hbm %s8084_s2, %s4661_s5  ;;  %383 = sbr.rel (%p5383_p5) target bundleno = 1202 (0x4b2), region = 48 }
  0x2f   : > { %s369_s14 = sshll.u32 %s368_s26, 4  ;;  %s370_s14 = int_to_ptr.hbm [resolvable:$true] %s369_s14 }
  0x30   : > { %4726 = dma.hbm_to_vmem [thread:$0]  (!%p5416_p0), %s370_s14, 256, %s372_s15, %s5429_s3, %s8129_s28, %s8129_s28, %s8128_s19  }
  0x33   : > { %s385_s7 = sand.u32 1, %s5271_s25  }
  0x34   : > { %s4581_s22 = sshll.u32 %s385_s7, 8  ;;  %s386_s27 = scalar_lea.sflag [#allocation4], %s385_s7 }
  0x35   : > { %s5466_s23 = scalar_lea.vmem [#allocation3], %s4581_s22 }
  0x36   : > { %5254 = dma.done.wait (%p5376_p4), %s386_s27, 4096  }
  0x37   : > { %5256 = vsyncadd (%p5376_p4), %s386_s27, 4294963200  ;;  %s8131_s5 = sadd.s32 4294967295, %s5287_s29   ;;  %s4582_s3 = sshll.u32 %s385_s7, 4 }
  0x38   : > { %s395_s24 = sand.u32 1, %s8131_s5   ;;  %s5474_s13 = scalar_lea.vmem [#allocation5], %s4582_s3 }
  0x39   : > { %s396_s28 = scalar_lea.sflag [#allocation6], %s395_s24 }
  0x3a   : > { %5258 = dma.done.wait (%p5376_p4), %s396_s28, 512  }
  0x3b   : > { %5260 = vsyncadd (%p5376_p4), %s396_s28, 4294966784  ;;  %s5480_s19 = scalar_lea.vmem [#allocation7], %s4582_s3 }
  0x3c   : > { %5262 = dma.done.wait (%p5368_p1), [#allocation9], 20480  }
  0x3d   : > { %5264 = vsyncadd (%p5368_p1), [#allocation9], 4294946816  ;;  %v5486_v0 = vld [vmem:[#allocation8 + $0x78] sm:$0xff]  ;;  %v5488_v1 = vld [vmem:[#allocation8 + $0x70] sm:$0xff]  ;;  %s8381_s18 = sld [smem:[#allocation15_spill]] }
  0x3e   : > { %538 = vmatpush.msra.mxu0 %v5486_v0  ;;  %4664 = vmatpush.msra.mxu1 %v5486_v0  ;;  %v5492_v2 = vld [vmem:[#allocation8 + $0x68] sm:$0xff]  ;;  %v5497_v3 = vld [vmem:[#allocation8 + $0x60] sm:$0xff]  ;;  %v5502_v4 = vld [vmem:[#allocation8 + $0x58] sm:$0xff]  ;;  %s8393_s30 = sld [smem:[#allocation135_spill]] }
  0x3f   : > { %1398 = vmatpush.msra.mxu2 %v5486_v0  ;;  %v496_v5 = vld [vmem:[#allocation8 + $0x50] sm:$0xff]  ;;  %v495_v6 = vld [vmem:[#allocation8 + $0x48] sm:$0xff]  ;;  %v494_v7 = vld [vmem:[#allocation8 + $0x40] sm:$0xff] }
  0x40   : > { %539 = vmatpush.msra.mxu0 %v5488_v1  ;;  %4665 = vmatpush.msra.mxu1 %v5488_v1  ;;  %v493_v8 = vld [vmem:[#allocation8 + $0x38] sm:$0xff]  ;;  %v492_v9 = vld [vmem:[#allocation8 + $0x30] sm:$0xff]  ;;  %v491_v10 = vld [vmem:[#allocation8 + $0x28] sm:$0xff] }
  0x41   : > { %1399 = vmatpush.msra.mxu2 %v5488_v1  ;;  %v490_v11 = vld [vmem:[#allocation8 + $0x20] sm:$0xff]  ;;  %v489_v12 = vld [vmem:[#allocation8 + $0x18] sm:$0xff]  ;;  %v488_v13 = vld [vmem:[#allocation8 + $0x10] sm:$0xff] }
  0x42   : > { %540 = vmatpush.msra.mxu0 %v5492_v2  ;;  %4666 = vmatpush.msra.mxu1 %v5492_v2  ;;  %v487_v14 = vld [vmem:[#allocation8 + $0x8] sm:$0xff]  ;;  %v486_v15 = vld [vmem:[#allocation8] sm:$0xff]  ;;  %v521_v17 = vld [vmem:[%s5466_s23 + $0x90] sm:$0xff] }
  0x43   : > { %1400 = vmatpush.msra.mxu2 %v5492_v2  ;;  %v503_v16 = vld [vmem:[%s5466_s23] sm:$0xff]  ;;  %v504_v18 = vld [vmem:[%s5466_s23 + $0x8] sm:$0xff]  ;;  %v522_v19 = vld [vmem:[%s5466_s23 + $0x98] sm:$0xff]  ;;  %p476_p1 = scmp.lt.s32.totalorder %s8381_s18, 1 }
  0x44   : > { %541 = vmatpush.msra.mxu0 %v5497_v3  ;;  %4667 = vmatpush.msra.mxu1 %v5497_v3  ;;  %v505_v20 = vld [vmem:[%s5466_s23 + $0x10] sm:$0xff]  ;;  %v523_v21 = vld [vmem:[%s5466_s23 + $0xa0] sm:$0xff]  ;;  %v506_v22 = vld [vmem:[%s5466_s23 + $0x18] sm:$0xff] }
  0x45   : > { %1401 = vmatpush.msra.mxu2 %v5497_v3  ;;  %v524_v23 = vld [vmem:[%s5466_s23 + $0xa8] sm:$0xff]  ;;  %v507_v24 = vld [vmem:[%s5466_s23 + $0x20] sm:$0xff]  ;;  %v525_v25 = vld [vmem:[%s5466_s23 + $0xb0] sm:$0xff]  ;;  %s8494_s18 = smov (!%p476_p1, %s8381_s18), 1 }
  0x46   : > { %542 = vmatpush.msra.mxu0 %v5502_v4  ;;  %4668 = vmatpush.msra.mxu1 %v5502_v4  ;;  %v508_v26 = vld [vmem:[%s5466_s23 + $0x28] sm:$0xff]  ;;  %v526_v27 = vld [vmem:[%s5466_s23 + $0xb8] sm:$0xff]  ;;  %v509_v28 = vld [vmem:[%s5466_s23 + $0x30] sm:$0xff]  ;;  %s4662_s11 = sshll.u32 %s8494_s18, 8 }
  0x47   : > { %1402 = vmatpush.msra.mxu2 %v5502_v4  ;;  %v527_v29 = vld [vmem:[%s5466_s23 + $0xc0] sm:$0xff]  ;;  %v510_v30 = vld [vmem:[%s5466_s23 + $0x38] sm:$0xff]  ;;  %v528_v31 = vld [vmem:[%s5466_s23 + $0xc8] sm:$0xff]  ;;  %s7192_s16 = scalar_lea.vmem %s8393_s30, %s4662_s11 }
  0x48   : > { %543 = vmatpush.msra.mxu0 %v496_v5  ;;  %4669 = vmatpush.msra.mxu1 %v496_v5  ;;  %v511_v32 = vld [vmem:[%s5466_s23 + $0x40] sm:$0xff]  ;;  %v529_v33 = vld [vmem:[%s5466_s23 + $0xd0] sm:$0xff]  ;;  %v512_v34 = vld [vmem:[%s5466_s23 + $0x48] sm:$0xff] }
  0x49   : > { %1403 = vmatpush.msra.mxu2 %v496_v5  ;;  %v530_v35 = vld [vmem:[%s5466_s23 + $0xd8] sm:$0xff]  ;;  %v513_v36 = vld [vmem:[%s5466_s23 + $0x50] sm:$0xff]  ;;  %v531_v37 = vld [vmem:[%s5466_s23 + $0xe0] sm:$0xff] }
  0x4a   : > { %544 = vmatpush.msra.mxu0 %v495_v6  ;;  %4670 = vmatpush.msra.mxu1 %v495_v6  ;;  %v1542_v38 = vld [vmem:[#allocation10 + $0x168] sm:$0xff]  ;;  %v1539_v39 = vld [vmem:[#allocation10 + $0x150] sm:$0xff]  ;;  %v1536_v40 = vld [vmem:[#allocation10 + $0x138] sm:$0xff] }
  0x4b   : > { %1404 = vmatpush.msra.mxu2 %v495_v6  ;;  %v1533_v41 = vld [vmem:[#allocation10 + $0x120] sm:$0xff]  ;;  %v514_v42 = vld [vmem:[%s5466_s23 + $0x58] sm:$0xff]  ;;  %v532_v43 = vld [vmem:[%s5466_s23 + $0xe8] sm:$0xff] }
  0x4c   : > { %545 = vmatpush.msra.mxu0 %v494_v7  ;;  %4671 = vmatpush.msra.mxu1 %v494_v7  ;;  %v1530_v44 = vld [vmem:[#allocation10 + $0x108] sm:$0xff]  ;;  %v1527_v45 = vld [vmem:[#allocation10 + $0xf0] sm:$0xff]  ;;  %v1524_v46 = vld [vmem:[#allocation10 + $0xd8] sm:$0xff] }
  0x4d   : > { %1405 = vmatpush.msra.mxu2 %v494_v7  ;;  %v515_v47 = vld [vmem:[%s5466_s23 + $0x60] sm:$0xff]  ;;  %v533_v48 = vld [vmem:[%s5466_s23 + $0xf0] sm:$0xff]  ;;  %v1592_v49 = vld [vmem:[#allocation10 + $0x2e8] sm:$0xff] }
  0x4e   : > { %546 = vmatpush.msra.mxu0 %v493_v8  ;;  %4672 = vmatpush.msra.mxu1 %v493_v8  ;;  %v1593_v50 = vld [vmem:[#allocation10 + $0x2f0] sm:$0xff]  ;;  %v1521_v51 = vld [vmem:[#allocation10 + $0xc0] sm:$0xff]  ;;  %v1590_v53 = vld [vmem:[#allocation10 + $0x2d8] sm:$0xff] }
  0x4f   : > { %1406 = vmatpush.msra.mxu2 %v493_v8  ;;  %v1589_v52 = vld [vmem:[#allocation10 + $0x2d0] sm:$0xff]  ;;  %v1518_v54 = vld [vmem:[#allocation10 + $0xa8] sm:$0xff]  ;;  %v1586_v55 = vld [vmem:[#allocation10 + $0x2b8] sm:$0xff]  ;;  %4680 = vmatpush.msra.mxu3 %v1592_v49 }
  0x50   : > { %547 = vmatpush.msra.mxu0 %v492_v9  ;;  %4673 = vmatpush.msra.mxu1 %v492_v9  ;;  %v1587_v56 = vld [vmem:[#allocation10 + $0x2c0] sm:$0xff]  ;;  %v1515_v57 = vld [vmem:[#allocation10 + $0x90] sm:$0xff]  ;;  %v1584_v59 = vld [vmem:[#allocation10 + $0x2a8] sm:$0xff] }
  0x51   : > { %1407 = vmatpush.msra.mxu2 %v492_v9  ;;  %v1583_v58 = vld [vmem:[#allocation10 + $0x2a0] sm:$0xff]  ;;  %v1512_v60 = vld [vmem:[#allocation10 + $0x78] sm:$0xff]  ;;  %4681 = vmatpush.msra.mxu3 %v1589_v52  ;;  %v516_v61 = vld [vmem:[%s5466_s23 + $0x68] sm:$0xff] }
  0x52   : > { %548 = vmatpush.msra.mxu0 %v491_v10  ;;  %4674 = vmatpush.msra.mxu1 %v491_v10  ;;  %v534_v62 = vld [vmem:[%s5466_s23 + $0xf8] sm:$0xff]  ;;  %v1580_v63 = vld [vmem:[#allocation10 + $0x288] sm:$0xff] }
  0x53   : > { %1408 = vmatpush.msra.mxu2 %v491_v10  ;;  %4682 = vmatpush.msra.mxu3 %v1586_v55 }
  0x54   : > { %549 = vmatpush.msra.mxu0 %v490_v11  ;;  %4675 = vmatpush.msra.mxu1 %v490_v11 }
  0x55   : > { %1409 = vmatpush.msra.mxu2 %v490_v11  ;;  %4683 = vmatpush.msra.mxu3 %v1583_v58 }
  0x56   : > { %550 = vmatpush.msra.mxu0 %v489_v12  ;;  %4676 = vmatpush.msra.mxu1 %v489_v12 }
  0x57   : > { %1410 = vmatpush.msra.mxu2 %v489_v12  ;;  %4684 = vmatpush.msra.mxu3 %v1580_v63 }
  0x58   : > { %551 = vmatpush.msra.mxu0 %v488_v13  ;;  %4677 = vmatpush.msra.mxu1 %v488_v13 }
  0x59   : > { %1411 = vmatpush.msra.mxu2 %v488_v13 }
  0x5a   : > { %552 = vmatpush.msra.mxu0 %v487_v14  ;;  %4678 = vmatpush.msra.mxu1 %v487_v14 }
  0x5b   : > { %1412 = vmatpush.msra.mxu2 %v487_v14 }
  0x5c   : > { %553 = vmatpush.msra.mxu0 %v486_v15  ;;  %4679 = vmatpush.msra.mxu1 %v486_v15 }
  0x5d   : > { %554 = vmatmul.f32.vlgmr.msra.gmra.mxu0 %v503_v16  ;;  %608 = vmatmul.f32.vlgmr.msra.gmra.mxu1 %v521_v17  ;;  %v1497_v16 = vld [vmem:[#allocation10] sm:$0xff]  ;;  %v1565_v17 = vld [vmem:[#allocation10 + $0x210] sm:$0xff] }
  0x5e   : > { %1325 = vmatpush.msrb.mxu1 %v5486_v0  ;;  %1413 = vmatpush.msra.mxu2 %v486_v15  ;;  %v1581_v0 = vld [vmem:[#allocation10 + $0x290] sm:$0xff] }
  0x5f   : > { %1934 = vmatpush.msrb.mxu0 %v1542_v38  ;;  %v1547_v38 = vld [vmem:[#allocation10 + $0x180] sm:$0xff] }
  0x60   : > { %1326 = vmatpush.msrb.mxu1 %v5488_v1  ;;  %1595 = vmatpush.msrb.mxu2 %v1592_v49  ;;  %v1509_v1 = vld [vmem:[#allocation10 + $0x60] sm:$0xff] }
  0x61   : > { %1935 = vmatpush.msrb.mxu0 %v1539_v39  ;;  %v1548_v39 = vld [vmem:[#allocation10 + $0x188] sm:$0xff] }
  0x62   : > { %1327 = vmatpush.msrb.mxu1 %v5492_v2  ;;  %1596 = vmatpush.msrb.mxu2 %v1589_v52  ;;  %v1577_v2 = vld [vmem:[#allocation10 + $0x270] sm:$0xff] }
  0x63   : > { %1936 = vmatpush.msrb.mxu0 %v1536_v40  ;;  %4685 = vmatpush.msra.mxu3 %v1577_v2 }
  0x64   : > { %1328 = vmatpush.msrb.mxu1 %v5497_v3  ;;  %1597 = vmatpush.msrb.mxu2 %v1586_v55  ;;  %v1578_v3 = vld [vmem:[#allocation10 + $0x278] sm:$0xff] }
  0x65   : > { %557 = vmatmul.f32.gmra.mxu0 %v504_v18  ;;  %611 = vmatmul.f32.gmra.mxu1 %v522_v19  ;;  %v1566_v18 = vld [vmem:[#allocation10 + $0x218] sm:$0xff] }
  0x66   : > { %1329 = vmatpush.msrb.mxu1 %v5502_v4  ;;  %1937 = vmatpush.msrb.mxu0 %v1533_v41  ;;  %v1506_v4 = vld [vmem:[#allocation10 + $0x48] sm:$0xff]  ;;  %v1562_v19 = vld [vmem:[#allocation10 + $0x1f8] sm:$0xff] }
  0x67   : > { %1598 = vmatpush.msrb.mxu2 %v1583_v58  ;;  %v520_v41 = vld [vmem:[%s5466_s23 + $0x88] sm:$0xff] }
  0x68   : > { %1330 = vmatpush.msrb.mxu1 %v496_v5  ;;  %1938 = vmatpush.msrb.mxu0 %v1530_v44  ;;  %v1574_v5 = vld [vmem:[#allocation10 + $0x258] sm:$0xff] }
  0x69   : > { %1599 = vmatpush.msrb.mxu2 %v1580_v63  ;;  %4686 = vmatpush.msra.mxu3 %v1574_v5 }
  0x6a   : > { %1331 = vmatpush.msrb.mxu1 %v495_v6  ;;  %1939 = vmatpush.msrb.mxu0 %v1527_v45  ;;  %v1575_v6 = vld [vmem:[#allocation10 + $0x260] sm:$0xff] }
  0x6b   : > { %1600 = vmatpush.msrb.mxu2 %v1577_v2 }
  0x6c   : > { %1332 = vmatpush.msrb.mxu1 %v494_v7  ;;  %1940 = vmatpush.msrb.mxu0 %v1524_v46  ;;  %v1503_v7 = vld [vmem:[#allocation10 + $0x30] sm:$0xff] }
  0x6d   : > { %560 = vmatmul.f32.gmra.mxu0 %v505_v20  ;;  %614 = vmatmul.f32.gmra.mxu1 %v523_v21  ;;  %v1563_v20 = vld [vmem:[#allocation10 + $0x200] sm:$0xff]  ;;  %v518_v21 = vld [vmem:[%s5466_s23 + $0x78] sm:$0xff] }
  0x6e   : > { %1333 = vmatpush.msrb.mxu1 %v493_v8  ;;  %1941 = vmatpush.msrb.mxu0 %v1521_v51  ;;  %v517_v8 = vld [vmem:[%s5466_s23 + $0x70] sm:$0xff]  ;;  %v8099_v51 = vmov 0.0  }
  0x6f   : > { %1601 = vmatpush.msrb.mxu2 %v1574_v5 }
  0x70   : > { %1334 = vmatpush.msrb.mxu1 %v492_v9  ;;  %1942 = vmatpush.msrb.mxu0 %v1518_v54  ;;  %v1571_v9 = vld [vmem:[#allocation10 + $0x240] sm:$0xff] }
  0x71   : > { %1602 = vmatpush.msrb.mxu2 %v1571_v9  ;;  %4687 = vmatpush.msra.mxu3 %v1571_v9 }
  0x72   : > { %1335 = vmatpush.msrb.mxu1 %v491_v10  ;;  %1943 = vmatpush.msrb.mxu0 %v1515_v57  ;;  %v1572_v10 = vld [vmem:[#allocation10 + $0x248] sm:$0xff] }
  0x74   : > { %1336 = vmatpush.msrb.mxu1 %v490_v11  ;;  %1944 = vmatpush.msrb.mxu0 %v1512_v60  ;;  %v1500_v11 = vld [vmem:[#allocation10 + $0x18] sm:$0xff] }
  0x75   : > { %563 = vmatmul.f32.gmra.mxu0 %v506_v22  ;;  %617 = vmatmul.f32.gmra.mxu1 %v524_v23  ;;  %v1559_v22 = vld [vmem:[#allocation10 + $0x1e0] sm:$0xff]  ;;  %v1560_v23 = vld [vmem:[#allocation10 + $0x1e8] sm:$0xff] }
  0x76   : > { %1337 = vmatpush.msrb.mxu1 %v489_v12  ;;  %1945 = vmatpush.msrb.mxu0 %v1509_v1  ;;  %v1323_v12 = vld [vmem:[%s5474_s13] sm:$0xff] }
  0x78   : > { %1338 = vmatpush.msrb.mxu1 %v488_v13  ;;  %1946 = vmatpush.msrb.mxu0 %v1506_v4  ;;  %v1396_v13 = vld [vmem:[%s5480_s19] sm:$0xff] }
  0x79   : > { %1414 = vmatmul.f32.vlgmr.msra.gmra.mxu2 %v1396_v13 }
  0x7a   : > { %1339 = vmatpush.msrb.mxu1 %v487_v14  ;;  %1947 = vmatpush.msrb.mxu0 %v1503_v7  ;;  %v1568_v14 = vld [vmem:[#allocation10 + $0x228] sm:$0xff] }
  0x7b   : > { %1603 = vmatpush.msrb.mxu2 %v1568_v14  ;;  %4688 = vmatpush.msra.mxu3 %v1568_v14 }
  0x7c   : > { %1340 = vmatpush.msrb.mxu1 %v486_v15  ;;  %1948 = vmatpush.msrb.mxu0 %v1500_v11  ;;  %v1569_v15 = vld [vmem:[#allocation10 + $0x230] sm:$0xff] }
  0x7d   : > { %566 = vmatmul.f32.gmra.mxu0 %v507_v24  ;;  %620 = vmatmul.f32.gmra.mxu1 %v525_v25  ;;  %v1324_v24 = vld [vmem:[%s5474_s13 + $0x8] sm:$0xff] }
  0x7e   : > { %1708 = vmatpush.msra.mxu1 %v1593_v50  ;;  %1949 = vmatpush.msrb.mxu0 %v1497_v16  ;;  %v1397_v25 = vld [vmem:[%s5480_s19 + $0x8] sm:$0xff] }
  0x7f   : > { %1604 = vmatpush.msrb.mxu2 %v1565_v17  ;;  %4689 = vmatpush.msra.mxu3 %v1565_v17 }
  0x80   : > { %1709 = vmatpush.msra.mxu1 %v1590_v53 }
  0x81   : > { %1605 = vmatpush.msrb.mxu2 %v1562_v19  ;;  %4690 = vmatpush.msra.mxu3 %v1562_v19 }
  0x82   : > { %1710 = vmatpush.msra.mxu1 %v1587_v56  ;;  %1417 = vmatmul.f32.gmra.mxu2 %v1397_v25 }
  0x83   : > { %1606 = vmatpush.msrb.mxu2 %v1559_v22  ;;  %4691 = vmatpush.msra.mxu3 %v1559_v22 }
  0x84   : > { %1711 = vmatpush.msra.mxu1 %v1584_v59 }
  0x85   : > { %569 = vmatmul.f32.gmra.mxu0 %v508_v26  ;;  %623 = vmatmul.f32.gmra.mxu1 %v526_v27  ;;  %v1556_v26 = vld [vmem:[#allocation10 + $0x1c8] sm:$0xff]  ;;  %v1557_v27 = vld [vmem:[#allocation10 + $0x1d0] sm:$0xff] }
  0x86   : > { %1712 = vmatpush.msra.mxu1 %v1581_v0  ;;  %1607 = vmatpush.msrb.mxu2 %v1556_v26 }
  0x87   : > { %4692 = vmatpush.msra.mxu3 %v1556_v26 }
  0x88   : > { %1713 = vmatpush.msra.mxu1 %v1578_v3 }
  0x8a   : > { %1714 = vmatpush.msra.mxu1 %v1575_v6 }
  0x8c   : > { %1715 = vmatpush.msra.mxu1 %v1572_v10 }
  0x8d   : > { %572 = vmatmul.f32.gmra.mxu0 %v509_v28  ;;  %626 = vmatmul.f32.gmra.mxu1 %v527_v29  ;;  %v1553_v28 = vld [vmem:[#allocation10 + $0x1b0] sm:$0xff]  ;;  %v1554_v29 = vld [vmem:[#allocation10 + $0x1b8] sm:$0xff] }
  0x8e   : > { %1716 = vmatpush.msra.mxu1 %v1569_v15  ;;  %1608 = vmatpush.msrb.mxu2 %v1553_v28 }
  0x8f   : > { %4693 = vmatpush.msra.mxu3 %v1553_v28 }
  0x90   : > { %1717 = vmatpush.msra.mxu1 %v1566_v18 }
  0x92   : > { %1718 = vmatpush.msra.mxu1 %v1563_v20 }
  0x94   : > { %1719 = vmatpush.msra.mxu1 %v1560_v23 }
  0x95   : > { %575 = vmatmul.f32.gmra.mxu0 %v510_v30  ;;  %629 = vmatmul.f32.gmra.mxu1 %v528_v31  ;;  %v5553_v30 = vld [vmem:[%s8086_s4] ss:$0 sm:$0xff]  ;;  %v1550_v31 = vld [vmem:[#allocation10 + $0x198] sm:$0xff] }
  0x96   : > { %1720 = vmatpush.msra.mxu1 %v1557_v27  ;;  %1609 = vmatpush.msrb.mxu2 %v1550_v31 }
  0x97   : > { %4694 = vmatpush.msra.mxu3 %v1550_v31 }
  0x98   : > { %1721 = vmatpush.msra.mxu1 %v1554_v29  ;;  %1610 = vmatpush.msrb.mxu2 %v1547_v38 }
  0x99   : > { %4695 = vmatpush.msra.mxu3 %v1547_v38 }
  0x9d   : > { %578 = vmatmul.f32.gmra.mxu0 %v511_v32  ;;  %632 = vmatmul.f32.gmra.mxu1 %v529_v33  ;;  %v1551_v32 = vld [vmem:[#allocation10 + $0x1a0] sm:$0xff] }
  0x9e   : > { %1722 = vmatpush.msra.mxu1 %v1551_v32 }
  0xa0   : > { %1723 = vmatpush.msra.mxu1 %v1548_v39 }
  0xa5   : > { %581 = vmatmul.f32.gmra.mxu0 %v512_v34  ;;  %635 = vmatmul.f32.gmra.mxu1 %v530_v35  ;;  %v519_v34 = vld [vmem:[%s5466_s23 + $0x80] sm:$0xff] }
  0xad   : > { %584 = vmatmul.f32.gmra.mxu0 %v513_v36  ;;  %638 = vmatmul.f32.gmra.mxu1 %v531_v37 }
  0xb5   : > { %587 = vmatmul.f32.gmra.mxu0 %v514_v42  ;;  %641 = vmatmul.f32.gmra.mxu1 %v532_v43 }
  0xbd   : > { %590 = vmatmul.f32.gmra.mxu0 %v515_v47  ;;  %644 = vmatmul.f32.gmra.mxu1 %v533_v48 }
  0xc5   : > { %593 = vmatmul.f32.gmra.mxu0 %v516_v61  ;;  %647 = vmatmul.f32.gmra.mxu1 %v534_v62 }
  0xcd   : > { %596 = vmatmul.f32.gmra.mxu0 %v517_v8  ;;  %1341 = vmatmul.f32.vlgmr.msrb.gmra.mxu1 %v1323_v12 }
  0xd5   : > { %599 = vmatmul.f32.gmra.mxu0 %v518_v21  ;;  %1344 = vmatmul.f32.gmra.mxu1 %v1324_v24 }
  0xda   : > { %v555_v33 = vpop.f32.mrf.mxu0  ;;  %v5556_v35 = vpop.f32.mrf.mxu1 }
  0xdb   : > { %v556_v36 = vadd.f32 %v5553_v30, %v555_v33 }
  0xdd   : > { %v4588_v37 = vmul.f32 -1.442695, %v556_v36  ;;  %602 = vmatmul.f32.gmra.mxu0 %v519_v34 }
  0xdf   : > { %4789 = vpow2.f32 %v4588_v37 }
  0xe2   : > { %v558_v40 = vpop.f32.mrf.mxu0  ;;  %v5563_v43 = vpop.f32.mrf.mxu1 }
  0xe3   : > { %v5561_v42 = vadd.f32 %v5553_v30, %v558_v40 }
  0xe5   : > { %v4790_v44 = vpop.eup %4789  ;;  %v4589_v45 = vmul.f32 -1.442695, %v5561_v42  ;;  %605 = vmatmul.f32.gmra.mxu0 %v520_v41 }
  0xe6   : > { %v747_v46 = vadd.f32 1.0, %v4790_v44 }
  0xe7   : > { %4791 = vpow2.f32 %v4589_v45 }
  0xe8   : > { %4793 = vrcp.f32 %v747_v46  ;;  %v790_v57 = vand.u32 2147483648, %v747_v46  ;;  %v788_v60 = vand.u32 2147483647, %v747_v46  ;;  %vm784_vm1 = vweird.f32 %v747_v46 }
  0xea   : > { %v561_v47 = vpop.f32.mrf.mxu0  ;;  %v5571_v54 = vpop.f32.mrf.mxu1  ;;  %v791_v2 = vor.u32 1.1754944e-38, %v790_v57  ;;  %vm789_vm3 = vcmp.eq.f32.partialorder %v788_v60, 8.507059e+37 }
  0xeb   : > { %v5567_v48 = vadd.f32 %v5553_v30, %v561_v47 }
  0xed   : > { %v4792_v49 = vpop.eup %4791  ;;  %v4590_v50 = vmul.f32 -1.442695, %v5567_v48  ;;  %1950 = vmatmul.f32.vlgmr.msrb.gmra.mxu0 %v8099_v51 }
  0xee   : > { %v4794_v52 = vpop.eup %4793  ;;  %v748_v53 = vadd.f32 1.0, %v4792_v49 }
  0xef   : > { %v780_v55 = vmul.f32 %v4794_v52, %v747_v46  ;;  %4795 = vpow2.f32 %v4590_v50  ;;  %vm785_vm0 = vweird.f32 %v4794_v52 }
  0xf0   : > { %4797 = vrcp.f32 %v748_v53  ;;  %vm786_vm2 = vmor %vm784_vm1, %vm785_vm0  ;;  %v805_v10 = vand.u32 2147483648, %v748_v53  ;;  %v803_v13 = vand.u32 2147483647, %v748_v53  ;;  %vm799_vm5 = vweird.f32 %v748_v53 }
  0xf1   : > { %v781_v56 = vsub.f32 1.0, %v780_v55 }
  0xf2   : > { %v564_v58 = vpop.f32.mrf.mxu0  ;;  %v5578_v7 = vpop.f32.mrf.mxu1  ;;  %v806_v18 = vor.u32 1.1754944e-38, %v805_v10  ;;  %vm804_vm7 = vcmp.eq.f32.partialorder %v803_v13, 8.507059e+37 }
  0xf3   : > { %v782_v59 = vmul.f32 %v4794_v52, %v781_v56  ;;  %v5574_v61 = vadd.f32 %v5553_v30, %v564_v58 }
  0xf5   : > { %v4796_v62 = vpop.eup %4795  ;;  %v783_v63 = vadd.f32 %v4794_v52, %v782_v59  ;;  %v4591_v0 = vmul.f32 -1.442695, %v5574_v61  ;;  %1953 = vmatmul.f32.gmra.mxu0 %v8099_v51 }
  0xf6   : > { %v4798_v1 = vpop.eup %4797  ;;  %v749_v3 = vadd.f32 1.0, %v4796_v62 }
  0xf7   : > { %v787_v4 = vsel %vm786_vm2, %v4794_v52, %v783_v63  ;;  %v795_v5 = vmul.f32 %v4798_v1, %v748_v53  ;;  %4799 = vpow2.f32 %v4591_v0  ;;  %vm800_vm4 = vweird.f32 %v4798_v1 }
  0xf8   : > { %v792_v6 = vsel %vm789_vm3, %v791_v2, %v787_v4  ;;  %4801 = vrcp.f32 %v749_v3  ;;  %vm801_vm6 = vmor %vm799_vm5, %vm800_vm4  ;;  %v820_v26 = vand.u32 2147483648, %v749_v3  ;;  %v818_v31 = vand.u32 2147483647, %v749_v3 }
  0xf9   : > { %v5580_v8 = vmul.f32 %v792_v6, %v556_v36  ;;  %v796_v9 = vsub.f32 1.0, %v795_v5  ;;  %vm814_vm9 = vweird.f32 %v749_v3 }
  0xfa   : > { %v567_v11 = vpop.f32.mrf.mxu0  ;;  %v5592_v28 = vpop.f32.mrf.mxu1  ;;  %v821_v37 = vor.u32 1.1754944e-38, %v820_v26  ;;  %vm819_vm11 = vcmp.eq.f32.partialorder %v818_v31, 8.507059e+37 }
  0xfb   : > { %v797_v12 = vmul.f32 %v4798_v1, %v796_v9  ;;  %v5583_v14 = vadd.f32 %v5553_v30, %v567_v11  ;;  %1611 = vmatmul.f32.vlgmr.msrb.gmra.mxu2 %v5580_v8  ;;  %1724 = vmatmul.f32.vlgmr.msra.gmra.mxu1 %v5580_v8 }
  0xfd   : > { %v4800_v15 = vpop.eup %4799  ;;  %v798_v16 = vadd.f32 %v4798_v1, %v797_v12  ;;  %1956 = vmatmul.f32.gmra.mxu0 %v5580_v8  ;;  %v4592_v20 = vmul.f32 -1.442695, %v5583_v14 }
  0xfe   : > { %v4802_v17 = vpop.eup %4801  ;;  %v750_v19 = vadd.f32 1.0, %v4800_v15 }
  0xff   : > { %v802_v21 = vsel %vm801_vm6, %v4798_v1, %v798_v16  ;;  %v810_v22 = vmul.f32 %v4802_v17, %v749_v3  ;;  %vm815_vm8 = vweird.f32 %v4802_v17 }
 0x100   : > { %v807_v23 = vsel %vm804_vm7, %v806_v18, %v802_v21  ;;  %4803 = vrcp.f32 %v750_v19  ;;  %vm816_vm10 = vmor %vm814_vm9, %vm815_vm8  ;;  %v835_v46 = vand.u32 2147483648, %v750_v19  ;;  %v833_v50 = vand.u32 2147483647, %v750_v19 }
 0x101   : > { %v5590_v24 = vmul.f32 %v807_v23, %v5561_v42  ;;  %v811_v25 = vsub.f32 1.0, %v810_v22  ;;  %4805 = vpow2.f32 %v4592_v20  ;;  %vm829_vm13 = vweird.f32 %v750_v19 }
 0x102   : > { %v570_v27 = vpop.f32.mrf.mxu0  ;;  %v5606_v52 = vpop.f32.mrf.mxu1  ;;  %v836_v55 = vor.u32 1.1754944e-38, %v835_v46  ;;  %vm834_vm15 = vcmp.eq.f32.partialorder %v833_v50, 8.507059e+37 }
 0x103   : > { %v812_v29 = vmul.f32 %v4802_v17, %v811_v25  ;;  %v5595_v32 = vadd.f32 %v5553_v30, %v570_v27  ;;  %1614 = vmatmul.f32.gmra.mxu2 %v5590_v24  ;;  %1727 = vmatmul.f32.gmra.mxu1 %v5590_v24 }
 0x105   : > { %v813_v33 = vadd.f32 %v4802_v17, %v812_v29  ;;  %v4593_v34 = vmul.f32 -1.442695, %v5595_v32  ;;  %1959 = vmatmul.f32.gmra.mxu0 %v5590_v24 }
 0x106   : > { %v4804_v36 = vpop.eup %4803 }
 0x107   : > { %v817_v38 = vsel %vm816_vm10, %v4802_v17, %v813_v33  ;;  %v825_v39 = vmul.f32 %v4804_v36, %v750_v19  ;;  %v4806_v40 = vpop.eup %4805  ;;  %4807 = vpow2.f32 %v4593_v34  ;;  %vm830_vm12 = vweird.f32 %v4804_v36 }
 0x108   : > { %v822_v41 = vsel %vm819_vm11, %v821_v37, %v817_v38  ;;  %v751_v45 = vadd.f32 1.0, %v4806_v40  ;;  %vm831_vm14 = vmor %vm829_vm13, %vm830_vm12 }
 0x109   : > { %v5602_v42 = vmul.f32 %v822_v41, %v5567_v48  ;;  %v826_v44 = vsub.f32 1.0, %v825_v39 }
 0x10a   : > { %v573_v47 = vpop.f32.mrf.mxu0  ;;  %4809 = vrcp.f32 %v751_v45  ;;  %v850_v3 = vand.u32 2147483648, %v751_v45  ;;  %v848_v5 = vand.u32 2147483647, %v751_v45  ;;  %v5619_v6 = vpop.f32.mrf.mxu1  ;;  %vm844_vm1 = vweird.f32 %v751_v45 }
 0x10b   : > { %v827_v49 = vmul.f32 %v4804_v36, %v826_v44  ;;  %1617 = vmatmul.f32.gmra.mxu2 %v5602_v42  ;;  %1730 = vmatmul.f32.gmra.mxu1 %v5602_v42  ;;  %v5610_v56 = vadd.f32 %v5553_v30, %v573_v47 }
 0x10c   : > { %v851_v11 = vor.u32 1.1754944e-38, %v850_v3  ;;  %vm849_vm3 = vcmp.eq.f32.partialorder %v848_v5, 8.507059e+37 }
 0x10d   : > { %v828_v53 = vadd.f32 %v4804_v36, %v827_v49  ;;  %1962 = vmatmul.f32.gmra.mxu0 %v5602_v42  ;;  %v4808_v48 = vpop.eup %4807  ;;  %v4594_v0 = vmul.f32 -1.442695, %v5610_v56 }
 0x10e   : > { %v752_v59 = vadd.f32 1.0, %v4808_v48 }
 0x10f   : > { %v832_v57 = vsel %vm831_vm14, %v4804_v36, %v828_v53 }
 0x110   : > { %v837_v58 = vsel %vm834_vm15, %v836_v55, %v832_v57  ;;  %v4810_v60 = vpop.eup %4809  ;;  %4811 = vrcp.f32 %v752_v59  ;;  %v865_v21 = vand.u32 2147483648, %v752_v59  ;;  %v863_v25 = vand.u32 2147483647, %v752_v59 }
 0x111   : > { %v5613_v62 = vmul.f32 %v837_v58, %v5574_v61  ;;  %v840_v63 = vmul.f32 %v4810_v60, %v751_v45  ;;  %vm845_vm0 = vweird.f32 %v4810_v60  ;;  %4813 = vpow2.f32 %v4594_v0 }
 0x112   : > { %v576_v1 = vpop.f32.mrf.mxu0  ;;  %vm846_vm2 = vmor %vm844_vm1, %vm845_vm0  ;;  %v5634_v29 = vpop.f32.mrf.mxu1  ;;  %vm859_vm5 = vweird.f32 %v752_v59  ;;  %vm864_vm7 = vcmp.eq.f32.partialorder %v863_v25, 8.507059e+37 }
 0x113   : > { %1620 = vmatmul.f32.gmra.mxu2 %v5613_v62  ;;  %1733 = vmatmul.f32.gmra.mxu1 %v5613_v62  ;;  %v841_v2 = vsub.f32 1.0, %v840_v63  ;;  %v5622_v61 = vadd.f32 %v5553_v30, %v576_v1 }
 0x115   : > { %1965 = vmatmul.f32.gmra.mxu0 %v5613_v62  ;;  %v842_v4 = vmul.f32 %v4810_v60, %v841_v2  ;;  %v4595_v15 = vmul.f32 -1.442695, %v5622_v61 }
 0x116   : > { %v4812_v9 = vpop.eup %4811 }
 0x117   : > { %v843_v10 = vadd.f32 %v4810_v60, %v842_v4  ;;  %v855_v12 = vmul.f32 %v4812_v9, %v752_v59  ;;  %v4814_v19 = vpop.eup %4813  ;;  %4815 = vpow2.f32 %v4595_v15  ;;  %vm860_vm4 = vweird.f32 %v4812_v9 }
 0x118   : > { %v753_v26 = vadd.f32 1.0, %v4814_v19  ;;  %vm861_vm6 = vmor %vm859_vm5, %vm860_vm4 }
 0x119   : > { %v847_v13 = vsel %vm846_vm2, %v4810_v60, %v843_v10  ;;  %v856_v18 = vsub.f32 1.0, %v855_v12 }
 0x11a   : > { %v579_v16 = vpop.f32.mrf.mxu0  ;;  %v852_v17 = vsel %vm849_vm3, %v851_v11, %v847_v13  ;;  %4817 = vrcp.f32 %v753_v26  ;;  %v5642_v44 = vpop.f32.mrf.mxu1  ;;  %v880_v47 = vand.u32 2147483648, %v753_v26  ;;  %vm874_vm9 = vweird.f32 %v753_v26 }
 0x11b   : > { %v5626_v20 = vmul.f32 %v852_v17, %v5583_v14  ;;  %v5629_v22 = vadd.f32 %v5553_v30, %v579_v16  ;;  %v857_v23 = vmul.f32 %v4812_v9, %v856_v18  ;;  %v866_v14 = vor.u32 1.1754944e-38, %v865_v21 }
 0x11c   : > { %v881_v58 = vor.u32 1.1754944e-38, %v880_v47 }
 0x11d   : > { %v4596_v27 = vmul.f32 -1.442695, %v5629_v22  ;;  %1623 = vmatmul.f32.gmra.mxu2 %v5626_v20  ;;  %1736 = vmatmul.f32.gmra.mxu1 %v5626_v20  ;;  %v858_v31 = vadd.f32 %v4812_v9, %v857_v23  ;;  %v4816_v34 = vpop.eup %4815 }
 0x11e   : > { %1968 = vmatmul.f32.gmra.mxu0 %v5626_v20  ;;  %v754_v39 = vadd.f32 1.0, %v4816_v34 }
 0x11f   : > { %v862_v33 = vsel %vm861_vm6, %v4812_v9, %v858_v31  ;;  %4819 = vpow2.f32 %v4596_v27 }
 0x120   : > { %v867_v36 = vsel %vm864_vm7, %v866_v14, %v862_v33  ;;  %v4818_v40 = vpop.eup %4817  ;;  %4821 = vrcp.f32 %v754_v39  ;;  %v893_v2 = vand.u32 2147483647, %v754_v39  ;;  %v895_v9 = vand.u32 2147483648, %v754_v39 }
 0x121   : > { %v5638_v38 = vmul.f32 %v867_v36, %v5595_v32  ;;  %v870_v41 = vmul.f32 %v4818_v40, %v753_v26  ;;  %vm875_vm8 = vweird.f32 %v4818_v40  ;;  %v878_v32 = vand.u32 2147483647, %v753_v26 }
 0x122   : > { %v582_v37 = vpop.f32.mrf.mxu0  ;;  %vm876_vm10 = vmor %vm874_vm9, %vm875_vm8  ;;  %v5652_v4 = vpop.f32.mrf.mxu1  ;;  %vm889_vm13 = vweird.f32 %v754_v39  ;;  %vm894_vm14 = vcmp.eq.f32.partialorder %v893_v2, 8.507059e+37  ;;  %v896_v16 = vor.u32 1.1754944e-38, %v895_v9 }
 0x123   : > { %v871_v46 = vsub.f32 1.0, %v870_v41  ;;  %v5646_v55 = vadd.f32 %v5553_v30, %v582_v37  ;;  %vm879_vm11 = vcmp.eq.f32.partialorder %v878_v32, 8.507059e+37 }
 0x125   : > { %1626 = vmatmul.f32.gmra.mxu2 %v5638_v38  ;;  %1739 = vmatmul.f32.gmra.mxu1 %v5638_v38  ;;  %v4820_v45 = vpop.eup %4819  ;;  %v872_v50 = vmul.f32 %v4818_v40, %v871_v46  ;;  %v4597_v3 = vmul.f32 -1.442695, %v5646_v55 }
 0x126   : > { %1971 = vmatmul.f32.gmra.mxu0 %v5638_v38  ;;  %v755_v49 = vadd.f32 1.0, %v4820_v45  ;;  %v4822_v57 = vpop.eup %4821  ;;  %v1594_v45 = vld [vmem:[#allocation10 + $0x2f8] sm:$0xff] }
 0x127   : > { %v873_v48 = vadd.f32 %v4818_v40, %v872_v50  ;;  %v885_v60 = vmul.f32 %v4822_v57, %v754_v39  ;;  %vm890_vm12 = vweird.f32 %v4822_v57  ;;  %1821 = vmatpush.msra.mxu2 %v1594_v45 }
 0x128   : > { %4823 = vrcp.f32 %v755_v49  ;;  %vm891_vm15 = vmor %vm889_vm13, %vm890_vm12  ;;  %v908_v17 = vand.u32 2147483647, %v755_v49  ;;  %v910_v18 = vand.u32 2147483648, %v755_v49  ;;  %vm904_vm1 = vweird.f32 %v755_v49 }
 0x129   : > { %v877_v59 = vsel %vm876_vm10, %v4818_v40, %v873_v48  ;;  %v886_v1 = vsub.f32 1.0, %v885_v60  ;;  %4825 = vpow2.f32 %v4597_v3 }
 0x12a   : > { %v585_v53 = vpop.f32.mrf.mxu0  ;;  %v882_v63 = vsel %vm879_vm11, %v881_v58, %v877_v59  ;;  %v911_v14 = vor.u32 1.1754944e-38, %v910_v18  ;;  %vm909_vm3 = vcmp.eq.f32.partialorder %v908_v17, 8.507059e+37  ;;  %v5670_v39 = vpop.f32.mrf.mxu1  ;;  %v1585_v59 = vld [vmem:[#allocation10 + $0x2b0] sm:$0xff] }
 0x12b   : > { %v5649_v0 = vmul.f32 %v882_v63, %v5610_v56  ;;  %v5655_v10 = vadd.f32 %v5553_v30, %v585_v53  ;;  %v887_v11 = vmul.f32 %v4822_v57, %v886_v1  ;;  %v1588_v53 = vld [vmem:[#allocation10 + $0x2c8] sm:$0xff]  ;;  %v1582_v1 = vld [vmem:[#allocation10 + $0x298] sm:$0xff] }
 0x12d   : > { %1629 = vmatmul.f32.gmra.mxu2 %v5649_v0  ;;  %1742 = vmatmul.f32.gmra.mxu1 %v5649_v0  ;;  %v888_v13 = vadd.f32 %v4822_v57, %v887_v11  ;;  %v4598_v19 = vmul.f32 -1.442695, %v5655_v10 }
 0x12e   : > { %v4824_v5 = vpop.eup %4823  ;;  %1974 = vmatmul.f32.gmra.mxu0 %v5649_v0 }
 0x12f   : > { %v900_v12 = vmul.f32 %v4824_v5, %v755_v49  ;;  %v892_v21 = vsel %vm891_vm15, %v4822_v57, %v888_v13  ;;  %vm905_vm0 = vweird.f32 %v4824_v5  ;;  %4827 = vpow2.f32 %v4598_v19  ;;  %v4826_v33 = vpop.eup %4825  ;;  %v1591_v49 = vld [vmem:[#allocation10 + $0x2e0] sm:$0xff]  ;;  %v1576_v13 = vld [vmem:[#allocation10 + $0x268] sm:$0xff] }
 0x130   : > { %v897_v26 = vsel %vm894_vm14, %v896_v16, %v892_v21  ;;  %vm906_vm2 = vmor %vm904_vm1, %vm905_vm0  ;;  %1822 = vmatpush.msra.mxu2 %v1591_v49  ;;  %v1567_v49 = vld [vmem:[#allocation10 + $0x220] sm:$0xff] }
 0x131   : > { %v901_v15 = vsub.f32 1.0, %v900_v12  ;;  %v5665_v27 = vmul.f32 %v897_v26, %v5622_v61  ;;  %v756_v61 = vadd.f32 1.0, %v4826_v33 }
 0x132   : > { %v588_v56 = vpop.f32.mrf.mxu0  ;;  %v5685_v58 = vpop.f32.mrf.mxu1  ;;  %1823 = vmatpush.msra.mxu2 %v1588_v53 }
 0x133   : > { %v902_v23 = vmul.f32 %v4824_v5, %v901_v15  ;;  %v5662_v25 = vadd.f32 %v5553_v30, %v588_v56  ;;  %v925_v3 = vand.u32 2147483648, %v756_v61  ;;  %v923_v12 = vand.u32 2147483647, %v756_v61 }
 0x134   : > { %1824 = vmatpush.msra.mxu2 %v1585_v59  ;;  %vm919_vm5 = vweird.f32 %v756_v61 }
 0x135   : > { %v903_v31 = vadd.f32 %v4824_v5, %v902_v23  ;;  %v4599_v36 = vmul.f32 -1.442695, %v5662_v25  ;;  %1632 = vmatmul.f32.gmra.mxu2 %v5665_v27  ;;  %1745 = vmatmul.f32.gmra.mxu1 %v5665_v27  ;;  %v4828_v47 = vpop.eup %4827  ;;  %v926_v19 = vor.u32 1.1754944e-38, %v925_v3  ;;  %v1573_v23 = vld [vmem:[#allocation10 + $0x250] sm:$0xff]  ;;  %vm924_vm7 = vcmp.eq.f32.partialorder %v923_v12, 8.507059e+37 }
 0x136   : > { %1977 = vmatmul.f32.gmra.mxu0 %v5665_v27  ;;  %v5679_v50 = vadd.f32 1.0, %v4828_v47  ;;  %1825 = vmatpush.msra.mxu2 %v1582_v1 }
 0x137   : > { %v907_v34 = vsel %vm906_vm2, %v4824_v5, %v903_v31  ;;  %4829 = vpow2.f32 %v4599_v36  ;;  %v1579_v5 = vld [vmem:[#allocation10 + $0x280] sm:$0xff] }
 0x138   : > { %v912_v40 = vsel %vm909_vm3, %v911_v14, %v907_v34  ;;  %4831 = vrcp.f32 %v756_v61  ;;  %1826 = vmatpush.msra.mxu2 %v1579_v5  ;;  %v938_v31 = vand.u32 2147483647, %v5679_v50  ;;  %v940_v14 = vand.u32 2147483648, %v5679_v50 }
 0x139   : > { %v5677_v46 = vmul.f32 %v912_v40, %v5629_v22  ;;  %4833 = vrcp.f32 %v5679_v50  ;;  %vm934_vm9 = vweird.f32 %v5679_v50 }
 0x13a   : > { %v591_v37 = vpop.f32.mrf.mxu0  ;;  %v5692_v18 = vpop.f32.mrf.mxu1  ;;  %1827 = vmatpush.msra.mxu2 %v1576_v13  ;;  %vm939_vm11 = vcmp.eq.f32.partialorder %v938_v31, 8.507059e+37  ;;  %v1558_v31 = vld [vmem:[#allocation10 + $0x1d8] sm:$0xff] }
 0x13b   : > { %v5674_v41 = vadd.f32 %v5553_v30, %v591_v37  ;;  %v1570_v37 = vld [vmem:[#allocation10 + $0x238] sm:$0xff] }
 0x13c   : > { %1828 = vmatpush.msra.mxu2 %v1573_v23 }
 0x13d   : > { %v4600_v32 = vmul.f32 -1.442695, %v5674_v41  ;;  %v4830_v48 = vpop.eup %4829  ;;  %1635 = vmatmul.f32.gmra.mxu2 %v5677_v46  ;;  %1748 = vmatmul.f32.gmra.mxu1 %v5677_v46 }
 0x13e   : > { %v4832_v22 = vpop.eup %4831  ;;  %1980 = vmatmul.f32.gmra.mxu0 %v5677_v46  ;;  %v5688_v63 = vadd.f32 1.0, %v4830_v48  ;;  %1829 = vmatpush.msra.mxu2 %v1570_v37 }
 0x13f   : > { %v915_v60 = vmul.f32 %v4832_v22, %v756_v61  ;;  %4835 = vpow2.f32 %v4600_v32  ;;  %v4834_v9 = vpop.eup %4833  ;;  %vm920_vm4 = vweird.f32 %v4832_v22  ;;  %v941_v32 = vor.u32 1.1754944e-38, %v940_v14 }
 0x140   : > { %4837 = vrcp.f32 %v5688_v63  ;;  %v930_v56 = vmul.f32 %v4834_v9, %v5679_v50  ;;  %vm921_vm6 = vmor %vm919_vm5, %vm920_vm4  ;;  %vm935_vm8 = vweird.f32 %v4834_v9  ;;  %1830 = vmatpush.msra.mxu2 %v1567_v49  ;;  %v1564_v50 = vld [vmem:[#allocation10 + $0x208] sm:$0xff]  ;;  %v955_v3 = vand.u32 2147483648, %v5688_v63 }
 0x141   : > { %v916_v2 = vsub.f32 1.0, %v915_v60  ;;  %vm936_vm10 = vmor %vm934_vm9, %vm935_vm8  ;;  %vm949_vm13 = vweird.f32 %v5688_v63 }
 0x142   : > { %v594_v57 = vpop.f32.mrf.mxu0  ;;  %v931_v21 = vsub.f32 1.0, %v930_v56  ;;  %v5710_v1 = vpop.f32.mrf.mxu1  ;;  %1831 = vmatpush.msra.mxu2 %v1564_v50 }
 0x143   : > { %v917_v11 = vmul.f32 %v4832_v22, %v916_v2 }
 0x144   : > { %v932_v34 = vmul.f32 %v4834_v9, %v931_v21 }
 0x145   : > { %v4836_v15 = vpop.eup %4835  ;;  %v918_v16 = vadd.f32 %v4832_v22, %v917_v11 }
 0x146   : > { %v5696_v36 = vadd.f32 1.0, %v4836_v15  ;;  %v4838_v40 = vpop.eup %4837  ;;  %v933_v45 = vadd.f32 %v4834_v9, %v932_v34  ;;  %v956_v15 = vor.u32 1.1754944e-38, %v955_v3 }
 0x147   : > { %v922_v26 = vsel %vm921_vm6, %v4832_v22, %v918_v16  ;;  %v945_v47 = vmul.f32 %v4838_v40, %v5688_v63  ;;  %v1415_v22 = vpop.f32.mrf.mxu2  ;;  %vm950_vm12 = vweird.f32 %v4838_v40 }
 0x148   : > { %v927_v33 = vsel %vm924_vm7, %v926_v19, %v922_v26  ;;  %4839 = vrcp.f32 %v5696_v36  ;;  %v937_v53 = vsel %vm936_vm10, %v4834_v9, %v933_v45  ;;  %vm951_vm14 = vmor %vm949_vm13, %vm950_vm12  ;;  %v970_v34 = vand.u32 2147483648, %v5696_v36  ;;  %v1555_v45 = vld [vmem:[#allocation10 + $0x1c0] sm:$0xff] }
 0x149   : > { %v5699_v61 = vmul.f32 %v927_v33, %v5646_v55  ;;  %v946_v48 = vsub.f32 1.0, %v945_v47  ;;  %v5707_v55 = vadd.f32 %v5553_v30, %v594_v57  ;;  %v942_v59 = vsel %vm939_vm11, %v941_v32, %v937_v53  ;;  %v1552_v32 = vld [vmem:[#allocation10 + $0x1a8] sm:$0xff] }
 0x14a   : > { %v597_v17 = vpop.f32.mrf.mxu0  ;;  %v5714_v5 = vmul.f32 %v942_v59, %v5655_v10  ;;  %v953_v57 = vand.u32 2147483647, %v5688_v63  ;;  %v1561_v10 = vld [vmem:[#allocation10 + $0x1f0] sm:$0xff]  ;;  %v1342_v14 = vpop.f32.mrf.mxu1  ;;  %vm964_vm1 = vweird.f32 %v5696_v36  ;;  %v971_v50 = vor.u32 1.1754944e-38, %v970_v34 }
 0x14b   : > { %1638 = vmatmul.f32.gmra.mxu2 %v5699_v61  ;;  %1751 = vmatmul.f32.gmra.mxu1 %v5699_v61  ;;  %v947_v2 = vmul.f32 %v4838_v40, %v946_v48  ;;  %v4601_v11 = vmul.f32 -1.442695, %v5707_v55  ;;  %v5720_v56 = vadd.f32 %v5553_v30, %v597_v17 }
 0x14c   : > { %1983 = vmatmul.f32.gmra.mxu0 %v5699_v61  ;;  %vm954_vm15 = vcmp.eq.f32.partialorder %v953_v57, 8.507059e+37  ;;  %1832 = vmatpush.msra.mxu2 %v1561_v10  ;;  %v5754_v10 = vadd.f32 %v5553_v30, %v5556_v35 }
 0x14d   : > { %v948_v9 = vadd.f32 %v4838_v40, %v947_v2  ;;  %4841 = vpow2.f32 %v4601_v11  ;;  %v4602_v17 = vmul.f32 -1.442695, %v5720_v56 }
 0x14e   : > { %v4840_v12 = vpop.eup %4839  ;;  %1833 = vmatpush.msra.mxu2 %v1558_v31  ;;  %v4606_v14 = vmul.f32 -1.442695, %v5754_v10 }
 0x14f   : > { %v952_v13 = vsel %vm951_vm14, %v4838_v40, %v948_v9  ;;  %v960_v16 = vmul.f32 %v4840_v12, %v5696_v36  ;;  %v1418_v63 = vpop.f32.mrf.mxu2  ;;  %vm965_vm0 = vweird.f32 %v4840_v12  ;;  %v968_v40 = vand.u32 2147483647, %v5696_v36 }
 0x150   : > { %v957_v19 = vsel %vm954_vm15, %v956_v15, %v952_v13  ;;  %4843 = vpow2.f32 %v4602_v17  ;;  %1834 = vmatpush.msra.mxu2 %v1555_v45  ;;  %vm966_vm2 = vmor %vm964_vm1, %vm965_vm0 }
 0x151   : > { %v961_v21 = vsub.f32 1.0, %v960_v16  ;;  %v5732_v37 = vmul.f32 %v957_v19, %v5662_v25  ;;  %vm969_vm3 = vcmp.eq.f32.partialorder %v968_v40, 8.507059e+37  ;;  %v1549_v25 = vld [vmem:[#allocation10 + $0x190] sm:$0xff] }
 0x152   : > { %v600_v60 = vpop.f32.mrf.mxu0  ;;  %1835 = vmatpush.msra.mxu2 %v1552_v32  ;;  %v1345_v3 = vpop.f32.mrf.mxu1 }
 0x153   : > { %1641 = vmatmul.f32.gmra.mxu2 %v5714_v5  ;;  %1754 = vmatmul.f32.gmra.mxu1 %v5714_v5  ;;  %v5728_v23 = vadd.f32 %v5553_v30, %v600_v60  ;;  %v962_v33 = vmul.f32 %v4840_v12, %v961_v21  ;;  %v4842_v53 = vpop.eup %4841 }
 0x154   : > { %1986 = vmatmul.f32.gmra.mxu0 %v5714_v5  ;;  %v760_v22 = vadd.f32 1.0, %v4842_v53  ;;  %1836 = vmatpush.msra.mxu2 %v1549_v25 }
 0x155   : > { %v963_v47 = vadd.f32 %v4840_v12, %v962_v33  ;;  %v4603_v49 = vmul.f32 -1.442695, %v5728_v23 }
 0x156   : > { %v4844_v36 = vpop.eup %4843  ;;  %v983_v63 = vand.u32 2147483647, %v760_v22  ;;  %v985_v17 = vand.u32 2147483648, %v760_v22  ;;  %vm979_vm5 = vweird.f32 %v760_v22 }
 0x157   : > { %v967_v48 = vsel %vm966_vm2, %v4840_v12, %v963_v47  ;;  %4845 = vpow2.f32 %v4603_v49  ;;  %v761_v57 = vadd.f32 1.0, %v4844_v36 }
 0x158   : > { %v972_v59 = vsel %vm969_vm3, %v971_v50, %v967_v48  ;;  %4847 = vrcp.f32 %v760_v22  ;;  %vm984_vm7 = vcmp.eq.f32.partialorder %v983_v63, 8.507059e+37  ;;  %v986_v35 = vor.u32 1.1754944e-38, %v985_v17  ;;  %v1540_v17 = vld [vmem:[#allocation10 + $0x158] sm:$0xff] }
 0x159   : > { %v5744_v9 = vmul.f32 %v972_v59, %v5674_v41  ;;  %4849 = vrcp.f32 %v761_v57  ;;  %v1000_v45 = vand.u32 2147483648, %v761_v57  ;;  %v998_v53 = vand.u32 2147483647, %v761_v57 }
 0x15a   : > { %v603_v26 = vpop.f32.mrf.mxu0  ;;  %v5762_v48 = vadd.f32 %v5553_v30, %v5563_v43  ;;  %vm994_vm9 = vweird.f32 %v761_v57 }
 0x15b   : > { %1644 = vmatmul.f32.gmra.mxu2 %v5732_v37  ;;  %1757 = vmatmul.f32.gmra.mxu1 %v5732_v37  ;;  %v5741_v60 = vadd.f32 %v5553_v30, %v603_v26  ;;  %vm999_vm11 = vcmp.eq.f32.partialorder %v998_v53, 8.507059e+37 }
 0x15c   : > { %1989 = vmatmul.f32.gmra.mxu0 %v5732_v37  ;;  %v4607_v63 = vmul.f32 -1.442695, %v5762_v48 }
 0x15d   : > { %v4604_v11 = vmul.f32 -1.442695, %v5741_v60  ;;  %v4846_v12 = vpop.eup %4845 }
 0x15e   : > { %v4848_v13 = vpop.eup %4847  ;;  %v5747_v15 = vadd.f32 1.0, %v4846_v12 }
 0x15f   : > { %v975_v16 = vmul.f32 %v4848_v13, %v760_v22  ;;  %4851 = vpow2.f32 %v4604_v11  ;;  %v4850_v21 = vpop.eup %4849  ;;  %vm980_vm4 = vweird.f32 %v4848_v13  ;;  %v1001_v11 = vor.u32 1.1754944e-38, %v1000_v45 }
 0x160   : > { %4853 = vrcp.f32 %v5747_v15  ;;  %v990_v31 = vmul.f32 %v4850_v21, %v761_v57  ;;  %vm981_vm6 = vmor %vm979_vm5, %vm980_vm4  ;;  %vm995_vm8 = vweird.f32 %v4850_v21  ;;  %v1015_v43 = vand.u32 2147483648, %v5747_v15 }
 0x161   : > { %v976_v19 = vsub.f32 1.0, %v975_v16  ;;  %4855 = vpow2.f32 %v4606_v14  ;;  %vm996_vm10 = vmor %vm994_vm9, %vm995_vm8  ;;  %v1013_v57 = vand.u32 2147483647, %v5747_v15  ;;  %vm1009_vm13 = vweird.f32 %v5747_v15 }
 0x162   : > { %v606_v2 = vpop.f32.mrf.mxu0  ;;  %v991_v34 = vsub.f32 1.0, %v990_v31  ;;  %v1016_v14 = vor.u32 1.1754944e-38, %v1015_v43  ;;  %v5794_v45 = vadd.f32 %v5553_v30, %v5571_v54 }
 0x163   : > { %1647 = vmatmul.f32.gmra.mxu2 %v5744_v9  ;;  %1760 = vmatmul.f32.gmra.mxu1 %v5744_v9  ;;  %v977_v26 = vmul.f32 %v4848_v13, %v976_v19  ;;  %v5774_v16 = vadd.f32 %v5553_v30, %v606_v2  ;;  %v1543_v2 = vld [vmem:[#allocation10 + $0x170] sm:$0xff]  ;;  %vm1014_vm15 = vcmp.eq.f32.partialorder %v1013_v57, 8.507059e+37 }
 0x164   : > { %1992 = vmatmul.f32.gmra.mxu0 %v5744_v9  ;;  %v992_v32 = vmul.f32 %v4850_v21, %v991_v34  ;;  %2047 = vmatpush.msrb.mxu3 %v1543_v2  ;;  %v1537_v34 = vld [vmem:[#allocation10 + $0x140] sm:$0xff]  ;;  %v4608_v30 = vmul.f32 -1.442695, %v5794_v45 }
 0x165   : > { %v978_v33 = vadd.f32 %v4848_v13, %v977_v26  ;;  %v4852_v40 = vpop.eup %4851 }
 0x166   : > { %v4854_v47 = vpop.eup %4853  ;;  %v993_v36 = vadd.f32 %v4850_v21, %v992_v32  ;;  %v5770_v3 = vadd.f32 1.0, %v4852_v40  ;;  %2048 = vmatpush.msrb.mxu3 %v1540_v17 }
 0x167   : > { %v982_v49 = vsel %vm981_vm6, %v4848_v13, %v978_v33  ;;  %v1005_v25 = vmul.f32 %v4854_v47, %v5747_v15  ;;  %vm1010_vm12 = vweird.f32 %v4854_v47  ;;  %v4856_v26 = vpop.eup %4855  ;;  %v4605_v33 = vmul.f32 -1.442695, %v5774_v16 }
 0x168   : > { %v987_v50 = vsel %vm984_vm7, %v986_v35, %v982_v49  ;;  %v997_v13 = vsel %vm996_vm10, %v4850_v21, %v993_v36  ;;  %4857 = vrcp.f32 %v5770_v3  ;;  %vm1011_vm14 = vmor %vm1009_vm13, %vm1010_vm12  ;;  %v5790_v35 = vadd.f32 1.0, %v4856_v26  ;;  %v1534_v49 = vld [vmem:[#allocation10 + $0x128] sm:$0xff]  ;;  %2049 = vmatpush.msrb.mxu3 %v1537_v34 }
 0x169   : > { %v5768_v59 = vmul.f32 %v987_v50, %v5707_v55  ;;  %v1006_v12 = vsub.f32 1.0, %v1005_v25  ;;  %v1002_v55 = vsel %vm999_vm11, %v1001_v11, %v997_v13  ;;  %4859 = vpow2.f32 %v4607_v63  ;;  %v1531_v13 = vld [vmem:[#allocation10 + $0x110] sm:$0xff] }
 0x16a   : > { %v5756_v41 = vpop.f32.mrf.mxu0  ;;  %v5782_v21 = vmul.f32 %v1002_v55, %v5720_v56  ;;  %4861 = vpow2.f32 %v4605_v33  ;;  %2050 = vmatpush.msrb.mxu3 %v1534_v49  ;;  %v1028_v11 = vand.u32 2147483647, %v5770_v3  ;;  %v5815_v55 = vld [vmem:[%s8086_s4] ss:$0 sm:$0xff]  ;;  %vm1024_vm1 = vweird.f32 %v5770_v3 }
 0x16b   : > { %8132 = vst [vmem:[#allocation19_spill] sm:$0xff] %v5756_v41  ;;  %1650 = vmatmul.f32.gmra.mxu2 %v5768_v59  ;;  %1763 = vmatmul.f32.gmra.mxu1 %v5768_v59  ;;  %v1007_v19 = vmul.f32 %v4854_v47, %v1006_v12  ;;  %4863 = vrcp.f32 %v5790_v35  ;;  %vm1054_vm5 = vweird.f32 %v5790_v35 }
 0x16c   : > { %1995 = vmatmul.f32.gmra.mxu0 %v5768_v59  ;;  %8134 = vst [vmem:[#allocation21_spill] sm:$0xff] %v5782_v21  ;;  %1653 = vmatmul.f32.vlgmr.msra.gmra.mxu3 %v5782_v21  ;;  %4865 = vpow2.f32 %v4608_v30  ;;  %vm1029_vm3 = vcmp.eq.f32.partialorder %v1028_v11, 8.507059e+37 }
 0x16d   : > { %v1008_v31 = vadd.f32 %v4854_v47, %v1007_v19  ;;  %v5819_v19 = vadd.f32 %v5815_v55, %v5578_v7  ;;  %2051 = vmatpush.msrb.mxu3 %v1531_v13 }
 0x16e   : > { %v4858_v32 = vpop.eup %4857 }
 0x16f   : > { %v1012_v40 = vsel %vm1011_vm14, %v4854_v47, %v1008_v31  ;;  %v1020_v47 = vmul.f32 %v4858_v32, %v5770_v3  ;;  %v4860_v25 = vpop.eup %4859  ;;  %vm1025_vm0 = vweird.f32 %v4858_v32  ;;  %v4609_v33 = vmul.f32 -1.442695, %v5819_v19 }
 0x170   : > { %v1017_v15 = vsel %vm1014_vm15, %v1016_v14, %v1012_v40  ;;  %v4862_v43 = vpop.eup %4861  ;;  %v5823_v63 = vadd.f32 1.0, %v4860_v25  ;;  %vm1026_vm2 = vmor %vm1024_vm1, %vm1025_vm0 }
 0x171   : > { %v5797_v53 = vmul.f32 %v1017_v15, %v5728_v23  ;;  %v1021_v54 = vsub.f32 1.0, %v1020_v47  ;;  %v1030_v23 = vand.u32 2147483648, %v5770_v3  ;;  %v764_v17 = vadd.f32 1.0, %v4862_v43  ;;  %v5826_v26 = vpop.eup %4863 }
 0x172   : > { %v5765_v22 = vpop.f32.mrf.mxu0  ;;  %v1050_v34 = vmul.f32 %v5826_v26, %v5790_v35  ;;  %v4866_v15 = vpop.eup %4865  ;;  %v5846_v47 = vadd.f32 %v5815_v55, %v5592_v28  ;;  %vm1055_vm6 = vweird.f32 %v5826_v26  ;;  %vm1069_vm12 = vweird.f32 %v5823_v63 }
 0x173   : > { %8133 = vst [vmem:[#allocation20_spill] sm:$0xff] %v5765_v22  ;;  %1766 = vmatmul.f32.gmra.mxu1 %v5782_v21  ;;  %1837 = vmatmul.f32.vlgmr.msra.gmra.mxu2 %v5580_v8  ;;  %v1022_v36 = vmul.f32 %v4858_v32, %v1021_v54  ;;  %v1031_v31 = vor.u32 1.1754944e-38, %v1030_v23  ;;  %4867 = vrcp.f32 %v764_v17  ;;  %v5848_v25 = vadd.f32 1.0, %v4866_v15  ;;  %v1525_v15 = vld [vmem:[#allocation10 + $0xe0] sm:$0xff]  ;;  %vm5884_vm10 = vmor %vm1054_vm5, %vm1055_vm6 }
 0x174   : > { %8136 = vst [vmem:[#allocation23_spill] sm:$0xff] %v5797_v53  ;;  %1998 = vmatmul.f32.gmra.mxu0 %v5782_v21  ;;  %1656 = vmatmul.f32.gmra.mxu3 %v5797_v53  ;;  %4869 = vrcp.f32 %v5823_v63  ;;  %v1051_v54 = vsub.f32 1.0, %v1050_v34  ;;  %v4610_v28 = vmul.f32 -1.442695, %v5846_v47  ;;  %vm1039_vm7 = vweird.f32 %v764_v17 }
 0x175   : > { %v1023_v2 = vadd.f32 %v4858_v32, %v1022_v36  ;;  %4871 = vpow2.f32 %v4609_v33  ;;  %vm1084_vm0 = vweird.f32 %v5848_v25 }
 0x176   : > { %v1052_v43 = vmul.f32 %v5826_v26, %v1051_v54  ;;  %4873 = vrcp.f32 %v5848_v25 }
 0x177   : > { %v1027_v7 = vsel %vm1026_vm2, %v4858_v32, %v1023_v2  ;;  %v1528_v32 = vld [vmem:[#allocation10 + $0xf8] sm:$0xff]  ;;  %v1045_v2 = vand.u32 2147483648, %v764_v17  ;;  %4875 = vpow2.f32 %v4610_v28 }
 0x178   : > { %v5821_v57 = vpop.f32.mrf.mxu1  ;;  %v1032_v3 = vsel %vm1029_vm3, %v1031_v31, %v1027_v7  ;;  %2052 = vmatpush.msrb.mxu3 %v1528_v32  ;;  %v5870_v32 = vadd.f32 %v5815_v55, %v5606_v52 }
 0x179   : > { %v5839_v40 = vmul.f32 %v1032_v3, %v5741_v60  ;;  %v4868_v30 = vpop.eup %4867  ;;  %v1043_v3 = vand.u32 2147483647, %v764_v17 }
 0x17a   : > { %v5788_v56 = vpop.f32.mrf.mxu0  ;;  %v1035_v23 = vmul.f32 %v4868_v30, %v764_v17  ;;  %v5854_v36 = vpop.eup %4869  ;;  %vm1040_vm4 = vweird.f32 %v4868_v30  ;;  %2053 = vmatpush.msrb.mxu3 %v1525_v15 }
 0x17b   : > { %8135 = vst [vmem:[#allocation22_spill] sm:$0xff] %v5788_v56  ;;  %1769 = vmatmul.f32.gmra.mxu1 %v5797_v53  ;;  %1840 = vmatmul.f32.gmra.mxu2 %v5590_v24  ;;  %v4872_v31 = vpop.eup %4871  ;;  %v1065_v7 = vmul.f32 %v5854_v36, %v5823_v63  ;;  %vm1041_vm8 = vmor %vm1039_vm7, %vm1040_vm4  ;;  %vm1044_vm9 = vcmp.eq.f32.partialorder %v1043_v3, 8.507059e+37  ;;  %vm1070_vm13 = vweird.f32 %v5854_v36  ;;  %v1075_v3 = vand.u32 2147483648, %v5823_v63 }
 0x17c   : > { %2001 = vmatmul.f32.gmra.mxu0 %v5797_v53  ;;  %8140 = vst [vmem:[#allocation27_spill] sm:$0xff] %v5839_v40  ;;  %1659 = vmatmul.f32.gmra.mxu3 %v5839_v40  ;;  %v1036_v13 = vsub.f32 1.0, %v1035_v23  ;;  %v1058_v23 = vand.u32 2147483647, %v5790_v35  ;;  %v5874_v51 = vadd.f32 1.0, %v4872_v31  ;;  %v5878_v52 = vpop.eup %4873  ;;  %vm5922_vm14 = vmor %vm1069_vm12, %vm1070_vm13 }
 0x17d   : > { %vm1085_vm1 = vweird.f32 %v5878_v52 }
 0x17e   : > { %v5803_v50 = vpop.f32.mrf.mxu2  ;;  %v1037_v33 = vmul.f32 %v4868_v30, %v1036_v13  ;;  %v1060_v13 = vand.u32 2147483648, %v5790_v35  ;;  %4877 = vrcp.f32 %v5874_v51  ;;  %vm1059_vm11 = vcmp.eq.f32.partialorder %v1058_v23, 8.507059e+37  ;;  %vm5958_vm2 = vmor %vm1084_vm0, %vm1085_vm1 }
 0x17f   : > { %8137 = vst [vmem:[#allocation24_spill] sm:$0xff] %v5803_v50  ;;  %v1073_v23 = vand.u32 2147483647, %v5823_v63  ;;  %vm1099_vm4 = vweird.f32 %v5874_v51 }
 0x180   : > { %v5852_v60 = vpop.f32.mrf.mxu1  ;;  %v1038_v54 = vadd.f32 %v4868_v30, %v1037_v33  ;;  %v4876_v33 = vpop.eup %4875 }
 0x181   : > { %vm1074_vm15 = vcmp.eq.f32.partialorder %v1073_v23, 8.507059e+37  ;;  %v1088_v23 = vand.u32 2147483647, %v5848_v25 }
 0x182   : > { %v5810_v12 = vpop.f32.mrf.mxu0  ;;  %v1042_v56 = vsel %vm1041_vm8, %v4868_v30, %v1038_v54 }
 0x183   : > { %8138 = vst [vmem:[#allocation25_spill] sm:$0xff] %v5810_v12  ;;  %1772 = vmatmul.f32.gmra.mxu1 %v5839_v40  ;;  %1843 = vmatmul.f32.gmra.mxu2 %v5602_v42  ;;  %v1053_v12 = vadd.f32 %v5826_v26, %v1052_v43  ;;  %vm1089_vm3 = vcmp.eq.f32.partialorder %v1088_v23, 8.507059e+37  ;;  %v1105_v23 = vand.u32 2147483648, %v5874_v51 }
 0x184   : > { %2004 = vmatmul.f32.gmra.mxu0 %v5839_v40  ;;  %v5920_v17 = vpop.eup %4877 }
 0x185   : > { %v1057_v35 = vsel %vm5884_vm10, %v5826_v26, %v1053_v12  ;;  %v5910_v12 = vadd.f32 %v5815_v55, %v5619_v6  ;;  %vm1100_vm5 = vweird.f32 %v5920_v17 }
 0x186   : > { %v5832_v14 = vpop.f32.mrf.mxu2  ;;  %vm5996_vm6 = vmor %vm1099_vm4, %vm1100_vm5 }
 0x187   : > { %8139 = vst [vmem:[#allocation26_spill] sm:$0xff] %v5832_v14 }
 0x188   : > { %v5892_v30 = vpop.f32.mrf.mxu1 }
 0x18a   : > { %v5842_v49 = vpop.f32.mrf.mxu0 }
 0x18b   : > { %8141 = vst [vmem:[#allocation28_spill] sm:$0xff] %v5842_v49  ;;  %v1046_v49 = vor.u32 1.1754944e-38, %v1045_v2  ;;  %1846 = vmatmul.f32.gmra.mxu2 %v5613_v62  ;;  %v4611_v2 = vmul.f32 -1.442695, %v5870_v32 }
 0x18d   : > { %v1047_v28 = vsel %vm1044_vm9, %v1046_v49, %v1042_v56  ;;  %v1080_v49 = vmul.f32 %v5878_v52, %v5848_v25  ;;  %4879 = vpow2.f32 %v4611_v2  ;;  %v4612_v2 = vmul.f32 -1.442695, %v5910_v12 }
 0x18e   : > { %v5857_v11 = vpop.f32.mrf.mxu2  ;;  %v5890_v43 = vmul.f32 %v1047_v28, %v5774_v16  ;;  %v1522_v16 = vld [vmem:[#allocation10 + $0xc8] sm:$0xff] }
 0x18f   : > { %8142 = vst [vmem:[#allocation29_spill] sm:$0xff] %v5857_v11  ;;  %2054 = vmatpush.msrb.mxu3 %v1522_v16  ;;  %v2345_v11 = vld [vmem:[#allocation10 + $0x440] sm:$0xff] }
 0x190   : > { %8146 = vst [vmem:[#allocation31_spill] sm:$0xff] %v5890_v43  ;;  %1662 = vmatmul.f32.gmra.mxu3 %v5890_v43  ;;  %1775 = vmatmul.f32.gmra.mxu1 %v5890_v43 }
 0x191   : > { %2007 = vmatmul.f32.gmra.mxu0 %v5890_v43 }
 0x192   : > { %v5866_v34 = vpop.f32.mrf.mxu0 }
 0x193   : > { %8143 = vst [vmem:[#allocation30_spill] sm:$0xff] %v5866_v34  ;;  %v1066_v34 = vsub.f32 1.0, %v1065_v7  ;;  %v1061_v7 = vor.u32 1.1754944e-38, %v1060_v13  ;;  %v1081_v13 = vsub.f32 1.0, %v1080_v49  ;;  %1849 = vmatmul.f32.gmra.mxu2 %v5626_v20 }
 0x195   : > { %v1067_v56 = vmul.f32 %v5854_v36, %v1066_v34  ;;  %v1062_v26 = vsel %vm1059_vm11, %v1061_v7, %v1057_v35  ;;  %v5913_v34 = vadd.f32 1.0, %v4876_v33  ;;  %v1076_v7 = vor.u32 1.1754944e-38, %v1075_v3  ;;  %v4880_v33 = vpop.eup %4879 }
 0x196   : > { %v5894_v31 = vpop.f32.mrf.mxu2  ;;  %v5927_v28 = vmul.f32 %v1062_v26, %v5754_v10  ;;  %v1082_v35 = vmul.f32 %v5878_v52, %v1081_v13  ;;  %v5939_v10 = vpop.f32.mrf.mxu1  ;;  %v1090_v26 = vand.u32 2147483648, %v5848_v25  ;;  %v5951_v3 = vadd.f32 1.0, %v4880_v33 }
 0x197   : > { %8147 = vst [vmem:[#allocation32_spill] sm:$0xff] %v5894_v31  ;;  %v1068_v54 = vadd.f32 %v5854_v36, %v1067_v56  ;;  %4881 = vrcp.f32 %v5913_v34  ;;  %v1095_v56 = vmul.f32 %v5920_v17, %v5874_v51  ;;  %vm1114_vm8 = vweird.f32 %v5913_v34 }
 0x198   : > { %8151 = vst [vmem:[#allocation34_spill] sm:$0xff] %v5927_v28  ;;  %1665 = vmatmul.f32.gmra.mxu3 %v5927_v28  ;;  %1778 = vmatmul.f32.gmra.mxu1 %v5927_v28  ;;  %4883 = vpow2.f32 %v4612_v2  ;;  %vm1129_vm12 = vweird.f32 %v5951_v3 }
 0x199   : > { %v1072_v63 = vsel %vm5922_vm14, %v5854_v36, %v1068_v54  ;;  %2010 = vmatmul.f32.gmra.mxu0 %v5927_v28  ;;  %v5948_v36 = vadd.f32 %v5815_v55, %v5634_v29  ;;  %v1083_v54 = vadd.f32 %v5878_v52, %v1082_v35  ;;  %v1096_v13 = vsub.f32 1.0, %v1095_v56 }
 0x19a   : > { %v1077_v16 = vsel %vm1074_vm15, %v1076_v7, %v1072_v63  ;;  %v1091_v63 = vor.u32 1.1754944e-38, %v1090_v26  ;;  %4885 = vrcp.f32 %v5951_v3 }
 0x19b   : > { %v5915_v15 = vpop.f32.mrf.mxu0  ;;  %1852 = vmatmul.f32.gmra.mxu2 %v5638_v38  ;;  %v5965_v7 = vmul.f32 %v1077_v16, %v5762_v48  ;;  %v4613_v33 = vmul.f32 -1.442695, %v5948_v36  ;;  %v1087_v35 = vsel %vm5958_vm2, %v5878_v52, %v1083_v54  ;;  %v1097_v56 = vmul.f32 %v5920_v17, %v1096_v13  ;;  %v1519_v48 = vld [vmem:[#allocation10 + $0xb0] sm:$0xff] }
 0x19c   : > { %8148 = vst [vmem:[#allocation33_spill] sm:$0xff] %v5915_v15  ;;  %2055 = vmatpush.msrb.mxu3 %v1519_v48  ;;  %v5982_v52 = vadd.f32 %v5815_v55, %v5642_v44  ;;  %v1092_v54 = vsel %vm1089_vm3, %v1091_v63, %v1087_v35  ;;  %v1103_v48 = vand.u32 2147483647, %v5874_v51 }
 0x19d   : > { %v5956_v6 = vpop.eup %4881  ;;  %8156 = vst [vmem:[#allocation37_spill] sm:$0xff] %v5965_v7  ;;  %4887 = vpow2.f32 %v4613_v33  ;;  %v1098_v2 = vadd.f32 %v5920_v17, %v1097_v56 }
 0x19e   : > { %v4884_v25 = vpop.eup %4883  ;;  %v1110_v15 = vmul.f32 %v5956_v6, %v5913_v34  ;;  %v5984_v16 = vpop.f32.mrf.mxu1  ;;  %v4614_v63 = vmul.f32 -1.442695, %v5982_v52  ;;  %vm1104_vm7 = vcmp.eq.f32.partialorder %v1103_v48, 8.507059e+37  ;;  %vm1115_vm9 = vweird.f32 %v5956_v6 }
 0x19f   : > { %v5989_v13 = vadd.f32 1.0, %v4884_v25  ;;  %v1106_v25 = vor.u32 1.1754944e-38, %v1105_v23  ;;  %v1118_v48 = vand.u32 2147483647, %v5913_v34  ;;  %vm6034_vm10 = vmor %vm1114_vm8, %vm1115_vm9 }
 0x1a0   : > { %v5941_v49 = vpop.f32.mrf.mxu2  ;;  %1668 = vmatmul.f32.gmra.mxu3 %v5965_v7  ;;  %1781 = vmatmul.f32.gmra.mxu1 %v5965_v7  ;;  %v5994_v33 = vpop.eup %4885 }
 0x1a1   : > { %8152 = vst [vmem:[#allocation35_spill] sm:$0xff] %v5941_v49  ;;  %2013 = vmatmul.f32.gmra.mxu0 %v5965_v7  ;;  %4889 = vrcp.f32 %v5989_v13  ;;  %v1125_v49 = vmul.f32 %v5994_v33, %v5951_v3  ;;  %vm1119_vm11 = vcmp.eq.f32.partialorder %v1118_v48, 8.507059e+37  ;;  %vm1130_vm13 = vweird.f32 %v5994_v33 }
 0x1a2   : > { %4891 = vpow2.f32 %v4614_v63  ;;  %vm6068_vm14 = vmor %vm1129_vm12, %vm1130_vm13  ;;  %vm1144_vm0 = vweird.f32 %v5989_v13  ;;  %v1148_v14 = vand.u32 2147483647, %v5989_v13 }
 0x1a3   : > { %v5962_v29 = vpop.f32.mrf.mxu0  ;;  %1855 = vmatmul.f32.gmra.mxu2 %v5649_v0  ;;  %v4888_v51 = vpop.eup %4887  ;;  %v1126_v44 = vsub.f32 1.0, %v1125_v49 }
 0x1a4   : > { %8155 = vst [vmem:[#allocation36_spill] sm:$0xff] %v5962_v29  ;;  %v1111_v29 = vsub.f32 1.0, %v1110_v15  ;;  %v1102_v15 = vsel %vm5996_vm6, %v5920_v17, %v1098_v2  ;;  %v6020_v17 = vadd.f32 %v5815_v55, %v5652_v4  ;;  %v6023_v23 = vadd.f32 1.0, %v4888_v51 }
 0x1a5   : > { %v1133_v4 = vand.u32 2147483647, %v5951_v3  ;;  %vm6122_vm3 = vcmp.eq.f32.partialorder %v1148_v14, 8.507059e+37  ;;  %v1507_v14 = vld [vmem:[#allocation10 + $0x50] sm:$0xff] }
 0x1a6   : > { %v1112_v56 = vmul.f32 %v5956_v6, %v1111_v29  ;;  %v1107_v29 = vsel %vm1104_vm7, %v1106_v25, %v1102_v15  ;;  %v4615_v51 = vmul.f32 -1.442695, %v6020_v17  ;;  %4893 = vrcp.f32 %v6023_v23 }
 0x1a7   : > { %v6032_v63 = vpop.eup %4889  ;;  %v6039_v25 = vmul.f32 %v1107_v29, %v5819_v19  ;;  %v1513_v29 = vld [vmem:[#allocation10 + $0x80] sm:$0xff]  ;;  %vm1134_vm15 = vcmp.eq.f32.partialorder %v1133_v4, 8.507059e+37  ;;  %vm1159_vm4 = vweird.f32 %v6023_v23 }
 0x1a8   : > { %v5986_v26 = vpop.f32.mrf.mxu2  ;;  %v1113_v2 = vadd.f32 %v5956_v6, %v1112_v56  ;;  %v1127_v56 = vmul.f32 %v5994_v33, %v1126_v44  ;;  %4895 = vpow2.f32 %v4615_v51  ;;  %vm1145_vm1 = vweird.f32 %v6032_v63 }
 0x1a9   : > { %8157 = vst [vmem:[#allocation38_spill] sm:$0xff] %v5986_v26  ;;  %v6001_v26 = vmul.f32 %v1092_v54, %v5794_v45  ;;  %v1516_v45 = vld [vmem:[#allocation10 + $0x98] sm:$0xff]  ;;  %v1120_v54 = vand.u32 2147483648, %v5913_v34  ;;  %v4892_v34 = vpop.eup %4891  ;;  %vm6110_vm2 = vmor %vm1144_vm0, %vm1145_vm1 }
 0x1aa   : > { %2056 = vmatpush.msrb.mxu3 %v1516_v45  ;;  %v6027_v45 = vpop.f32.mrf.mxu1  ;;  %v1117_v49 = vsel %vm6034_vm10, %v5956_v6, %v1113_v2  ;;  %v6058_v6 = vadd.f32 %v5815_v55, %v5670_v39  ;;  %v1135_v2 = vand.u32 2147483648, %v5951_v3  ;;  %v6061_v48 = vadd.f32 1.0, %v4892_v34 }
 0x1ab   : > { %8160 = vst [vmem:[#allocation39_spill] sm:$0xff] %v6001_v26  ;;  %v6005_v35 = vpop.f32.mrf.mxu0  ;;  %1671 = vmatmul.f32.gmra.mxu3 %v6001_v26  ;;  %1784 = vmatmul.f32.gmra.mxu1 %v6001_v26  ;;  %v1121_v15 = vor.u32 1.1754944e-38, %v1120_v54  ;;  %v1128_v44 = vadd.f32 %v5994_v33, %v1127_v56 }
 0x1ac   : > { %8161 = vst [vmem:[#allocation40_spill] sm:$0xff] %v6005_v35  ;;  %2016 = vmatmul.f32.gmra.mxu0 %v6001_v26  ;;  %1858 = vmatmul.f32.gmra.mxu2 %v5665_v27  ;;  %v6066_v31 = vpop.eup %4893  ;;  %v1136_v56 = vor.u32 1.1754944e-38, %v1135_v2  ;;  %4897 = vrcp.f32 %v6061_v48  ;;  %v2351_v2 = vld [vmem:[#allocation10 + $0x470] sm:$0xff]  ;;  %vm1174_vm8 = vweird.f32 %v6061_v48 }
 0x1ad   : > { %2057 = vmatpush.msrb.mxu3 %v1513_v29  ;;  %v1122_v54 = vsel %vm1119_vm11, %v1121_v15, %v1117_v49  ;;  %v4616_v15 = vmul.f32 -1.442695, %v6058_v6  ;;  %2466 = vmatpush.msra.mxu0 %v2351_v2  ;;  %v2342_v2 = vld [vmem:[#allocation10 + $0x428] sm:$0xff]  ;;  %vm1160_vm5 = vweird.f32 %v6066_v31 }
 0x1ae   : > { %v6073_v39 = vmul.f32 %v1122_v54, %v5846_v47  ;;  %v4896_v3 = vpop.eup %4895  ;;  %v1155_v47 = vmul.f32 %v6066_v31, %v6023_v23  ;;  %v1510_v54 = vld [vmem:[#allocation10 + $0x68] sm:$0xff]  ;;  %vm6156_vm6 = vmor %vm1159_vm4, %vm1160_vm5 }
 0x1af   : > { %4899 = vpow2.f32 %v4616_v15  ;;  %2058 = vmatpush.msrb.mxu3 %v1510_v54  ;;  %v6097_v4 = vadd.f32 1.0, %v4896_v3  ;;  %v2336_v15 = vld [vmem:[#allocation10 + $0x3f8] sm:$0xff] }
 0x1b0   : > { %v6030_v35 = vpop.f32.mrf.mxu2  ;;  %v1156_v41 = vsub.f32 1.0, %v1155_v47 }
 0x1b1   : > { %8162 = vst [vmem:[#allocation41_spill] sm:$0xff] %v6030_v35  ;;  %v1140_v35 = vmul.f32 %v6032_v63, %v5989_v13  ;;  %4901 = vrcp.f32 %v6097_v4  ;;  %2059 = vmatpush.msrb.mxu3 %v1507_v14  ;;  %v1544_v14 = vld [vmem:[#allocation10 + $0x178] sm:$0xff]  ;;  %vm1189_vm12 = vweird.f32 %v6097_v4 }
 0x1b2   : > { %v6076_v34 = vpop.f32.mrf.mxu1  ;;  %v1157_v47 = vmul.f32 %v6066_v31, %v1156_v41  ;;  %v6140_v41 = vadd.f32 %v5815_v55, %v5692_v18  ;;  %2160 = vmatpush.msrb.mxu1 %v1544_v14  ;;  %v1180_v14 = vand.u32 2147483648, %v6061_v48 }
 0x1b3   : > { %1674 = vmatmul.f32.gmra.mxu3 %v6039_v25  ;;  %1787 = vmatmul.f32.gmra.mxu1 %v6039_v25  ;;  %v6052_v19 = vpop.f32.mrf.mxu0 }
 0x1b4   : > { %2019 = vmatmul.f32.gmra.mxu0 %v6039_v25  ;;  %8165 = vst [vmem:[#allocation42_spill] sm:$0xff] %v6052_v19  ;;  %v1141_v19 = vsub.f32 1.0, %v1140_v35  ;;  %1861 = vmatmul.f32.gmra.mxu2 %v5677_v46  ;;  %v1132_v35 = vsel %vm6068_vm14, %v5994_v33, %v1128_v44  ;;  %v6094_v33 = vadd.f32 %v5815_v55, %v5685_v58  ;;  %v1150_v44 = vand.u32 2147483648, %v5989_v13  ;;  %v6104_v58 = vpop.eup %4897 }
 0x1b5   : > { %vm1175_vm9 = vweird.f32 %v6104_v58 }
 0x1b6   : > { %v1142_v29 = vmul.f32 %v6032_v63, %v1141_v19  ;;  %v1137_v19 = vsel %vm1134_vm15, %v1136_v56, %v1132_v35  ;;  %v4617_v3 = vmul.f32 -1.442695, %v6094_v33  ;;  %v1151_v35 = vor.u32 1.1754944e-38, %v1150_v44  ;;  %vm6204_vm10 = vmor %vm1174_vm8, %vm1175_vm9 }
 0x1b7   : > { %v6115_v56 = vmul.f32 %v1137_v19, %v5870_v32  ;;  %v1170_v32 = vmul.f32 %v6104_v58, %v6061_v48  ;;  %v1165_v19 = vand.u32 2147483648, %v6023_v23 }
 0x1b8   : > { %v6078_v49 = vpop.f32.mrf.mxu2  ;;  %v1143_v22 = vadd.f32 %v6032_v63, %v1142_v29  ;;  %4903 = vpow2.f32 %v4617_v3 }
 0x1b9   : > { %8168 = vst [vmem:[#allocation43_spill] sm:$0xff] %v6078_v49  ;;  %v2348_v49 = vld [vmem:[#allocation10 + $0x458] sm:$0xff]  ;;  %v1171_v50 = vsub.f32 1.0, %v1170_v32  ;;  %v1166_v13 = vor.u32 1.1754944e-38, %v1165_v19  ;;  %v1541_v19 = vld [vmem:[#allocation10 + $0x160] sm:$0xff] }
 0x1ba   : > { %2467 = vmatpush.msra.mxu0 %v2348_v49  ;;  %v4900_v49 = vpop.eup %4899  ;;  %v1147_v29 = vsel %vm6110_vm2, %v6032_v63, %v1143_v22  ;;  %v6129_v54 = vpop.f32.mrf.mxu1  ;;  %v2339_v22 = vld [vmem:[#allocation10 + $0x410] sm:$0xff]  ;;  %2161 = vmatpush.msrb.mxu1 %v1541_v19 }
 0x1bb   : > { %1677 = vmatmul.f32.gmra.mxu3 %v6073_v39  ;;  %1790 = vmatmul.f32.gmra.mxu1 %v6073_v39  ;;  %v6099_v51 = vpop.f32.mrf.mxu0  ;;  %8174 = vst [vmem:[#allocation45_spill] sm:$0xff] %v6129_v54  ;;  %v1152_v63 = vsel %vm6122_vm3, %v1151_v35, %v1147_v29  ;;  %v6145_v44 = vadd.f32 1.0, %v4900_v49  ;;  %v6150_v18 = vpop.eup %4901  ;;  %v4618_v29 = vmul.f32 -1.442695, %v6140_v41 }
 0x1bc   : > { %2022 = vmatmul.f32.gmra.mxu0 %v6073_v39  ;;  %8169 = vst [vmem:[#allocation44_spill] sm:$0xff] %v6099_v51  ;;  %1864 = vmatmul.f32.gmra.mxu2 %v5699_v61  ;;  %v1158_v51 = vadd.f32 %v6066_v31, %v1157_v47  ;;  %v6163_v49 = vmul.f32 %v1152_v63, %v5910_v12  ;;  %v2333_v47 = vld [vmem:[#allocation10 + $0x3e0] sm:$0xff]  ;;  %v2330_v63 = vld [vmem:[#allocation10 + $0x3c8] sm:$0xff]  ;;  %vm1190_vm13 = vweird.f32 %v6150_v18 }
 0x1bd   : > { %2468 = vmatpush.msra.mxu0 %v2345_v11  ;;  %4905 = vrcp.f32 %v6145_v44  ;;  %v1185_v12 = vmul.f32 %v6150_v18, %v6097_v4  ;;  %vm6248_vm14 = vmor %vm1189_vm12, %vm1190_vm13  ;;  %vm1204_vm0 = vweird.f32 %v6145_v44 }
 0x1be   : > { %v4904_v32 = vpop.eup %4903  ;;  %4907 = vpow2.f32 %v4618_v29  ;;  %v2327_v29 = vld [vmem:[#allocation10 + $0x3b0] sm:$0xff] }
 0x1bf   : > { %2469 = vmatpush.msra.mxu0 %v2342_v2 }
 0x1c0   : > { %v6133_v11 = vpop.f32.mrf.mxu2 }
 0x1c1   : > { %8175 = vst [vmem:[#allocation46_spill] sm:$0xff] %v6133_v11  ;;  %v1163_v11 = vand.u32 2147483647, %v6023_v23  ;;  %2470 = vmatpush.msra.mxu0 %v2339_v22  ;;  %v1162_v23 = vsel %vm6156_vm6, %v6066_v31, %v1158_v51  ;;  %v1172_v22 = vmul.f32 %v6104_v58, %v1171_v50  ;;  %v1504_v31 = vld [vmem:[#allocation10 + $0x38] sm:$0xff]  ;;  %v6184_v50 = vadd.f32 %v5815_v55, %v5710_v1 }
 0x1c2   : > { %v6186_v51 = vpop.f32.mrf.mxu1  ;;  %2060 = vmatpush.msrb.mxu3 %v1504_v31  ;;  %v1178_v1 = vand.u32 2147483647, %v6061_v48  ;;  %v1186_v55 = vsub.f32 1.0, %v1185_v12  ;;  %v2324_v12 = vld [vmem:[#allocation10 + $0x398] sm:$0xff] }
 0x1c3   : > { %1680 = vmatmul.f32.gmra.mxu3 %v6115_v56  ;;  %1793 = vmatmul.f32.gmra.mxu1 %v6115_v56  ;;  %vm6170_vm7 = vcmp.eq.f32.partialorder %v1163_v11, 8.507059e+37  ;;  %8181 = vst [vmem:[#allocation48_spill] sm:$0xff] %v6186_v51  ;;  %v1173_v54 = vadd.f32 %v6104_v58, %v1172_v22  ;;  %v6198_v31 = vpop.eup %4905  ;;  %v4619_v2 = vmul.f32 -1.442695, %v6184_v50  ;;  %v1181_v22 = vor.u32 1.1754944e-38, %v1180_v14  ;;  %v2321_v14 = vld [vmem:[#allocation10 + $0x380] sm:$0xff] }
 0x1c4   : > { %2025 = vmatmul.f32.gmra.mxu0 %v6115_v56  ;;  %1867 = vmatmul.f32.gmra.mxu2 %v5714_v5  ;;  %v1167_v3 = vsel %vm6170_vm7, %v1166_v13, %v1162_v23  ;;  %vm6218_vm11 = vcmp.eq.f32.partialorder %v1178_v1, 8.507059e+37  ;;  %v1501_v1 = vld [vmem:[#allocation10 + $0x20] sm:$0xff]  ;;  %vm1205_vm1 = vweird.f32 %v6198_v31 }
 0x1c5   : > { %2471 = vmatpush.msra.mxu0 %v2336_v15  ;;  %v1538_v15 = vld [vmem:[#allocation10 + $0x148] sm:$0xff]  ;;  %v6211_v23 = vmul.f32 %v1167_v3, %v5948_v36  ;;  %v1177_v48 = vsel %vm6204_vm10, %v6104_v58, %v1173_v54  ;;  %v1187_v36 = vmul.f32 %v6150_v18, %v1186_v55  ;;  %v1532_v3 = vld [vmem:[#allocation10 + $0x118] sm:$0xff]  ;;  %2061 = vmatpush.msrb.mxu3 %v1501_v1  ;;  %v1517_v1 = vld [vmem:[#allocation10 + $0xa0] sm:$0xff] }
 0x1c6   : > { %2162 = vmatpush.msrb.mxu1 %v1538_v15  ;;  %v1200_v15 = vmul.f32 %v6198_v31, %v6145_v44  ;;  %v1526_v54 = vld [vmem:[#allocation10 + $0xe8] sm:$0xff]  ;;  %v1182_v55 = vsel %vm6218_vm11, %v1181_v22, %v1177_v48  ;;  %vm6283_vm2 = vmor %vm1204_vm0, %vm1205_vm1 }
 0x1c7   : > { %2472 = vmatpush.msra.mxu0 %v2333_v47  ;;  %v1535_v47 = vld [vmem:[#allocation10 + $0x130] sm:$0xff] }
 0x1c8   : > { %2163 = vmatpush.msrb.mxu1 %v1535_v47  ;;  %v1195_v47 = vand.u32 2147483648, %v6097_v4 }
 0x1c9   : > { %v6160_v35 = vpop.f32.mrf.mxu0  ;;  %2473 = vmatpush.msra.mxu0 %v2330_v63  ;;  %v4908_v63 = vpop.eup %4907 }
 0x1ca   : > { %8178 = vst [vmem:[#allocation47_spill] sm:$0xff] %v6160_v35  ;;  %v6193_v35 = vadd.f32 1.0, %v4904_v32  ;;  %2164 = vmatpush.msrb.mxu1 %v1532_v3  ;;  %v6235_v13 = vadd.f32 1.0, %v4908_v63  ;;  %v1188_v3 = vadd.f32 %v6150_v18, %v1187_v36  ;;  %v6239_v51 = vpop.f32.mrf.mxu1  ;;  %v6253_v63 = vmul.f32 %v1182_v55, %v5982_v52 }
 0x1cb   : > { %1683 = vmatmul.f32.gmra.mxu3 %v6163_v49  ;;  %1796 = vmatmul.f32.gmra.mxu1 %v6163_v49  ;;  %v1196_v36 = vor.u32 1.1754944e-38, %v1195_v47  ;;  %v1210_v47 = vand.u32 2147483648, %v6145_v44 }
 0x1cc   : > { %2028 = vmatmul.f32.gmra.mxu0 %v6163_v49  ;;  %1870 = vmatmul.f32.gmra.mxu2 %v5732_v37  ;;  %4909 = vrcp.f32 %v6193_v35  ;;  %8191 = vst [vmem:[#allocation52_spill] sm:$0xff] %v6253_v63  ;;  %vm1219_vm4 = vweird.f32 %v6193_v35  ;;  %vm1234_vm8 = vweird.f32 %v6235_v13 }
 0x1cd   : > { %2474 = vmatpush.msra.mxu0 %v2327_v29  ;;  %v1529_v29 = vld [vmem:[#allocation10 + $0x100] sm:$0xff]  ;;  %4911 = vpow2.f32 %v4619_v2  ;;  %v1201_v2 = vsub.f32 1.0, %v1200_v15  ;;  %v2315_v15 = vld [vmem:[#allocation10 + $0x350] sm:$0xff] }
 0x1ce   : > { %v6188_v11 = vpop.f32.mrf.mxu2  ;;  %2165 = vmatpush.msrb.mxu1 %v1529_v29  ;;  %4913 = vrcp.f32 %v6235_v13 }
 0x1cf   : > { %8182 = vst [vmem:[#allocation49_spill] sm:$0xff] %v6188_v11  ;;  %2475 = vmatpush.msra.mxu0 %v2324_v12  ;;  %v1193_v11 = vand.u32 2147483647, %v6097_v4  ;;  %v1523_v12 = vld [vmem:[#allocation10 + $0xd0] sm:$0xff]  ;;  %v1192_v4 = vsel %vm6248_vm14, %v6150_v18, %v1188_v3  ;;  %v1202_v29 = vmul.f32 %v6198_v31, %v1201_v2  ;;  %v1514_v18 = vld [vmem:[#allocation10 + $0x88] sm:$0xff] }
 0x1d0   : > { %2166 = vmatpush.msrb.mxu1 %v1526_v54  ;;  %v2312_v54 = vld [vmem:[#allocation10 + $0x338] sm:$0xff] }
 0x1d1   : > { %v6208_v32 = vpop.f32.mrf.mxu0  ;;  %2476 = vmatpush.msra.mxu0 %v2321_v14  ;;  %vm1194_vm15 = vcmp.eq.f32.partialorder %v1193_v11, 8.507059e+37  ;;  %v1498_v11 = vld [vmem:[#allocation10 + $0x8] sm:$0xff]  ;;  %v1203_v22 = vadd.f32 %v6198_v31, %v1202_v29  ;;  %v1211_v29 = vor.u32 1.1754944e-38, %v1210_v47 }
 0x1d2   : > { %8185 = vst [vmem:[#allocation50_spill] sm:$0xff] %v6208_v32  ;;  %v2318_v32 = vld [vmem:[#allocation10 + $0x368] sm:$0xff]  ;;  %v6242_v19 = vpop.eup %4909  ;;  %2167 = vmatpush.msrb.mxu1 %v1523_v12  ;;  %v1197_v55 = vsel %vm1194_vm15, %v1196_v36, %v1192_v4  ;;  %v2309_v12 = vld [vmem:[#allocation10 + $0x320] sm:$0xff]  ;;  %2062 = vmatpush.msrb.mxu3 %v1498_v11  ;;  %v6290_v4 = vpop.f32.mrf.mxu1  ;;  %v1508_v11 = vld [vmem:[#allocation10 + $0x58] sm:$0xff] }
 0x1d3   : > { %1686 = vmatmul.f32.gmra.mxu3 %v6211_v23  ;;  %1799 = vmatmul.f32.gmra.mxu1 %v6211_v23  ;;  %v4912_v14 = vpop.eup %4911  ;;  %v1215_v52 = vmul.f32 %v6242_v19, %v6193_v35  ;;  %vm1220_vm5 = vweird.f32 %v6242_v19  ;;  %v1499_v36 = vld [vmem:[#allocation10 + $0x10] sm:$0xff] }
 0x1d4   : > { %2031 = vmatmul.f32.gmra.mxu0 %v6211_v23  ;;  %1873 = vmatmul.f32.gmra.mxu2 %v5744_v9  ;;  %v6270_v3 = vadd.f32 1.0, %v4912_v14  ;;  %v6288_v14 = vmul.f32 %v1197_v55, %v6020_v17  ;;  %v2350_v55 = vld [vmem:[#allocation10 + $0x468] sm:$0xff]  ;;  %vm6316_vm6 = vmor %vm1219_vm4, %vm1220_vm5 }
 0x1d5   : > { %2477 = vmatpush.msra.mxu0 %v2318_v32  ;;  %v1520_v32 = vld [vmem:[#allocation10 + $0xb8] sm:$0xff]  ;;  %2353 = vmatpush.msrb.mxu2 %v2350_v55 }
 0x1d6   : > { %v6230_v58 = vpop.f32.mrf.mxu2  ;;  %2168 = vmatpush.msrb.mxu1 %v1520_v32  ;;  %v1208_v32 = vand.u32 2147483647, %v6145_v44  ;;  %4915 = vrcp.f32 %v6270_v3  ;;  %v1207_v44 = vsel %vm6283_vm2, %v6198_v31, %v1203_v22  ;;  %v1505_v31 = vld [vmem:[#allocation10 + $0x40] sm:$0xff]  ;;  %vm1249_vm12 = vweird.f32 %v6270_v3 }
 0x1d7   : > { %8188 = vst [vmem:[#allocation51_spill] sm:$0xff] %v6230_v58  ;;  %2478 = vmatpush.msra.mxu0 %v2315_v15  ;;  %v1511_v15 = vld [vmem:[#allocation10 + $0x70] sm:$0xff]  ;;  %v6277_v58 = vpop.eup %4913 }
 0x1d8   : > { %2169 = vmatpush.msrb.mxu1 %v1517_v1  ;;  %vm6296_vm3 = vcmp.eq.f32.partialorder %v1208_v32, 8.507059e+37  ;;  %v1230_v17 = vmul.f32 %v6277_v58, %v6235_v13  ;;  %v1223_v32 = vand.u32 2147483647, %v6193_v35  ;;  %vm1235_vm9 = vweird.f32 %v6277_v58 }
 0x1d9   : > { %v6255_v48 = vpop.f32.mrf.mxu0  ;;  %2479 = vmatpush.msra.mxu0 %v2312_v54  ;;  %v1212_v47 = vsel %vm6296_vm3, %v1211_v29, %v1207_v44  ;;  %vm1236_vm10 = vmor %vm1234_vm8, %vm1235_vm9 }
 0x1da   : > { %8192 = vst [vmem:[#allocation53_spill] sm:$0xff] %v6255_v48  ;;  %v1216_v48 = vsub.f32 1.0, %v1215_v52  ;;  %2170 = vmatpush.msrb.mxu1 %v1514_v18  ;;  %v2306_v52 = vld [vmem:[#allocation10 + $0x308] sm:$0xff]  ;;  %v6323_v29 = vmul.f32 %v1212_v47, %v6058_v6  ;;  %vm1224_vm7 = vcmp.eq.f32.partialorder %v1223_v32, 8.507059e+37 }
 0x1db   : > { %1689 = vmatmul.f32.gmra.mxu3 %v6253_v63  ;;  %1802 = vmatmul.f32.gmra.mxu1 %v6253_v63 }
 0x1dc   : > { %2034 = vmatmul.f32.gmra.mxu0 %v6253_v63  ;;  %1876 = vmatmul.f32.gmra.mxu2 %v5768_v59  ;;  %v1217_v1 = vmul.f32 %v6242_v19, %v1216_v48  ;;  %v1502_v48 = vld [vmem:[#allocation10 + $0x28] sm:$0xff] }
 0x1dd   : > { %2480 = vmatpush.msra.mxu0 %v2309_v12  ;;  %2171 = vmatpush.msrb.mxu1 %v1511_v15  ;;  %v1225_v12 = vand.u32 2147483648, %v6193_v35  ;;  %v1231_v15 = vsub.f32 1.0, %v1230_v17  ;;  %v6330_v17 = vpop.f32.mrf.mxu1 }
 0x1de   : > { %v6272_v2 = vpop.f32.mrf.mxu2  ;;  %v1218_v22 = vadd.f32 %v6242_v19, %v1217_v1 }
 0x1df   : > { %2172 = vmatpush.msrb.mxu1 %v1508_v11  ;;  %2481 = vmatpush.msra.mxu0 %v2306_v52  ;;  %v4916_v11 = vpop.eup %4915  ;;  %v1226_v44 = vor.u32 1.1754944e-38, %v1225_v12  ;;  %v1232_v54 = vmul.f32 %v6277_v58, %v1231_v15 }
 0x1e0   : > { %v1222_v35 = vsel %vm6316_vm6, %v6242_v19, %v1218_v22  ;;  %v1245_v1 = vmul.f32 %v4916_v11, %v6270_v3  ;;  %vm1250_vm13 = vweird.f32 %v4916_v11 }
 0x1e1   : > { %v6305_v18 = vpop.f32.mrf.mxu0  ;;  %2173 = vmatpush.msrb.mxu1 %v1505_v31  ;;  %v2352_v31 = vld [vmem:[#allocation10 + $0x478] sm:$0xff]  ;;  %v1227_v19 = vsel %vm1224_vm7, %v1226_v44, %v1222_v35  ;;  %v1233_v55 = vadd.f32 %v6277_v58, %v1232_v54  ;;  %v1255_v35 = vand.u32 2147483648, %v6270_v3  ;;  %vm6360_vm14 = vmor %vm1249_vm12, %vm1250_vm13 }
 0x1e2   : > { %8197 = vst [vmem:[#allocation54_spill] sm:$0xff] %v6305_v18  ;;  %2579 = vmatpush.msra.mxu3 %v2352_v31  ;;  %v1240_v18 = vand.u32 2147483648, %v6235_v13  ;;  %v1246_v47 = vsub.f32 1.0, %v1245_v1  ;;  %v6344_v12 = vmul.f32 %v1227_v19, %v6094_v33  ;;  %v2347_v19 = vld [vmem:[#allocation10 + $0x450] sm:$0xff] }
 0x1e3   : > { %1692 = vmatmul.f32.gmra.mxu3 %v6288_v14  ;;  %1805 = vmatmul.f32.gmra.mxu1 %v6288_v14  ;;  %v1237_v15 = vsel %vm1236_vm10, %v6277_v58, %v1233_v55  ;;  %v1253_v58 = vand.u32 2147483647, %v6270_v3  ;;  %v1256_v55 = vor.u32 1.1754944e-38, %v1255_v35  ;;  %v2349_v3 = vld [vmem:[#allocation10 + $0x460] sm:$0xff] }
 0x1e4   : > { %2037 = vmatmul.f32.gmra.mxu0 %v6288_v14  ;;  %1879 = vmatmul.f32.gmra.mxu2 %v5782_v21  ;;  %v1241_v22 = vor.u32 1.1754944e-38, %v1240_v18 }
 0x1e5   : > { %2174 = vmatpush.msrb.mxu1 %v1502_v48  ;;  %v1238_v48 = vand.u32 2147483647, %v6235_v13  ;;  %v6353_v13 = vpop.f32.mrf.mxu1  ;;  %2354 = vmatpush.msrb.mxu2 %v2347_v19  ;;  %vm1254_vm15 = vcmp.eq.f32.partialorder %v1253_v58, 8.507059e+37  ;;  %v2346_v19 = vld [vmem:[#allocation10 + $0x448] sm:$0xff] }
 0x1e6   : > { %v6320_v52 = vpop.f32.mrf.mxu2  ;;  %2580 = vmatpush.msra.mxu3 %v2349_v3 }
 0x1e7   : > { %2175 = vmatpush.msrb.mxu1 %v1499_v36  ;;  %vm1239_vm11 = vcmp.eq.f32.partialorder %v1238_v48, 8.507059e+37  ;;  %v1247_v36 = vmul.f32 %v4916_v11, %v1246_v47 }
 0x1e8   : > { %v1242_v44 = vsel %vm1239_vm11, %v1241_v22, %v1237_v15  ;;  %2581 = vmatpush.msra.mxu3 %v2346_v19 }
 0x1e9   : > { %v6337_v6 = vpop.f32.mrf.mxu0  ;;  %v1248_v54 = vadd.f32 %v4916_v11, %v1247_v36  ;;  %v6367_v18 = vmul.f32 %v1242_v44, %v6140_v41 }
 0x1ea   : > { %8200 = vst [vmem:[#allocation55_spill] sm:$0xff] %v6337_v6 }
 0x1eb   : > { %1695 = vmatmul.f32.gmra.mxu3 %v6323_v29  ;;  %1808 = vmatmul.f32.gmra.mxu1 %v6323_v29  ;;  %v1252_v47 = vsel %vm6360_vm14, %v4916_v11, %v1248_v54  ;;  %v2344_v54 = vld [vmem:[#allocation10 + $0x438] sm:$0xff] }
 0x1ec   : > { %2040 = vmatmul.f32.gmra.mxu0 %v6323_v29  ;;  %1882 = vmatmul.f32.gmra.mxu2 %v5797_v53  ;;  %v1257_v15 = vsel %vm1254_vm15, %v1256_v55, %v1252_v47 }
 0x1ed   : > { %v6376_v41 = vpop.f32.mrf.mxu1  ;;  %v6380_v36 = vmul.f32 %v1257_v15, %v6184_v50  ;;  %2355 = vmatpush.msrb.mxu2 %v2344_v54  ;;  %v8209_v50 = vmov 0.0  }
 0x1ee   : > { %v6346_v32 = vpop.f32.mrf.mxu2 }
 0x1ef   : > { %v6364_v31 = vpop.f32.mrf.mxu3 }
 0x1f1   : > { %v6355_v33 = vpop.f32.mrf.mxu0 }
 0x1f2   : > { %8201 = vst [vmem:[#allocation56_spill] sm:$0xff] %v6355_v33 }
 0x1f3   : > { %1698 = vmatmul.f32.gmra.mxu3 %v6344_v12  ;;  %1811 = vmatmul.f32.gmra.mxu1 %v6344_v12 }
 0x1f4   : > { %2043 = vmatmul.f32.gmra.mxu0 %v6344_v12  ;;  %1885 = vmatmul.f32.gmra.mxu2 %v5839_v40 }
 0x1f5   : > { %v6390_v58 = vpop.f32.mrf.mxu1 }
 0x1f6   : > { %v6369_v48 = vpop.f32.mrf.mxu2  ;;  %8207 = vst [vmem:[#allocation60_spill] sm:$0xff] %v6390_v58 }
 0x1f7   : > { %8204 = vst [vmem:[#allocation57_spill] sm:$0xff] %v6369_v48  ;;  %v6382_v44 = vpop.f32.mrf.mxu3 }
 0x1f8   : > { %8205 = vst [vmem:[#allocation58_spill] sm:$0xff] %v6382_v44 }
 0x1f9   : > { %v2002_v22 = vpop.f32.mrf.mxu0 }
 0x1fb   : > { %1701 = vmatmul.f32.gmra.mxu3 %v6367_v18  ;;  %1814 = vmatmul.f32.gmra.mxu1 %v6367_v18 }
 0x1fc   : > { %2482 = vmatmul.f32.vlgmr.msra.gmra.mxu0 %v5602_v42  ;;  %1888 = vmatmul.f32.gmra.mxu2 %v5890_v43 }
 0x1fd   : > { %v6402_v15 = vpop.f32.mrf.mxu1 }
 0x1fe   : > { %v6384_v11 = vpop.f32.mrf.mxu2  ;;  %8212 = vst [vmem:[#allocation64_spill] sm:$0xff] %v6402_v15 }
 0x1ff   : > { %8206 = vst [vmem:[#allocation59_spill] sm:$0xff] %v6384_v11  ;;  %v6397_v55 = vpop.f32.mrf.mxu3 }
 0x200   : > { %8210 = vst [vmem:[#allocation62_spill] sm:$0xff] %v6397_v55 }
 0x201   : > { %v2005_v35 = vpop.f32.mrf.mxu0 }
 0x203   : > { %1704 = vmatmul.f32.gmra.mxu3 %v6380_v36  ;;  %1817 = vmatmul.f32.gmra.mxu1 %v6380_v36 }
 0x204   : > { %2485 = vmatmul.f32.gmra.mxu0 %v5613_v62  ;;  %1891 = vmatmul.f32.gmra.mxu2 %v5927_v28 }
 0x205   : > { %v6415_v33 = vpop.f32.mrf.mxu1 }
 0x206   : > { %v6392_v1 = vpop.f32.mrf.mxu2  ;;  %8215 = vst [vmem:[#allocation67_spill] sm:$0xff] %v6415_v33  ;;  %v2317_v33 = vld [vmem:[#allocation10 + $0x360] sm:$0xff] }
 0x207   : > { %8208 = vst [vmem:[#allocation61_spill] sm:$0xff] %v6392_v1  ;;  %v2341_v1 = vld [vmem:[#allocation10 + $0x420] sm:$0xff] }
 0x208   : > { %2356 = vmatpush.msrb.mxu2 %v2341_v1 }
 0x20b   : > { %2063 = vmatmul.f32.vlgmr.msrb.gmra.mxu3 %v8209_v50  ;;  %2176 = vmatmul.f32.vlgmr.msrb.gmra.mxu1 %v8209_v50 }
 0x20c   : > { %2488 = vmatmul.f32.gmra.mxu0 %v5626_v20  ;;  %1894 = vmatmul.f32.gmra.mxu2 %v5965_v7 }
 0x20d   : > { %v6425_v1 = vpop.f32.mrf.mxu1 }
 0x20e   : > { %v2008_v47 = vpop.f32.mrf.mxu0  ;;  %v6400_v3 = vpop.f32.mrf.mxu2  ;;  %8218 = vst [vmem:[#allocation70_spill] sm:$0xff] %v6425_v1  ;;  %v2326_v1 = vld [vmem:[#allocation10 + $0x3a8] sm:$0xff] }
 0x20f   : > { %8211 = vst [vmem:[#allocation63_spill] sm:$0xff] %v6400_v3  ;;  %v2343_v3 = vld [vmem:[#allocation10 + $0x430] sm:$0xff] }
 0x210   : > { %2582 = vmatpush.msra.mxu3 %v2343_v3 }
 0x213   : > { %2066 = vmatmul.f32.gmra.mxu3 %v8209_v50  ;;  %2179 = vmatmul.f32.gmra.mxu1 %v8209_v50  ;;  %v1663_v54 = vpop.f32.mrf.mxu3 }
 0x214   : > { %2491 = vmatmul.f32.gmra.mxu0 %v5638_v38  ;;  %v6407_v48 = vadd.f32 %v2002_v22, %v1663_v54  ;;  %1897 = vmatmul.f32.gmra.mxu2 %v6001_v26 }
 0x216   : > { %8213 = vst [vmem:[#allocation65_spill] sm:$0xff] %v6407_v48  ;;  %v2011_v19 = vpop.f32.mrf.mxu0  ;;  %v6410_v11 = vpop.f32.mrf.mxu2 }
 0x217   : > { %8214 = vst [vmem:[#allocation66_spill] sm:$0xff] %v6410_v11 }
 0x21b   : > { %2069 = vmatmul.f32.gmra.mxu3 %v5580_v8  ;;  %2182 = vmatmul.f32.gmra.mxu1 %v5580_v8  ;;  %v1666_v55 = vpop.f32.mrf.mxu3 }
 0x21c   : > { %2494 = vmatmul.f32.gmra.mxu0 %v5649_v0  ;;  %v6417_v22 = vadd.f32 %v2005_v35, %v1666_v55  ;;  %1900 = vmatmul.f32.gmra.mxu2 %v6039_v25  ;;  %v2338_v35 = vld [vmem:[#allocation10 + $0x408] sm:$0xff] }
 0x21d   : > { %2357 = vmatpush.msrb.mxu2 %v2338_v35 }
 0x21e   : > { %8216 = vst [vmem:[#allocation68_spill] sm:$0xff] %v6417_v22  ;;  %v2014_v54 = vpop.f32.mrf.mxu0  ;;  %v6420_v48 = vpop.f32.mrf.mxu2 }
 0x21f   : > { %8217 = vst [vmem:[#allocation69_spill] sm:$0xff] %v6420_v48  ;;  %v2340_v48 = vld [vmem:[#allocation10 + $0x418] sm:$0xff] }
 0x220   : > { %2583 = vmatpush.msra.mxu3 %v2340_v48  ;;  %v2335_v48 = vld [vmem:[#allocation10 + $0x3f0] sm:$0xff] }
 0x221   : > { %2358 = vmatpush.msrb.mxu2 %v2335_v48 }
 0x223   : > { %2072 = vmatmul.f32.gmra.mxu3 %v5590_v24  ;;  %2185 = vmatmul.f32.gmra.mxu1 %v5590_v24  ;;  %v1669_v8 = vpop.f32.mrf.mxu3 }
 0x224   : > { %2497 = vmatmul.f32.gmra.mxu0 %v5665_v27  ;;  %v6427_v3 = vadd.f32 %v2008_v47, %v1669_v8  ;;  %1903 = vmatmul.f32.gmra.mxu2 %v6073_v39  ;;  %v6438_v47 = vpop.f32.mrf.mxu1 }
 0x225   : > { %8222 = vst [vmem:[#allocation74_spill] sm:$0xff] %v6438_v47 }
 0x226   : > { %8219 = vst [vmem:[#allocation71_spill] sm:$0xff] %v6427_v3  ;;  %v6430_v11 = vpop.f32.mrf.mxu2 }
 0x227   : > { %8220 = vst [vmem:[#allocation72_spill] sm:$0xff] %v6430_v11 }
 0x229   : > { %v2017_v55 = vpop.f32.mrf.mxu0 }
 0x22b   : > { %2075 = vmatmul.f32.gmra.mxu3 %v5602_v42  ;;  %2188 = vmatmul.f32.gmra.mxu1 %v5602_v42 }
 0x22c   : > { %2500 = vmatmul.f32.gmra.mxu0 %v5677_v46  ;;  %1906 = vmatmul.f32.gmra.mxu2 %v6115_v56 }
 0x22e   : > { %v1672_v24 = vpop.f32.mrf.mxu3 }
 0x22f   : > { %v6435_v22 = vadd.f32 %v2011_v19, %v1672_v24  ;;  %v6440_v3 = vpop.f32.mrf.mxu2 }
 0x230   : > { %8223 = vst [vmem:[#allocation75_spill] sm:$0xff] %v6440_v3  ;;  %v2337_v3 = vld [vmem:[#allocation10 + $0x400] sm:$0xff] }
 0x231   : > { %8221 = vst [vmem:[#allocation73_spill] sm:$0xff] %v6435_v22  ;;  %v2020_v8 = vpop.f32.mrf.mxu0  ;;  %v6450_v22 = vpop.f32.mrf.mxu1  ;;  %2584 = vmatpush.msra.mxu3 %v2337_v3  ;;  %v2332_v3 = vld [vmem:[#allocation10 + $0x3d8] sm:$0xff] }
 0x232   : > { %8226 = vst [vmem:[#allocation78_spill] sm:$0xff] %v6450_v22  ;;  %2359 = vmatpush.msrb.mxu2 %v2332_v3  ;;  %v2320_v3 = vld [vmem:[#allocation10 + $0x378] sm:$0xff] }
 0x233   : > { %2078 = vmatmul.f32.gmra.mxu3 %v5613_v62  ;;  %2191 = vmatmul.f32.gmra.mxu1 %v5613_v62 }
 0x234   : > { %2503 = vmatmul.f32.gmra.mxu0 %v5699_v61  ;;  %1909 = vmatmul.f32.gmra.mxu2 %v6163_v49 }
 0x236   : > { %v1675_v35 = vpop.f32.mrf.mxu3 }
 0x237   : > { %v6445_v11 = vadd.f32 %v2014_v54, %v1675_v35  ;;  %v6448_v24 = vpop.f32.mrf.mxu2 }
 0x238   : > { %8225 = vst [vmem:[#allocation77_spill] sm:$0xff] %v6448_v24 }
 0x239   : > { %8224 = vst [vmem:[#allocation76_spill] sm:$0xff] %v6445_v11  ;;  %v2023_v19 = vpop.f32.mrf.mxu0  ;;  %v6463_v48 = vpop.f32.mrf.mxu1 }
 0x23a   : > { %8229 = vst [vmem:[#allocation81_spill] sm:$0xff] %v6463_v48 }
 0x23b   : > { %2081 = vmatmul.f32.gmra.mxu3 %v5626_v20  ;;  %2194 = vmatmul.f32.gmra.mxu1 %v5626_v20 }
 0x23c   : > { %2506 = vmatmul.f32.gmra.mxu0 %v5714_v5  ;;  %1912 = vmatmul.f32.gmra.mxu2 %v6211_v23 }
 0x23e   : > { %v1678_v47 = vpop.f32.mrf.mxu3 }
 0x23f   : > { %v6455_v54 = vadd.f32 %v2017_v55, %v1678_v47  ;;  %v6458_v11 = vpop.f32.mrf.mxu2  ;;  %v2329_v47 = vld [vmem:[#allocation10 + $0x3c0] sm:$0xff] }
 0x240   : > { %8228 = vst [vmem:[#allocation80_spill] sm:$0xff] %v6458_v11  ;;  %v2334_v11 = vld [vmem:[#allocation10 + $0x3e8] sm:$0xff]  ;;  %2360 = vmatpush.msrb.mxu2 %v2329_v47 }
 0x241   : > { %8227 = vst [vmem:[#allocation79_spill] sm:$0xff] %v6455_v54  ;;  %v2026_v35 = vpop.f32.mrf.mxu0  ;;  %2585 = vmatpush.msra.mxu3 %v2334_v11  ;;  %v2314_v11 = vld [vmem:[#allocation10 + $0x348] sm:$0xff] }
 0x242   : > { %2361 = vmatpush.msrb.mxu2 %v2326_v1 }
 0x243   : > { %2084 = vmatmul.f32.gmra.mxu3 %v5638_v38  ;;  %2197 = vmatmul.f32.gmra.mxu1 %v5638_v38 }
 0x244   : > { %2509 = vmatmul.f32.gmra.mxu0 %v5732_v37  ;;  %1915 = vmatmul.f32.gmra.mxu2 %v6253_v63 }
 0x246   : > { %v1681_v24 = vpop.f32.mrf.mxu3 }
 0x247   : > { %v6465_v22 = vadd.f32 %v2020_v8, %v1681_v24  ;;  %v6468_v54 = vpop.f32.mrf.mxu2  ;;  %v2323_v24 = vld [vmem:[#allocation10 + $0x390] sm:$0xff] }
 0x248   : > { %8231 = vst [vmem:[#allocation83_spill] sm:$0xff] %v6468_v54  ;;  %2362 = vmatpush.msrb.mxu2 %v2323_v24 }
 0x249   : > { %8230 = vst [vmem:[#allocation82_spill] sm:$0xff] %v6465_v22  ;;  %v2029_v55 = vpop.f32.mrf.mxu0  ;;  %v6473_v22 = vpop.f32.mrf.mxu1 }
 0x24a   : > { %8232 = vst [vmem:[#allocation84_spill] sm:$0xff] %v6473_v22  ;;  %2363 = vmatpush.msrb.mxu2 %v2320_v3  ;;  %v2305_v3 = vld [vmem:[#allocation10 + $0x300] sm:$0xff]  ;;  %v8282_v22 = vld [vmem:[#allocation24_spill] sm:$0xff] }
 0x24b   : > { %2087 = vmatmul.f32.gmra.mxu3 %v5649_v0  ;;  %2200 = vmatmul.f32.gmra.mxu1 %v5649_v0 }
 0x24c   : > { %2512 = vmatmul.f32.gmra.mxu0 %v5744_v9  ;;  %1918 = vmatmul.f32.gmra.mxu2 %v6288_v14 }
 0x24d   : > { %2364 = vmatpush.msrb.mxu2 %v2317_v33  ;;  %v2331_v33 = vld [vmem:[#allocation10 + $0x3d0] sm:$0xff] }
 0x24e   : > { %v1684_v8 = vpop.f32.mrf.mxu3  ;;  %2586 = vmatpush.msra.mxu3 %v2331_v33 }
 0x24f   : > { %v6475_v48 = vadd.f32 %v2023_v19, %v1684_v8  ;;  %v6478_v15 = vpop.f32.mrf.mxu2  ;;  %2365 = vmatpush.msrb.mxu2 %v2314_v11  ;;  %v2311_v19 = vld [vmem:[#allocation10 + $0x330] sm:$0xff]  ;;  %v2308_v8 = vld [vmem:[#allocation10 + $0x318] sm:$0xff] }
 0x250   : > { %8234 = vst [vmem:[#allocation86_spill] sm:$0xff] %v6478_v15 }
 0x251   : > { %8233 = vst [vmem:[#allocation85_spill] sm:$0xff] %v6475_v48  ;;  %v2032_v54 = vpop.f32.mrf.mxu0  ;;  %2366 = vmatpush.msrb.mxu2 %v2311_v19  ;;  %v6486_v24 = vpop.f32.mrf.mxu1 }
 0x252   : > { %8236 = vst [vmem:[#allocation88_spill] sm:$0xff] %v6486_v24 }
 0x253   : > { %2090 = vmatmul.f32.gmra.mxu3 %v5665_v27  ;;  %2203 = vmatmul.f32.gmra.mxu1 %v5665_v27 }
 0x254   : > { %2515 = vmatmul.f32.gmra.mxu0 %v5768_v59  ;;  %1921 = vmatmul.f32.gmra.mxu2 %v6323_v29 }
 0x255   : > { %2367 = vmatpush.msrb.mxu2 %v2308_v8 }
 0x256   : > { %v1687_v1 = vpop.f32.mrf.mxu3 }
 0x257   : > { %v6483_v47 = vadd.f32 %v2026_v35, %v1687_v1  ;;  %v6488_v15 = vpop.f32.mrf.mxu2  ;;  %2368 = vmatpush.msrb.mxu2 %v2305_v3  ;;  %v2328_v3 = vld [vmem:[#allocation10 + $0x3b8] sm:$0xff] }
 0x258   : > { %8237 = vst [vmem:[#allocation89_spill] sm:$0xff] %v6488_v15  ;;  %2587 = vmatpush.msra.mxu3 %v2328_v3 }
 0x259   : > { %8235 = vst [vmem:[#allocation87_spill] sm:$0xff] %v6483_v47  ;;  %v2035_v48 = vpop.f32.mrf.mxu0  ;;  %v6498_v19 = vpop.f32.mrf.mxu1 }
 0x25a   : > { %8240 = vst [vmem:[#allocation92_spill] sm:$0xff] %v6498_v19 }
 0x25b   : > { %2093 = vmatmul.f32.gmra.mxu3 %v5677_v46  ;;  %2206 = vmatmul.f32.gmra.mxu1 %v5677_v46 }
 0x25c   : > { %2518 = vmatmul.f32.gmra.mxu0 %v5782_v21  ;;  %1924 = vmatmul.f32.gmra.mxu2 %v6344_v12 }
 0x25e   : > { %v1690_v35 = vpop.f32.mrf.mxu3 }
 0x25f   : > { %v6493_v11 = vadd.f32 %v2029_v55, %v1690_v35  ;;  %v6496_v1 = vpop.f32.mrf.mxu2 }
 0x260   : > { %8239 = vst [vmem:[#allocation91_spill] sm:$0xff] %v6496_v1 }
 0x261   : > { %8238 = vst [vmem:[#allocation90_spill] sm:$0xff] %v6493_v11  ;;  %v2038_v8 = vpop.f32.mrf.mxu0  ;;  %v6511_v33 = vpop.f32.mrf.mxu1 }
 0x262   : > { %8243 = vst [vmem:[#allocation95_spill] sm:$0xff] %v6511_v33 }
 0x263   : > { %2096 = vmatmul.f32.gmra.mxu3 %v5699_v61  ;;  %2209 = vmatmul.f32.gmra.mxu1 %v5699_v61 }
 0x264   : > { %2521 = vmatmul.f32.gmra.mxu0 %v5797_v53  ;;  %1927 = vmatmul.f32.gmra.mxu2 %v6367_v18 }
 0x266   : > { %v1693_v47 = vpop.f32.mrf.mxu3 }
 0x267   : > { %v6503_v15 = vadd.f32 %v2032_v54, %v1693_v47  ;;  %v6506_v55 = vpop.f32.mrf.mxu2 }
 0x268   : > { %8242 = vst [vmem:[#allocation94_spill] sm:$0xff] %v6506_v55 }
 0x269   : > { %8241 = vst [vmem:[#allocation93_spill] sm:$0xff] %v6503_v15  ;;  %v2041_v35 = vpop.f32.mrf.mxu0  ;;  %v6521_v55 = vpop.f32.mrf.mxu1 }
 0x26a   : > { %8246 = vst [vmem:[#allocation98_spill] sm:$0xff] %v6521_v55 }
 0x26b   : > { %2099 = vmatmul.f32.gmra.mxu3 %v5714_v5  ;;  %2212 = vmatmul.f32.gmra.mxu1 %v5714_v5 }
 0x26c   : > { %2524 = vmatmul.f32.gmra.mxu0 %v5839_v40  ;;  %1930 = vmatmul.f32.gmra.mxu2 %v6380_v36 }
 0x26e   : > { %v1696_v11 = vpop.f32.mrf.mxu3 }
 0x26f   : > { %v6513_v1 = vadd.f32 %v2035_v48, %v1696_v11  ;;  %v6516_v54 = vpop.f32.mrf.mxu2  ;;  %v2325_v11 = vld [vmem:[#allocation10 + $0x3a0] sm:$0xff] }
 0x270   : > { %8245 = vst [vmem:[#allocation97_spill] sm:$0xff] %v6516_v54  ;;  %2588 = vmatpush.msra.mxu3 %v2325_v11  ;;  %v2322_v11 = vld [vmem:[#allocation10 + $0x388] sm:$0xff] }
 0x271   : > { %8244 = vst [vmem:[#allocation96_spill] sm:$0xff] %v6513_v1  ;;  %v2044_v15 = vpop.f32.mrf.mxu0 }
 0x272   : > { %2589 = vmatpush.msra.mxu3 %v2322_v11 }
 0x273   : > { %2102 = vmatmul.f32.gmra.mxu3 %v5732_v37  ;;  %2215 = vmatmul.f32.gmra.mxu1 %v5732_v37 }
 0x274   : > { %2527 = vmatmul.f32.gmra.mxu0 %v5890_v43  ;;  %2369 = vmatmul.f32.vlgmr.msrb.gmra.mxu2 %v5602_v42 }
 0x276   : > { %v1699_v47 = vpop.f32.mrf.mxu3 }
 0x277   : > { %v6523_v3 = vadd.f32 %v2038_v8, %v1699_v47  ;;  %v6526_v48 = vpop.f32.mrf.mxu2  ;;  %v6534_v8 = vpop.f32.mrf.mxu1 }
 0x278   : > { %8248 = vst [vmem:[#allocation100_spill] sm:$0xff] %v6526_v48 }
 0x279   : > { %8247 = vst [vmem:[#allocation99_spill] sm:$0xff] %v6523_v3  ;;  %v2483_v47 = vpop.f32.mrf.mxu0 }
 0x27a   : > { %8250 = vst [vmem:[#allocation102_spill] sm:$0xff] %v6534_v8 }
 0x27b   : > { %2105 = vmatmul.f32.gmra.mxu3 %v5744_v9  ;;  %2218 = vmatmul.f32.gmra.mxu1 %v5744_v9 }
 0x27c   : > { %2530 = vmatmul.f32.gmra.mxu0 %v5927_v28  ;;  %2372 = vmatmul.f32.gmra.mxu2 %v5613_v62 }
 0x27e   : > { %v1702_v54 = vpop.f32.mrf.mxu3 }
 0x27f   : > { %v6531_v1 = vadd.f32 %v2041_v35, %v1702_v54  ;;  %v6536_v3 = vpop.f32.mrf.mxu2  ;;  %v6546_v54 = vpop.f32.mrf.mxu1 }
 0x280   : > { %8251 = vst [vmem:[#allocation103_spill] sm:$0xff] %v6536_v3 }
 0x281   : > { %8249 = vst [vmem:[#allocation101_spill] sm:$0xff] %v6531_v1  ;;  %v2486_v3 = vpop.f32.mrf.mxu0 }
 0x282   : > { %8254 = vst [vmem:[#allocation106_spill] sm:$0xff] %v6546_v54 }
 0x283   : > { %2108 = vmatmul.f32.gmra.mxu3 %v5768_v59  ;;  %2221 = vmatmul.f32.gmra.mxu1 %v5768_v59 }
 0x284   : > { %2533 = vmatmul.f32.gmra.mxu0 %v5965_v7  ;;  %2375 = vmatmul.f32.gmra.mxu2 %v5626_v20 }
 0x286   : > { %v1705_v48 = vpop.f32.mrf.mxu3 }
 0x287   : > { %v6541_v55 = vadd.f32 %v2044_v15, %v1705_v48  ;;  %v6544_v35 = vpop.f32.mrf.mxu2 }
 0x288   : > { %8253 = vst [vmem:[#allocation105_spill] sm:$0xff] %v6544_v35  ;;  %v6560_v35 = vpop.f32.mrf.mxu1 }
 0x289   : > { %8252 = vst [vmem:[#allocation104_spill] sm:$0xff] %v6541_v55  ;;  %v2489_v55 = vpop.f32.mrf.mxu0 }
 0x28a   : > { %8257 = vst [vmem:[#allocation109_spill] sm:$0xff] %v6560_v35 }
 0x28b   : > { %2111 = vmatmul.f32.gmra.mxu3 %v5782_v21  ;;  %2224 = vmatmul.f32.gmra.mxu1 %v5782_v21 }
 0x28c   : > { %2536 = vmatmul.f32.gmra.mxu0 %v6001_v26  ;;  %2378 = vmatmul.f32.gmra.mxu2 %v5638_v38 }
 0x28e   : > { %v2064_v1 = vpop.f32.mrf.mxu3 }
 0x28f   : > { %v2065_v8 = vadd.f32 %v2064_v1, %v5821_v57  ;;  %v6555_v48 = vpop.f32.mrf.mxu2 }
 0x290   : > { %8256 = vst [vmem:[#allocation108_spill] sm:$0xff] %v6555_v48  ;;  %v6571_v48 = vpop.f32.mrf.mxu1 }
 0x291   : > { %v6553_v15 = vadd.f32 %v2483_v47, %v2065_v8  ;;  %v2319_v8 = vld [vmem:[#allocation10 + $0x370] sm:$0xff]  ;;  %8259 = vst [vmem:[#allocation111_spill] sm:$0xff] %v6571_v48 }
 0x292   : > { %2590 = vmatpush.msra.mxu3 %v2319_v8 }
 0x293   : > { %8255 = vst [vmem:[#allocation107_spill] sm:$0xff] %v6553_v15  ;;  %2114 = vmatmul.f32.gmra.mxu3 %v5797_v53  ;;  %2227 = vmatmul.f32.gmra.mxu1 %v5797_v53 }
 0x294   : > { %2539 = vmatmul.f32.gmra.mxu0 %v6039_v25  ;;  %2381 = vmatmul.f32.gmra.mxu2 %v5649_v0 }
 0x296   : > { %v2067_v54 = vpop.f32.mrf.mxu3 }
 0x297   : > { %v2068_v11 = vadd.f32 %v2067_v54, %v5852_v60  ;;  %v6566_v1 = vpop.f32.mrf.mxu2  ;;  %v2492_v60 = vpop.f32.mrf.mxu0 }
 0x298   : > { %8258 = vst [vmem:[#allocation110_spill] sm:$0xff] %v6566_v1  ;;  %v6584_v1 = vpop.f32.mrf.mxu1 }
 0x299   : > { %v6564_v57 = vadd.f32 %v2486_v3, %v2068_v11  ;;  %8261 = vst [vmem:[#allocation113_spill] sm:$0xff] %v6584_v1 }
 0x29b   : > { %2117 = vmatmul.f32.gmra.mxu3 %v5839_v40  ;;  %2230 = vmatmul.f32.gmra.mxu1 %v5839_v40 }
 0x29c   : > { %2542 = vmatmul.f32.gmra.mxu0 %v6073_v39  ;;  %2384 = vmatmul.f32.gmra.mxu2 %v5665_v27 }
 0x29e   : > { %v2070_v47 = vpop.f32.mrf.mxu3 }
 0x29f   : > { %v2071_v15 = vadd.f32 %v2070_v47, %v5892_v30  ;;  %v6577_v54 = vpop.f32.mrf.mxu2  ;;  %v2495_v47 = vpop.f32.mrf.mxu0 }
 0x2a0   : > { %8260 = vst [vmem:[#allocation112_spill] sm:$0xff] %v6577_v54 }
 0x2a1   : > { %v6575_v3 = vadd.f32 %v2489_v55, %v2071_v15  ;;  %v2316_v15 = vld [vmem:[#allocation10 + $0x358] sm:$0xff] }
 0x2a2   : > { %2591 = vmatpush.msra.mxu3 %v2316_v15 }
 0x2a3   : > { %2120 = vmatmul.f32.gmra.mxu3 %v5890_v43  ;;  %2233 = vmatmul.f32.gmra.mxu1 %v5890_v43 }
 0x2a4   : > { %2545 = vmatmul.f32.gmra.mxu0 %v6115_v56  ;;  %2387 = vmatmul.f32.gmra.mxu2 %v5677_v46 }
 0x2a6   : > { %v2073_v11 = vpop.f32.mrf.mxu3 }
 0x2a7   : > { %v2074_v8 = vadd.f32 %v2073_v11, %v5939_v10  ;;  %v6588_v55 = vpop.f32.mrf.mxu2 }
 0x2a8   : > { %8262 = vst [vmem:[#allocation114_spill] sm:$0xff] %v6588_v55  ;;  %v2498_v55 = vpop.f32.mrf.mxu0 }
 0x2a9   : > { %v6586_v30 = vadd.f32 %v2492_v60, %v2074_v8  ;;  %v6599_v8 = vpop.f32.mrf.mxu1 }
 0x2aa   : > { %8264 = vst [vmem:[#allocation116_spill] sm:$0xff] %v6599_v8 }
 0x2ab   : > { %2123 = vmatmul.f32.gmra.mxu3 %v5927_v28  ;;  %2236 = vmatmul.f32.gmra.mxu1 %v5927_v28 }
 0x2ac   : > { %2548 = vmatmul.f32.gmra.mxu0 %v6163_v49  ;;  %2390 = vmatmul.f32.gmra.mxu2 %v5699_v61 }
 0x2ae   : > { %v2076_v54 = vpop.f32.mrf.mxu3 }
 0x2af   : > { %v2077_v10 = vadd.f32 %v2076_v54, %v5984_v16  ;;  %v6597_v60 = vpop.f32.mrf.mxu2 }
 0x2b0   : > { %8263 = vst [vmem:[#allocation115_spill] sm:$0xff] %v6597_v60  ;;  %v2501_v60 = vpop.f32.mrf.mxu0 }
 0x2b1   : > { %v6595_v11 = vadd.f32 %v2495_v47, %v2077_v10  ;;  %v2313_v47 = vld [vmem:[#allocation10 + $0x340] sm:$0xff]  ;;  %v6613_v10 = vpop.f32.mrf.mxu1 }
 0x2b2   : > { %2592 = vmatpush.msra.mxu3 %v2313_v47  ;;  %8266 = vst [vmem:[#allocation118_spill] sm:$0xff] %v6613_v10 }
 0x2b3   : > { %2126 = vmatmul.f32.gmra.mxu3 %v5965_v7  ;;  %2239 = vmatmul.f32.gmra.mxu1 %v5965_v7 }
 0x2b4   : > { %2551 = vmatmul.f32.gmra.mxu0 %v6211_v23  ;;  %2393 = vmatmul.f32.gmra.mxu2 %v5714_v5 }
 0x2b6   : > { %v2079_v1 = vpop.f32.mrf.mxu3 }
 0x2b7   : > { %v2080_v15 = vadd.f32 %v2079_v1, %v6027_v45  ;;  %v6608_v54 = vpop.f32.mrf.mxu2 }
 0x2b8   : > { %8265 = vst [vmem:[#allocation117_spill] sm:$0xff] %v6608_v54  ;;  %v8269_v54 = vld [vmem:[#allocation45_spill] sm:$0xff] }
 0x2b9   : > { %v6606_v16 = vadd.f32 %v2498_v55, %v2080_v15  ;;  %v6624_v47 = vpop.f32.mrf.mxu1 }
 0x2ba   : > { %8268 = vst [vmem:[#allocation120_spill] sm:$0xff] %v6624_v47 }
 0x2bb   : > { %2129 = vmatmul.f32.gmra.mxu3 %v6001_v26  ;;  %2242 = vmatmul.f32.gmra.mxu1 %v6001_v26 }
 0x2bc   : > { %2554 = vmatmul.f32.gmra.mxu0 %v6253_v63  ;;  %2396 = vmatmul.f32.gmra.mxu2 %v5732_v37 }
 0x2be   : > { %v2082_v8 = vpop.f32.mrf.mxu3 }
 0x2bf   : > { %v2083_v45 = vadd.f32 %v2082_v8, %v6076_v34  ;;  %v6619_v55 = vpop.f32.mrf.mxu2  ;;  %v2504_v34 = vpop.f32.mrf.mxu0 }
 0x2c0   : > { %8267 = vst [vmem:[#allocation119_spill] sm:$0xff] %v6619_v55 }
 0x2c1   : > { %v6617_v1 = vadd.f32 %v2501_v60, %v2083_v45  ;;  %v2310_v45 = vld [vmem:[#allocation10 + $0x328] sm:$0xff] }
 0x2c2   : > { %2593 = vmatpush.msra.mxu3 %v2310_v45 }
 0x2c3   : > { %2132 = vmatmul.f32.gmra.mxu3 %v6039_v25  ;;  %2245 = vmatmul.f32.gmra.mxu1 %v6039_v25 }
 0x2c4   : > { %2557 = vmatmul.f32.gmra.mxu0 %v6288_v14  ;;  %2399 = vmatmul.f32.gmra.mxu2 %v5744_v9 }
 0x2c6   : > { %v2085_v15 = vpop.f32.mrf.mxu3 }
 0x2c7   : > { %v2086_v48 = vadd.f32 %v2085_v15, %v8269_v54  ;;  %v6630_v60 = vpop.f32.mrf.mxu2  ;;  %v6638_v54 = vpop.f32.mrf.mxu1 }
 0x2c8   : > { %8270 = vst [vmem:[#allocation45_spill] sm:$0xff] %v6630_v60  ;;  %v2307_v60 = vld [vmem:[#allocation10 + $0x310] sm:$0xff] }
 0x2c9   : > { %v6628_v8 = vadd.f32 %v2504_v34, %v2086_v48  ;;  %8271 = vst [vmem:[#allocation121_spill] sm:$0xff] %v6638_v54  ;;  %2594 = vmatpush.msra.mxu3 %v2307_v60  ;;  %v8283_v54 = vld [vmem:[#allocation19_spill] sm:$0xff] }
 0x2ca   : > { %v1952_v47 = vadd.f32 %v8283_v54, %v8282_v22 }
 0x2cb   : > { %2135 = vmatmul.f32.gmra.mxu3 %v6073_v39  ;;  %2248 = vmatmul.f32.gmra.mxu1 %v6073_v39 }
 0x2cc   : > { %2560 = vmatmul.f32.gmra.mxu0 %v6323_v29  ;;  %2402 = vmatmul.f32.gmra.mxu2 %v5768_v59 }
 0x2ce   : > { %v6635_v55 = vpop.f32.mrf.mxu3 }
 0x2cf   : > { %v6640_v15 = vpop.f32.mrf.mxu2  ;;  %v6650_v45 = vpop.f32.mrf.mxu1 }
 0x2d0   : > { %8272 = vst [vmem:[#allocation122_spill] sm:$0xff] %v6640_v15 }
 0x2d1   : > { %8274 = vst [vmem:[#allocation124_spill] sm:$0xff] %v6650_v45  ;;  %v6690_v45 = vpop.f32.mrf.mxu0 }
 0x2d3   : > { %2138 = vmatmul.f32.gmra.mxu3 %v6115_v56  ;;  %2251 = vmatmul.f32.gmra.mxu1 %v6115_v56 }
 0x2d4   : > { %2563 = vmatmul.f32.gmra.mxu0 %v6344_v12  ;;  %2405 = vmatmul.f32.gmra.mxu2 %v5782_v21 }
 0x2d6   : > { %v6645_v48 = vpop.f32.mrf.mxu3 }
 0x2d7   : > { %v6648_v34 = vpop.f32.mrf.mxu2 }
 0x2d8   : > { %8273 = vst [vmem:[#allocation123_spill] sm:$0xff] %v6648_v34  ;;  %v6663_v34 = vpop.f32.mrf.mxu1 }
 0x2d9   : > { %8276 = vst [vmem:[#allocation126_spill] sm:$0xff] %v6663_v34 }
 0x2db   : > { %2141 = vmatmul.f32.gmra.mxu3 %v6163_v49  ;;  %2254 = vmatmul.f32.gmra.mxu1 %v6163_v49 }
 0x2dc   : > { %2566 = vmatmul.f32.gmra.mxu0 %v6367_v18  ;;  %2408 = vmatmul.f32.gmra.mxu2 %v5797_v53 }
 0x2de   : > { %v6655_v15 = vpop.f32.mrf.mxu3 }
 0x2df   : > { %v6658_v35 = vpop.f32.mrf.mxu2 }
 0x2e0   : > { %8275 = vst [vmem:[#allocation125_spill] sm:$0xff] %v6658_v35  ;;  %v6675_v35 = vpop.f32.mrf.mxu1 }
 0x2e1   : > { %8278 = vst [vmem:[#allocation128_spill] sm:$0xff] %v6675_v35  ;;  %v2788_v35 = vlaneseq }
 0x2e3   : > { %2144 = vmatmul.f32.gmra.mxu3 %v6211_v23  ;;  %2257 = vmatmul.f32.gmra.mxu1 %v6211_v23 }
 0x2e4   : > { %2569 = vmatmul.f32.gmra.mxu0 %v6380_v36  ;;  %2411 = vmatmul.f32.gmra.mxu2 %v5839_v40  ;;  %v8285_v40 = vld [vmem:[#allocation20_spill] sm:$0xff] }
 0x2e6   : > { %v6665_v33 = vpop.f32.mrf.mxu3 }
 0x2e7   : > { %v6668_v10 = vpop.f32.mrf.mxu2 }
 0x2e8   : > { %8277 = vst [vmem:[#allocation127_spill] sm:$0xff] %v6668_v10  ;;  %v6686_v34 = vpop.f32.mrf.mxu1 }
 0x2e9   : > { %8280 = vst [vmem:[#allocation130_spill] sm:$0xff] %v6686_v34 }
 0x2eb   : > { %2147 = vmatmul.f32.gmra.mxu3 %v6253_v63  ;;  %2260 = vmatmul.f32.gmra.mxu1 %v6253_v63 }
 0x2ec   : > { %2572 = vmatmul.f32.gmra.mxu0 %v8209_v50  ;;  %2414 = vmatmul.f32.gmra.mxu2 %v5890_v43  ;;  %v6697_v43 = vshrl.u32 %v2788_v35, 7 }
 0x2ee   : > { %v6673_v60 = vpop.f32.mrf.mxu3  ;;  %vm3237_vm0 = vcmp.lt.s32.totalorder %v6697_v43, 1  ;;  %v2791_v35 = vadd.s32 16, %v6697_v43  ;;  %vm3302_vm12 = vcmp.lt.s32.totalorder %v6697_v43, 7 }
 0x2ef   : > { %v6678_v19 = vpop.f32.mrf.mxu2 }
 0x2f0   : > { %8279 = vst [vmem:[#allocation129_spill] sm:$0xff] %v6678_v19  ;;  %v6703_v44 = vpop.f32.mrf.mxu1 }
 0x2f1   : > { %8287 = vst [vmem:[#allocation19_spill] sm:$0xff] %v6703_v44 }
 0x2f3   : > { %2150 = vmatmul.f32.gmra.mxu3 %v6288_v14  ;;  %2263 = vmatmul.f32.gmra.mxu1 %v6288_v14 }
 0x2f4   : > { %2575 = vmatmul.f32.gmra.mxu0 %v8209_v50  ;;  %2417 = vmatmul.f32.gmra.mxu2 %v5927_v28  ;;  %v8284_v28 = vld [vmem:[#allocation26_spill] sm:$0xff] }
 0x2f5   : > { %v1955_v34 = vadd.f32 %v8285_v40, %v8284_v28  ;;  %v6712_v40 = vpop.f32.mrf.mxu0 }
 0x2f6   : > { %v6683_v10 = vpop.f32.mrf.mxu3 }
 0x2f7   : > { %v2370_v24 = vpop.f32.mrf.mxu2 }
 0x2f8   : > { %v6701_v53 = vadd.f32 %v2370_v24, %v1952_v47  ;;  %v8290_v24 = vld [vmem:[#allocation29_spill] sm:$0xff]  ;;  %v8291_v47 = vld [vmem:[#allocation22_spill] sm:$0xff] }
 0x2fa   : > { %8286 = vst [vmem:[#allocation24_spill] sm:$0xff] %v6701_v53  ;;  %v8107_v22 = vrot.slane %v6701_v53, 7 }
 0x2fb   : > { %2153 = vmatmul.f32.gmra.mxu3 %v6323_v29  ;;  %2266 = vmatmul.f32.gmra.mxu1 %v6323_v29 }
 0x2fc   : > { %2420 = vmatmul.f32.gmra.mxu2 %v5965_v7 }
 0x2fe   : > { %v6692_v19 = vpop.f32.mrf.mxu3 }
 0x2ff   : > { %8281 = vst [vmem:[#allocation131_spill] sm:$0xff] %v6692_v19  ;;  %v2373_v6 = vpop.f32.mrf.mxu2 }
 0x300   : > { %v2695_v21 = vadd.f32 %v2373_v6, %v1955_v34  ;;  %v1958_v34 = vadd.f32 %v8291_v47, %v8290_v24  ;;  %v2793_v24 = vadd.s32 32, %v6697_v43 }
 0x302   : > { %v3206_v54 = vrot.slane %v2695_v21, 7  ;;  %v2839_v21 = vand.u32 15, %v2791_v35 }
 0x303   : > { %2156 = vmatmul.f32.gmra.mxu3 %v6344_v12  ;;  %2269 = vmatmul.f32.gmra.mxu1 %v6344_v12 }
 0x304   : > { %v3268_v28 = vsel %vm3237_vm0, %v8107_v22, %v3206_v54  ;;  %2423 = vmatmul.f32.gmra.mxu2 %v6001_v26  ;;  %vm3337_vm1 = vcmp.eq.s32.totalorder %v2839_v21, 0  ;;  %v6732_v26 = vpop.f32.mrf.mxu0  ;;  %v2853_v21 = vand.u32 15, %v2793_v24 }
 0x305   : > { %v6720_v6 = vadd.f32 %v3268_v28, %v6564_v57  ;;  %v8292_v57 = vld [vmem:[#allocation32_spill] sm:$0xff]  ;;  %v8293_v28 = vld [vmem:[#allocation25_spill] sm:$0xff] }
 0x306   : > { %v6710_v7 = vpop.f32.mrf.mxu3  ;;  %vm3339_vm2 = vcmp.eq.s32.totalorder %v2853_v21, 0 }
 0x307   : > { %8288 = vst [vmem:[#allocation26_spill] sm:$0xff] %v6710_v7  ;;  %v2376_v44 = vpop.f32.mrf.mxu2 }
 0x308   : > { %8289 = vst [vmem:[#allocation20_spill] sm:$0xff] %v6720_v6  ;;  %v2698_v7 = vadd.f32 %v2376_v44, %v1958_v34  ;;  %v1961_v6 = vadd.f32 %v8293_v28, %v8292_v57  ;;  %v8294_v34 = vld [vmem:[#allocation35_spill] sm:$0xff] }
 0x30a   : > { %v3207_v19 = vrot.slane %v2698_v7, 7 }
 0x30b   : > { %2595 = vmatmul.f32.vlgmr.msra.gmra.mxu3 %v5602_v42 }
 0x30c   : > { %v3267_v22 = vsel %vm3237_vm0, %v3206_v54, %v3207_v19  ;;  %2426 = vmatmul.f32.gmra.mxu2 %v6039_v25 }
 0x30d   : > { %v3433_v53 = vsel %vm3337_vm1, 0.0, %v3267_v22 }
 0x30e   : > { %v6725_v58 = vpop.f32.mrf.mxu3  ;;  %v6735_v35 = vadd.f32 %v3433_v53, %v6575_v3  ;;  %v8295_v53 = vld [vmem:[#allocation28_spill] sm:$0xff] }
 0x30f   : > { %v2379_v42 = vpop.f32.mrf.mxu2  ;;  %v1964_v3 = vadd.f32 %v8295_v53, %v8294_v34 }
 0x310   : > { %v2701_v7 = vadd.f32 %v2379_v42, %v1961_v6 }
 0x312   : > { %v3208_v44 = vrot.slane %v2701_v7, 7  ;;  %v8296_v7 = vld [vmem:[#allocation38_spill] sm:$0xff] }
 0x313   : > { %2598 = vmatmul.f32.gmra.mxu3 %v5613_v62  ;;  %v6749_v62 = vpop.f32.mrf.mxu0 }
 0x314   : > { %v3266_v22 = vsel %vm3237_vm0, %v3207_v19, %v3208_v44  ;;  %2429 = vmatmul.f32.gmra.mxu2 %v6073_v39 }
 0x315   : > { %v6745_v54 = vadd.f32 %v3266_v22, %v6586_v30  ;;  %v8297_v22 = vld [vmem:[#allocation30_spill] sm:$0xff] }
 0x316   : > { %v6739_v47 = vpop.f32.mrf.mxu3  ;;  %v1967_v34 = vadd.f32 %v8297_v22, %v8296_v7 }
 0x317   : > { %v2382_v57 = vpop.f32.mrf.mxu2 }
 0x318   : > { %v2704_v6 = vadd.f32 %v2382_v57, %v1964_v3  ;;  %v2795_v57 = vadd.s32 48, %v6697_v43 }
 0x31a   : > { %v3209_v28 = vrot.slane %v2704_v6, 7 }
 0x31b   : > { %2601 = vmatmul.f32.gmra.mxu3 %v5626_v20  ;;  %v6763_v3 = vpop.f32.mrf.mxu0 }
 0x31c   : > { %v3265_v19 = vsel %vm3237_vm0, %v3208_v44, %v3209_v28  ;;  %2432 = vmatmul.f32.gmra.mxu2 %v6115_v56 }
 0x31d   : > { %v3435_v30 = vsel %vm3339_vm2, 0.0, %v3265_v19 }
 0x31e   : > { %v6752_v42 = vpop.f32.mrf.mxu3  ;;  %v6760_v24 = vadd.f32 %v3435_v30, %v6595_v11  ;;  %v8300_v11 = vld [vmem:[#allocation41_spill] sm:$0xff] }
 0x31f   : > { %v2385_v53 = vpop.f32.mrf.mxu2  ;;  %v8301_v30 = vld [vmem:[#allocation33_spill] sm:$0xff] }
 0x320   : > { %8298 = vst [vmem:[#allocation29_spill] sm:$0xff] %v6760_v24  ;;  %v2707_v20 = vadd.f32 %v2385_v53, %v1967_v34  ;;  %v1970_v7 = vadd.f32 %v8301_v30, %v8300_v11 }
 0x322   : > { %v3210_v21 = vrot.slane %v2707_v20, 7 }
 0x323   : > { %2604 = vmatmul.f32.gmra.mxu3 %v5638_v38  ;;  %v2867_v38 = vand.u32 15, %v2795_v57  ;;  %v6779_v24 = vpop.f32.mrf.mxu0 }
 0x324   : > { %v3264_v44 = vsel %vm3237_vm0, %v3209_v28, %v3210_v21  ;;  %2435 = vmatmul.f32.gmra.mxu2 %v6163_v49 }
 0x325   : > { %v6772_v19 = vadd.f32 %v3264_v44, %v6606_v16  ;;  %vm3341_vm3 = vcmp.eq.s32.totalorder %v2867_v38, 0  ;;  %v8302_v44 = vld [vmem:[#allocation43_spill] sm:$0xff]  ;;  %v2797_v38 = vadd.s32 64, %v6697_v43 }
 0x326   : > { %v6766_v6 = vpop.f32.mrf.mxu3 }
 0x327   : > { %8299 = vst [vmem:[#allocation22_spill] sm:$0xff] %v6772_v19  ;;  %v2388_v22 = vpop.f32.mrf.mxu2  ;;  %v8303_v19 = vld [vmem:[#allocation36_spill] sm:$0xff] }
 0x328   : > { %v2710_v34 = vadd.f32 %v2388_v22, %v1970_v7  ;;  %v1973_v11 = vadd.f32 %v8303_v19, %v8302_v44  ;;  %v8306_v19 = vld [vmem:[#allocation46_spill] sm:$0xff] }
 0x32a   : > { %v3211_v53 = vrot.slane %v2710_v34, 7 }
 0x32b   : > { %2607 = vmatmul.f32.gmra.mxu3 %v5649_v0 }
 0x32c   : > { %v3263_v28 = vsel %vm3237_vm0, %v3210_v21, %v3211_v53  ;;  %2438 = vmatmul.f32.gmra.mxu2 %v6211_v23 }
 0x32d   : > { %v3437_v16 = vsel %vm3341_vm3, 0.0, %v3263_v28 }
 0x32e   : > { %v6777_v20 = vpop.f32.mrf.mxu3  ;;  %v6787_v57 = vadd.f32 %v3437_v16, %v6617_v1  ;;  %v8307_v1 = vld [vmem:[#allocation40_spill] sm:$0xff]  ;;  %v6801_v16 = vpop.f32.mrf.mxu0 }
 0x32f   : > { %v2391_v0 = vpop.f32.mrf.mxu2  ;;  %v1976_v28 = vadd.f32 %v8307_v1, %v8306_v19  ;;  %v8310_v1 = vld [vmem:[#allocation42_spill] sm:$0xff] }
 0x330   : > { %8304 = vst [vmem:[#allocation32_spill] sm:$0xff] %v6787_v57  ;;  %v2713_v30 = vadd.f32 %v2391_v0, %v1973_v11  ;;  %v8308_v11 = vld [vmem:[#allocation48_spill] sm:$0xff] }
 0x331   : > { %v2089_v0 = vadd.f32 %v6635_v55, %v8308_v11 }
 0x332   : > { %v3212_v7 = vrot.slane %v2713_v30, 7 }
 0x333   : > { %2610 = vmatmul.f32.gmra.mxu3 %v5665_v27  ;;  %v2881_v27 = vand.u32 15, %v2797_v38  ;;  %v8309_v38 = vld [vmem:[#allocation49_spill] sm:$0xff] }
 0x334   : > { %v3262_v21 = vsel %vm3237_vm0, %v3211_v53, %v3212_v7  ;;  %2441 = vmatmul.f32.gmra.mxu2 %v6253_v63 }
 0x335   : > { %v6797_v34 = vadd.f32 %v3262_v21, %v6628_v8  ;;  %vm3343_vm4 = vcmp.eq.s32.totalorder %v2881_v27, 0  ;;  %v2717_v8 = vadd.f32 %v6690_v45, %v2089_v0 }
 0x336   : > { %v6791_v22 = vpop.f32.mrf.mxu3 }
 0x337   : > { %8305 = vst [vmem:[#allocation25_spill] sm:$0xff] %v6797_v34  ;;  %v2394_v44 = vpop.f32.mrf.mxu2  ;;  %v1979_v34 = vadd.f32 %v8310_v1, %v8309_v38 }
 0x338   : > { %v2716_v30 = vadd.f32 %v2394_v44, %v1976_v28  ;;  %v6818_v28 = vpop.f32.mrf.mxu0 }
 0x33a   : > { %v3213_v57 = vrot.slane %v2716_v30, 7 }
 0x33b   : > { %2613 = vmatmul.f32.gmra.mxu3 %v5677_v46  ;;  %v2092_v46 = vadd.f32 %v6645_v48, %v6239_v51  ;;  %v8311_v51 = vld [vmem:[#allocation51_spill] sm:$0xff]  ;;  %v8312_v48 = vld [vmem:[#allocation44_spill] sm:$0xff] }
 0x33c   : > { %v3261_v21 = vsel %vm3237_vm0, %v3212_v7, %v3213_v57  ;;  %2444 = vmatmul.f32.gmra.mxu2 %v6288_v14  ;;  %v2799_v7 = vadd.s32 80, %v6697_v43 }
 0x33d   : > { %v3439_v19 = vsel %vm3343_vm4, 0.0, %v3261_v21  ;;  %v2720_v44 = vadd.f32 %v6712_v40, %v2092_v46  ;;  %vm4363_vm4 = vcmask 31744  }
 0x33e   : > { %v6806_v53 = vpop.f32.mrf.mxu3  ;;  %v6814_v63 = vadd.f32 %v3439_v19, %v2717_v8  ;;  %v1982_v8 = vadd.f32 %v8312_v48, %v8311_v51  ;;  %v2895_v21 = vand.u32 15, %v2799_v7 }
 0x33f   : > { %v2397_v55 = vpop.f32.mrf.mxu2 }
 0x340   : > { %v2719_v45 = vadd.f32 %v2397_v55, %v1979_v34  ;;  %v2095_v34 = vadd.f32 %v6655_v15, %v6290_v4  ;;  %v6835_v19 = vpop.f32.mrf.mxu0  ;;  %vm3345_vm5 = vcmp.eq.s32.totalorder %v2895_v21, 0 }
 0x342   : > { %v3214_v27 = vrot.slane %v2719_v45, 7  ;;  %v2723_v1 = vadd.f32 %v6732_v26, %v2095_v34  ;;  %v8313_v45 = vld [vmem:[#allocation47_spill] sm:$0xff]  ;;  %v2801_v26 = vadd.s32 96, %v6697_v43 }
 0x343   : > { %2616 = vmatmul.f32.gmra.mxu3 %v5699_v61  ;;  %v1985_v4 = vadd.f32 %v8313_v45, %v6272_v2 }
 0x344   : > { %v3260_v0 = vsel %vm3237_vm0, %v3213_v57, %v3214_v27  ;;  %2447 = vmatmul.f32.gmra.mxu2 %v6323_v29 }
 0x345   : > { %v6828_v30 = vadd.f32 %v3260_v0, %v2720_v44 }
 0x346   : > { %v6823_v11 = vpop.f32.mrf.mxu3 }
 0x347   : > { %v2400_v61 = vpop.f32.mrf.mxu2 }
 0x348   : > { %v2722_v40 = vadd.f32 %v2400_v61, %v1982_v8  ;;  %v6854_v48 = vpop.f32.mrf.mxu0  ;;  %v2101_v61 = vadd.f32 %v6673_v60, %v6353_v13 }
 0x34a   : > { %v3215_v38 = vrot.slane %v2722_v40, 7 }
 0x34b   : > { %2619 = vmatmul.f32.gmra.mxu3 %v5714_v5  ;;  %v2098_v5 = vadd.f32 %v6665_v33, %v6330_v17  ;;  %v8314_v17 = vld [vmem:[#allocation50_spill] sm:$0xff]  ;;  %v2909_v33 = vand.u32 15, %v2801_v26 }
 0x34c   : > { %v3259_v46 = vsel %vm3237_vm0, %v3214_v27, %v3215_v38  ;;  %2450 = vmatmul.f32.gmra.mxu2 %v6344_v12 }
 0x34d   : > { %v3441_v55 = vsel %vm3345_vm5, 0.0, %v3259_v46  ;;  %v2726_v27 = vadd.f32 %v6749_v62, %v2098_v5  ;;  %vm3347_vm6 = vcmp.eq.s32.totalorder %v2909_v33, 0  ;;  %v8315_v46 = vld [vmem:[#allocation53_spill] sm:$0xff]  ;;  %v2803_v5 = vadd.s32 112, %v6697_v43 }
 0x34e   : > { %v6837_v57 = vpop.f32.mrf.mxu3  ;;  %v6845_v15 = vadd.f32 %v3441_v55, %v2723_v1  ;;  %v1991_v55 = vadd.f32 %v8315_v46, %v6346_v32 }
 0x34f   : > { %v2403_v7 = vpop.f32.mrf.mxu2  ;;  %v2923_v26 = vand.u32 15, %v2803_v5  ;;  %v8324_v5 = vld [vmem:[#allocation23_spill] sm:$0xff] }
 0x350   : > { %v2725_v44 = vadd.f32 %v2403_v7, %v1985_v4  ;;  %v6874_v45 = vpop.f32.mrf.mxu0 }
 0x351   : > { %vm3349_vm7 = vcmp.eq.s32.totalorder %v2923_v26, 0 }
 0x352   : > { %v3216_v0 = vrot.slane %v2725_v44, 7 }
 0x353   : > { %2622 = vmatmul.f32.gmra.mxu3 %v5732_v37  ;;  %v1988_v37 = vadd.f32 %v8314_v17, %v6320_v52 }
 0x354   : > { %v3258_v2 = vsel %vm3237_vm0, %v3215_v38, %v3216_v0  ;;  %2453 = vmatmul.f32.gmra.mxu2 %v6367_v18  ;;  %v2729_v38 = vadd.f32 %v6763_v3, %v2101_v61 }
 0x355   : > { %v6859_v8 = vadd.f32 %v3258_v2, %v2726_v27  ;;  %v8317_v27 = vld [vmem:[#allocation60_spill] sm:$0xff]  ;;  %v8318_v2 = vld [vmem:[#allocation131_spill] sm:$0xff] }
 0x356   : > { %v6852_v51 = vpop.f32.mrf.mxu3  ;;  %v2107_v17 = vadd.f32 %v8318_v2, %v8317_v27  ;;  %v8326_v27 = vld [vmem:[#allocation62_spill] sm:$0xff]  ;;  %v8327_v2 = vld [vmem:[#allocation56_spill] sm:$0xff] }
 0x357   : > { %v2406_v21 = vpop.f32.mrf.mxu2 }
 0x358   : > { %v2728_v62 = vadd.f32 %v2406_v21, %v1988_v37  ;;  %v6894_v37 = vpop.f32.mrf.mxu0 }
 0x35a   : > { %v3217_v34 = vrot.slane %v2728_v62, 7  ;;  %v2735_v62 = vadd.f32 %v6801_v16, %v2107_v17  ;;  %v2000_v17 = vadd.f32 %v8327_v2, %v8326_v27 }
 0x35b   : > { %2625 = vmatmul.f32.gmra.mxu3 %v5744_v9  ;;  %v2104_v9 = vadd.f32 %v6683_v10, %v6376_v41  ;;  %v8316_v41 = vld [vmem:[#allocation54_spill] sm:$0xff] }
 0x35c   : > { %v3257_v1 = vsel %vm3237_vm0, %v3216_v0, %v3217_v34  ;;  %2456 = vmatmul.f32.gmra.mxu2 %v6380_v36  ;;  %v1994_v10 = vadd.f32 %v8316_v41, %v6364_v31 }
 0x35d   : > { %v3443_v52 = vsel %vm3347_vm6, 0.0, %v3257_v1  ;;  %v2732_v7 = vadd.f32 %v6779_v24, %v2104_v9  ;;  %v8319_v24 = vld [vmem:[#allocation21_spill] sm:$0xff]  ;;  %v8321_v1 = vld [vmem:[#allocation55_spill] sm:$0xff]  ;;  %v8323_v9 = vld [vmem:[#allocation26_spill] sm:$0xff] }
 0x35e   : > { %v6866_v40 = vpop.f32.mrf.mxu3  ;;  %v6876_v13 = vadd.f32 %v3443_v52, %v2729_v38  ;;  %v8320_v38 = vld [vmem:[#allocation58_spill] sm:$0xff] }
 0x35f   : > { %v2409_v60 = vpop.f32.mrf.mxu2  ;;  %v1997_v52 = vadd.f32 %v8321_v1, %v8320_v38 }
 0x360   : > { %v2731_v3 = vadd.f32 %v2409_v60, %v1991_v55  ;;  %v8322_v55 = vld [vmem:[#allocation64_spill] sm:$0xff] }
 0x361   : > { %v2110_v60 = vadd.f32 %v8323_v9, %v8322_v55 }
 0x362   : > { %v3218_v4 = vrot.slane %v2731_v3, 7 }
 0x363   : > { %2628 = vmatmul.f32.gmra.mxu3 %v5768_v59  ;;  %v2738_v41 = vadd.f32 %v6818_v28, %v2110_v60 }
 0x364   : > { %v3256_v32 = vsel %vm3237_vm0, %v3217_v34, %v3218_v4  ;;  %2459 = vmatmul.f32.gmra.mxu2 %v8209_v50 }
 0x365   : > { %v6888_v0 = vadd.f32 %v3256_v32, %v2732_v7  ;;  %v6910_v32 = vpop.f32.mrf.mxu0 }
 0x366   : > { %v6883_v44 = vpop.f32.mrf.mxu3 }
 0x367   : > { %v2412_v59 = vpop.f32.mrf.mxu2 }
 0x368   : > { %v2734_v33 = vadd.f32 %v2412_v59, %v1994_v10 }
 0x36a   : > { %v3219_v21 = vrot.slane %v2734_v33, 7 }
 0x36b   : > { %2631 = vmatmul.f32.gmra.mxu3 %v8319_v24 }
 0x36c   : > { %v3255_v34 = vsel %vm3237_vm0, %v3218_v4, %v3219_v21  ;;  %2462 = vmatmul.f32.gmra.mxu2 %v8209_v50  ;;  %v2805_v4 = vadd.s32 128, %v6697_v43 }
 0x36d   : > { %v3445_v31 = vsel %vm3349_vm7, 0.0, %v3255_v34 }
 0x36e   : > { %v6897_v61 = vpop.f32.mrf.mxu3  ;;  %v6905_v46 = vadd.f32 %v3445_v31, %v2735_v62  ;;  %v2937_v24 = vand.u32 15, %v2805_v4  ;;  %v8328_v62 = vld [vmem:[#allocation67_spill] sm:$0xff]  ;;  %v8333_v4 = vld [vmem:[#allocation65_spill] sm:$0xff] }
 0x36f   : > { %v2415_v3 = vpop.f32.mrf.mxu2  ;;  %v2113_v34 = vadd.f32 %v6725_v58, %v8328_v62  ;;  %v8329_v31 = vld [vmem:[#allocation27_spill] sm:$0xff] }
 0x370   : > { %v2737_v7 = vadd.f32 %v2415_v3, %v1997_v52  ;;  %vm3351_vm8 = vcmp.eq.s32.totalorder %v2937_v24, 0  ;;  %v8331_v3 = vld [vmem:[#allocation70_spill] sm:$0xff] }
 0x371   : > { %v2741_v52 = vadd.f32 %v6835_v19, %v2113_v34  ;;  %v2116_v58 = vadd.f32 %v6739_v47, %v8331_v3  ;;  %v2807_v19 = vadd.s32 144, %v6697_v43  ;;  %v8335_v34 = vld [vmem:[#allocation74_spill] sm:$0xff] }
 0x372   : > { %v3220_v16 = vrot.slane %v2737_v7, 7  ;;  %v8332_v7 = vld [vmem:[#allocation31_spill] sm:$0xff] }
 0x373   : > { %2634 = vmatmul.f32.gmra.mxu3 %v8324_v5  ;;  %v2744_v2 = vadd.f32 %v6854_v48, %v2116_v58 }
 0x374   : > { %v3254_v26 = vsel %vm3237_vm0, %v3219_v21, %v3220_v16  ;;  %v6928_v21 = vpop.f32.mrf.mxu0 }
 0x375   : > { %v6918_v59 = vadd.f32 %v3254_v26, %v2738_v41  ;;  %v6938_v26 = vpop.f32.mrf.mxu1 }
 0x376   : > { %v6914_v10 = vpop.f32.mrf.mxu3 }
 0x377   : > { %8325 = vst [vmem:[#allocation35_spill] sm:$0xff] %v6918_v59  ;;  %v2418_v33 = vpop.f32.mrf.mxu2 }
 0x378   : > { %v2740_v38 = vadd.f32 %v2418_v33, %v2000_v17  ;;  %v2951_v33 = vand.u32 15, %v2807_v19 }
 0x37a   : > { %v3221_v1 = vrot.slane %v2740_v38, 7  ;;  %v8336_v38 = vld [vmem:[#allocation34_spill] sm:$0xff]  ;;  %vm3353_vm9 = vcmp.eq.s32.totalorder %v2951_v33, 0 }
 0x37b   : > { %2637 = vmatmul.f32.gmra.mxu3 %v8329_v31  ;;  %v2119_v31 = vadd.f32 %v6752_v42, %v8335_v34  ;;  %v2809_v34 = vadd.s32 160, %v6697_v43 }
 0x37c   : > { %v3253_v55 = vsel %vm3237_vm0, %v3220_v16, %v3221_v1  ;;  %v6948_v47 = vpop.f32.mrf.mxu0 }
 0x37d   : > { %v3447_v9 = vsel %vm3351_vm8, 0.0, %v3253_v55  ;;  %v6956_v3 = vpop.f32.mrf.mxu1 }
 0x37e   : > { %v6925_v28 = vpop.f32.mrf.mxu3  ;;  %v6932_v60 = vadd.f32 %v3447_v9, %v2741_v52  ;;  %v8337_v52 = vld [vmem:[#allocation68_spill] sm:$0xff] }
 0x37f   : > { %v2421_v5 = vpop.f32.mrf.mxu2 }
 0x380   : > { %8330 = vst [vmem:[#allocation28_spill] sm:$0xff] %v6932_v60  ;;  %v2743_v41 = vadd.f32 %v2421_v5, %v8333_v4  ;;  %v8339_v4 = vld [vmem:[#allocation78_spill] sm:$0xff] }
 0x381   : > { %v2122_v42 = vadd.f32 %v6766_v6, %v8339_v4  ;;  %v2965_v6 = vand.u32 15, %v2809_v34 }
 0x382   : > { %v3222_v27 = vrot.slane %v2743_v41, 7 }
 0x383   : > { %2640 = vmatmul.f32.gmra.mxu3 %v8332_v7  ;;  %vm3355_vm10 = vcmp.eq.s32.totalorder %v2965_v6, 0 }
 0x384   : > { %v3252_v16 = vsel %vm3237_vm0, %v3221_v1, %v3222_v27  ;;  %v2747_v1 = vadd.f32 %v6874_v45, %v2119_v31  ;;  %v6965_v19 = vpop.f32.mrf.mxu0  ;;  %v2750_v45 = vadd.f32 %v6894_v37, %v2122_v42  ;;  %v8347_v37 = vld [vmem:[#allocation73_spill] sm:$0xff] }
 0x385   : > { %v6946_v24 = vadd.f32 %v3252_v16, %v2744_v2  ;;  %v8340_v2 = vld [vmem:[#allocation37_spill] sm:$0xff]  ;;  %v8341_v16 = vld [vmem:[#allocation71_spill] sm:$0xff] }
 0x386   : > { %v6942_v17 = vpop.f32.mrf.mxu3 }
 0x387   : > { %8334 = vst [vmem:[#allocation38_spill] sm:$0xff] %v6946_v24  ;;  %v2424_v62 = vpop.f32.mrf.mxu2 }
 0x388   : > { %v2746_v55 = vadd.f32 %v2424_v62, %v8337_v52  ;;  %v6975_v52 = vpop.f32.mrf.mxu1 }
 0x38a   : > { %v3223_v9 = vrot.slane %v2746_v55, 7  ;;  %v2790_v55 = vadd.s32 8, %v6697_v43 }
 0x38b   : > { %2643 = vmatmul.f32.gmra.mxu3 %v8336_v38 }
 0x38c   : > { %v3251_v58 = vsel %vm3237_vm0, %v3222_v27, %v3223_v9 }
 0x38d   : > { %v3449_v5 = vsel %vm3353_vm9, 0.0, %v3251_v58  ;;  %v8343_v58 = vld [vmem:[#allocation59_spill] sm:$0xff] }
 0x38e   : > { %v6954_v48 = vpop.f32.mrf.mxu3  ;;  %v6961_v7 = vadd.f32 %v3449_v5, %v2747_v1  ;;  %v8344_v5 = vld [vmem:[#allocation120_spill] sm:$0xff] }
 0x38f   : > { %v2427_v41 = vpop.f32.mrf.mxu2  ;;  %v2181_v4 = vadd.f32 %v8344_v5, %v8343_v58 }
 0x390   : > { %8338 = vst [vmem:[#allocation30_spill] sm:$0xff] %v6961_v7  ;;  %v2749_v33 = vadd.f32 %v2427_v41, %v8341_v16  ;;  %v8345_v41 = vld [vmem:[#allocation81_spill] sm:$0xff]  ;;  %v8346_v16 = vld [vmem:[#allocation39_spill] sm:$0xff]  ;;  %v2832_v7 = vand.u32 15, %v2790_v55  ;;  %v6999_v55 = vpop.f32.mrf.mxu1 }
 0x392   : > { %v3224_v62 = vrot.slane %v2749_v33, 7  ;;  %v8348_v33 = vld [vmem:[#allocation61_spill] sm:$0xff]  ;;  %vm3496_vm11 = vcmp.eq.s32.totalorder %v2832_v7, 15  ;;  %v8352_v7 = vld [vmem:[#allocation76_spill] sm:$0xff] }
 0x393   : > { %2646 = vmatmul.f32.gmra.mxu3 %v8340_v2  ;;  %v2125_v2 = vadd.f32 %v6777_v20, %v8345_v41 }
 0x394   : > { %v3250_v27 = vsel %vm3237_vm0, %v3223_v9, %v3224_v62  ;;  %v8349_v9 = vld [vmem:[#allocation121_spill] sm:$0xff] }
 0x395   : > { %v6973_v38 = vadd.f32 %v3250_v27, %v2750_v45  ;;  %v2184_v45 = vadd.f32 %v8349_v9, %v8348_v33  ;;  %v6986_v27 = vpop.f32.mrf.mxu0  ;;  %v2753_v58 = vadd.f32 %v6910_v32, %v2125_v2  ;;  %v8351_v33 = vld [vmem:[#allocation84_spill] sm:$0xff] }
 0x396   : > { %v2599_v31 = vpop.f32.mrf.mxu3  ;;  %v8354_v2 = vld [vmem:[#allocation124_spill] sm:$0xff] }
 0x397   : > { %8342 = vst [vmem:[#allocation41_spill] sm:$0xff] %v6973_v38  ;;  %v2430_v1 = vpop.f32.mrf.mxu2  ;;  %v6988_v38 = vadd.f32 %v2599_v31, %v2181_v4  ;;  %v2128_v31 = vadd.f32 %v6791_v22, %v8351_v33  ;;  %v8353_v4 = vld [vmem:[#allocation63_spill] sm:$0xff]  ;;  %v8355_v9 = vld [vmem:[#allocation20_spill] sm:$0xff] }
 0x398   : > { %v2752_v42 = vadd.f32 %v2430_v1, %v8347_v37 }
 0x399   : > { %v8111_v1 = vrot.slane %v6988_v38, 1 }
 0x39a   : > { %v3225_v34 = vrot.slane %v2752_v42, 7  ;;  %v2187_v42 = vadd.f32 %v8354_v2, %v8353_v4  ;;  %v2792_v2 = vadd.s32 24, %v6697_v43 }
 0x39b   : > { %2649 = vmatmul.f32.gmra.mxu3 %v8346_v16 }
 0x39c   : > { %v3249_v20 = vsel %vm3237_vm0, %v3224_v62, %v3225_v34 }
 0x39d   : > { %v3451_v41 = vsel %vm3355_vm10, 0.0, %v3249_v20  ;;  %v2811_v20 = vadd.s32 176, %v6697_v43  ;;  %v7017_v33 = vpop.f32.mrf.mxu0 }
 0x39e   : > { %v2602_v24 = vpop.f32.mrf.mxu3  ;;  %v6994_v16 = vadd.f32 %v3451_v41, %v2753_v58 }
 0x39f   : > { %v2700_v5 = vadd.f32 %v2602_v24, %v2184_v45  ;;  %v2433_v6 = vpop.f32.mrf.mxu2  ;;  %v7008_v24 = vld [vmem:[%s8088_s6] ss:$0 sm:$0xff] }
 0x3a0   : > { %8350 = vst [vmem:[#allocation33_spill] sm:$0xff] %v6994_v16  ;;  %v2755_v62 = vadd.f32 %v2433_v6, %v8352_v7 }
 0x3a1   : > { %v3272_v37 = vrot.slane %v2700_v5, 1  ;;  %v2756_v5 = vadd.f32 %v6928_v21, %v2128_v31  ;;  %v8357_v21 = vld [vmem:[#allocation88_spill] sm:$0xff] }
 0x3a2   : > { %v3226_v58 = vrot.slane %v2755_v62, 7  ;;  %v2979_v62 = vand.u32 15, %v2811_v20  ;;  %v2131_v31 = vadd.f32 %v6806_v53, %v8357_v21  ;;  %v2213_v20 = vpop.f32.mrf.mxu1 }
 0x3a3   : > { %v3332_v32 = vsel %vm3302_vm12, %v8111_v1, %v3272_v37  ;;  %2652 = vmatmul.f32.gmra.mxu3 %v6039_v25 }
 0x3a4   : > { %v3592_v22 = vsel %vm3496_vm11, 0.0, %v3332_v32  ;;  %v3248_v25 = vsel %vm3237_vm0, %v3225_v34, %v3226_v58  ;;  %v8358_v34 = vld [vmem:[#allocation79_spill] sm:$0xff]  ;;  %vm3357_vm13 = vcmp.eq.s32.totalorder %v2979_v62, 0  ;;  %v2759_v21 = vadd.f32 %v6948_v47, %v2131_v31  ;;  %v8362_v62 = vld [vmem:[#allocation92_spill] sm:$0xff]  ;;  %v8366_v31 = vld [vmem:[#allocation118_spill] sm:$0xff] }
 0x3a5   : > { %v3624_v45 = vadd.f32 %v3592_v22, %v8355_v9  ;;  %v7024_v32 = vadd.f32 %v3248_v25, %v2756_v5  ;;  %v8359_v5 = vld [vmem:[#allocation66_spill] sm:$0xff] }
 0x3a6   : > { %v2605_v41 = vpop.f32.mrf.mxu3 }
 0x3a7   : > { %v7020_v1 = vadd.f32 %v7008_v24, %v3624_v45  ;;  %v2703_v6 = vadd.f32 %v2605_v41, %v2187_v42  ;;  %8356 = vst [vmem:[#allocation43_spill] sm:$0xff] %v7024_v32  ;;  %v2436_v4 = vpop.f32.mrf.mxu2  ;;  %v8360_v41 = vld [vmem:[#allocation126_spill] sm:$0xff] }
 0x3a8   : > { %v2758_v42 = vadd.f32 %v2436_v4, %v8358_v34  ;;  %v2190_v25 = vadd.f32 %v8360_v41, %v8359_v5  ;;  %v2561_v34 = vpop.f32.mrf.mxu0 }
 0x3a9   : > { %v4625_v7 = vmul.f32 -1.442695, %v7020_v1  ;;  %v3273_v22 = vrot.slane %v2703_v6, 1 }
 0x3aa   : > { %v3227_v6 = vrot.slane %v2758_v42, 7 }
 0x3ab   : > { %4917 = vpow2.f32 %v4625_v7  ;;  %v3331_v9 = vsel %vm3302_vm12, %v3272_v37, %v3273_v22  ;;  %2655 = vmatmul.f32.gmra.mxu3 %v6073_v39  ;;  %v2846_v7 = vand.u32 15, %v2792_v2  ;;  %v8365_v2 = vld [vmem:[#allocation57_spill] sm:$0xff] }
 0x3ac   : > { %v3625_v45 = vadd.f32 %v6735_v35, %v3331_v9  ;;  %v3247_v39 = vsel %vm3237_vm0, %v3226_v58, %v3227_v6 }
 0x3ad   : > { %v3453_v35 = vsel %vm3357_vm13, 0.0, %v3247_v39  ;;  %vm7050_vm14 = vcmp.eq.s32.totalorder %v2846_v7, 15  ;;  %v8368_v39 = vld [vmem:[#allocation128_spill] sm:$0xff] }
 0x3ae   : > { %v7038_v32 = vadd.f32 %v7008_v24, %v3625_v45  ;;  %v2608_v53 = vpop.f32.mrf.mxu3  ;;  %v7044_v5 = vadd.f32 %v3453_v35, %v2759_v21  ;;  %v2134_v45 = vadd.f32 %v6823_v11, %v8362_v62  ;;  %v8369_v11 = vld [vmem:[#allocation82_spill] sm:$0xff]  ;;  %v8370_v7 = vld [vmem:[#allocation72_spill] sm:$0xff]  ;;  %v8372_v62 = vld [vmem:[#allocation75_spill] sm:$0xff] }
 0x3af   : > { %v2706_v37 = vadd.f32 %v2608_v53, %v2190_v25  ;;  %v2439_v58 = vpop.f32.mrf.mxu2  ;;  %v7056_v25 = vadd.f32 %v8366_v31, %v8365_v2  ;;  %v8367_v53 = vld [vmem:[#allocation69_spill] sm:$0xff] }
 0x3b0   : > { %v4626_v4 = vmul.f32 -1.442695, %v7038_v32  ;;  %8361 = vst [vmem:[#allocation36_spill] sm:$0xff] %v7044_v5  ;;  %v2193_v21 = vadd.f32 %v8368_v39, %v8367_v53  ;;  %v7064_v35 = vadd.f32 %v2439_v58, %v8369_v11  ;;  %v8373_v5 = vld [vmem:[#allocation19_spill] sm:$0xff]  ;;  %v8374_v2 = vld [vmem:[#allocation77_spill] sm:$0xff]  ;;  %v8375_v53 = vld [vmem:[#allocation80_spill] sm:$0xff] }
 0x3b1   : > { %v4918_v9 = vpop.eup %4917  ;;  %v3274_v42 = vrot.slane %v2706_v37, 1  ;;  %v7070_v16 = vadd.f32 %v8373_v5, %v8372_v62  ;;  %v7074_v31 = vadd.f32 %v6938_v26, %v8374_v2  ;;  %v2813_v39 = vadd.s32 192, %v6697_v43  ;;  %v8376_v11 = vld [vmem:[#allocation83_spill] sm:$0xff] }
 0x3b2   : > { %v7048_v41 = vadd.f32 1.0, %v4918_v9  ;;  %4919 = vpow2.f32 %v4626_v4  ;;  %v8371_v4 = vld [vmem:[#allocation130_spill] sm:$0xff]  ;;  %v3228_v58 = vrot.slane %v7064_v35, 7  ;;  %v7087_v5 = vadd.f32 %v6975_v52, %v8376_v11  ;;  %v8377_v2 = vld [vmem:[#allocation95_spill] sm:$0xff] }
 0x3b3   : > { %v3330_v37 = vsel %vm3302_vm12, %v3273_v22, %v3274_v42  ;;  %2658 = vmatmul.f32.gmra.mxu3 %v6115_v56  ;;  %v2196_v9 = vadd.f32 %v8371_v4, %v8370_v7  ;;  %v7079_v22 = vadd.f32 %v6956_v3, %v8375_v53  ;;  %v2762_v26 = vadd.f32 %v6965_v19, %v2134_v45  ;;  %v2216_v3 = vpop.f32.mrf.mxu1  ;;  %v8379_v11 = vld [vmem:[#allocation102_spill] sm:$0xff] }
 0x3b4   : > { %4921 = vrcp.f32 %v7048_v41  ;;  %v3594_v56 = vsel %vm7050_vm14, 0.0, %v3330_v37  ;;  %v2794_v62 = vadd.s32 40, %v6697_v43  ;;  %v2137_v47 = vadd.f32 %v6837_v57, %v8377_v2  ;;  %v8378_v37 = vld [vmem:[#allocation98_spill] sm:$0xff] }
 0x3b5   : > { %v3626_v7 = vadd.f32 %v3594_v56, %v6745_v54  ;;  %v2140_v35 = vadd.f32 %v6852_v51, %v8378_v37  ;;  %v3246_v53 = vsel %vm3237_vm0, %v3227_v6, %v3228_v58  ;;  %v2143_v19 = vadd.f32 %v6866_v40, %v8379_v11  ;;  %v8380_v54 = vld [vmem:[#allocation106_spill] sm:$0xff]  ;;  %v8384_v40 = vld [vmem:[#allocation89_spill] sm:$0xff] }
 0x3b6   : > { %v2611_v4 = vpop.f32.mrf.mxu3  ;;  %v2146_v45 = vadd.f32 %v6883_v44, %v8380_v54  ;;  %v7107_v57 = vadd.f32 %v3246_v53, %v2762_v26  ;;  %v8383_v2 = vld [vmem:[#allocation86_spill] sm:$0xff]  ;;  %v7117_v11 = vadd.f32 %v2213_v20, %v8384_v40  ;;  %v8385_v44 = vld [vmem:[#allocation91_spill] sm:$0xff]  ;;  %v2860_v53 = vand.u32 15, %v2794_v62 }
 0x3b7   : > { %v7098_v60 = vadd.f32 %v2611_v4, %v2193_v21  ;;  %v7105_v56 = vadd.f32 %v7008_v24, %v3626_v7  ;;  %v7111_v51 = vadd.f32 %v6999_v55, %v8383_v2  ;;  %v2993_v4 = vand.u32 15, %v2813_v39  ;;  %v2442_v26 = vpop.f32.mrf.mxu2  ;;  %v2564_v55 = vpop.f32.mrf.mxu0 }
 0x3b8   : > { %v4920_v52 = vpop.eup %4919  ;;  %8382 = vst [vmem:[#allocation46_spill] sm:$0xff] %v7107_v57  ;;  %v7120_v54 = vadd.f32 %v2216_v3, %v8385_v44  ;;  %v2765_v57 = vadd.f32 %v6986_v27, %v2137_v47  ;;  %v7131_v20 = vadd.f32 %v2561_v34, %v2143_v19  ;;  %v7133_v39 = vadd.f32 %v2564_v55, %v2146_v45  ;;  %v8387_v47 = vld [vmem:[#allocation85_spill] sm:$0xff] }
 0x3b9   : > { %v7113_v6 = vadd.f32 1.0, %v4920_v52  ;;  %v3275_v21 = vrot.slane %v7098_v60, 1  ;;  %v4627_v7 = vmul.f32 -1.442695, %v7105_v56  ;;  %v7125_v52 = vadd.f32 %v7017_v33, %v2140_v35  ;;  %v8386_v33 = vld [vmem:[#allocation29_spill] sm:$0xff] }
 0x3ba   : > { %v4922_v37 = vpop.eup %4921  ;;  %v2764_v35 = vadd.f32 %v2442_v26, %v8387_v47  ;;  %vm7139_vm15 = vcmp.eq.s32.totalorder %v2993_v4, 0  ;;  %v3845_v34 = vand.u32 2147483648, %v7048_v41  ;;  %vm7145_vm2 = vcmp.eq.s32.totalorder %v2860_v53, 15 }
 0x3bb   : > { %v3835_v60 = vmul.f32 %v4922_v37, %v7048_v41  ;;  %4923 = vrcp.f32 %v7113_v6  ;;  %2661 = vmatmul.f32.gmra.mxu3 %v6163_v49  ;;  %v3329_v27 = vsel %vm3302_vm12, %v3274_v42, %v3275_v21  ;;  %vm3840_vm1 = vweird.f32 %v4922_v37 }
 0x3bc   : > { %4925 = vpow2.f32 %v4627_v7  ;;  %v3627_v3 = vadd.f32 %v8386_v33, %v3329_v27  ;;  %v3843_v49 = vand.u32 2147483647, %v7048_v41  ;;  %v3229_v4 = vrot.slane %v2764_v35, 7 }
 0x3bd   : > { %v3836_v62 = vsub.f32 1.0, %v3835_v60  ;;  %vm3839_vm3 = vweird.f32 %v7048_v41  ;;  %v7161_v7 = vadd.s32 208, %v6697_v43  ;;  %v7164_v26 = vadd.s32 56, %v6697_v43 }
 0x3be   : > { %v2614_v19 = vpop.f32.mrf.mxu3  ;;  %v7155_v40 = vadd.f32 %v7008_v24, %v3627_v3  ;;  %v3245_v27 = vsel %vm3237_vm0, %v3228_v58, %v3229_v4  ;;  %vm3841_vm5 = vmor %vm3839_vm3, %vm3840_vm1  ;;  %vm3844_vm6 = vcmp.eq.f32.partialorder %v3843_v49, 8.507059e+37  ;;  %v3846_v41 = vor.u32 1.1754944e-38, %v3845_v34  ;;  %v8392_v34 = vld [vmem:[#allocation87_spill] sm:$0xff] }
 0x3bf   : > { %v3837_v42 = vmul.f32 %v4922_v37, %v3836_v62  ;;  %v7157_v44 = vadd.f32 %v2614_v19, %v2196_v9  ;;  %v3455_v3 = vsel %vm7139_vm15, 0.0, %v3245_v27  ;;  %v2445_v47 = vpop.f32.mrf.mxu2  ;;  %v8394_v27 = vld [vmem:[#allocation109_spill] sm:$0xff]  ;;  %vm3854_vm8 = vweird.f32 %v7113_v6 }
 0x3c0   : > { %v4628_v60 = vmul.f32 -1.442695, %v7155_v40  ;;  %v7183_v59 = vadd.f32 %v2445_v47, %v8392_v34 }
 0x3c1   : > { %v4924_v53 = vpop.eup %4923  ;;  %v3838_v55 = vadd.f32 %v4922_v37, %v3837_v42  ;;  %v3276_v9 = vrot.slane %v7157_v44, 1  ;;  %v7177_v42 = vadd.f32 %v3455_v3, %v2765_v57  ;;  %v8395_v3 = vld [vmem:[#allocation22_spill] sm:$0xff] }
 0x3c2   : > { %v4926_v62 = vpop.eup %4925  ;;  %v3850_v33 = vmul.f32 %v4924_v53, %v7113_v6  ;;  %4927 = vpow2.f32 %v4628_v60  ;;  %vm3855_vm7 = vweird.f32 %v4924_v53  ;;  %v2567_v60 = vpop.f32.mrf.mxu0 }
 0x3c3   : > { %v3842_v35 = vsel %vm3841_vm5, %v4922_v37, %v3838_v55  ;;  %v7175_v19 = vadd.f32 1.0, %v4926_v62  ;;  %2664 = vmatmul.f32.gmra.mxu3 %v6211_v23  ;;  %v3328_v49 = vsel %vm3302_vm12, %v3275_v21, %v3276_v9  ;;  %v3858_v37 = vand.u32 2147483647, %v7113_v6  ;;  %vm3856_vm9 = vmor %vm3854_vm8, %vm3855_vm7 }
 0x3c4   : > { %v3847_v58 = vsel %vm3844_vm6, %v3846_v41, %v3842_v35  ;;  %v3851_v44 = vsub.f32 1.0, %v3850_v33  ;;  %v3860_v55 = vand.u32 2147483648, %v7113_v6  ;;  %v3596_v57 = vsel %vm7145_vm2, 0.0, %v3328_v49  ;;  %v5046_v41 = vld [vmem:[%s5466_s23 + $0x8] sm:$0xff] }
 0x3c5   : > { %v4300_v2 = vmul.f32 %v3847_v58, %v7020_v1  ;;  %4929 = vrcp.f32 %v7175_v19  ;;  %v3230_v21 = vrot.slane %v7183_v59, 7  ;;  %v2149_v62 = vadd.f32 %v6897_v61, %v8394_v27  ;;  %v8396_v27 = vld [vmem:[#allocation52_spill] sm:$0xff] }
 0x3c6   : > { %v3852_v23 = vmul.f32 %v4924_v53, %v3851_v44  ;;  %v2617_v1 = vpop.f32.mrf.mxu3  ;;  %v3628_v47 = vadd.f32 %v3596_v57, %v8395_v3  ;;  %v3007_v44 = vand.u32 15, %v7161_v7  ;;  %v3861_v61 = vor.u32 1.1754944e-38, %v3860_v55 }
 0x3c7   : > { %v4332_v33 = vadd.f32 %v5046_v41, %v4300_v2  ;;  %v2715_v35 = vadd.f32 %v2617_v1, %v7070_v16  ;;  %v3244_v45 = vsel %vm3237_vm0, %v3229_v4, %v3230_v21  ;;  %vm3859_vm10 = vcmp.eq.f32.partialorder %v3858_v37, 8.507059e+37  ;;  %v2448_v4 = vpop.f32.mrf.mxu2 }
 0x3c8   : > { %v3853_v58 = vadd.f32 %v4924_v53, %v3852_v23  ;;  %v4928_v59 = vpop.eup %4927  ;;  %v7210_v49 = vadd.f32 %v7008_v24, %v3628_v47  ;;  %v7213_v34 = vadd.f32 %v3244_v45, %v7125_v52  ;;  %v2874_v7 = vand.u32 15, %v7164_v26  ;;  %v8397_v52 = vld [vmem:[#allocation90_spill] sm:$0xff]  ;;  %v5047_v47 = vld [vmem:[%s5466_s23 + $0x10] sm:$0xff] }
 0x3c9   : > { %4365 = vst.msk [vmem:[%s7192_s16 + $0x8] sm:$0xff] %vm4363_vm4, %v4332_v33  ;;  %v3277_v16 = vrot.slane %v2715_v35, 1  ;;  %v7215_v6 = vadd.f32 1.0, %v4928_v59  ;;  %v2770_v41 = vadd.f32 %v2448_v4, %v8397_v52  ;;  %v7223_v33 = vadd.f32 %v2567_v60, %v2149_v62  ;;  %v8400_v62 = vld [vmem:[#allocation32_spill] sm:$0xff]  ;;  %v8401_v59 = vld [vmem:[#allocation111_spill] sm:$0xff] }
 0x3ca   : > { %v3857_v2 = vsel %vm3856_vm9, %v4924_v53, %v3853_v58  ;;  %v4629_v1 = vmul.f32 -1.442695, %v7210_v49  ;;  %v3873_v26 = vand.u32 2147483647, %v7175_v19  ;;  %v3875_v3 = vand.u32 2147483648, %v7175_v19 }
 0x3cb   : > { %v4930_v23 = vpop.eup %4929  ;;  %v3862_v57 = vsel %vm3859_vm10, %v3861_v61, %v3857_v2  ;;  %v3327_v55 = vsel %vm3302_vm12, %v3276_v9, %v3277_v16  ;;  %2667 = vmatmul.f32.gmra.mxu3 %v8396_v27  ;;  %4931 = vrcp.f32 %v7215_v6  ;;  %vm7230_vm11 = vcmp.eq.s32.totalorder %v3007_v44, 0 }
 0x3cc   : > { %v4301_v53 = vmul.f32 %v3862_v57, %v7038_v32  ;;  %v3865_v37 = vmul.f32 %v4930_v23, %v7175_v19  ;;  %4933 = vpow2.f32 %v4629_v1  ;;  %v3629_v58 = vadd.f32 %v8400_v62, %v3327_v55  ;;  %v2570_v1 = vpop.f32.mrf.mxu0 }
 0x3cd   : > { %v3231_v32 = vrot.slane %v2770_v41, 7  ;;  %v7238_v61 = vadd.f32 %v6914_v10, %v8401_v59  ;;  %vm3869_vm13 = vweird.f32 %v7175_v19  ;;  %vm7244_vm14 = vcmp.eq.s32.totalorder %v2874_v7, 15 }
 0x3ce   : > { %v4333_v35 = vadd.f32 %v5047_v47, %v4301_v53  ;;  %v3866_v60 = vsub.f32 1.0, %v3865_v37  ;;  %v2620_v45 = vpop.f32.mrf.mxu3  ;;  %vm3870_vm15 = vweird.f32 %v4930_v23  ;;  %v7251_v57 = vadd.f32 %v7008_v24, %v3629_v58 }
 0x3cf   : > { %v7242_v2 = vadd.f32 %v2620_v45, %v7074_v31  ;;  %v3243_v10 = vsel %vm3237_vm0, %v3230_v21, %v3231_v32  ;;  %vm7255_vm1 = vcmp.eq.f32.partialorder %v3873_v26, 8.507059e+37  ;;  %v3876_v31 = vor.u32 1.1754944e-38, %v3875_v3  ;;  %v2451_v47 = vpop.f32.mrf.mxu2  ;;  %vm3871_vm2 = vmor %vm3869_vm13, %vm3870_vm15 }
 0x3d0   : > { %4366 = vst.msk [vmem:[%s7192_s16 + $0x10] sm:$0xff] %vm4363_vm4, %v4333_v35  ;;  %v3867_v4 = vmul.f32 %v4930_v23, %v3866_v60  ;;  %v3457_v7 = vsel %vm7230_vm11, 0.0, %v3243_v10  ;;  %v4630_v53 = vmul.f32 -1.442695, %v7251_v57  ;;  %v2817_v21 = vadd.s32 224, %v6697_v43  ;;  %v8406_v35 = vld [vmem:[#allocation93_spill] sm:$0xff] }
 0x3d1   : > { %v3278_v27 = vrot.slane %v7242_v2, 1  ;;  %v4932_v52 = vpop.eup %4931  ;;  %v7264_v37 = vadd.f32 %v3457_v7, %v7131_v20  ;;  %v7275_v60 = vadd.f32 %v2451_v47, %v8406_v35  ;;  %v2798_v20 = vadd.s32 72, %v6697_v43  ;;  %v5048_v47 = vld [vmem:[%s5466_s23 + $0x18] sm:$0xff] }
 0x3d2   : > { %v3868_v41 = vadd.f32 %v4930_v23, %v3867_v4  ;;  %v4934_v26 = vpop.eup %4933  ;;  %v3880_v3 = vmul.f32 %v4932_v52, %v7215_v6  ;;  %4935 = vpow2.f32 %v4630_v53  ;;  %v3888_v10 = vand.u32 2147483647, %v7215_v6  ;;  %v8408_v53 = vld [vmem:[#allocation113_spill] sm:$0xff] }
 0x3d3   : > { %v3326_v9 = vsel %vm3302_vm12, %v3277_v16, %v3278_v27  ;;  %2670 = vmatmul.f32.gmra.mxu3 %v6288_v14  ;;  %v7278_v58 = vadd.f32 1.0, %v4934_v26  ;;  %v8407_v16 = vld [vmem:[#allocation25_spill] sm:$0xff]  ;;  %v3232_v14 = vrot.slane %v7275_v60, 7  ;;  %vm3885_vm3 = vweird.f32 %v4932_v52 }
 0x3d4   : > { %v3872_v62 = vsel %vm3871_vm2, %v4930_v23, %v3868_v41  ;;  %v3598_v19 = vsel %vm7244_vm14, 0.0, %v3326_v9  ;;  %v3881_v59 = vsub.f32 1.0, %v3880_v3  ;;  %v3890_v23 = vand.u32 2147483648, %v7215_v6  ;;  %v7295_v41 = vpop.f32.mrf.mxu1  ;;  %v2573_v35 = vpop.f32.mrf.mxu0 }
 0x3d5   : > { %v3877_v45 = vsel %vm7255_vm1, %v3876_v31, %v3872_v62  ;;  %v3630_v2 = vadd.f32 %v3598_v19, %v8407_v16  ;;  %4937 = vrcp.f32 %v7278_v58  ;;  %v3242_v31 = vsel %vm3237_vm0, %v3231_v32, %v3232_v14 }
 0x3d6   : > { %v4302_v4 = vmul.f32 %v3877_v45, %v7105_v56  ;;  %v2623_v7 = vpop.f32.mrf.mxu3  ;;  %v3882_v44 = vmul.f32 %v4932_v52, %v3881_v59  ;;  %v2155_v56 = vadd.f32 %v6925_v28, %v8408_v53  ;;  %v7301_v3 = vadd.f32 %v3242_v31, %v7133_v39 }
 0x3d7   : > { %v7291_v55 = vadd.f32 %v7008_v24, %v3630_v2  ;;  %v2721_v9 = vadd.f32 %v2623_v7, %v7079_v22  ;;  %vm3884_vm5 = vweird.f32 %v7215_v6  ;;  %v3021_v19 = vand.u32 15, %v2817_v21  ;;  %v2454_v59 = vpop.f32.mrf.mxu2  ;;  %v8409_v22 = vld [vmem:[#allocation96_spill] sm:$0xff] }
 0x3d8   : > { %v4334_v26 = vadd.f32 %v5048_v47, %v4302_v4  ;;  %v3883_v60 = vadd.f32 %v4932_v52, %v3882_v44  ;;  %v4936_v32 = vpop.eup %4935  ;;  %vm3886_vm6 = vmor %vm3884_vm5, %vm3885_vm3  ;;  %vm3889_vm7 = vcmp.eq.f32.partialorder %v3888_v10, 8.507059e+37  ;;  %v3891_v28 = vor.u32 1.1754944e-38, %v3890_v23 }
 0x3d9   : > { %v4631_v62 = vmul.f32 -1.442695, %v7291_v55  ;;  %v3279_v45 = vrot.slane %v2721_v9, 1  ;;  %v2888_v39 = vand.u32 15, %v2798_v20  ;;  %v7309_v2 = vadd.f32 1.0, %v4936_v32 }
 0x3da   : > { %4367 = vst.msk [vmem:[%s7192_s16 + $0x18] sm:$0xff] %vm4363_vm4, %v4334_v26  ;;  %v3887_v16 = vsel %vm3886_vm6, %v4932_v52, %v3883_v60  ;;  %v7313_v6 = vadd.f32 %v2454_v59, %v8409_v22  ;;  %v7316_v4 = vadd.f32 %v2570_v1, %v7238_v61  ;;  %v7318_v7 = vadd.f32 %v2573_v35, %v2155_v56  ;;  %v8410_v52 = vld [vmem:[#allocation116_spill] sm:$0xff] }
 0x3db   : > { %4939 = vpow2.f32 %v4631_v62  ;;  %2673 = vmatmul.f32.gmra.mxu3 %v6323_v29  ;;  %v4938_v21 = vpop.eup %4937  ;;  %v3892_v10 = vsel %vm3889_vm7, %v3891_v28, %v3887_v16  ;;  %v3325_v20 = vsel %vm3302_vm12, %v3278_v27, %v3279_v45  ;;  %v7324_v23 = vadd.f32 %v6942_v17, %v8410_v52  ;;  %v5050_v17 = vld [vmem:[%s5466_s23 + $0x28] sm:$0xff] }
 0x3dc   : > { %v4303_v29 = vmul.f32 %v3892_v10, %v7155_v40  ;;  %v3895_v44 = vmul.f32 %v4938_v21, %v7278_v58  ;;  %4941 = vrcp.f32 %v7309_v2  ;;  %v7331_v61 = vadd.f32 %v6954_v48, %v7056_v25  ;;  %v5049_v40 = vld [vmem:[%s5466_s23 + $0x20] sm:$0xff]  ;;  %v7358_v62 = vpop.f32.mrf.mxu1 }
 0x3dd   : > { %v3631_v1 = vadd.f32 %v6814_v63, %v3325_v20  ;;  %vm7334_vm8 = vcmp.eq.s32.totalorder %v3021_v19, 0  ;;  %vm7338_vm9 = vcmp.eq.s32.totalorder %v2888_v39, 15  ;;  %v3233_v47 = vrot.slane %v7313_v6, 7  ;;  %v8415_v10 = vld [vmem:[#allocation99_spill] sm:$0xff] }
 0x3de   : > { %v2626_v27 = vpop.f32.mrf.mxu3  ;;  %v4335_v53 = vadd.f32 %v5049_v40, %v4303_v29  ;;  %v3896_v56 = vsub.f32 1.0, %v3895_v44  ;;  %vm3899_vm10 = vweird.f32 %v7278_v58  ;;  %v3903_v63 = vand.u32 2147483647, %v7278_v58 }
 0x3df   : > { %v7345_v26 = vadd.f32 %v2626_v27, %v7087_v5  ;;  %v3905_v48 = vand.u32 2147483648, %v7278_v58  ;;  %v7351_v25 = vadd.f32 %v7008_v24, %v3631_v1  ;;  %vm3900_vm11 = vweird.f32 %v4938_v21  ;;  %v2457_v59 = vpop.f32.mrf.mxu2 }
 0x3e0   : > { %4368 = vst.msk [vmem:[%s7192_s16 + $0x20] sm:$0xff] %vm4363_vm4, %v4335_v53  ;;  %v3897_v35 = vmul.f32 %v4938_v21, %v3896_v56  ;;  %v3241_v60 = vsel %vm3237_vm0, %v3232_v14, %v3233_v47  ;;  %v2819_v39 = vadd.s32 240, %v6697_v43  ;;  %v7373_v20 = vadd.f32 %v2457_v59, %v8415_v10  ;;  %vm3901_vm13 = vmor %vm3899_vm10, %vm3900_vm11 }
 0x3e1   : > { %v4940_v9 = vpop.eup %4939  ;;  %v3280_v5 = vrot.slane %v7345_v26, 1  ;;  %v4632_v32 = vmul.f32 -1.442695, %v7351_v25  ;;  %v3459_v28 = vsel %vm7334_vm8, 0.0, %v3241_v60  ;;  %vm3904_vm14 = vcmp.eq.f32.partialorder %v3903_v63, 8.507059e+37 }
 0x3e2   : > { %v7360_v19 = vadd.f32 1.0, %v4940_v9  ;;  %v4942_v16 = vpop.eup %4941  ;;  %v3898_v22 = vadd.f32 %v4938_v21, %v3897_v35  ;;  %v7367_v6 = vadd.f32 %v3459_v28, %v7223_v33  ;;  %v3906_v52 = vor.u32 1.1754944e-38, %v3905_v48 }
 0x3e3   : > { %v3324_v14 = vsel %vm3302_vm12, %v3279_v45, %v3280_v5  ;;  %2676 = vmatmul.f32.gmra.mxu3 %v6344_v12  ;;  %v3910_v29 = vmul.f32 %v4942_v16, %v7309_v2  ;;  %v3918_v44 = vand.u32 2147483647, %v7309_v2  ;;  %v2800_v12 = vadd.s32 88, %v6697_v43 }
 0x3e4   : > { %4943 = vrcp.f32 %v7360_v19  ;;  %v3902_v33 = vsel %vm3901_vm13, %v4938_v21, %v3898_v22  ;;  %v3600_v31 = vsel %vm7338_vm9, 0.0, %v3324_v14  ;;  %v3234_v58 = vrot.slane %v7373_v20, 7  ;;  %v7415_v10 = vpop.f32.mrf.mxu1 }
 0x3e5   : > { %4945 = vpow2.f32 %v4632_v32  ;;  %v3907_v45 = vsel %vm3904_vm14, %v3906_v52, %v3902_v33  ;;  %v3911_v1 = vsub.f32 1.0, %v3910_v29  ;;  %v3920_v53 = vand.u32 2147483648, %v7309_v2 }
 0x3e6   : > { %v2629_v27 = vpop.f32.mrf.mxu3  ;;  %v4304_v40 = vmul.f32 %v3907_v45, %v7210_v49  ;;  %v3632_v21 = vadd.f32 %v3600_v31, %v6828_v30  ;;  %v3035_v56 = vand.u32 15, %v2819_v39  ;;  %vm3915_vm15 = vweird.f32 %v4942_v16 }
 0x3e7   : > { %v3912_v26 = vmul.f32 %v4942_v16, %v3911_v1  ;;  %v3240_v63 = vsel %vm3237_vm0, %v3233_v47, %v3234_v58  ;;  %v7391_v48 = vadd.f32 %v2629_v27, %v7111_v51  ;;  %v2902_v60 = vand.u32 15, %v2800_v12  ;;  %v2460_v47 = vpop.f32.mrf.mxu2 }
 0x3e8   : > { %v4336_v9 = vadd.f32 %v5050_v17, %v4304_v40  ;;  %v7395_v35 = vadd.f32 %v7008_v24, %v3632_v21  ;;  %v7398_v49 = vadd.f32 %v3240_v63, %v7316_v4  ;;  %vm3914_vm1 = vweird.f32 %v7309_v2  ;;  %v8418_v2 = vld [vmem:[#allocation101_spill] sm:$0xff]  ;;  %v2576_v17 = vpop.f32.mrf.mxu0 }
 0x3e9   : > { %v3913_v32 = vadd.f32 %v4942_v16, %v3912_v26  ;;  %vm7401_vm2 = vcmp.eq.f32.partialorder %v3918_v44, 8.507059e+37  ;;  %v3281_v51 = vrot.slane %v7391_v48, 1  ;;  %vm3916_vm3 = vmor %vm3914_vm1, %vm3915_vm15  ;;  %v3921_v39 = vor.u32 1.1754944e-38, %v3920_v53  ;;  %v5051_v53 = vld [vmem:[%s5466_s23 + $0x30] sm:$0xff] }
 0x3ea   : > { %v4944_v30 = vpop.eup %4943  ;;  %4369 = vst.msk [vmem:[%s7192_s16 + $0x28] sm:$0xff] %vm4363_vm4, %v4336_v9  ;;  %v4633_v22 = vmul.f32 -1.442695, %v7395_v35  ;;  %v7413_v14 = vadd.f32 %v2460_v47, %v8418_v2  ;;  %vm7421_vm5 = vcmp.eq.s32.totalorder %v3035_v56, 0  ;;  %v3935_v1 = vand.u32 2147483648, %v7360_v19 }
 0x3eb   : > { %v4946_v59 = vpop.eup %4945  ;;  %v3925_v4 = vmul.f32 %v4944_v30, %v7360_v19  ;;  %2679 = vmatmul.f32.gmra.mxu3 %v6367_v18  ;;  %v3917_v20 = vsel %vm3916_vm3, %v4942_v16, %v3913_v32  ;;  %v3323_v29 = vsel %vm3302_vm12, %v3280_v5, %v3281_v51  ;;  %v3933_v16 = vand.u32 2147483647, %v7360_v19 }
 0x3ec   : > { %v7417_v52 = vadd.f32 1.0, %v4946_v59  ;;  %v3922_v44 = vsel %vm7401_vm2, %v3921_v39, %v3917_v20  ;;  %4947 = vpow2.f32 %v4633_v22  ;;  %v3633_v12 = vadd.f32 %v6845_v15, %v3323_v29  ;;  %v7472_v33 = vpop.f32.mrf.mxu1 }
 0x3ed   : > { %v3926_v18 = vsub.f32 1.0, %v3925_v4  ;;  %v4305_v45 = vmul.f32 %v3922_v44, %v7251_v57  ;;  %vm3930_vm6 = vweird.f32 %v4944_v30  ;;  %v3235_v40 = vrot.slane %v7413_v14, 7  ;;  %v8424_v4 = vld [vmem:[#allocation94_spill] sm:$0xff] }
 0x3ee   : > { %4949 = vrcp.f32 %v7417_v52  ;;  %v2632_v5 = vpop.f32.mrf.mxu3  ;;  %v7433_v27 = vadd.f32 %v7008_v24, %v3633_v12  ;;  %vm7440_vm7 = vcmp.eq.s32.totalorder %v2902_v60, 15  ;;  %v2825_v56 = vand.u32 15, %v6697_v43 }
 0x3ef   : > { %v3927_v31 = vmul.f32 %v4944_v30, %v3926_v18  ;;  %v4337_v21 = vadd.f32 %v5051_v53, %v4305_v45  ;;  %v7438_v15 = vadd.f32 %v2632_v5, %v7117_v11  ;;  %vm3929_vm8 = vweird.f32 %v7360_v19  ;;  %v2463_v32 = vpop.f32.mrf.mxu2 }
 0x3f0   : > { %v4634_v63 = vmul.f32 -1.442695, %v7433_v27  ;;  %v3239_v48 = vsel %vm3237_vm0, %v3234_v58, %v3235_v40  ;;  %vm3931_vm9 = vmor %vm3929_vm8, %vm3930_vm6  ;;  %vm3934_vm10 = vcmp.eq.f32.partialorder %v3933_v16, 8.507059e+37  ;;  %v3936_v11 = vor.u32 1.1754944e-38, %v3935_v1  ;;  %v8423_v58 = vld [vmem:[#allocation104_spill] sm:$0xff] }
 0x3f1   : > { %v3928_v26 = vadd.f32 %v4944_v30, %v3927_v31  ;;  %4370 = vst.msk [vmem:[%s7192_s16 + $0x30] sm:$0xff] %vm4363_vm4, %v4337_v21  ;;  %v3461_v9 = vsel %vm7421_vm5, 0.0, %v3239_v48  ;;  %v3282_v60 = vrot.slane %v7438_v15, 1  ;;  %v2785_v59 = vadd.f32 %v2463_v32, %v8423_v58  ;;  %v8429_v32 = vld [vmem:[#allocation107_spill] sm:$0xff] }
 0x3f2   : > { %v4948_v28 = vpop.eup %4947  ;;  %4951 = vpow2.f32 %v4634_v63  ;;  %v7455_v19 = vadd.f32 %v3461_v9, %v7318_v7  ;;  %v2220_v22 = vadd.f32 %v7295_v41, %v8424_v4  ;;  %v2786_v7 = vadd.f32 %v2576_v17, %v7324_v23  ;;  %v5053_v15 = vld [vmem:[%s5466_s23 + $0x40] sm:$0xff] }
 0x3f3   : > { %v3932_v47 = vsel %vm3931_vm9, %v4944_v30, %v3928_v26  ;;  %2682 = vmatmul.f32.gmra.mxu3 %v6380_v36  ;;  %v7461_v14 = vadd.f32 1.0, %v4948_v28  ;;  %v3322_v30 = vsel %vm3302_vm12, %v3281_v51, %v3282_v60  ;;  %v3270_v41 = vrot.slane %v7331_v61, 1  ;;  %v8427_v26 = vld [vmem:[#allocation24_spill] sm:$0xff] }
 0x3f4   : > { %v4950_v39 = vpop.eup %4949  ;;  %v3937_v2 = vsel %vm3934_vm10, %v3936_v11, %v3932_v47  ;;  %v3602_v29 = vsel %vm7440_vm7, 0.0, %v3322_v30  ;;  %vm7476_vm11 = vcmp.eq.s32.totalorder %v2825_v56, 0  ;;  %v2802_v23 = vadd.s32 104, %v6697_v43 }
 0x3f5   : > { %v4306_v20 = vmul.f32 %v3937_v2, %v7291_v55  ;;  %v3940_v36 = vmul.f32 %v4950_v39, %v7417_v52  ;;  %4953 = vrcp.f32 %v7461_v14  ;;  %v5052_v55 = vld [vmem:[%s5466_s23 + $0x38] sm:$0xff]  ;;  %v3634_v45 = vadd.f32 %v3602_v29, %v6859_v8 }
 0x3f6   : > { %v2635_v51 = vpop.f32.mrf.mxu3  ;;  %v3236_v16 = vrot.slane %v2785_v59, 7  ;;  %vm3945_vm13 = vweird.f32 %v4950_v39  ;;  %v3948_v1 = vand.u32 2147483647, %v7417_v52  ;;  %v3950_v5 = vand.u32 2147483648, %v7417_v52 }
 0x3f7   : > { %v4338_v18 = vadd.f32 %v5052_v55, %v4306_v20  ;;  %v3941_v12 = vsub.f32 1.0, %v3940_v36  ;;  %v2733_v31 = vadd.f32 %v2635_v51, %v7120_v54  ;;  %v7489_v57 = vadd.f32 %v7008_v24, %v3634_v45 }
 0x3f8   : > { %v4952_v53 = vpop.eup %4951  ;;  %v3238_v56 = vsel %vm3237_vm0, %v3235_v40, %v3236_v16  ;;  %v8428_v8 = vrot.slane %v8427_v26, 7  ;;  %vm3944_vm14 = vweird.f32 %v7417_v52  ;;  %v8430_v58 = vrot.slane %v6988_v38, 1 }
 0x3f9   : > { %4371 = vst.msk [vmem:[%s7192_s16 + $0x38] sm:$0xff] %vm4363_vm4, %v4338_v18  ;;  %v3942_v21 = vmul.f32 %v4950_v39, %v3941_v12  ;;  %v7498_v48 = vadd.f32 1.0, %v4952_v53  ;;  %v7502_v17 = vadd.f32 %v3238_v56, %v2786_v7  ;;  %v4635_v9 = vmul.f32 -1.442695, %v7489_v57 }
 0x3fa   : > { %v3269_v63 = vsel %vm3237_vm0, %v3236_v16, %v8428_v8  ;;  %v3283_v40 = vrot.slane %v2733_v31, 1  ;;  %v3333_v52 = vsel %vm3302_vm12, %v3270_v41, %v8430_v58  ;;  %vm3946_vm0 = vmor %vm3944_vm14, %vm3945_vm13  ;;  %v3951_v59 = vor.u32 1.1754944e-38, %v3950_v5 }
 0x3fb   : > { %v3431_v54 = vsel %vm7476_vm11, 0.0, %v3269_v63  ;;  %v3943_v11 = vadd.f32 %v4950_v39, %v3942_v21  ;;  %2685 = vmatmul.f32.gmra.mxu3 %v8209_v50  ;;  %v4954_v47 = vpop.eup %4953  ;;  %4955 = vrcp.f32 %v7498_v48  ;;  %v2916_v4 = vand.u32 15, %v2802_v23 }
 0x3fc   : > { %v3463_v28 = vadd.f32 %v3431_v54, %v8429_v32  ;;  %vm3949_vm15 = vcmp.eq.f32.partialorder %v3948_v1, 8.507059e+37  ;;  %v3955_v30 = vmul.f32 %v4954_v47, %v7461_v14  ;;  %4957 = vpow2.f32 %v4635_v9  ;;  %v8433_v1 = vld [vmem:[#allocation97_spill] sm:$0xff] }
 0x3fd   : > { %v3947_v2 = vsel %vm3946_vm0, %v4950_v39, %v3943_v11  ;;  %v3965_v38 = vand.u32 2147483648, %v7461_v14  ;;  %v3321_v51 = vsel %vm3302_vm12, %v3282_v60, %v3283_v40  ;;  %v7524_v39 = vpop.f32.mrf.mxu1  ;;  %v3963_v55 = vand.u32 2147483647, %v7461_v14 }
 0x3fe   : > { %v3952_v7 = vsel %vm3949_vm15, %v3951_v59, %v3947_v2  ;;  %v3623_v20 = vadd.f32 %v3463_v28, %v3333_v52  ;;  %v2638_v36 = vpop.f32.mrf.mxu3  ;;  %v3956_v44 = vsub.f32 1.0, %v3955_v30  ;;  %v3635_v12 = vadd.f32 %v6876_v13, %v3321_v51 }
 0x3ff   : > { %v4307_v29 = vmul.f32 %v3952_v7, %v7351_v25  ;;  %v7522_v23 = vadd.f32 %v2638_v36, %v2220_v22  ;;  %vm7531_vm1 = vcmp.eq.s32.totalorder %v2916_v4, 15  ;;  %vm3960_vm2 = vweird.f32 %v4954_v47  ;;  %v5054_v4 = vld [vmem:[%s5466_s23 + $0x48] sm:$0xff] }
 0x400   : > { %v7528_v18 = vadd.f32 %v7008_v24, %v3623_v20  ;;  %v3957_v16 = vmul.f32 %v4954_v47, %v3956_v44  ;;  %v2223_v5 = vadd.f32 %v7358_v62, %v8433_v1  ;;  %vm3959_vm3 = vweird.f32 %v7461_v14 }
 0x401   : > { %v4339_v45 = vadd.f32 %v5053_v15, %v4307_v29  ;;  %v3284_v60 = vrot.slane %v7522_v23, 1  ;;  %v4956_v22 = vpop.eup %4955  ;;  %v7542_v13 = vadd.f32 %v7008_v24, %v3635_v12  ;;  %v3966_v56 = vor.u32 1.1754944e-38, %v3965_v38  ;;  %vm3961_vm5 = vmor %vm3959_vm3, %vm3960_vm2  ;;  %v8434_v12 = vld [vmem:[#allocation100_spill] sm:$0xff] }
 0x402   : > { %v4624_v31 = vmul.f32 -1.442695, %v7528_v18  ;;  %v4958_v53 = vpop.eup %4957  ;;  %v3958_v21 = vadd.f32 %v4954_v47, %v3957_v16  ;;  %v3970_v26 = vmul.f32 %v4956_v22, %v7498_v48  ;;  %vm3964_vm6 = vcmp.eq.f32.partialorder %v3963_v55, 8.507059e+37 }
 0x403   : > { %4372 = vst.msk [vmem:[%s7192_s16 + $0x40] sm:$0xff] %vm4363_vm4, %v4339_v45  ;;  %v3320_v8 = vsel %vm3302_vm12, %v3283_v40, %v3284_v60  ;;  %2688 = vmatmul.f32.gmra.mxu3 %v8209_v50  ;;  %v7550_v62 = vadd.f32 1.0, %v4958_v53  ;;  %v4636_v14 = vmul.f32 -1.442695, %v7542_v13  ;;  %v3978_v28 = vand.u32 2147483647, %v7498_v48 }
 0x404   : > { %4959 = vpow2.f32 %v4624_v31  ;;  %v3604_v63 = vsel %vm7531_vm1, 0.0, %v3320_v8  ;;  %v3962_v54 = vsel %vm3961_vm5, %v4954_v47, %v3958_v21  ;;  %v3971_v11 = vsub.f32 1.0, %v3970_v26  ;;  %v5055_v31 = vld [vmem:[%s5466_s23 + $0x50] sm:$0xff] }
 0x405   : > { %v3636_v9 = vadd.f32 %v3604_v63, %v6888_v0  ;;  %v3967_v32 = vsel %vm3964_vm6, %v3966_v56, %v3962_v54  ;;  %v3980_v50 = vand.u32 2147483648, %v7498_v48  ;;  %4961 = vrcp.f32 %v7550_v62  ;;  %v7565_v7 = vpop.f32.mrf.mxu1  ;;  %v8435_v63 = vld [vmem:[#allocation103_spill] sm:$0xff]  ;;  %v8436_v54 = vld [vmem:[#allocation105_spill] sm:$0xff] }
 0x406   : > { %v2641_v40 = vpop.f32.mrf.mxu3  ;;  %v4308_v58 = vmul.f32 %v3967_v32, %v7395_v35  ;;  %v3972_v52 = vmul.f32 %v4956_v22, %v3971_v11  ;;  %vm3975_vm7 = vweird.f32 %v4956_v22  ;;  %4963 = vpow2.f32 %v4636_v14 }
 0x407   : > { %v7561_v47 = vadd.f32 %v7008_v24, %v3636_v9  ;;  %v2739_v59 = vadd.f32 %v2641_v40, %v2223_v5  ;;  %vm3974_vm8 = vweird.f32 %v7498_v48  ;;  %v3981_v38 = vor.u32 1.1754944e-38, %v3980_v50 }
 0x408   : > { %v4340_v0 = vadd.f32 %v5054_v4, %v4308_v58  ;;  %v3973_v2 = vadd.f32 %v4956_v22, %v3972_v52  ;;  %vm3976_vm9 = vmor %vm3974_vm8, %vm3975_vm7  ;;  %v2804_v36 = vadd.s32 120, %v6697_v43  ;;  %vm3979_vm10 = vcmp.eq.f32.partialorder %v3978_v28, 8.507059e+37 }
 0x409   : > { %v4637_v35 = vmul.f32 -1.442695, %v7561_v47  ;;  %v3285_v20 = vrot.slane %v2739_v59, 1  ;;  %v2226_v25 = vadd.f32 %v7415_v10, %v8434_v12  ;;  %v3993_v16 = vand.u32 2147483647, %v7550_v62 }
 0x40a   : > { %v4960_v30 = vpop.eup %4959  ;;  %4373 = vst.msk [vmem:[%s7192_s16 + $0x48] sm:$0xff] %vm4363_vm4, %v4340_v0  ;;  %v3977_v29 = vsel %vm3976_vm9, %v4956_v22, %v3973_v2  ;;  %v2930_v5 = vand.u32 15, %v2804_v36  ;;  %v3995_v10 = vand.u32 2147483648, %v7550_v62  ;;  %v7601_v11 = vadd.f32 %v7524_v39, %v8436_v54 }
 0x40b   : > { %v7571_v44 = vadd.f32 1.0, %v4960_v30  ;;  %v4962_v51 = vpop.eup %4961  ;;  %v3982_v23 = vsel %vm3979_vm10, %v3981_v38, %v3977_v29  ;;  %4965 = vpow2.f32 %v4637_v35  ;;  %v3319_v48 = vsel %vm3302_vm12, %v3284_v60, %v3285_v20 }
 0x40c   : > { %v4964_v55 = vpop.eup %4963  ;;  %v4309_v15 = vmul.f32 %v3982_v23, %v7433_v27  ;;  %v3985_v45 = vmul.f32 %v4962_v51, %v7550_v62  ;;  %v3637_v21 = vadd.f32 %v6905_v46, %v3319_v48  ;;  %v7590_v27 = vadd.s32 136, %v6697_v43 }
 0x40d   : > { %4967 = vrcp.f32 %v7571_v44  ;;  %v7581_v22 = vadd.f32 1.0, %v4964_v55  ;;  %vm3990_vm11 = vweird.f32 %v4962_v51  ;;  %v2229_v46 = vadd.f32 %v7472_v33, %v8435_v63  ;;  %v7611_v40 = vpop.f32.mrf.mxu1  ;;  %v5056_v55 = vld [vmem:[%s5466_s23 + $0x58] sm:$0xff] }
 0x40e   : > { %v2644_v1 = vpop.f32.mrf.mxu3  ;;  %v4341_v53 = vadd.f32 %v5055_v31, %v4309_v15  ;;  %v3986_v60 = vsub.f32 1.0, %v3985_v45  ;;  %v7595_v8 = vadd.f32 %v7008_v24, %v3637_v21  ;;  %vm7604_vm13 = vcmp.eq.s32.totalorder %v2930_v5, 15  ;;  %v8441_v15 = vld [vmem:[#allocation35_spill] sm:$0xff] }
 0x40f   : > { %v7585_v56 = vadd.f32 %v2644_v1, %v2226_v25  ;;  %4969 = vrcp.f32 %v7581_v22  ;;  %vm3989_vm14 = vweird.f32 %v7550_v62  ;;  %vm3994_vm0 = vcmp.eq.f32.partialorder %v3993_v16, 8.507059e+37  ;;  %v7645_v21 = vld [vmem:[%s8088_s6] ss:$0 sm:$0xff] }
 0x410   : > { %4374 = vst.msk [vmem:[%s7192_s16 + $0x50] sm:$0xff] %vm4363_vm4, %v4341_v53  ;;  %v3987_v26 = vmul.f32 %v4962_v51, %v3986_v60  ;;  %vm3991_vm15 = vmor %vm3989_vm14, %vm3990_vm11  ;;  %v3996_v33 = vor.u32 1.1754944e-38, %v3995_v10  ;;  %v4638_v58 = vmul.f32 -1.442695, %v7595_v8  ;;  %v2944_v52 = vand.u32 15, %v7590_v27 }
 0x411   : > { %v4966_v14 = vpop.eup %4965  ;;  %v3286_v9 = vrot.slane %v7585_v56, 1  ;;  %v3828_v4 = vand.u32 2147483647, %v7571_v44  ;;  %v3830_v38 = vand.u32 2147483648, %v7571_v44  ;;  %vm3824_vm1 = vweird.f32 %v7571_v44 }
 0x412   : > { %v3988_v50 = vadd.f32 %v4962_v51, %v3987_v26  ;;  %v7609_v24 = vadd.f32 1.0, %v4966_v14  ;;  %v4010_v5 = vand.u32 2147483648, %v7581_v22  ;;  %vm4004_vm6 = vweird.f32 %v7581_v22 }
 0x413   : > { %v4968_v28 = vpop.eup %4967  ;;  %v3318_v62 = vsel %vm3302_vm12, %v3285_v20, %v3286_v9  ;;  %vm7630_vm3 = vcmp.eq.f32.partialorder %v3828_v4, 8.507059e+37  ;;  %v3831_v1 = vor.u32 1.1754944e-38, %v3830_v38  ;;  %v5058_v38 = vld [vmem:[%s5466_s23] sm:$0xff] }
 0x414   : > { %v3820_v39 = vmul.f32 %v4968_v28, %v7571_v44  ;;  %v3992_v59 = vsel %vm3991_vm15, %v4962_v51, %v3988_v50  ;;  %4971 = vrcp.f32 %v7609_v24  ;;  %v4008_v51 = vand.u32 2147483647, %v7581_v22 }
 0x415   : > { %v4970_v0 = vpop.eup %4969  ;;  %v3997_v2 = vsel %vm3994_vm0, %v3996_v33, %v3992_v59  ;;  %4973 = vpow2.f32 %v4638_v58  ;;  %vm3825_vm2 = vweird.f32 %v4968_v28  ;;  %v3606_v20 = vsel %vm7604_vm13, 0.0, %v3318_v62  ;;  %v7662_v33 = vpop.f32.mrf.mxu1 }
 0x416   : > { %v3821_v30 = vsub.f32 1.0, %v3820_v39  ;;  %v2647_v35 = vpop.f32.mrf.mxu3  ;;  %v4310_v36 = vmul.f32 %v3997_v2, %v7489_v57  ;;  %v4000_v29 = vmul.f32 %v4970_v0, %v7581_v22  ;;  %v3638_v45 = vadd.f32 %v3606_v20, %v8441_v15  ;;  %vm3826_vm5 = vmor %vm3824_vm1, %vm3825_vm2 }
 0x417   : > { %v7627_v48 = vadd.f32 %v2647_v35, %v2229_v46  ;;  %vm4005_vm7 = vweird.f32 %v4970_v0  ;;  %vm7650_vm8 = vcmp.eq.f32.partialorder %v4008_v51, 8.507059e+37  ;;  %v4011_v39 = vor.u32 1.1754944e-38, %v4010_v5 }
 0x418   : > { %v3822_v23 = vmul.f32 %v4968_v28, %v3821_v30  ;;  %v4342_v12 = vadd.f32 %v5056_v55, %v4310_v36  ;;  %v4001_v57 = vsub.f32 1.0, %v4000_v29  ;;  %v7648_v56 = vadd.f32 %v7645_v21, %v3638_v45  ;;  %vm4006_vm9 = vmor %vm4004_vm6, %vm4005_vm7 }
 0x419   : > { %v3287_v31 = vrot.slane %v7627_v48, 1  ;;  %v4023_v2 = vand.u32 2147483647, %v7609_v24  ;;  %v4025_v30 = vand.u32 2147483648, %v7609_v24  ;;  %vm4019_vm11 = vweird.f32 %v7609_v24 }
 0x41a   : > { %v3823_v16 = vadd.f32 %v4968_v28, %v3822_v23  ;;  %v4972_v53 = vpop.eup %4971  ;;  %4375 = vst.msk [vmem:[%s7192_s16 + $0x58] sm:$0xff] %vm4363_vm4, %v4342_v12  ;;  %v4002_v60 = vmul.f32 %v4970_v0, %v4001_v57  ;;  %v4639_v50 = vmul.f32 -1.442695, %v7648_v56  ;;  %v5059_v23 = vld [vmem:[%s5466_s23 + $0x60] sm:$0xff]  ;;  %vm7686_vm0 = vcmp.eq.s32.totalorder %v2944_v52, 15 }
 0x41b   : > { %v4974_v10 = vpop.eup %4973  ;;  %v4015_v44 = vmul.f32 %v4972_v53, %v7609_v24  ;;  %v3317_v63 = vsel %vm3302_vm12, %v3286_v9, %v3287_v31  ;;  %v8444_v9 = vld [vmem:[#allocation28_spill] sm:$0xff]  ;;  %vm4020_vm10 = vweird.f32 %v4972_v53  ;;  %v4026_v48 = vor.u32 1.1754944e-38, %v4025_v30 }
 0x41c   : > { %v3827_v26 = vsel %vm3826_vm5, %v4968_v28, %v3823_v16  ;;  %v4003_v54 = vadd.f32 %v4970_v0, %v4002_v60  ;;  %v7659_v32 = vadd.f32 1.0, %v4974_v10  ;;  %v3639_v59 = vadd.f32 %v8444_v9, %v3317_v63  ;;  %vm4021_vm13 = vmor %vm4019_vm11, %vm4020_vm10  ;;  %v8447_v24 = vld [vmem:[#allocation108_spill] sm:$0xff] }
 0x41d   : > { %v3832_v46 = vsel %vm7630_vm3, %v3831_v1, %v3827_v26  ;;  %v4016_v58 = vsub.f32 1.0, %v4015_v44  ;;  %vm4024_vm14 = vcmp.eq.f32.partialorder %v4023_v2, 8.507059e+37  ;;  %v7700_v60 = vpop.f32.mrf.mxu1  ;;  %v8448_v44 = vld [vmem:[#allocation38_spill] sm:$0xff] }
 0x41e   : > { %v4299_v28 = vmul.f32 %v3832_v46, %v7528_v18  ;;  %v2650_v4 = vpop.f32.mrf.mxu3  ;;  %v4007_v62 = vsel %vm4006_vm9, %v4970_v0, %v4003_v54  ;;  %4975 = vrcp.f32 %v7659_v32  ;;  %v7676_v29 = vadd.f32 %v7645_v21, %v3639_v59  ;;  %v8450_v2 = vld [vmem:[#allocation110_spill] sm:$0xff] }
 0x41f   : > { %v4012_v18 = vsel %vm7650_vm8, %v4011_v39, %v4007_v62  ;;  %v4017_v22 = vmul.f32 %v4972_v53, %v4016_v58  ;;  %4977 = vpow2.f32 %v4639_v50  ;;  %v2748_v51 = vadd.f32 %v2650_v4, %v7601_v11  ;;  %v8449_v4 = vld [vmem:[#allocation30_spill] sm:$0xff] }
 0x420   : > { %v4331_v35 = vadd.f32 %v5058_v38, %v4299_v28  ;;  %v4311_v36 = vmul.f32 %v4012_v18, %v7542_v13  ;;  %v4640_v55 = vmul.f32 -1.442695, %v7676_v29  ;;  %v2235_v11 = vadd.f32 %v7565_v7, %v8447_v24  ;;  %v5060_v7 = vld [vmem:[%s5466_s23 + $0x68] sm:$0xff] }
 0x421   : > { %v4018_v0 = vadd.f32 %v4972_v53, %v4017_v22  ;;  %v3288_v13 = vrot.slane %v2748_v51, 1  ;;  %v4040_v63 = vand.u32 2147483648, %v7659_v32  ;;  %v2808_v54 = vadd.s32 152, %v6697_v43 }
 0x422   : > { %4364 = vst.msk [vmem:[%s7192_s16] sm:$0xff] %vm4363_vm4, %v4331_v35  ;;  %v4343_v20 = vadd.f32 %v5059_v23, %v4311_v36  ;;  %4979 = vpow2.f32 %v4640_v55  ;;  %v4038_v50 = vand.u32 2147483647, %v7659_v32  ;;  %vm4034_vm1 = vweird.f32 %v7659_v32 }
 0x423   : > { %v4022_v12 = vsel %vm4021_vm13, %v4972_v53, %v4018_v0  ;;  %v3316_v27 = vsel %vm3302_vm12, %v3287_v31, %v3288_v13  ;;  %v2238_v30 = vadd.f32 %v7611_v40, %v8450_v2  ;;  %v4041_v38 = vor.u32 1.1754944e-38, %v4040_v63 }
 0x424   : > { %v4976_v57 = vpop.eup %4975  ;;  %4376 = vst.msk [vmem:[%s7192_s16 + $0x60] sm:$0xff] %vm4363_vm4, %v4343_v20  ;;  %v4027_v15 = vsel %vm4024_vm14, %v4026_v48, %v4022_v12  ;;  %v3608_v5 = vsel %vm7686_vm0, 0.0, %v3316_v27  ;;  %vm4039_vm3 = vcmp.eq.f32.partialorder %v4038_v50, 8.507059e+37  ;;  %v2958_v36 = vand.u32 15, %v2808_v54  ;;  %v5061_v12 = vld [vmem:[%s5466_s23 + $0x70] sm:$0xff] }
 0x425   : > { %v4312_v45 = vmul.f32 %v4027_v15, %v7561_v47  ;;  %v4030_v16 = vmul.f32 %v4976_v57, %v7659_v32  ;;  %v4978_v1 = vpop.eup %4977  ;;  %v3640_v47 = vadd.f32 %v3608_v5, %v8448_v44  ;;  %vm4035_vm15 = vweird.f32 %v4976_v57  ;;  %v7727_v55 = vpop.f32.mrf.mxu1 }
 0x426   : > { %v2653_v52 = vpop.f32.mrf.mxu3  ;;  %v3802_v14 = vadd.f32 1.0, %v4978_v1  ;;  %vm4036_vm2 = vmor %vm4034_vm1, %vm4035_vm15  ;;  %vm7730_vm5 = vcmp.eq.s32.totalorder %v2958_v36, 15 }
 0x427   : > { %v2751_v53 = vadd.f32 %v2653_v52, %v2235_v11  ;;  %v4344_v10 = vadd.f32 %v5060_v7, %v4312_v45  ;;  %v4031_v26 = vsub.f32 1.0, %v4030_v16  ;;  %v7710_v39 = vadd.f32 %v7645_v21, %v3640_v47  ;;  %v8453_v16 = vld [vmem:[#allocation112_spill] sm:$0xff] }
 0x428   : > { %4981 = vrcp.f32 %v3802_v14  ;;  %v4980_v28 = vpop.eup %4979  ;;  %v4053_v25 = vand.u32 2147483647, %v3802_v14  ;;  %v4055_v15 = vand.u32 2147483648, %v3802_v14  ;;  %vm4049_vm7 = vweird.f32 %v3802_v14 }
 0x429   : > { %v3289_v46 = vrot.slane %v2751_v53, 1  ;;  %4377 = vst.msk [vmem:[%s7192_s16 + $0x68] sm:$0xff] %vm4363_vm4, %v4344_v10  ;;  %v4032_v31 = vmul.f32 %v4976_v57, %v4031_v26  ;;  %v7715_v59 = vadd.f32 1.0, %v4980_v28  ;;  %v4641_v35 = vmul.f32 -1.442695, %v7710_v39 }
 0x42a   : > { %vm7743_vm8 = vcmp.eq.f32.partialorder %v4053_v25, 8.507059e+37  ;;  %v4056_v63 = vor.u32 1.1754944e-38, %v4055_v15 }
 0x42b   : > { %v3315_v58 = vsel %vm3302_vm12, %v3288_v13, %v3289_v46  ;;  %v4033_v9 = vadd.f32 %v4976_v57, %v4032_v31  ;;  %4983 = vrcp.f32 %v7715_v59  ;;  %v4068_v31 = vand.u32 2147483647, %v7715_v59 }
 0x42c   : > { %v3641_v62 = vadd.f32 %v8449_v4, %v3315_v58  ;;  %4985 = vpow2.f32 %v4641_v35  ;;  %v4070_v50 = vand.u32 2147483648, %v7715_v59  ;;  %vm4064_vm11 = vweird.f32 %v7715_v59 }
 0x42d   : > { %v4037_v18 = vsel %vm4036_vm2, %v4976_v57, %v4033_v9  ;;  %v7766_v36 = vpop.f32.mrf.mxu1  ;;  %vm4069_vm14 = vcmp.eq.f32.partialorder %v4068_v31, 8.507059e+37 }
 0x42e   : > { %v2656_v22 = vpop.f32.mrf.mxu3  ;;  %v4042_v0 = vsel %vm4039_vm3, %v4041_v38, %v4037_v18  ;;  %v7723_v32 = vadd.f32 %v7645_v21, %v3641_v62  ;;  %v4982_v51 = vpop.eup %4981 }
 0x42f   : > { %v4313_v40 = vmul.f32 %v4042_v0, %v7595_v8  ;;  %v2754_v23 = vadd.f32 %v2656_v22, %v2238_v30  ;;  %v4045_v20 = vmul.f32 %v4982_v51, %v3802_v14  ;;  %v2241_v8 = vadd.f32 %v7662_v33, %v8453_v16  ;;  %v8456_v33 = vld [vmem:[#allocation41_spill] sm:$0xff] }
 0x430   : > { %v4642_v48 = vmul.f32 -1.442695, %v7723_v32  ;;  %vm4050_vm6 = vweird.f32 %v4982_v51  ;;  %v2810_v30 = vadd.s32 168, %v6697_v43  ;;  %v4071_v0 = vor.u32 1.1754944e-38, %v4070_v50 }
 0x431   : > { %v4345_v13 = vadd.f32 %v5061_v12, %v4313_v40  ;;  %v3290_v57 = vrot.slane %v2754_v23, 1  ;;  %v4046_v11 = vsub.f32 1.0, %v4045_v20  ;;  %v4984_v45 = vpop.eup %4983  ;;  %vm4051_vm9 = vmor %vm4049_vm7, %vm4050_vm6 }
 0x432   : > { %4987 = vpow2.f32 %v4642_v48  ;;  %v4986_v52 = vpop.eup %4985  ;;  %v4060_v5 = vmul.f32 %v4984_v45, %v7715_v59  ;;  %vm4065_vm10 = vweird.f32 %v4984_v45  ;;  %v5062_v59 = vld [vmem:[%s5466_s23 + $0x78] sm:$0xff] }
 0x433   : > { %4378 = vst.msk [vmem:[%s7192_s16 + $0x70] sm:$0xff] %vm4363_vm4, %v4345_v13  ;;  %v3314_v27 = vsel %vm3302_vm12, %v3289_v46, %v3290_v57  ;;  %v4047_v1 = vmul.f32 %v4982_v51, %v4046_v11  ;;  %v7747_v10 = vadd.f32 1.0, %v4986_v52  ;;  %vm4066_vm13 = vmor %vm4064_vm11, %vm4065_vm10  ;;  %v8458_v48 = vld [vmem:[#allocation114_spill] sm:$0xff] }
 0x434   : > { %v3610_v53 = vsel %vm7730_vm5, 0.0, %v3314_v27  ;;  %v4061_v46 = vsub.f32 1.0, %v4060_v5  ;;  %v2244_v12 = vadd.f32 %v7700_v60, %v8458_v48 }
 0x435   : > { %v3642_v26 = vadd.f32 %v3610_v53, %v8456_v33  ;;  %v4048_v47 = vadd.f32 %v4982_v51, %v4047_v1  ;;  %4989 = vrcp.f32 %v7747_v10  ;;  %v4085_v60 = vand.u32 2147483648, %v7747_v10  ;;  %v8459_v53 = vld [vmem:[#allocation115_spill] sm:$0xff] }
 0x436   : > { %v2659_v44 = vpop.f32.mrf.mxu3  ;;  %v4062_v58 = vmul.f32 %v4984_v45, %v4061_v46  ;;  %v2247_v7 = vadd.f32 %v7727_v55, %v8459_v53  ;;  %vm4079_vm1 = vweird.f32 %v7747_v10 }
 0x437   : > { %v2757_v54 = vadd.f32 %v2659_v44, %v2241_v8  ;;  %v4052_v28 = vsel %vm4051_vm9, %v4982_v51, %v4048_v47  ;;  %v7754_v9 = vadd.f32 %v7645_v21, %v3642_v26  ;;  %v5063_v8 = vld [vmem:[%s5466_s23 + $0x80] sm:$0xff]  ;;  %v4086_v31 = vor.u32 1.1754944e-38, %v4085_v60 }
 0x438   : > { %v4988_v14 = vpop.eup %4987  ;;  %v4057_v62 = vsel %vm7743_vm8, %v4056_v63, %v4052_v28  ;;  %v4063_v35 = vadd.f32 %v4984_v45, %v4062_v58  ;;  %v7805_v28 = vpop.f32.mrf.mxu1 }
 0x439   : > { %v3291_v4 = vrot.slane %v2757_v54, 1  ;;  %v7759_v2 = vadd.f32 1.0, %v4988_v14  ;;  %v4314_v38 = vmul.f32 %v4057_v62, %v7648_v56  ;;  %v4643_v18 = vmul.f32 -1.442695, %v7754_v9  ;;  %v8457_v56 = vld [vmem:[#allocation33_spill] sm:$0xff] }
 0x43a   : > { %v4067_v40 = vsel %vm4066_vm13, %v4984_v45, %v4063_v35  ;;  %v4083_v45 = vand.u32 2147483647, %v7747_v10 }
 0x43b   : > { %v3313_v22 = vsel %vm3302_vm12, %v3290_v57, %v3291_v4  ;;  %4991 = vrcp.f32 %v7759_v2  ;;  %v4346_v51 = vadd.f32 %v5062_v59, %v4314_v38  ;;  %v4990_v20 = vpop.eup %4989  ;;  %v4072_v13 = vsel %vm4069_vm14, %v4071_v0, %v4067_v40  ;;  %v8464_v38 = vld [vmem:[#allocation43_spill] sm:$0xff] }
 0x43c   : > { %4993 = vpow2.f32 %v4643_v18  ;;  %v3643_v23 = vadd.f32 %v8457_v56, %v3313_v22  ;;  %v2972_v57 = vand.u32 15, %v2810_v30  ;;  %v4315_v24 = vmul.f32 %v4072_v13, %v7676_v29 }
 0x43d   : > { %4379 = vst.msk [vmem:[%s7192_s16 + $0x78] sm:$0xff] %vm4363_vm4, %v4346_v51  ;;  %v4075_v11 = vmul.f32 %v4990_v20, %v7747_v10  ;;  %vm4080_vm15 = vweird.f32 %v4990_v20  ;;  %vm7795_vm2 = vcmp.eq.f32.partialorder %v4083_v45, 8.507059e+37  ;;  %v4098_v10 = vand.u32 2147483647, %v7759_v2 }
 0x43e   : > { %v2662_v25 = vpop.f32.mrf.mxu3  ;;  %v7779_v15 = vadd.f32 %v7645_v21, %v3643_v23  ;;  %v4347_v27 = vadd.f32 %v5063_v8, %v4315_v24  ;;  %vm7787_vm0 = vcmp.eq.s32.totalorder %v2972_v57, 15  ;;  %vm4081_vm3 = vmor %vm4079_vm1, %vm4080_vm15  ;;  %v4100_v58 = vand.u32 2147483648, %v7759_v2 }
 0x43f   : > { %v2760_v16 = vadd.f32 %v2662_v25, %v2244_v12  ;;  %v4076_v52 = vsub.f32 1.0, %v4075_v11  ;;  %vm4094_vm6 = vweird.f32 %v7759_v2  ;;  %v2812_v0 = vadd.s32 184, %v6697_v43  ;;  %v5064_v12 = vld [vmem:[%s5466_s23 + $0x88] sm:$0xff]  ;;  %v8465_v11 = vld [vmem:[#allocation117_spill] sm:$0xff] }
 0x440   : > { %v4644_v1 = vmul.f32 -1.442695, %v7779_v15  ;;  %4380 = vst.msk [vmem:[%s7192_s16 + $0x80] sm:$0xff] %vm4363_vm4, %v4347_v27  ;;  %vm4099_vm8 = vcmp.eq.f32.partialorder %v4098_v10, 8.507059e+37  ;;  %v2250_v45 = vadd.f32 %v7766_v36, %v8465_v11  ;;  %v2255_v33 = vpop.f32.mrf.mxu1 }
 0x441   : > { %v4992_v5 = vpop.eup %4991  ;;  %v3292_v29 = vrot.slane %v2760_v16, 1  ;;  %v4077_v44 = vmul.f32 %v4990_v20, %v4076_v52  ;;  %v2986_v27 = vand.u32 15, %v2812_v0  ;;  %v8466_v52 = vld [vmem:[#allocation36_spill] sm:$0xff] }
 0x442   : > { %v4994_v26 = vpop.eup %4993  ;;  %v4090_v47 = vmul.f32 %v4992_v5, %v7759_v2  ;;  %4995 = vpow2.f32 %v4644_v1  ;;  %vm4095_vm5 = vweird.f32 %v4992_v5 }
 0x443   : > { %v7799_v55 = vadd.f32 1.0, %v4994_v26  ;;  %v3312_v46 = vsel %vm3302_vm12, %v3291_v4, %v3292_v29  ;;  %v4078_v54 = vadd.f32 %v4990_v20, %v4077_v44  ;;  %vm4096_vm7 = vmor %vm4094_vm6, %vm4095_vm5  ;;  %vm7842_vm10 = vcmp.eq.s32.totalorder %v2986_v27, 15 }
 0x444   : > { %v4091_v50 = vsub.f32 1.0, %v4090_v47  ;;  %v3612_v14 = vsel %vm7787_vm0, 0.0, %v3312_v46 }
 0x445   : > { %4997 = vrcp.f32 %v7799_v55  ;;  %v4082_v30 = vsel %vm4081_vm3, %v4990_v20, %v4078_v54  ;;  %v3644_v35 = vadd.f32 %v3612_v14, %v8464_v38  ;;  %v4101_v20 = vor.u32 1.1754944e-38, %v4100_v58 }
 0x446   : > { %v2665_v62 = vpop.f32.mrf.mxu3  ;;  %v4092_v4 = vmul.f32 %v4992_v5, %v4091_v50  ;;  %v4087_v22 = vsel %vm7795_vm2, %v4086_v31, %v4082_v30  ;;  %v4113_v26 = vand.u32 2147483647, %v7799_v55  ;;  %v4115_v36 = vand.u32 2147483648, %v7799_v55 }
 0x447   : > { %v2763_v18 = vadd.f32 %v2665_v62, %v2247_v7  ;;  %v4316_v51 = vmul.f32 %v4087_v22, %v7710_v39  ;;  %v7817_v56 = vadd.f32 %v7645_v21, %v3644_v35  ;;  %vm4109_vm11 = vweird.f32 %v7799_v55  ;;  %v8469_v35 = vld [vmem:[#allocation46_spill] sm:$0xff] }
 0x448   : > { %v4996_v59 = vpop.eup %4995  ;;  %v4093_v40 = vadd.f32 %v4992_v5, %v4092_v4  ;;  %vm4114_vm14 = vcmp.eq.f32.partialorder %v4113_v26, 8.507059e+37  ;;  %v4116_v58 = vor.u32 1.1754944e-38, %v4115_v36  ;;  %v5067_v26 = vld [vmem:[%s5466_s23 + $0xa0] sm:$0xff] }
 0x449   : > { %v3293_v23 = vrot.slane %v2763_v18, 1  ;;  %v7820_v48 = vadd.f32 1.0, %v4996_v59  ;;  %v4348_v2 = vadd.f32 %v5064_v12, %v4316_v51  ;;  %v4645_v25 = vmul.f32 -1.442695, %v7817_v56  ;;  %v8470_v18 = vld [vmem:[#allocation119_spill] sm:$0xff] }
 0x44a   : > { %v4097_v13 = vsel %vm4096_vm7, %v4992_v5, %v4093_v40  ;;  %v5065_v5 = vld [vmem:[%s5466_s23 + $0x90] sm:$0xff]  ;;  %v2253_v22 = vadd.f32 %v7805_v28, %v8470_v18 }
 0x44b   : > { %v3311_v39 = vsel %vm3302_vm12, %v3292_v29, %v3293_v23  ;;  %v4998_v57 = vpop.eup %4997  ;;  %v4102_v24 = vsel %vm4099_vm8, %v4101_v20, %v4097_v13  ;;  %4999 = vrcp.f32 %v7820_v48  ;;  %4381 = vst.msk [vmem:[%s7192_s16 + $0x88] sm:$0xff] %vm4363_vm4, %v4348_v2  ;;  %v4128_v59 = vand.u32 2147483647, %v7820_v48  ;;  %v5066_v13 = vld [vmem:[%s5466_s23 + $0x98] sm:$0xff] }
 0x44c   : > { %v4317_v16 = vmul.f32 %v4102_v24, %v7723_v32  ;;  %v4105_v8 = vmul.f32 %v4998_v57, %v7799_v55  ;;  %5001 = vpow2.f32 %v4645_v25  ;;  %v3645_v60 = vadd.f32 %v8466_v52, %v3311_v39 }
 0x44d   : > { %vm4110_vm9 = vweird.f32 %v4998_v57  ;;  %v4130_v51 = vand.u32 2147483648, %v7820_v48  ;;  %vm4124_vm15 = vweird.f32 %v7820_v48  ;;  %vm4129_vm2 = vcmp.eq.f32.partialorder %v4128_v59, 8.507059e+37 }
 0x44e   : > { %v2668_v1 = vpop.f32.mrf.mxu3  ;;  %v4349_v53 = vadd.f32 %v5065_v5, %v4317_v16  ;;  %v4106_v7 = vsub.f32 1.0, %v4105_v8  ;;  %v7838_v44 = vadd.f32 %v7645_v21, %v3645_v60  ;;  %vm4111_vm13 = vmor %vm4109_vm11, %vm4110_vm9  ;;  %v2814_v8 = vadd.s32 200, %v6697_v43  ;;  %v8471_v60 = vld [vmem:[#allocation45_spill] sm:$0xff] }
 0x44f   : > { %v2766_v29 = vadd.f32 %v2668_v1, %v2250_v45  ;;  %v4131_v24 = vor.u32 1.1754944e-38, %v4130_v51  ;;  %v2256_v1 = vadd.f32 %v2255_v33, %v8471_v60 }
 0x450   : > { %4382 = vst.msk [vmem:[%s7192_s16 + $0x90] sm:$0xff] %vm4363_vm4, %v4349_v53  ;;  %v4107_v32 = vmul.f32 %v4998_v57, %v4106_v7  ;;  %v4646_v54 = vmul.f32 -1.442695, %v7838_v44  ;;  %v3000_v63 = vand.u32 15, %v2814_v8 }
 0x451   : > { %v3294_v47 = vrot.slane %v2766_v29, 1  ;;  %v5000_v46 = vpop.eup %4999 }
 0x452   : > { %v4108_v31 = vadd.f32 %v4998_v57, %v4107_v32  ;;  %v4120_v50 = vmul.f32 %v5000_v46, %v7820_v48  ;;  %v5002_v10 = vpop.eup %5001  ;;  %5003 = vpow2.f32 %v4646_v54  ;;  %vm4125_vm0 = vweird.f32 %v5000_v46 }
 0x453   : > { %v3310_v14 = vsel %vm3302_vm12, %v3293_v23, %v3294_v47  ;;  %v7853_v38 = vadd.f32 1.0, %v5002_v10  ;;  %vm4126_vm1 = vmor %vm4124_vm15, %vm4125_vm0  ;;  %vm7893_vm5 = vcmp.eq.s32.totalorder %v3000_v63, 15 }
 0x454   : > { %v3614_v62 = vsel %vm7842_vm10, 0.0, %v3310_v14  ;;  %v4112_v30 = vsel %vm4111_vm13, %v4998_v57, %v4108_v31  ;;  %v4121_v4 = vsub.f32 1.0, %v4120_v50  ;;  %v2258_v57 = vpop.f32.mrf.mxu1 }
 0x455   : > { %v3646_v55 = vadd.f32 %v3614_v62, %v8469_v35  ;;  %v4117_v0 = vsel %vm4114_vm14, %v4116_v58, %v4112_v30  ;;  %5005 = vrcp.f32 %v7853_v38  ;;  %v4145_v33 = vand.u32 2147483648, %v7853_v38 }
 0x456   : > { %v2671_v40 = vpop.f32.mrf.mxu3  ;;  %v4318_v23 = vmul.f32 %v4117_v0, %v7754_v9  ;;  %v4122_v20 = vmul.f32 %v5000_v46, %v4121_v4  ;;  %v4143_v50 = vand.u32 2147483647, %v7853_v38  ;;  %vm4139_vm6 = vweird.f32 %v7853_v38 }
 0x457   : > { %v7863_v12 = vadd.f32 %v7645_v21, %v3646_v55  ;;  %v2769_v2 = vadd.f32 %v2671_v40, %v2253_v22  ;;  %v8474_v55 = vld [vmem:[#allocation122_spill] sm:$0xff]  ;;  %v4146_v22 = vor.u32 1.1754944e-38, %v4145_v33 }
 0x458   : > { %v4350_v25 = vadd.f32 %v5066_v13, %v4318_v23  ;;  %v4123_v28 = vadd.f32 %v5000_v46, %v4122_v20  ;;  %v5004_v39 = vpop.eup %5003  ;;  %v2259_v18 = vadd.f32 %v2258_v57, %v8474_v55  ;;  %vm4144_vm8 = vcmp.eq.f32.partialorder %v4143_v50, 8.507059e+37 }
 0x459   : > { %v4647_v9 = vmul.f32 -1.442695, %v7863_v12  ;;  %v3295_v11 = vrot.slane %v2769_v2, 1  ;;  %v7870_v16 = vadd.f32 1.0, %v5004_v39  ;;  %v2816_v57 = vadd.s32 216, %v6697_v43 }
 0x45a   : > { %4383 = vst.msk [vmem:[%s7192_s16 + $0x98] sm:$0xff] %vm4363_vm4, %v4350_v25  ;;  %v4127_v45 = vsel %vm4126_vm1, %v5000_v46, %v4123_v28 }
 0x45b   : > { %v4132_v27 = vsel %vm4129_vm2, %v4131_v24, %v4127_v45  ;;  %5007 = vpow2.f32 %v4647_v9  ;;  %v3309_v48 = vsel %vm3302_vm12, %v3294_v47, %v3295_v11  ;;  %v5006_v52 = vpop.eup %5005  ;;  %v4160_v20 = vand.u32 2147483648, %v7870_v16  ;;  %v5068_v9 = vld [vmem:[%s5466_s23 + $0xa8] sm:$0xff] }
 0x45c   : > { %v4319_v5 = vmul.f32 %v4132_v27, %v7779_v15  ;;  %5009 = vrcp.f32 %v7870_v16  ;;  %v4135_v53 = vmul.f32 %v5006_v52, %v7853_v38  ;;  %v3647_v7 = vadd.f32 %v7177_v42, %v3309_v48  ;;  %v2261_v30 = vpop.f32.mrf.mxu1 }
 0x45d   : > { %vm4140_vm3 = vweird.f32 %v5006_v52  ;;  %v4158_v38 = vand.u32 2147483647, %v7870_v16  ;;  %vm4154_vm10 = vweird.f32 %v7870_v16 }
 0x45e   : > { %v2674_v29 = vpop.f32.mrf.mxu3  ;;  %v4351_v36 = vadd.f32 %v5067_v26, %v4319_v5  ;;  %v4136_v46 = vsub.f32 1.0, %v4135_v53  ;;  %v7882_v54 = vadd.f32 %v7645_v21, %v3647_v7  ;;  %vm4141_vm7 = vmor %vm4139_vm6, %vm4140_vm3  ;;  %v8475_v5 = vld [vmem:[#allocation123_spill] sm:$0xff]  ;;  %v3014_v7 = vand.u32 15, %v2816_v57 }
 0x45f   : > { %v2772_v32 = vadd.f32 %v2674_v29, %v2256_v1  ;;  %vm4159_vm13 = vcmp.eq.f32.partialorder %v4158_v38, 8.507059e+37 }
 0x460   : > { %4384 = vst.msk [vmem:[%s7192_s16 + $0xa0] sm:$0xff] %vm4363_vm4, %v4351_v36  ;;  %v4137_v31 = vmul.f32 %v5006_v52, %v4136_v46  ;;  %v4648_v42 = vmul.f32 -1.442695, %v7882_v54  ;;  %vm7931_vm0 = vcmp.eq.s32.totalorder %v3014_v7, 15 }
 0x461   : > { %v3296_v15 = vrot.slane %v2772_v32, 1  ;;  %v5008_v47 = vpop.eup %5007 }
 0x462   : > { %v5010_v14 = vpop.eup %5009  ;;  %v7889_v10 = vadd.f32 1.0, %v5008_v47  ;;  %v4138_v4 = vadd.f32 %v5006_v52, %v4137_v31  ;;  %5011 = vpow2.f32 %v4648_v42  ;;  %v5069_v47 = vld [vmem:[%s5466_s23 + $0xb0] sm:$0xff] }
 0x463   : > { %v3308_v58 = vsel %vm3302_vm12, %v3295_v11, %v3296_v15  ;;  %v4150_v35 = vmul.f32 %v5010_v14, %v7870_v16  ;;  %vm4155_vm9 = vweird.f32 %v5010_v14  ;;  %v2262_v16 = vadd.f32 %v2261_v30, %v8475_v5 }
 0x464   : > { %5013 = vrcp.f32 %v7889_v10  ;;  %v4142_v0 = vsel %vm4141_vm7, %v5006_v52, %v4138_v4  ;;  %v3616_v51 = vsel %vm7893_vm5, 0.0, %v3308_v58  ;;  %vm4156_vm11 = vmor %vm4154_vm10, %vm4155_vm9  ;;  %v2264_v29 = vpop.f32.mrf.mxu1  ;;  %v4175_v63 = vand.u32 2147483648, %v7889_v10 }
 0x465   : > { %v4151_v59 = vsub.f32 1.0, %v4150_v35  ;;  %v4147_v23 = vsel %vm4144_vm8, %v4146_v22, %v4142_v0  ;;  %v3648_v2 = vadd.f32 %v3616_v51, %v7213_v34  ;;  %v4161_v34 = vor.u32 1.1754944e-38, %v4160_v20  ;;  %v8478_v51 = vld [vmem:[#allocation125_spill] sm:$0xff] }
 0x466   : > { %v2677_v40 = vpop.f32.mrf.mxu3  ;;  %v4320_v13 = vmul.f32 %v4147_v23, %v7817_v56  ;;  %v4173_v50 = vand.u32 2147483647, %v7889_v10  ;;  %vm4169_vm15 = vweird.f32 %v7889_v10  ;;  %v4176_v62 = vor.u32 1.1754944e-38, %v4175_v63  ;;  %v5071_v63 = vld [vmem:[%s5466_s23 + $0xc0] sm:$0xff] }
 0x467   : > { %v4152_v25 = vmul.f32 %v5010_v14, %v4151_v59  ;;  %v2775_v28 = vadd.f32 %v2677_v40, %v2259_v18  ;;  %v7908_v39 = vadd.f32 %v7645_v21, %v3648_v2  ;;  %v2265_v40 = vadd.f32 %v2264_v29, %v8478_v51 }
 0x468   : > { %v5012_v24 = vpop.eup %5011  ;;  %v4352_v11 = vadd.f32 %v5068_v9, %v4320_v13  ;;  %vm4174_vm2 = vcmp.eq.f32.partialorder %v4173_v50, 8.507059e+37 }
 0x469   : > { %v4153_v45 = vadd.f32 %v5010_v14, %v4152_v25  ;;  %v3297_v8 = vrot.slane %v2775_v28, 1  ;;  %v7913_v56 = vadd.f32 1.0, %v5012_v24  ;;  %v4649_v48 = vmul.f32 -1.442695, %v7908_v39  ;;  %v5070_v28 = vld [vmem:[%s5466_s23 + $0xb8] sm:$0xff] }
 0x46a   : > { %v5014_v27 = vpop.eup %5013  ;;  %4385 = vst.msk [vmem:[%s7192_s16 + $0xa8] sm:$0xff] %vm4363_vm4, %v4352_v11 }
 0x46b   : > { %v4157_v52 = vsel %vm4156_vm11, %v5010_v14, %v4153_v45  ;;  %v4165_v60 = vmul.f32 %v5014_v27, %v7889_v10  ;;  %v3307_v1 = vsel %vm3302_vm12, %v3296_v15, %v3297_v8  ;;  %5015 = vrcp.f32 %v7913_v56 }
 0x46c   : > { %v4162_v53 = vsel %vm4159_vm13, %v4161_v34, %v4157_v52  ;;  %5017 = vpow2.f32 %v4649_v48  ;;  %v3649_v46 = vadd.f32 %v7264_v37, %v3307_v1  ;;  %vm4170_vm14 = vweird.f32 %v5014_v27  ;;  %v2267_v25 = vpop.f32.mrf.mxu1 }
 0x46d   : > { %v4321_v26 = vmul.f32 %v4162_v53, %v7838_v44  ;;  %v4166_v36 = vsub.f32 1.0, %v4165_v60  ;;  %vm4171_vm1 = vmor %vm4169_vm15, %vm4170_vm14  ;;  %v4188_v2 = vand.u32 2147483647, %v7913_v56  ;;  %v4190_v13 = vand.u32 2147483648, %v7913_v56 }
 0x46e   : > { %v2680_v32 = vpop.f32.mrf.mxu3  ;;  %v7929_v42 = vadd.f32 %v7645_v21, %v3649_v46  ;;  %vm4184_vm5 = vweird.f32 %v7913_v56  ;;  %v2818_v34 = vadd.s32 232, %v6697_v43 }
 0x46f   : > { %v2778_v33 = vadd.f32 %v2680_v32, %v2262_v16  ;;  %v4353_v15 = vadd.f32 %v5069_v47, %v4321_v26  ;;  %v4167_v31 = vmul.f32 %v5014_v27, %v4166_v36  ;;  %vm4189_vm7 = vcmp.eq.f32.partialorder %v4188_v2, 8.507059e+37  ;;  %v8479_v16 = vld [vmem:[#allocation127_spill] sm:$0xff] }
 0x470   : > { %v4650_v30 = vmul.f32 -1.442695, %v7929_v42  ;;  %v2268_v53 = vadd.f32 %v2267_v25, %v8479_v16  ;;  %v3028_v32 = vand.u32 15, %v2818_v34 }
 0x471   : > { %v3298_v14 = vrot.slane %v2778_v33, 1  ;;  %4386 = vst.msk [vmem:[%s7192_s16 + $0xb0] sm:$0xff] %vm4363_vm4, %v4353_v15  ;;  %v4168_v58 = vadd.f32 %v5014_v27, %v4167_v31  ;;  %v5016_v37 = vpop.eup %5015  ;;  %v2820_v31 = vadd.s32 248, %v6697_v43 }
 0x472   : > { %v5018_v35 = vpop.eup %5017  ;;  %v4180_v18 = vmul.f32 %v5016_v37, %v7913_v56  ;;  %5019 = vpow2.f32 %v4650_v30  ;;  %vm4185_vm3 = vweird.f32 %v5016_v37  ;;  %vm7983_vm9 = vcmp.eq.s32.totalorder %v3028_v32, 15 }
 0x473   : > { %v3306_v4 = vsel %vm3302_vm12, %v3297_v8, %v3298_v14  ;;  %v4172_v55 = vsel %vm4171_vm1, %v5014_v27, %v4168_v58  ;;  %v7944_v59 = vadd.f32 1.0, %v5018_v35  ;;  %vm4186_vm6 = vmor %vm4184_vm5, %vm4185_vm3  ;;  %v4191_v27 = vor.u32 1.1754944e-38, %v4190_v13 }
 0x474   : > { %v3618_v22 = vsel %vm7931_vm0, 0.0, %v3306_v4  ;;  %v4177_v0 = vsel %vm4174_vm2, %v4176_v62, %v4172_v55  ;;  %v4181_v38 = vsub.f32 1.0, %v4180_v18  ;;  %v2270_v50 = vpop.f32.mrf.mxu1  ;;  %v8482_v55 = vld [vmem:[#allocation129_spill] sm:$0xff] }
 0x475   : > { %v3650_v10 = vadd.f32 %v3618_v22, %v7301_v3  ;;  %v4322_v23 = vmul.f32 %v4177_v0, %v7863_v12  ;;  %5021 = vrcp.f32 %v7944_v59  ;;  %v4203_v44 = vand.u32 2147483647, %v7944_v59 }
 0x476   : > { %v2683_v20 = vpop.f32.mrf.mxu3  ;;  %v4182_v24 = vmul.f32 %v5016_v37, %v4181_v38  ;;  %vm4199_vm10 = vweird.f32 %v7944_v59  ;;  %v2271_v18 = vadd.f32 %v2270_v50, %v8482_v55 }
 0x477   : > { %v4354_v57 = vadd.f32 %v5070_v28, %v4322_v23  ;;  %v7954_v9 = vadd.f32 %v7645_v21, %v3650_v10  ;;  %v2781_v3 = vadd.f32 %v2683_v20, %v2265_v40  ;;  %vm4204_vm13 = vcmp.eq.f32.partialorder %v4203_v44, 8.507059e+37 }
 0x478   : > { %v4183_v12 = vadd.f32 %v5016_v37, %v4182_v24  ;;  %v5020_v8 = vpop.eup %5019  ;;  %v3042_v23 = vand.u32 15, %v2820_v31 }
 0x479   : > { %4387 = vst.msk [vmem:[%s7192_s16 + $0xb8] sm:$0xff] %vm4363_vm4, %v4354_v57  ;;  %v4651_v11 = vmul.f32 -1.442695, %v7954_v9  ;;  %v3299_v45 = vrot.slane %v2781_v3, 1  ;;  %v7962_v52 = vadd.f32 1.0, %v5020_v8 }
 0x47a   : > { %v4187_v48 = vsel %vm4186_vm6, %v5016_v37, %v4183_v12  ;;  %vm8006_vm15 = vcmp.eq.s32.totalorder %v3042_v23, 15 }
 0x47b   : > { %5023 = vpow2.f32 %v4651_v11  ;;  %v3305_v60 = vsel %vm3302_vm12, %v3298_v14, %v3299_v45  ;;  %v5022_v1 = vpop.eup %5021  ;;  %v4192_v56 = vsel %vm4189_vm7, %v4191_v27, %v4187_v48  ;;  %v4218_v25 = vand.u32 2147483647, %v7962_v52  ;;  %v5072_v11 = vld [vmem:[%s5466_s23 + $0xc8] sm:$0xff] }
 0x47c   : > { %v3651_v5 = vadd.f32 %v7367_v6, %v3305_v60  ;;  %v4323_v7 = vmul.f32 %v4192_v56, %v7882_v54  ;;  %v4195_v29 = vmul.f32 %v5022_v1, %v7944_v59  ;;  %5025 = vrcp.f32 %v7962_v52 }
 0x47d   : > { %v4205_v6 = vand.u32 2147483648, %v7944_v59  ;;  %vm4200_vm8 = vweird.f32 %v5022_v1  ;;  %v4220_v28 = vand.u32 2147483648, %v7962_v52  ;;  %vm4214_vm0 = vweird.f32 %v7962_v52 }
 0x47e   : > { %v2686_v26 = vpop.f32.mrf.mxu3  ;;  %v7972_v36 = vadd.f32 %v7645_v21, %v3651_v5  ;;  %v4355_v46 = vadd.f32 %v5071_v63, %v4323_v7  ;;  %v4196_v33 = vsub.f32 1.0, %v4195_v29  ;;  %vm4201_vm11 = vmor %vm4199_vm10, %vm4200_vm8  ;;  %vm4219_vm2 = vcmp.eq.f32.partialorder %v4218_v25, 8.507059e+37  ;;  %v5073_v63 = vld [vmem:[%s5466_s23 + $0xd0] sm:$0xff] }
 0x47f   : > { %v2784_v47 = vadd.f32 %v2686_v26, %v2268_v53  ;;  %v4206_v22 = vor.u32 1.1754944e-38, %v4205_v6 }
 0x480   : > { %v4652_v15 = vmul.f32 -1.442695, %v7972_v36  ;;  %4388 = vst.msk [vmem:[%s7192_s16 + $0xc0] sm:$0xff] %vm4363_vm4, %v4355_v46  ;;  %v4197_v14 = vmul.f32 %v5022_v1, %v4196_v33 }
 0x481   : > { %v5024_v54 = vpop.eup %5023  ;;  %v3300_v58 = vrot.slane %v2784_v47, 1 }
 0x482   : > { %v7981_v37 = vadd.f32 1.0, %v5024_v54  ;;  %5027 = vpow2.f32 %v4652_v15  ;;  %v5026_v30 = vpop.eup %5025  ;;  %v4198_v4 = vadd.f32 %v5022_v1, %v4197_v14 }
 0x483   : > { %v3304_v35 = vsel %vm3302_vm12, %v3299_v45, %v3300_v58  ;;  %v4210_v0 = vmul.f32 %v5026_v30, %v7962_v52  ;;  %vm4215_vm14 = vweird.f32 %v5026_v30  ;;  %v4221_v52 = vor.u32 1.1754944e-38, %v4220_v28 }
 0x484   : > { %5029 = vrcp.f32 %v7981_v37  ;;  %v4202_v10 = vsel %vm4201_vm11, %v5022_v1, %v4198_v4  ;;  %v3620_v51 = vsel %vm7983_vm9, 0.0, %v3304_v35  ;;  %vm4216_vm1 = vmor %vm4214_vm0, %vm4215_vm14  ;;  %v4235_v53 = vand.u32 2147483648, %v7981_v37 }
 0x485   : > { %v4207_v59 = vsel %vm4204_vm13, %v4206_v22, %v4202_v10  ;;  %v4211_v38 = vsub.f32 1.0, %v4210_v0  ;;  %v3652_v20 = vadd.f32 %v3620_v51, %v7398_v49  ;;  %v4233_v26 = vand.u32 2147483647, %v7981_v37 }
 0x486   : > { %v2689_v40 = vpop.f32.mrf.mxu3  ;;  %v4324_v13 = vmul.f32 %v4207_v59, %v7908_v39  ;;  %vm4229_vm3 = vweird.f32 %v7981_v37 }
 0x487   : > { %v2787_v2 = vadd.f32 %v2689_v40, %v2271_v18  ;;  %v4212_v24 = vmul.f32 %v5026_v30, %v4211_v38  ;;  %v8000_v3 = vadd.f32 %v7645_v21, %v3652_v20  ;;  %vm4234_vm6 = vcmp.eq.f32.partialorder %v4233_v26, 8.507059e+37  ;;  %v5075_v38 = vld [vmem:[%s5466_s23 + $0xe0] sm:$0xff] }
 0x488   : > { %v5028_v57 = vpop.eup %5027  ;;  %v4356_v45 = vadd.f32 %v5072_v11, %v4324_v13 }
 0x489   : > { %v3301_v12 = vrot.slane %v2787_v2, 1  ;;  %v8004_v49 = vadd.f32 1.0, %v5028_v57  ;;  %v4213_v27 = vadd.f32 %v5026_v30, %v4212_v24  ;;  %v4653_v34 = vmul.f32 -1.442695, %v8000_v3 }
 0x48a   : > { %v5030_v8 = vpop.eup %5029  ;;  %4389 = vst.msk [vmem:[%s7192_s16 + $0xc8] sm:$0xff] %vm4363_vm4, %v4356_v45 }
 0x48b   : > { %v3303_v48 = vsel %vm3302_vm12, %v3300_v58, %v3301_v12  ;;  %v3334_v60 = vsel %vm3302_vm12, %v3301_v12, %v3270_v41  ;;  %v4225_v1 = vmul.f32 %v5030_v8, %v7981_v37  ;;  %5031 = vrcp.f32 %v8004_v49 }
 0x48c   : > { %v4217_v56 = vsel %vm4216_vm1, %v5026_v30, %v4213_v27  ;;  %5033 = vpow2.f32 %v4653_v34  ;;  %v3622_v61 = vsel %vm8006_vm15, 0.0, %v3334_v60  ;;  %v3653_v43 = vadd.f32 %v7455_v19, %v3303_v48  ;;  %v5074_v30 = vld [vmem:[%s5466_s23 + $0xd8] sm:$0xff] }
 0x48d   : > { %v4222_v5 = vsel %vm4219_vm2, %v4221_v52, %v4217_v56  ;;  %v4226_v16 = vsub.f32 1.0, %v4225_v1  ;;  %v3654_v7 = vadd.f32 %v3622_v61, %v7502_v17  ;;  %vm4230_vm12 = vweird.f32 %v5030_v8  ;;  %v5076_v56 = vld [vmem:[%s5466_s23 + $0xe8] sm:$0xff] }
 0x48e   : > { %v4325_v41 = vmul.f32 %v4222_v5, %v7929_v42  ;;  %v8029_v32 = vadd.f32 %v7645_v21, %v3653_v43  ;;  %vm4231_vm5 = vmor %vm4229_vm3, %vm4230_vm12  ;;  %v4236_v17 = vor.u32 1.1754944e-38, %v4235_v53  ;;  %v4250_v58 = vand.u32 2147483648, %v8004_v49 }
 0x48f   : > { %v4227_v29 = vmul.f32 %v5030_v8, %v4226_v16  ;;  %v8033_v33 = vadd.f32 %v7645_v21, %v3654_v7  ;;  %v4248_v62 = vand.u32 2147483647, %v8004_v49  ;;  %vm4244_vm8 = vweird.f32 %v8004_v49 }
 0x490   : > { %v4357_v46 = vadd.f32 %v5073_v63, %v4325_v41  ;;  %v4654_v42 = vmul.f32 -1.442695, %v8029_v32  ;;  %v4251_v18 = vor.u32 1.1754944e-38, %v4250_v58 }
 0x491   : > { %v5032_v19 = vpop.eup %5031  ;;  %v4228_v47 = vadd.f32 %v5030_v8, %v4227_v29  ;;  %v4655_v31 = vmul.f32 -1.442695, %v8033_v33  ;;  %vm4249_vm10 = vcmp.eq.f32.partialorder %v4248_v62, 8.507059e+37 }
 0x492   : > { %v5034_v6 = vpop.eup %5033  ;;  %4390 = vst.msk [vmem:[%s7192_s16 + $0xd0] sm:$0xff] %vm4363_vm4, %v4357_v46  ;;  %v4240_v15 = vmul.f32 %v5032_v19, %v8004_v49  ;;  %5035 = vpow2.f32 %v4654_v42  ;;  %vm4245_vm7 = vweird.f32 %v5032_v19 }
 0x493   : > { %v4232_v54 = vsel %vm4231_vm5, %v5030_v8, %v4228_v47  ;;  %v3816_v21 = vadd.f32 1.0, %v5034_v6  ;;  %5037 = vpow2.f32 %v4655_v31  ;;  %vm4246_vm9 = vmor %vm4244_vm8, %vm4245_vm7  ;;  %v5077_v47 = vld [vmem:[%s5466_s23 + $0xf0] sm:$0xff]  ;;  %v5078_v6 = vld [vmem:[%s5466_s23 + $0xf8] sm:$0xff] }
 0x494   : > { %v4237_v50 = vsel %vm4234_vm6, %v4236_v17, %v4232_v54  ;;  %v4241_v14 = vsub.f32 1.0, %v4240_v15 }
 0x495   : > { %v4326_v44 = vmul.f32 %v4237_v50, %v7954_v9  ;;  %5039 = vrcp.f32 %v3816_v21  ;;  %v4265_v13 = vand.u32 2147483648, %v3816_v21  ;;  %v4263_v28 = vand.u32 2147483647, %v3816_v21 }
 0x496   : > { %v4242_v37 = vmul.f32 %v5032_v19, %v4241_v14  ;;  %vm4259_vm13 = vweird.f32 %v3816_v21 }
 0x497   : > { %v4358_v4 = vadd.f32 %v5074_v30, %v4326_v44  ;;  %v4266_v11 = vor.u32 1.1754944e-38, %v4265_v13  ;;  %vm4264_vm0 = vcmp.eq.f32.partialorder %v4263_v28, 8.507059e+37 }
 0x498   : > { %v4243_v35 = vadd.f32 %v5032_v19, %v4242_v37  ;;  %v5036_v55 = vpop.eup %5035 }
 0x499   : > { %4391 = vst.msk [vmem:[%s7192_s16 + $0xd8] sm:$0xff] %vm4363_vm4, %v4358_v4  ;;  %v5038_v9 = vpop.eup %5037  ;;  %v3817_v0 = vadd.f32 1.0, %v5036_v55 }
 0x49a   : > { %v4247_v22 = vsel %vm4246_vm9, %v5032_v19, %v4243_v35  ;;  %v3818_v40 = vadd.f32 1.0, %v5038_v9 }
 0x49b   : > { %v5040_v10 = vpop.eup %5039  ;;  %v4252_v51 = vsel %vm4249_vm10, %v4251_v18, %v4247_v22  ;;  %5041 = vrcp.f32 %v3817_v0  ;;  %v4280_v34 = vand.u32 2147483648, %v3817_v0  ;;  %v4278_v52 = vand.u32 2147483647, %v3817_v0 }
 0x49c   : > { %v4327_v23 = vmul.f32 %v4252_v51, %v7972_v36  ;;  %v4255_v59 = vmul.f32 %v5040_v10, %v3816_v21  ;;  %5043 = vrcp.f32 %v3818_v40  ;;  %vm4260_vm11 = vweird.f32 %v5040_v10 }
 0x49d   : > { %vm4261_vm14 = vmor %vm4259_vm13, %vm4260_vm11  ;;  %v4295_v1 = vand.u32 2147483648, %v3818_v40  ;;  %v4293_v61 = vand.u32 2147483647, %v3818_v40  ;;  %vm4274_vm2 = vweird.f32 %v3817_v0  ;;  %v4281_v41 = vor.u32 1.1754944e-38, %v4280_v34 }
 0x49e   : > { %v4359_v20 = vadd.f32 %v5075_v38, %v4327_v23  ;;  %v4256_v2 = vsub.f32 1.0, %v4255_v59  ;;  %vm4289_vm3 = vweird.f32 %v3818_v40  ;;  %vm4279_vm5 = vcmp.eq.f32.partialorder %v4278_v52, 8.507059e+37 }
 0x49f   : > { %v4296_v7 = vor.u32 1.1754944e-38, %v4295_v1  ;;  %vm4294_vm7 = vcmp.eq.f32.partialorder %v4293_v61, 8.507059e+37 }
 0x4a0   : > { %4392 = vst.msk [vmem:[%s7192_s16 + $0xe0] sm:$0xff] %vm4363_vm4, %v4359_v20  ;;  %v4257_v25 = vmul.f32 %v5040_v10, %v4256_v2 }
 0x4a1   : > { %v5042_v57 = vpop.eup %5041 }
 0x4a2   : > { %v4258_v24 = vadd.f32 %v5040_v10, %v4257_v25  ;;  %v5044_v12 = vpop.eup %5043  ;;  %v4270_v36 = vmul.f32 %v5042_v57, %v3817_v0  ;;  %vm4275_vm15 = vweird.f32 %v5042_v57 }
 0x4a3   : > { %v4285_v49 = vmul.f32 %v5044_v12, %v3818_v40  ;;  %vm4290_vm1 = vweird.f32 %v5044_v12  ;;  %vm4276_vm12 = vmor %vm4274_vm2, %vm4275_vm15 }
 0x4a4   : > { %v4262_v45 = vsel %vm4261_vm14, %v5040_v10, %v4258_v24  ;;  %v4271_v8 = vsub.f32 1.0, %v4270_v36  ;;  %vm4291_vm6 = vmor %vm4289_vm3, %vm4290_vm1 }
 0x4a5   : > { %v4267_v39 = vsel %vm4264_vm0, %v4266_v11, %v4262_v45  ;;  %v4286_v48 = vsub.f32 1.0, %v4285_v49 }
 0x4a6   : > { %v4328_v27 = vmul.f32 %v4267_v39, %v8000_v3  ;;  %v4272_v60 = vmul.f32 %v5042_v57, %v4271_v8 }
 0x4a7   : > { %v4287_v16 = vmul.f32 %v5044_v12, %v4286_v48 }
 0x4a8   : > { %v4360_v5 = vadd.f32 %v5076_v56, %v4328_v27  ;;  %v4273_v43 = vadd.f32 %v5042_v57, %v4272_v60 }
 0x4a9   : > { %v4288_v3 = vadd.f32 %v5044_v12, %v4287_v16 }
 0x4aa   : > { %4393 = vst.msk [vmem:[%s7192_s16 + $0xe8] sm:$0xff] %vm4363_vm4, %v4360_v5  ;;  %v4277_v53 = vsel %vm4276_vm12, %v5042_v57, %v4273_v43 }
 0x4ab   : > { %v4282_v29 = vsel %vm4279_vm5, %v4281_v41, %v4277_v53  ;;  %v4292_v26 = vsel %vm4291_vm6, %v5044_v12, %v4288_v3 }
 0x4ac   : > { %v4297_v63 = vsel %vm4294_vm7, %v4296_v7, %v4292_v26  ;;  %v4329_v46 = vmul.f32 %v4282_v29, %v8029_v32 }
 0x4ad   : > { %v4330_v19 = vmul.f32 %v4297_v63, %v8033_v33 }
 0x4ae   : > { %v4361_v42 = vadd.f32 %v5077_v47, %v4329_v46 }
 0x4af   : > { %v4362_v17 = vadd.f32 %v5078_v6, %v4330_v19 }
 0x4b0   : > { %4394 = vst.msk [vmem:[%s7192_s16 + $0xf0] sm:$0xff] %vm4363_vm4, %v4361_v42 }
 0x4b1   : > { %4395 = vst.msk [vmem:[%s7192_s16 + $0xf8] sm:$0xff] %vm4363_vm4, %v4362_v17 }
 0x4b2 PF: > { %s24_s29 = sadd.s32 1, %s5287_s29   ;;  %s8485_s14 = sld [smem:[#allocation14_spill]] }
 0x4b3   : > { %p21_p2 = scmp.ge.s32.totalorder %s24_s29, 4   ;;  %s8486_s26 = sld [smem:[#allocation18_spill]] }
 0x4b4   : > { %s8487_s27 = sld [smem:[#allocation16_spill]]  ;;  %s8489_s24 = smov %s5271_s25 }
 0x4b5   : > { %s8488_s28 = sld [smem:[#allocation17_spill]]  ;;  %23 = sbr.rel (!%p21_p2) target bundleno = 12 (0xc), region = 120 }
 0x4b8   : > { %s8490_s25 = smov %s8485_s14 }
 0x4ba   :  { %4428 = vsyncpa [#allocation4], 1 }
 0x4bb   :  { %4430 = vsyncpa [#allocation4 + $0x1], 1 }
 0x4bc   :  { %4431 = vsyncpa [#allocation6], 1 }
 0x4bd   :  { %4433 = vsyncpa [#allocation6 + $0x1], 1 }
 0x4be   :  { %4434 = vsyncpa [#allocation9], 1 }

</bundles_post_ra>
